<compile_context>
chip_gen: v5e
topology: v5e:2x2
jax: 0.10.0
libtpu: 0.0.40
codegen_flags: <defaults>
</compile_context>

<pallas_src>
import functools
import math

import jax
import jax.numpy as jnp
from jax.experimental import pallas as pl
from jax.experimental.pallas import tpu as pltpu

NEG_INF = -1e9
LN_EPS = 1e-5                      # PyTorch nn.LayerNorm default
VMEM_LIMIT = 32 * 1024 * 1024      # explicit scoped-VMEM limit (v7x-safe)


def _cparams(n_parallel=0, n_arbitrary=0):
    sem = ("parallel",) * n_parallel + ("arbitrary",) * n_arbitrary
    return pltpu.CompilerParams(dimension_semantics=sem,
                                vmem_limit_bytes=VMEM_LIMIT)


# ----------------------------- Pallas kernels -----------------------------

def _linear_kernel(x_ref, w_ref, b_ref, o_ref, *, activation):
    x = x_ref[...].astype(jnp.bfloat16)
    y = jnp.dot(x, w_ref[...], preferred_element_type=jnp.float32) + b_ref[...]
    if activation == "relu":
        y = jnp.maximum(y, 0.0)
    o_ref[...] = y.astype(o_ref.dtype)


def linear(x, w, b, activation=None):
    """x:(M,K) f32 @ w:(K,N) bf16 + b:(N,) f32.  Tiles N for large-N linears so
    the weight DMA pipelines with the MXU and gives a parallel grid axis."""
    M, K = x.shape
    N = w.shape[1]
    bn = 256 if (N > 512 and N % 256 == 0) else N
    return pl.pallas_call(
        functools.partial(_linear_kernel, activation=activation),
        out_shape=jax.ShapeDtypeStruct((M, N), jnp.float32),
        grid=(N // bn,),
        in_specs=[
            pl.BlockSpec((M, K), lambda j: (0, 0)),
            pl.BlockSpec((K, bn), lambda j: (0, j)),
            pl.BlockSpec((1, bn), lambda j: (0, j)),
        ],
        out_specs=pl.BlockSpec((M, bn), lambda j: (0, j)),
        compiler_params=_cparams(n_parallel=1),
    )(x, w, b.reshape(1, N))


def _ln(y, g, b, eps):
    mean = jnp.mean(y, axis=-1, keepdims=True)
    var = jnp.mean((y - mean) ** 2, axis=-1, keepdims=True)
    return (y - mean) * jax.lax.rsqrt(var + eps) * g + b


def _layernorm_kernel(x_ref, g_ref, b_ref, o_ref, *, eps):
    o_ref[...] = _ln(x_ref[...], g_ref[...], b_ref[...], eps).astype(o_ref.dtype)


def layer_norm(x, gamma, beta, eps=LN_EPS):
    M, D = x.shape
    return pl.pallas_call(
        functools.partial(_layernorm_kernel, eps=eps),
        out_shape=jax.ShapeDtypeStruct((M, D), jnp.float32),
        grid=(1,),
        in_specs=[
            pl.BlockSpec((M, D), lambda i: (0, 0)),
            pl.BlockSpec((1, D), lambda i: (0, 0)),
            pl.BlockSpec((1, D), lambda i: (0, 0)),
        ],
        out_specs=pl.BlockSpec((M, D), lambda i: (0, 0)),
        compiler_params=_cparams(n_arbitrary=1),
    )(x, gamma.reshape(1, D), beta.reshape(1, D))


def _linear_res_ln_kernel(x_ref, w_ref, b_ref, r_ref, g_ref, bb_ref, o_ref, *, eps):
    x = x_ref[...].astype(jnp.bfloat16)
    y = jnp.dot(x, w_ref[...], preferred_element_type=jnp.float32)
    y = y + b_ref[...] + r_ref[...]
    o_ref[...] = _ln(y, g_ref[...], bb_ref[...], eps).astype(o_ref.dtype)


def linear_residual_ln(x, w, b, residual, gamma, beta, eps=LN_EPS):
    """Fused (x @ w + b + residual) -> LayerNorm.  One launch, one store."""
    M, K = x.shape
    N = w.shape[1]
    return pl.pallas_call(
        functools.partial(_linear_res_ln_kernel, eps=eps),
        out_shape=jax.ShapeDtypeStruct((M, N), jnp.float32),
        grid=(1,),
        in_specs=[
            pl.BlockSpec((M, K), lambda i: (0, 0)),
            pl.BlockSpec((K, N), lambda i: (0, 0)),
            pl.BlockSpec((1, N), lambda i: (0, 0)),
            pl.BlockSpec((M, N), lambda i: (0, 0)),
            pl.BlockSpec((1, N), lambda i: (0, 0)),
            pl.BlockSpec((1, N), lambda i: (0, 0)),
        ],
        out_specs=pl.BlockSpec((M, N), lambda i: (0, 0)),
        compiler_params=_cparams(n_arbitrary=1),
    )(x, w, b.reshape(1, N), residual, gamma.reshape(1, N), beta.reshape(1, N))


def _ffn_kernel(x_ref, w1_ref, b1_ref, w2_ref, b2_ref, g_ref, bb_ref, o_ref, *, eps):
    x = x_ref[...]
    h = jnp.dot(x.astype(jnp.bfloat16), w1_ref[...],
                preferred_element_type=jnp.float32) + b1_ref[...]
    h = jnp.maximum(h, 0.0)
    y = jnp.dot(h.astype(jnp.bfloat16), w2_ref[...],
                preferred_element_type=jnp.float32) + b2_ref[...]
    y = y + x
    o_ref[...] = _ln(y, g_ref[...], bb_ref[...], eps).astype(o_ref.dtype)


def ffn_fused(x, w1, b1, w2, b2, gamma, beta, eps=LN_EPS):
    """Whole position-wise FFN (relu(x@w1+b1)@w2 + b2 + x -> LN) in one kernel."""
    M, D = x.shape
    H = w1.shape[1]
    return pl.pallas_call(
        functools.partial(_ffn_kernel, eps=eps),
        out_shape=jax.ShapeDtypeStruct((M, D), jnp.float32),
        grid=(1,),
        in_specs=[
            pl.BlockSpec((M, D), lambda i: (0, 0)),
            pl.BlockSpec((D, H), lambda i: (0, 0)),
            pl.BlockSpec((1, H), lambda i: (0, 0)),
            pl.BlockSpec((H, D), lambda i: (0, 0)),
            pl.BlockSpec((1, D), lambda i: (0, 0)),
            pl.BlockSpec((1, D), lambda i: (0, 0)),
            pl.BlockSpec((1, D), lambda i: (0, 0)),
        ],
        out_specs=pl.BlockSpec((M, D), lambda i: (0, 0)),
        compiler_params=_cparams(n_arbitrary=1),
    )(x, w1, b1.reshape(1, H), w2, b2.reshape(1, D),
      gamma.reshape(1, D), beta.reshape(1, D))


def _attn_heads(q, k, v, pad, *, n_head, scale, causal):
    """q:(Lq,D) k,v:(Lk,D) f32; pad:(1,Lk) int32.  All heads, mask built here."""
    Lq, D = q.shape
    Lk = k.shape[0]
    dh = D // n_head
    bias = jnp.where(pad > 0, 0.0, NEG_INF).astype(jnp.float32)      # (1, Lk)
    if causal:
        row = jax.lax.broadcasted_iota(jnp.int32, (Lq, Lk), 0)
        col = jax.lax.broadcasted_iota(jnp.int32, (Lq, Lk), 1)
        bias = bias + jnp.where(col <= row, 0.0, NEG_INF)            # (Lq, Lk)
    outs = []
    for h in range(n_head):                                          # static unroll
        sl = slice(h * dh, (h + 1) * dh)
        qh, kh, vh = q[:, sl], k[:, sl], v[:, sl]
        s = jax.lax.dot_general(qh, kh, (((1,), (1,)), ((), ())),
                                preferred_element_type=jnp.float32) * scale + bias
        m = jnp.max(s, axis=-1, keepdims=True)
        p = jnp.exp(s - m)
        p = p * pl.reciprocal(jnp.sum(p, axis=-1, keepdims=True), approx=True)
        outs.append(jnp.dot(p, vh, preferred_element_type=jnp.float32))
    return jnp.concatenate(outs, axis=-1)                            # (Lq, D)


def _self_attn_kernel(qkv_ref, m_ref, o_ref, *, n_head, scale, causal):
    qkv = qkv_ref[0]                                                 # (L, 3D)
    D = qkv.shape[-1] // 3
    q, k, v = qkv[:, :D], qkv[:, D:2 * D], qkv[:, 2 * D:]
    o_ref[0] = _attn_heads(q, k, v, m_ref[0], n_head=n_head,
                           scale=scale, causal=causal).astype(o_ref.dtype)


def self_attention(qkv, pad_mask, *, n_head, causal):
    """qkv:(B,L,3D) fused projections, pad_mask:(B,1,L) int32 -> (B,L,D)."""
    B, L, D3 = qkv.shape
    D = D3 // 3
    scale = 1.0 / math.sqrt(D // n_head)
    return pl.pallas_call(
        functools.partial(_self_attn_kernel, n_head=n_head, scale=scale,
                          causal=causal),
        out_shape=jax.ShapeDtypeStruct((B, L, D), jnp.float32),
        grid=(B,),
        in_specs=[
            pl.BlockSpec((1, L, D3), lambda b: (b, 0, 0)),
            pl.BlockSpec((1, 1, L), lambda b: (b, 0, 0)),
        ],
        out_specs=pl.BlockSpec((1, L, D), lambda b: (b, 0, 0)),
        compiler_params=_cparams(n_parallel=1),
    )(qkv, pad_mask)


def _cross_attn_kernel(q_ref, kv_ref, m_ref, o_ref, *, n_head, scale):
    q = q_ref[0]                                                     # (Lq, D)
    kv = kv_ref[0]                                                   # (Lk, 2D)
    D = q.shape[-1]
    k, v = kv[:, :D], kv[:, D:]
    o_ref[0] = _attn_heads(q, k, v, m_ref[0], n_head=n_head,
                           scale=scale, causal=False).astype(o_ref.dtype)


def cross_attention(q, kv, pad_mask, *, n_head):
    """q:(B,Lq,D), kv:(B,Lk,2D) fused, pad_mask:(B,1,Lk) int32 -> (B,Lq,D)."""
    B, Lq, D = q.shape
    Lk = kv.shape[1]
    scale = 1.0 / math.sqrt(D // n_head)
    return pl.pallas_call(
        functools.partial(_cross_attn_kernel, n_head=n_head, scale=scale),
        out_shape=jax.ShapeDtypeStruct((B, Lq, D), jnp.float32),
        grid=(B,),
        in_specs=[
            pl.BlockSpec((1, Lq, D), lambda b: (b, 0, 0)),
            pl.BlockSpec((1, Lk, 2 * D), lambda b: (b, 0, 0)),
            pl.BlockSpec((1, 1, Lk), lambda b: (b, 0, 0)),
        ],
        out_specs=pl.BlockSpec((1, Lq, D), lambda b: (b, 0, 0)),
        compiler_params=_cparams(n_parallel=1),
    )(q, kv, pad_mask)


def _softmax_head_kernel(x_ref, w_ref, b_ref, o_ref):
    x = x_ref[...].astype(jnp.bfloat16)
    y = jnp.dot(x, w_ref[...], preferred_element_type=jnp.float32) + b_ref[...]
    m = jnp.max(y, axis=-1, keepdims=True)
    e = jnp.exp(y - m)
    o_ref[...] = (e / jnp.sum(e, axis=-1, keepdims=True)).astype(o_ref.dtype)


def category_head(x, w, b):
    """Linear(d_model, 36) + softmax.  Output columns padded to a lane-dense 128
    (pad logits -1e9 so the softmax over the 36 real classes is unchanged)."""
    M, K = x.shape
    N = w.shape[1]
    Np = 128
    w_pad = jnp.zeros((K, Np), w.dtype).at[:, :N].set(w)
    b_pad = jnp.full((Np,), NEG_INF, jnp.float32).at[:N].set(b)
    out = pl.pallas_call(
        _softmax_head_kernel,
        out_shape=jax.ShapeDtypeStruct((M, Np), jnp.float32),
        grid=(1,),
        in_specs=[
            pl.BlockSpec((M, K), lambda i: (0, 0)),
            pl.BlockSpec((K, Np), lambda i: (0, 0)),
            pl.BlockSpec((1, Np), lambda i: (0, 0)),
        ],
        out_specs=pl.BlockSpec((M, Np), lambda i: (0, 0)),
        compiler_params=_cparams(n_arbitrary=1),
    )(x, w_pad, b_pad.reshape(1, Np))
    return out[:, :N]


# --------------------------- transformer blocks ---------------------------

def mha_self_block(x, pad_mask, p, n_head, causal):
    B, L, D = x.shape
    M = B * L
    qkv = linear(x.reshape(M, D), p["wqkv"], p["bqkv"]).reshape(B, L, 3 * D)
    attn = self_attention(qkv, pad_mask, n_head=n_head, causal=causal)
    out = linear_residual_ln(attn.reshape(M, D), p["wo"], p["bo"],
                             x.reshape(M, D), p["ln_g"], p["ln_b"])
    return out.reshape(B, L, D)


def mha_cross_block(x_q, x_kv, pad_mask, p, n_head):
    B, Lq, D = x_q.shape
    Lk = x_kv.shape[1]
    q = linear(x_q.reshape(B * Lq, D), p["wq"], p["bq"]).reshape(B, Lq, D)
    kv = linear(x_kv.reshape(B * Lk, D), p["wkv"], p["bkv"]).reshape(B, Lk, 2 * D)
    attn = cross_attention(q, kv, pad_mask, n_head=n_head)
    out = linear_residual_ln(attn.reshape(B * Lq, D), p["wo"], p["bo"],
                             x_q.reshape(B * Lq, D), p["ln_g"], p["ln_b"])
    return out.reshape(B, Lq, D)


def ffn_block(x, p):
    B, L, D = x.shape
    out = ffn_fused(x.reshape(B * L, D), p["w1"], p["b1"], p["w2"], p["b2"],
                    p["ln_g"], p["ln_b"])
    return out.reshape(B, L, D)


def decoder_layer(enc_input, dec_input, dec_mask, enc_mask, p, n_head):
    # TODO(synk): DecoderLayer is not defined in the reference source; the
    # standard post-LN decoder layer (self-attn -> cross-attn -> FFN) is used.
    dec = mha_self_block(dec_input, dec_mask, p["slf"], n_head, causal=True)
    dec = mha_cross_block(dec, enc_input, enc_mask, p["enc"], n_head)
    dec = ffn_block(dec, p["ffn"])
    return dec


def transformer_decoder(p, enc_input, position_sequence, id_sequence,
                        category_sequence, dec_mask, enc_mask, n_head):
    B, L, _ = position_sequence.shape
    d_half = p["pos_w"].shape[1]
    pos = linear(position_sequence.reshape(B * L, 3), p["pos_w"], p["pos_b"])
    pos = pos.reshape(B, L, d_half)
    id_emb = p["id_emb"][id_sequence]            # gathers stay in plain JAX
    cat_emb = p["cat_emb"][category_sequence]
    dec = jnp.concatenate([pos, id_emb, cat_emb], axis=-1)
    # dropout: identity at inference
    for layer_p in p["layers"]:
        dec = decoder_layer(enc_input, dec, dec_mask, enc_mask, layer_p, n_head)
    return dec


def synthetic_bert(p, input_ids, attention_mask, n_head):
    # TODO(synk): pretrained bert-base-uncased weights cannot be loaded in-script;
    # deterministic single-layer BERT-style encoder with the same 768-d output.
    B, Lb = input_ids.shape
    h = p["tok_emb"][input_ids] + p["pos_emb"][None, :Lb, :]
    D = h.shape[-1]
    h = layer_norm(h.reshape(B * Lb, D), p["emb_ln_g"], p["emb_ln_b"]).reshape(B, Lb, D)
    enc_mask = attention_mask.reshape(B, 1, Lb).astype(jnp.int32)
    h = mha_self_block(h, enc_mask, p["attn"], n_head, causal=False)
    h = ffn_block(h, p["ffn"])
    return h


# ------------------------------ full forward ------------------------------

def category_transformer_forward(params, input_ids, attention_mask,
                                 position_sequence, id_sequence,
                                 category_sequence, pad_mask_sequence,
                                 n_head, bert_n_head):
    B, L = id_sequence.shape

    # BERT encoder (synthetic stand-in) + bert_encoding linear
    bert_out = synthetic_bert(params["bert"], input_ids, attention_mask, bert_n_head)
    Lb, Db = bert_out.shape[1], bert_out.shape[2]
    w_be, b_be = params["bert_encoding"]
    enc = linear(bert_out.reshape(B * Lb, Db), w_be, b_be)
    enc = enc.reshape(B, Lb, w_be.shape[1])

    # masks: only the bool pad masks go to HBM; the causal (triu diagonal=1
    # complement) part of global_mask is built inside the attention kernel.
    bert_mask = attention_mask.reshape(B, 1, Lb).astype(jnp.int32)
    dec_pad_mask = pad_mask_sequence.reshape(B, 1, L).astype(jnp.int32)

    cat_out = transformer_decoder(params["decoder"], enc, position_sequence,
                                  id_sequence, category_sequence,
                                  dec_pad_mask, bert_mask, n_head)

    # category_decoding linear + softmax (fused, lane-padded to 128 columns)
    w_cd, b_cd = params["category_decoding"]
    d_model = cat_out.shape[-1]
    out = category_head(cat_out.reshape(B * L, d_model), w_cd, b_cd)
    return out.reshape(B, L, w_cd.shape[1])


# ----------------------------- parameter init -----------------------------

def _dense(key, k_in, k_out):
    kw, kb = jax.random.split(key)
    w = (jax.random.normal(kw, (k_in, k_out), jnp.float32) * 0.02).astype(jnp.bfloat16)
    b = jax.random.normal(kb, (k_out,), jnp.float32) * 0.02
    return w, b


def _init_mha_self(key, d_model):
    kqkv, ko = jax.random.split(key)
    wqkv, bqkv = _dense(kqkv, d_model, 3 * d_model)     # fused Q|K|V
    wo, bo = _dense(ko, d_model, d_model)
    return {"wqkv": wqkv, "bqkv": bqkv, "wo": wo, "bo": bo,
            "ln_g": jnp.ones((d_model,), jnp.float32),
            "ln_b": jnp.zeros((d_model,), jnp.float32)}


def _init_mha_cross(key, d_model):
    kq, kkv, ko = jax.random.split(key, 3)
    wq, bq = _dense(kq, d_model, d_model)
    wkv, bkv = _dense(kkv, d_model, 2 * d_model)        # fused K|V
    wo, bo = _dense(ko, d_model, d_model)
    return {"wq": wq, "bq": bq, "wkv": wkv, "bkv": bkv, "wo": wo, "bo": bo,
            "ln_g": jnp.ones((d_model,), jnp.float32),
            "ln_b": jnp.zeros((d_model,), jnp.float32)}


def _init_ffn(key, d_model, d_inner):
    k1, k2 = jax.random.split(key)
    w1, b1 = _dense(k1, d_model, d_inner)
    w2, b2 = _dense(k2, d_inner, d_model)
    return {"w1": w1, "b1": b1, "w2": w2, "b2": b2,
            "ln_g": jnp.ones((d_model,), jnp.float32),
            "ln_b": jnp.zeros((d_model,), jnp.float32)}


def init_params(key, d_model, d_hidden, n_layer, bert_vocab, bert_dim,
                bert_max_seq, bert_inner):
    keys = jax.random.split(key, 10)
    params = {}

    bert = {}
    bert["tok_emb"] = jax.random.normal(keys[0], (bert_vocab, bert_dim), jnp.float32) * 0.02
    bert["pos_emb"] = jax.random.normal(keys[1], (bert_max_seq, bert_dim), jnp.float32) * 0.02
    bert["emb_ln_g"] = jnp.ones((bert_dim,), jnp.float32)
    bert["emb_ln_b"] = jnp.zeros((bert_dim,), jnp.float32)
    bert["attn"] = _init_mha_self(keys[2], bert_dim)
    bert["ffn"] = _init_ffn(keys[3], bert_dim, bert_inner)
    params["bert"] = bert

    # bert_encoding: Linear(768, d_model)
    params["bert_encoding"] = _dense(keys[4], bert_dim, d_model)

    # TransformerDecoder
    dec = {}
    dec["pos_w"], dec["pos_b"] = _dense(keys[5], 3, d_model // 2)   # Linear(3, d_model/2)
    dec["id_emb"] = jax.random.normal(keys[6], (253, d_model // 4), jnp.float32) * 0.02
    dec["cat_emb"] = jax.random.normal(keys[7], (33 + 3, d_model // 4), jnp.float32) * 0.02
    layer_keys = jax.random.split(keys[8], n_layer)
    layers = []
    for lk in layer_keys:
        k_slf, k_enc, k_ffn = jax.random.split(lk, 3)
        layers.append({"slf": _init_mha_self(k_slf, d_model),
                       "enc": _init_mha_cross(k_enc, d_model),
                       "ffn": _init_ffn(k_ffn, d_model, d_hidden)})
    dec["layers"] = layers
    params["decoder"] = dec

    # category_decoding: Linear(d_model, 36)
    params["category_decoding"] = _dense(keys[9], d_model, 33 + 3)
    return params


# ---------------------------------- main ----------------------------------

if __name__ == "__main__":
    d_model, d_hidden, n_head, n_layer = 64, 128, 4, 2
    bert_vocab, bert_dim, bert_inner, bert_n_head = 1000, 768, 256, 12
    B, L, Lb = 2, 8, 8

    key = jax.random.PRNGKey(0)
    kp, k1, k2, k3, k4 = jax.random.split(key, 5)
    params = init_params(kp, d_model, d_hidden, n_layer,
                         bert_vocab, bert_dim, Lb, bert_inner)

    input_ids = jax.random.randint(k1, (B, Lb), 0, bert_vocab, dtype=jnp.int32)
    attention_mask = jnp.ones((B, Lb), jnp.int32).at[1, 6:].set(0)
    position_sequence = jax.random.normal(k2, (B, L, 3), jnp.float32)
    id_sequence = jax.random.randint(k3, (B, L), 0, 253, dtype=jnp.int32)
    category_sequence = jax.random.randint(k4, (B, L), 0, 33 + 3, dtype=jnp.int32)
    pad_mask_sequence = jnp.ones((B, L), jnp.int32).at[1, 6:].set(0)

    fwd = jax.jit(functools.partial(category_transformer_forward,
                                    n_head=n_head, bert_n_head=bert_n_head))
    out = jax.block_until_ready(fwd(params, input_ids, attention_mask,
                                    position_sequence, id_sequence,
                                    category_sequence, pad_mask_sequence))

    assert out.shape == (B, L, 33 + 3), out.shape
    # softmax rows should sum to ~1
    assert bool(jnp.allclose(jnp.sum(out, axis=-1), 1.0, atol=1e-4))
    print("KERNEL_OK")
</pallas_src>

<mosaic_0001>
module attributes {stable_mosaic.version = 11 : i64} {
  func.func @_linear_kernel(%arg0: i32, %arg1: memref<16x768xf32, #tpu.memory_space<vmem>>, %arg2: memref<768x256xbf16, #tpu.memory_space<vmem>>, %arg3: memref<1x256xf32, #tpu.memory_space<vmem>>, %arg4: memref<16x256xf32, #tpu.memory_space<vmem>>) attributes {dimension_semantics = [#tpu.dimension_semantics<parallel>], iteration_bounds = array<i64: 9>, scalar_prefetch = 0 : i64, scratch_operands = 0 : i64, tpu.core_type = #tpu.core_type<tc>, window_params = [{pipeline_mode = #tpu.pipeline_mode<synchronous>, transform_indices = @transform_0, window_bounds = array<i64: 16, 768>}, {transform_indices = @transform_1, window_bounds = array<i64: 768, 256>}, {transform_indices = @transform_2, window_bounds = array<i64: 1, 256>}, {transform_indices = @transform_3, window_bounds = array<i64: 16, 256>}]} {
    %c0 = arith.constant 0 : index
    %c0_0 = arith.constant 0 : index
    %0 = vector.load %arg1[%c0, %c0_0] : memref<16x768xf32, #tpu.memory_space<vmem>>, vector<16x768xf32>
    %1 = arith.truncf %0 : vector<16x768xf32> to vector<16x768xbf16>
    %c0_1 = arith.constant 0 : index
    %c0_2 = arith.constant 0 : index
    %2 = vector.load %arg2[%c0_1, %c0_2] : memref<768x256xbf16, #tpu.memory_space<vmem>>, vector<768x256xbf16>
    %cst = arith.constant dense<0.000000e+00> : vector<16x256xf32>
    %3 = tpu.matmul %1, %2, %cst {dimension_numbers = #tpu.dot_dimension_numbers<[1], [0], [0], [1], [0, 0, 1, 1], [], []>} : vector<16x768xbf16>, vector<768x256xbf16>, vector<16x256xf32> -> vector<16x256xf32>
    %c0_3 = arith.constant 0 : index
    %c0_4 = arith.constant 0 : index
    %4 = vector.load %arg3[%c0_3, %c0_4] : memref<1x256xf32, #tpu.memory_space<vmem>>, vector<1x256xf32>
    %5 = vector.broadcast %4 : vector<1x256xf32> to vector<16x256xf32>
    %6 = arith.addf %3, %5 : vector<16x256xf32>
    %c0_5 = arith.constant 0 : index
    %c0_6 = arith.constant 0 : index
    %7 = vector.load %arg4[%c0_5, %c0_6] : memref<16x256xf32, #tpu.memory_space<vmem>>, vector<16x256xf32>
    tpu.vector_store %arg4[%c0_5, %c0_6], %6 {strides = array<i32>} : memref<16x256xf32, #tpu.memory_space<vmem>>, vector<16x256xf32>,
    return
  }
  func.func @transform_0(%arg0: i32) -> (i32, i32) {
    %c0_i32 = arith.constant 0 : i32
    %c0_i32_0 = arith.constant 0 : i32
    %c0_i32_1 = arith.constant 0 : i32
    return %c0_i32, %c0_i32_0 : i32, i32
  }
  func.func @transform_1(%arg0: i32) -> (i32, i32) {
    %c0_i32 = arith.constant 0 : i32
    %c0_i32_0 = arith.constant 0 : i32
    return %c0_i32, %arg0 : i32, i32
  }
  func.func @transform_2(%arg0: i32) -> (i32, i32) {
    %c0_i32 = arith.constant 0 : i32
    %c0_i32_0 = arith.constant 0 : i32
    return %c0_i32, %arg0 : i32, i32
  }
  func.func @transform_3(%arg0: i32) -> (i32, i32) {
    %c0_i32 = arith.constant 0 : i32
    %c0_i32_0 = arith.constant 0 : i32
    return %c0_i32, %arg0 : i32, i32
  }
}

module attributes {stable_mosaic.version = 11 : i64} {
  func.func @_layernorm_kernel(%arg0: i32, %arg1: memref<16x768xf32, #tpu.memory_space<vmem>>, %arg2: memref<1x768xf32, #tpu.memory_space<vmem>>, %arg3: memref<1x768xf32, #tpu.memory_space<vmem>>, %arg4: memref<16x768xf32, #tpu.memory_space<vmem>>) attributes {dimension_semantics = [#tpu.dimension_semantics<arbitrary>], iteration_bounds = array<i64: 1>, scalar_prefetch = 0 : i64, scratch_operands = 0 : i64, tpu.core_type = #tpu.core_type<tc>, window_params = [{pipeline_mode = #tpu.pipeline_mode<synchronous>, transform_indices = @transform_0, window_bounds = array<i64: 16, 768>}, {pipeline_mode = #tpu.pipeline_mode<synchronous>, transform_indices = @transform_1, window_bounds = array<i64: 1, 768>}, {pipeline_mode = #tpu.pipeline_mode<synchronous>, transform_indices = @transform_2, window_bounds = array<i64: 1, 768>}, {pipeline_mode = #tpu.pipeline_mode<synchronous>, transform_indices = @transform_3, window_bounds = array<i64: 16, 768>}]} {
    %c0 = arith.constant 0 : index
    %c0_0 = arith.constant 0 : index
    %0 = vector.load %arg1[%c0, %c0_0] : memref<16x768xf32, #tpu.memory_space<vmem>>, vector<16x768xf32>
    %c0_1 = arith.constant 0 : index
    %c0_2 = arith.constant 0 : index
    %1 = vector.load %arg2[%c0_1, %c0_2] : memref<1x768xf32, #tpu.memory_space<vmem>>, vector<1x768xf32>
    %c0_3 = arith.constant 0 : index
    %c0_4 = arith.constant 0 : index
    %2 = vector.load %arg3[%c0_3, %c0_4] : memref<1x768xf32, #tpu.memory_space<vmem>>, vector<1x768xf32>
    %cst = arith.constant dense<0.000000e+00> : vector<16xf32>
    %3 = vector.multi_reduction <add>, %0, %cst [1] : vector<16x768xf32> to vector<16xf32>
    %4 = vector.shape_cast %3 : vector<16xf32> to vector<16x1xf32>
    %cst_5 = arith.constant 7.680000e+02 : f32
    %5 = vector.broadcast %cst_5 : f32 to vector<16x1xf32>
    %6 = arith.divf %4, %5 : vector<16x1xf32>
    %7 = vector.broadcast %6 : vector<16x1xf32> to vector<16x768xf32>
    %8 = arith.subf %0, %7 : vector<16x768xf32>
    %9 = arith.mulf %8, %8 : vector<16x768xf32>
    %cst_6 = arith.constant dense<0.000000e+00> : vector<16xf32>
    %10 = vector.multi_reduction <add>, %9, %cst_6 [1] : vector<16x768xf32> to vector<16xf32>
    %11 = vector.shape_cast %10 : vector<16xf32> to vector<16x1xf32>
    %cst_7 = arith.constant 7.680000e+02 : f32
    %12 = vector.broadcast %cst_7 : f32 to vector<16x1xf32>
    %13 = arith.divf %11, %12 : vector<16x1xf32>
    %14 = vector.broadcast %6 : vector<16x1xf32> to vector<16x768xf32>
    %15 = arith.subf %0, %14 : vector<16x768xf32>
    %cst_8 = arith.constant 9.99999974E-6 : f32
    %16 = vector.broadcast %cst_8 : f32 to vector<16x1xf32>
    %17 = arith.addf %13, %16 : vector<16x1xf32>
    %18 = math.rsqrt %17 : vector<16x1xf32>
    %19 = vector.broadcast %18 : vector<16x1xf32> to vector<16x768xf32>
    %20 = arith.mulf %15, %19 : vector<16x768xf32>
    %21 = vector.broadcast %1 : vector<1x768xf32> to vector<16x768xf32>
    %22 = arith.mulf %20, %21 : vector<16x768xf32>
    %23 = vector.broadcast %2 : vector<1x768xf32> to vector<16x768xf32>
    %24 = arith.addf %22, %23 : vector<16x768xf32>
    %c0_9 = arith.constant 0 : index
    %c0_10 = arith.constant 0 : index
    %25 = vector.load %arg4[%c0_9, %c0_10] : memref<16x768xf32, #tpu.memory_space<vmem>>, vector<16x768xf32>
    tpu.vector_store %arg4[%c0_9, %c0_10], %24 {strides = array<i32>} : memref<16x768xf32, #tpu.memory_space<vmem>>, vector<16x768xf32>,
    return
  }
  func.func @transform_0(%arg0: i32) -> (i32, i32) {
    %c0_i32 = arith.constant 0 : i32
    %c0_i32_0 = arith.constant 0 : i32
    %c0_i32_1 = arith.constant 0 : i32
    return %c0_i32, %c0_i32_0 : i32, i32
  }
  func.func @transform_1(%arg0: i32) -> (i32, i32) {
    %c0_i32 = arith.constant 0 : i32
    %c0_i32_0 = arith.constant 0 : i32
    %c0_i32_1 = arith.constant 0 : i32
    return %c0_i32, %c0_i32_0 : i32, i32
  }
  func.func @transform_2(%arg0: i32) -> (i32, i32) {
    %c0_i32 = arith.constant 0 : i32
    %c0_i32_0 = arith.constant 0 : i32
    %c0_i32_1 = arith.constant 0 : i32
    return %c0_i32, %c0_i32_0 : i32, i32
  }
  func.func @transform_3(%arg0: i32) -> (i32, i32) {
    %c0_i32 = arith.constant 0 : i32
    %c0_i32_0 = arith.constant 0 : i32
    %c0_i32_1 = arith.constant 0 : i32
    return %c0_i32, %c0_i32_0 : i32, i32
  }
}

module attributes {stable_mosaic.version = 11 : i64} {
  func.func @_linear_res_ln_kernel(%arg0: i32, %arg1: memref<16x768xf32, #tpu.memory_space<vmem>>, %arg2: memref<768x768xbf16, #tpu.memory_space<vmem>>, %arg3: memref<1x768xf32, #tpu.memory_space<vmem>>, %arg4: memref<16x768xf32, #tpu.memory_space<vmem>>, %arg5: memref<1x768xf32, #tpu.memory_space<vmem>>, %arg6: memref<1x768xf32, #tpu.memory_space<vmem>>, %arg7: memref<16x768xf32, #tpu.memory_space<vmem>>) attributes {dimension_semantics = [#tpu.dimension_semantics<arbitrary>], iteration_bounds = array<i64: 1>, scalar_prefetch = 0 : i64, scratch_operands = 0 : i64, tpu.core_type = #tpu.core_type<tc>, window_params = [{pipeline_mode = #tpu.pipeline_mode<synchronous>, transform_indices = @transform_0, window_bounds = array<i64: 16, 768>}, {pipeline_mode = #tpu.pipeline_mode<synchronous>, transform_indices = @transform_1, window_bounds = array<i64: 768, 768>}, {pipeline_mode = #tpu.pipeline_mode<synchronous>, transform_indices = @transform_2, window_bounds = array<i64: 1, 768>}, {pipeline_mode = #tpu.pipeline_mode<synchronous>, transform_indices = @transform_3, window_bounds = array<i64: 16, 768>}, {pipeline_mode = #tpu.pipeline_mode<synchronous>, transform_indices = @transform_4, window_bounds = array<i64: 1, 768>}, {pipeline_mode = #tpu.pipeline_mode<synchronous>, transform_indices = @transform_5, window_bounds = array<i64: 1, 768>}, {pipeline_mode = #tpu.pipeline_mode<synchronous>, transform_indices = @transform_6, window_bounds = array<i64: 16, 768>}]} {
    %c0 = arith.constant 0 : index
    %c0_0 = arith.constant 0 : index
    %0 = vector.load %arg1[%c0, %c0_0] : memref<16x768xf32, #tpu.memory_space<vmem>>, vector<16x768xf32>
    %1 = arith.truncf %0 : vector<16x768xf32> to vector<16x768xbf16>
    %c0_1 = arith.constant 0 : index
    %c0_2 = arith.constant 0 : index
    %2 = vector.load %arg2[%c0_1, %c0_2] : memref<768x768xbf16, #tpu.memory_space<vmem>>, vector<768x768xbf16>
    %cst = arith.constant dense<0.000000e+00> : vector<16x768xf32>
    %3 = tpu.matmul %1, %2, %cst {dimension_numbers = #tpu.dot_dimension_numbers<[1], [0], [0], [1], [0, 0, 1, 1], [], []>} : vector<16x768xbf16>, vector<768x768xbf16>, vector<16x768xf32> -> vector<16x768xf32>
    %c0_3 = arith.constant 0 : index
    %c0_4 = arith.constant 0 : index
    %4 = vector.load %arg3[%c0_3, %c0_4] : memref<1x768xf32, #tpu.memory_space<vmem>>, vector<1x768xf32>
    %5 = vector.broadcast %4 : vector<1x768xf32> to vector<16x768xf32>
    %6 = arith.addf %3, %5 : vector<16x768xf32>
    %c0_5 = arith.constant 0 : index
    %c0_6 = arith.constant 0 : index
    %7 = vector.load %arg4[%c0_5, %c0_6] : memref<16x768xf32, #tpu.memory_space<vmem>>, vector<16x768xf32>
    %8 = arith.addf %6, %7 : vector<16x768xf32>
    %c0_7 = arith.constant 0 : index
    %c0_8 = arith.constant 0 : index
    %9 = vector.load %arg5[%c0_7, %c0_8] : memref<1x768xf32, #tpu.memory_space<vmem>>, vector<1x768xf32>
    %c0_9 = arith.constant 0 : index
    %c0_10 = arith.constant 0 : index
    %10 = vector.load %arg6[%c0_9, %c0_10] : memref<1x768xf32, #tpu.memory_space<vmem>>, vector<1x768xf32>
    %cst_11 = arith.constant dense<0.000000e+00> : vector<16xf32>
    %11 = vector.multi_reduction <add>, %8, %cst_11 [1] : vector<16x768xf32> to vector<16xf32>
    %12 = vector.shape_cast %11 : vector<16xf32> to vector<16x1xf32>
    %cst_12 = arith.constant 7.680000e+02 : f32
    %13 = vector.broadcast %cst_12 : f32 to vector<16x1xf32>
    %14 = arith.divf %12, %13 : vector<16x1xf32>
    %15 = vector.broadcast %14 : vector<16x1xf32> to vector<16x768xf32>
    %16 = arith.subf %8, %15 : vector<16x768xf32>
    %17 = arith.mulf %16, %16 : vector<16x768xf32>
    %cst_13 = arith.constant dense<0.000000e+00> : vector<16xf32>
    %18 = vector.multi_reduction <add>, %17, %cst_13 [1] : vector<16x768xf32> to vector<16xf32>
    %19 = vector.shape_cast %18 : vector<16xf32> to vector<16x1xf32>
    %cst_14 = arith.constant 7.680000e+02 : f32
    %20 = vector.broadcast %cst_14 : f32 to vector<16x1xf32>
    %21 = arith.divf %19, %20 : vector<16x1xf32>
    %22 = vector.broadcast %14 : vector<16x1xf32> to vector<16x768xf32>
    %23 = arith.subf %8, %22 : vector<16x768xf32>
    %cst_15 = arith.constant 9.99999974E-6 : f32
    %24 = vector.broadcast %cst_15 : f32 to vector<16x1xf32>
    %25 = arith.addf %21, %24 : vector<16x1xf32>
    %26 = math.rsqrt %25 : vector<16x1xf32>
    %27 = vector.broadcast %26 : vector<16x1xf32> to vector<16x768xf32>
    %28 = arith.mulf %23, %27 : vector<16x768xf32>
    %29 = vector.broadcast %9 : vector<1x768xf32> to vector<16x768xf32>
    %30 = arith.mulf %28, %29 : vector<16x768xf32>
    %31 = vector.broadcast %10 : vector<1x768xf32> to vector<16x768xf32>
    %32 = arith.addf %30, %31 : vector<16x768xf32>
    %c0_16 = arith.constant 0 : index
    %c0_17 = arith.constant 0 : index
    %33 = vector.load %arg7[%c0_16, %c0_17] : memref<16x768xf32, #tpu.memory_space<vmem>>, vector<16x768xf32>
    tpu.vector_store %arg7[%c0_16, %c0_17], %32 {strides = array<i32>} : memref<16x768xf32, #tpu.memory_space<vmem>>, vector<16x768xf32>,
    return
  }
  func.func @transform_0(%arg0: i32) -> (i32, i32) {
    %c0_i32 = arith.constant 0 : i32
    %c0_i32_0 = arith.constant 0 : i32
    %c0_i32_1 = arith.constant 0 : i32
    return %c0_i32, %c0_i32_0 : i32, i32
  }
  func.func @transform_1(%arg0: i32) -> (i32, i32) {
    %c0_i32 = arith.constant 0 : i32
    %c0_i32_0 = arith.constant 0 : i32
    %c0_i32_1 = arith.constant 0 : i32
    return %c0_i32, %c0_i32_0 : i32, i32
  }
  func.func @transform_2(%arg0: i32) -> (i32, i32) {
    %c0_i32 = arith.constant 0 : i32
    %c0_i32_0 = arith.constant 0 : i32
    %c0_i32_1 = arith.constant 0 : i32
    return %c0_i32, %c0_i32_0 : i32, i32
  }
  func.func @transform_3(%arg0: i32) -> (i32, i32) {
    %c0_i32 = arith.constant 0 : i32
    %c0_i32_0 = arith.constant 0 : i32
    %c0_i32_1 = arith.constant 0 : i32
    return %c0_i32, %c0_i32_0 : i32, i32
  }
  func.func @transform_4(%arg0: i32) -> (i32, i32) {
    %c0_i32 = arith.constant 0 : i32
    %c0_i32_0 = arith.constant 0 : i32
    %c0_i32_1 = arith.constant 0 : i32
    return %c0_i32, %c0_i32_0 : i32, i32
  }
  func.func @transform_5(%arg0: i32) -> (i32, i32) {
    %c0_i32 = arith.constant 0 : i32
    %c0_i32_0 = arith.constant 0 : i32
    %c0_i32_1 = arith.constant 0 : i32
    return %c0_i32, %c0_i32_0 : i32, i32
  }
  func.func @transform_6(%arg0: i32) -> (i32, i32) {
    %c0_i32 = arith.constant 0 : i32
    %c0_i32_0 = arith.constant 0 : i32
    %c0_i32_1 = arith.constant 0 : i32
    return %c0_i32, %c0_i32_0 : i32, i32
  }
}

module attributes {stable_mosaic.version = 11 : i64} {
  func.func @_self_attn_kernel(%arg0: i32, %arg1: memref<1x8x2304xf32, #tpu.memory_space<vmem>>, %arg2: memref<1x1x8xi32, #tpu.memory_space<vmem>>, %arg3: memref<1x8x768xf32, #tpu.memory_space<vmem>>) attributes {dimension_semantics = [#tpu.dimension_semantics<parallel>], iteration_bounds = array<i64: 2>, scalar_prefetch = 0 : i64, scratch_operands = 0 : i64, tpu.core_type = #tpu.core_type<tc>, window_params = [{transform_indices = @transform_0, window_bounds = array<i64: 1, 8, 2304>}, {transform_indices = @transform_1, window_bounds = array<i64: 1, 1, 8>}, {transform_indices = @transform_2, window_bounds = array<i64: 1, 8, 768>}]} {
    %c0 = arith.constant 0 : index
    %c0_0 = arith.constant 0 : index
    %c0_1 = arith.constant 0 : index
    %0 = vector.load %arg1[%c0, %c0_0, %c0_1] : memref<1x8x2304xf32, #tpu.memory_space<vmem>>, vector<1x8x2304xf32>
    %1 = vector.shape_cast %0 : vector<1x8x2304xf32> to vector<8x2304xf32>
    %2 = vector.extract_strided_slice %1 {offsets = [0, 0], sizes = [8, 768], strides = [1, 1]} : vector<8x2304xf32> to vector<8x768xf32>
    %3 = vector.extract_strided_slice %1 {offsets = [0, 768], sizes = [8, 768], strides = [1, 1]} : vector<8x2304xf32> to vector<8x768xf32>
    %4 = vector.extract_strided_slice %1 {offsets = [0, 1536], sizes = [8, 768], strides = [1, 1]} : vector<8x2304xf32> to vector<8x768xf32>
    %c0_2 = arith.constant 0 : index
    %c0_3 = arith.constant 0 : index
    %c0_4 = arith.constant 0 : index
    %5 = vector.load %arg2[%c0_2, %c0_3, %c0_4] : memref<1x1x8xi32, #tpu.memory_space<vmem>>, vector<1x1x8xi32>
    %6 = vector.shape_cast %5 : vector<1x1x8xi32> to vector<1x8xi32>
    %c0_i32 = arith.constant 0 : i32
    %7 = vector.broadcast %c0_i32 : i32 to vector<1x8xi32>
    %8 = arith.cmpi sgt, %6, %7 : vector<1x8xi32>
    %cst = arith.constant 0.000000e+00 : f32
    %cst_5 = arith.constant -1.000000e+09 : f32
    %9 = vector.broadcast %cst : f32 to vector<1x8xf32>
    %10 = vector.broadcast %cst_5 : f32 to vector<1x8xf32>
    %11 = arith.select %8, %9, %10 : vector<1x8xi1>, vector<1x8xf32>
    %12 = vector.extract_strided_slice %2 {offsets = [0, 0], sizes = [8, 64], strides = [1, 1]} : vector<8x768xf32> to vector<8x64xf32>
    %13 = vector.extract_strided_slice %3 {offsets = [0, 0], sizes = [8, 64], strides = [1, 1]} : vector<8x768xf32> to vector<8x64xf32>
    %14 = vector.extract_strided_slice %4 {offsets = [0, 0], sizes = [8, 64], strides = [1, 1]} : vector<8x768xf32> to vector<8x64xf32>
    %cst_6 = arith.constant dense<0.000000e+00> : vector<8x8xf32>
    %15 = tpu.matmul %12, %13, %cst_6 {dimension_numbers = #tpu.dot_dimension_numbers<[1], [1], [0], [0], [0, 0, 1, 0], [], []>} : vector<8x64xf32>, vector<8x64xf32>, vector<8x8xf32> -> vector<8x8xf32>
    %cst_7 = arith.constant 1.250000e-01 : f32
    %16 = vector.broadcast %cst_7 : f32 to vector<8x8xf32>
    %17 = arith.mulf %15, %16 : vector<8x8xf32>
    %18 = vector.broadcast %11 : vector<1x8xf32> to vector<8x8xf32>
    %19 = arith.addf %17, %18 : vector<8x8xf32>
    %cst_8 = arith.constant dense<0xFF800000> : vector<8xf32>
    %20 = vector.multi_reduction <maximumf>, %19, %cst_8 [1] : vector<8x8xf32> to vector<8xf32>
    %21 = vector.shape_cast %20 : vector<8xf32> to vector<8x1xf32>
    %22 = vector.broadcast %21 : vector<8x1xf32> to vector<8x8xf32>
    %23 = arith.subf %19, %22 : vector<8x8xf32>
    %24 = math.exp %23 : vector<8x8xf32>
    %cst_9 = arith.constant dense<0.000000e+00> : vector<8xf32>
    %25 = vector.multi_reduction <add>, %24, %cst_9 [1] : vector<8x8xf32> to vector<8xf32>
    %26 = vector.shape_cast %25 : vector<8xf32> to vector<8x1xf32>
    %27 = tpu.reciprocal %26 {approx = true} : vector<8x1xf32> -> vector<8x1xf32>
    %28 = vector.broadcast %27 : vector<8x1xf32> to vector<8x8xf32>
    %29 = arith.mulf %24, %28 : vector<8x8xf32>
    %cst_10 = arith.constant dense<0.000000e+00> : vector<8x64xf32>
    %30 = tpu.matmul %29, %14, %cst_10 {dimension_numbers = #tpu.dot_dimension_numbers<[1], [0], [0], [1], [0, 0, 1, 1], [], []>} : vector<8x8xf32>, vector<8x64xf32>, vector<8x64xf32> -> vector<8x64xf32>
    %31 = vector.extract_strided_slice %2 {offsets = [0, 64], sizes = [8, 64], strides = [1, 1]} : vector<8x768xf32> to vector<8x64xf32>
    %32 = vector.extract_strided_slice %3 {offsets = [0, 64], sizes = [8, 64], strides = [1, 1]} : vector<8x768xf32> to vector<8x64xf32>
    %33 = vector.extract_strided_slice %4 {offsets = [0, 64], sizes = [8, 64], strides = [1, 1]} : vector<8x768xf32> to vector<8x64xf32>
    %cst_11 = arith.constant dense<0.000000e+00> : vector<8x8xf32>
    %34 = tpu.matmul %31, %32, %cst_11 {dimension_numbers = #tpu.dot_dimension_numbers<[1], [1], [0], [0], [0, 0, 1, 0], [], []>} : vector<8x64xf32>, vector<8x64xf32>, vector<8x8xf32> -> vector<8x8xf32>
    %cst_12 = arith.constant 1.250000e-01 : f32
    %35 = vector.broadcast %cst_12 : f32 to vector<8x8xf32>
    %36 = arith.mulf %34, %35 : vector<8x8xf32>
    %37 = vector.broadcast %11 : vector<1x8xf32> to vector<8x8xf32>
    %38 = arith.addf %36, %37 : vector<8x8xf32>
    %cst_13 = arith.constant dense<0xFF800000> : vector<8xf32>
    %39 = vector.multi_reduction <maximumf>, %38, %cst_13 [1] : vector<8x8xf32> to vector<8xf32>
    %40 = vector.shape_cast %39 : vector<8xf32> to vector<8x1xf32>
    %41 = vector.broadcast %40 : vector<8x1xf32> to vector<8x8xf32>
    %42 = arith.subf %38, %41 : vector<8x8xf32>
    %43 = math.exp %42 : vector<8x8xf32>
    %cst_14 = arith.constant dense<0.000000e+00> : vector<8xf32>
    %44 = vector.multi_reduction <add>, %43, %cst_14 [1] : vector<8x8xf32> to vector<8xf32>
    %45 = vector.shape_cast %44 : vector<8xf32> to vector<8x1xf32>
    %46 = tpu.reciprocal %45 {approx = true} : vector<8x1xf32> -> vector<8x1xf32>
    %47 = vector.broadcast %46 : vector<8x1xf32> to vector<8x8xf32>
    %48 = arith.mulf %43, %47 : vector<8x8xf32>
    %cst_15 = arith.constant dense<0.000000e+00> : vector<8x64xf32>
    %49 = tpu.matmul %48, %33, %cst_15 {dimension_numbers = #tpu.dot_dimension_numbers<[1], [0], [0], [1], [0, 0, 1, 1], [], []>} : vector<8x8xf32>, vector<8x64xf32>, vector<8x64xf32> -> vector<8x64xf32>
    %50 = vector.extract_strided_slice %2 {offsets = [0, 128], sizes = [8, 64], strides = [1, 1]} : vector<8x768xf32> to vector<8x64xf32>
    %51 = vector.extract_strided_slice %3 {offsets = [0, 128], sizes = [8, 64], strides = [1, 1]} : vector<8x768xf32> to vector<8x64xf32>
    %52 = vector.extract_strided_slice %4 {offsets = [0, 128], sizes = [8, 64], strides = [1, 1]} : vector<8x768xf32> to vector<8x64xf32>
    %cst_16 = arith.constant dense<0.000000e+00> : vector<8x8xf32>
    %53 = tpu.matmul %50, %51, %cst_16 {dimension_numbers = #tpu.dot_dimension_numbers<[1], [1], [0], [0], [0, 0, 1, 0], [], []>} : vector<8x64xf32>, vector<8x64xf32>, vector<8x8xf32> -> vector<8x8xf32>
    %cst_17 = arith.constant 1.250000e-01 : f32
    %54 = vector.broadcast %cst_17 : f32 to vector<8x8xf32>
    %55 = arith.mulf %53, %54 : vector<8x8xf32>
    %56 = vector.broadcast %11 : vector<1x8xf32> to vector<8x8xf32>
    %57 = arith.addf %55, %56 : vector<8x8xf32>
    %cst_18 = arith.constant dense<0xFF800000> : vector<8xf32>
    %58 = vector.multi_reduction <maximumf>, %57, %cst_18 [1] : vector<8x8xf32> to vector<8xf32>
    %59 = vector.shape_cast %58 : vector<8xf32> to vector<8x1xf32>
    %60 = vector.broadcast %59 : vector<8x1xf32> to vector<8x8xf32>
    %61 = arith.subf %57, %60 : vector<8x8xf32>
    %62 = math.exp %61 : vector<8x8xf32>
    %cst_19 = arith.constant dense<0.000000e+00> : vector<8xf32>
    %63 = vector.multi_reduction <add>, %62, %cst_19 [1] : vector<8x8xf32> to vector<8xf32>
    %64 = vector.shape_cast %63 : vector<8xf32> to vector<8x1xf32>
    %65 = tpu.reciprocal %64 {approx = true} : vector<8x1xf32> -> vector<8x1xf32>
    %66 = vector.broadcast %65 : vector<8x1xf32> to vector<8x8xf32>
    %67 = arith.mulf %62, %66 : vector<8x8xf32>
    %cst_20 = arith.constant dense<0.000000e+00> : vector<8x64xf32>
    %68 = tpu.matmul %67, %52, %cst_20 {dimension_numbers = #tpu.dot_dimension_numbers<[1], [0], [0], [1], [0, 0, 1, 1], [], []>} : vector<8x8xf32>, vector<8x64xf32>, vector<8x64xf32> -> vector<8x64xf32>
    %69 = vector.extract_strided_slice %2 {offsets = [0, 192], sizes = [8, 64], strides = [1, 1]} : vector<8x768xf32> to vector<8x64xf32>
    %70 = vector.extract_strided_slice %3 {offsets = [0, 192], sizes = [8, 64], strides = [1, 1]} : vector<8x768xf32> to vector<8x64xf32>
    %71 = vector.extract_strided_slice %4 {offsets = [0, 192], sizes = [8, 64], strides = [1, 1]} : vector<8x768xf32> to vector<8x64xf32>
    %cst_21 = arith.constant dense<0.000000e+00> : vector<8x8xf32>
    %72 = tpu.matmul %69, %70, %cst_21 {dimension_numbers = #tpu.dot_dimension_numbers<[1], [1], [0], [0], [0, 0, 1, 0], [], []>} : vector<8x64xf32>, vector<8x64xf32>, vector<8x8xf32> -> vector<8x8xf32>
    %cst_22 = arith.constant 1.250000e-01 : f32
    %73 = vector.broadcast %cst_22 : f32 to vector<8x8xf32>
    %74 = arith.mulf %72, %73 : vector<8x8xf32>
    %75 = vector.broadcast %11 : vector<1x8xf32> to vector<8x8xf32>
    %76 = arith.addf %74, %75 : vector<8x8xf32>
    %cst_23 = arith.constant dense<0xFF800000> : vector<8xf32>
    %77 = vector.multi_reduction <maximumf>, %76, %cst_23 [1] : vector<8x8xf32> to vector<8xf32>
    %78 = vector.shape_cast %77 : vector<8xf32> to vector<8x1xf32>
    %79 = vector.broadcast %78 : vector<8x1xf32> to vector<8x8xf32>
    %80 = arith.subf %76, %79 : vector<8x8xf32>
    %81 = math.exp %80 : vector<8x8xf32>
    %cst_24 = arith.constant dense<0.000000e+00> : vector<8xf32>
    %82 = vector.multi_reduction <add>, %81, %cst_24 [1] : vector<8x8xf32> to vector<8xf32>
    %83 = vector.shape_cast %82 : vector<8xf32> to vector<8x1xf32>
    %84 = tpu.reciprocal %83 {approx = true} : vector<8x1xf32> -> vector<8x1xf32>
    %85 = vector.broadcast %84 : vector<8x1xf32> to vector<8x8xf32>
    %86 = arith.mulf %81, %85 : vector<8x8xf32>
    %cst_25 = arith.constant dense<0.000000e+00> : vector<8x64xf32>
    %87 = tpu.matmul %86, %71, %cst_25 {dimension_numbers = #tpu.dot_dimension_numbers<[1], [0], [0], [1], [0, 0, 1, 1], [], []>} : vector<8x8xf32>, vector<8x64xf32>, vector<8x64xf32> -> vector<8x64xf32>
    %88 = vector.extract_strided_slice %2 {offsets = [0, 256], sizes = [8, 64], strides = [1, 1]} : vector<8x768xf32> to vector<8x64xf32>
    %89 = vector.extract_strided_slice %3 {offsets = [0, 256], sizes = [8, 64], strides = [1, 1]} : vector<8x768xf32> to vector<8x64xf32>
    %90 = vector.extract_strided_slice %4 {offsets = [0, 256], sizes = [8, 64], strides = [1, 1]} : vector<8x768xf32> to vector<8x64xf32>
    %cst_26 = arith.constant dense<0.000000e+00> : vector<8x8xf32>
    %91 = tpu.matmul %88, %89, %cst_26 {dimension_numbers = #tpu.dot_dimension_numbers<[1], [1], [0], [0], [0, 0, 1, 0], [], []>} : vector<8x64xf32>, vector<8x64xf32>, vector<8x8xf32> -> vector<8x8xf32>
    %cst_27 = arith.constant 1.250000e-01 : f32
    %92 = vector.broadcast %cst_27 : f32 to vector<8x8xf32>
    %93 = arith.mulf %91, %92 : vector<8x8xf32>
    %94 = vector.broadcast %11 : vector<1x8xf32> to vector<8x8xf32>
    %95 = arith.addf %93, %94 : vector<8x8xf32>
    %cst_28 = arith.constant dense<0xFF800000> : vector<8xf32>
    %96 = vector.multi_reduction <maximumf>, %95, %cst_28 [1] : vector<8x8xf32> to vector<8xf32>
    %97 = vector.shape_cast %96 : vector<8xf32> to vector<8x1xf32>
    %98 = vector.broadcast %97 : vector<8x1xf32> to vector<8x8xf32>
    %99 = arith.subf %95, %98 : vector<8x8xf32>
    %100 = math.exp %99 : vector<8x8xf32>
    %cst_29 = arith.constant dense<0.000000e+00> : vector<8xf32>
    %101 = vector.multi_reduction <add>, %100, %cst_29 [1] : vector<8x8xf32> to vector<8xf32>
    %102 = vector.shape_cast %101 : vector<8xf32> to vector<8x1xf32>
    %103 = tpu.reciprocal %102 {approx = true} : vector<8x1xf32> -> vector<8x1xf32>
    %104 = vector.broadcast %103 : vector<8x1xf32> to vector<8x8xf32>
    %105 = arith.mulf %100, %104 : vector<8x8xf32>
    %cst_30 = arith.constant dense<0.000000e+00> : vector<8x64xf32>
    %106 = tpu.matmul %105, %90, %cst_30 {dimension_numbers = #tpu.dot_dimension_numbers<[1], [0], [0], [1], [0, 0, 1, 1], [], []>} : vector<8x8xf32>, vector<8x64xf32>, vector<8x64xf32> -> vector<8x64xf32>
    %107 = vector.extract_strided_slice %2 {offsets = [0, 320], sizes = [8, 64], strides = [1, 1]} : vector<8x768xf32> to vector<8x64xf32>
    %108 = vector.extract_strided_slice %3 {offsets = [0, 320], sizes = [8, 64], strides = [1, 1]} : vector<8x768xf32> to vector<8x64xf32>
    %109 = vector.extract_strided_slice %4 {offsets = [0, 320], sizes = [8, 64], strides = [1, 1]} : vector<8x768xf32> to vector<8x64xf32>
    %cst_31 = arith.constant dense<0.000000e+00> : vector<8x8xf32>
    %110 = tpu.matmul %107, %108, %cst_31 {dimension_numbers = #tpu.dot_dimension_numbers<[1], [1], [0], [0], [0, 0, 1, 0], [], []>} : vector<8x64xf32>, vector<8x64xf32>, vector<8x8xf32> -> vector<8x8xf32>
    %cst_32 = arith.constant 1.250000e-01 : f32
    %111 = vector.broadcast %cst_32 : f32 to vector<8x8xf32>
    %112 = arith.mulf %110, %111 : vector<8x8xf32>
    %113 = vector.broadcast %11 : vector<1x8xf32> to vector<8x8xf32>
    %114 = arith.addf %112, %113 : vector<8x8xf32>
    %cst_33 = arith.constant dense<0xFF800000> : vector<8xf32>
    %115 = vector.multi_reduction <maximumf>, %114, %cst_33 [1] : vector<8x8xf32> to vector<8xf32>
    %116 = vector.shape_cast %115 : vector<8xf32> to vector<8x1xf32>
    %117 = vector.broadcast %116 : vector<8x1xf32> to vector<8x8xf32>
    %118 = arith.subf %114, %117 : vector<8x8xf32>
    %119 = math.exp %118 : vector<8x8xf32>
    %cst_34 = arith.constant dense<0.000000e+00> : vector<8xf32>
    %120 = vector.multi_reduction <add>, %119, %cst_34 [1] : vector<8x8xf32> to vector<8xf32>
    %121 = vector.shape_cast %120 : vector<8xf32> to vector<8x1xf32>
    %122 = tpu.reciprocal %121 {approx = true} : vector<8x1xf32> -> vector<8x1xf32>
    %123 = vector.broadcast %122 : vector<8x1xf32> to vector<8x8xf32>
    %124 = arith.mulf %119, %123 : vector<8x8xf32>
    %cst_35 = arith.constant dense<0.000000e+00> : vector<8x64xf32>
    %125 = tpu.matmul %124, %109, %cst_35 {dimension_numbers = #tpu.dot_dimension_numbers<[1], [0], [0], [1], [0, 0, 1, 1], [], []>} : vector<8x8xf32>, vector<8x64xf32>, vector<8x64xf32> -> vector<8x64xf32>
    %126 = vector.extract_strided_slice %2 {offsets = [0, 384], sizes = [8, 64], strides = [1, 1]} : vector<8x768xf32> to vector<8x64xf32>
    %127 = vector.extract_strided_slice %3 {offsets = [0, 384], sizes = [8, 64], strides = [1, 1]} : vector<8x768xf32> to vector<8x64xf32>
    %128 = vector.extract_strided_slice %4 {offsets = [0, 384], sizes = [8, 64], strides = [1, 1]} : vector<8x768xf32> to vector<8x64xf32>
    %cst_36 = arith.constant dense<0.000000e+00> : vector<8x8xf32>
    %129 = tpu.matmul %126, %127, %cst_36 {dimension_numbers = #tpu.dot_dimension_numbers<[1], [1], [0], [0], [0, 0, 1, 0], [], []>} : vector<8x64xf32>, vector<8x64xf32>, vector<8x8xf32> -> vector<8x8xf32>
    %cst_37 = arith.constant 1.250000e-01 : f32
    %130 = vector.broadcast %cst_37 : f32 to vector<8x8xf32>
    %131 = arith.mulf %129, %130 : vector<8x8xf32>
    %132 = vector.broadcast %11 : vector<1x8xf32> to vector<8x8xf32>
    %133 = arith.addf %131, %132 : vector<8x8xf32>
    %cst_38 = arith.constant dense<0xFF800000> : vector<8xf32>
    %134 = vector.multi_reduction <maximumf>, %133, %cst_38 [1] : vector<8x8xf32> to vector<8xf32>
    %135 = vector.shape_cast %134 : vector<8xf32> to vector<8x1xf32>
    %136 = vector.broadcast %135 : vector<8x1xf32> to vector<8x8xf32>
    %137 = arith.subf %133, %136 : vector<8x8xf32>
    %138 = math.exp %137 : vector<8x8xf32>
    %cst_39 = arith.constant dense<0.000000e+00> : vector<8xf32>
    %139 = vector.multi_reduction <add>, %138, %cst_39 [1] : vector<8x8xf32> to vector<8xf32>
    %140 = vector.shape_cast %139 : vector<8xf32> to vector<8x1xf32>
    %141 = tpu.reciprocal %140 {approx = true} : vector<8x1xf32> -> vector<8x1xf32>
    %142 = vector.broadcast %141 : vector<8x1xf32> to vector<8x8xf32>
    %143 = arith.mulf %138, %142 : vector<8x8xf32>
    %cst_40 = arith.constant dense<0.000000e+00> : vector<8x64xf32>
    %144 = tpu.matmul %143, %128, %cst_40 {dimension_numbers = #tpu.dot_dimension_numbers<[1], [0], [0], [1], [0, 0, 1, 1], [], []>} : vector<8x8xf32>, vector<8x64xf32>, vector<8x64xf32> -> vector<8x64xf32>
    %145 = vector.extract_strided_slice %2 {offsets = [0, 448], sizes = [8, 64], strides = [1, 1]} : vector<8x768xf32> to vector<8x64xf32>
    %146 = vector.extract_strided_slice %3 {offsets = [0, 448], sizes = [8, 64], strides = [1, 1]} : vector<8x768xf32> to vector<8x64xf32>
    %147 = vector.extract_strided_slice %4 {offsets = [0, 448], sizes = [8, 64], strides = [1, 1]} : vector<8x768xf32> to vector<8x64xf32>
    %cst_41 = arith.constant dense<0.000000e+00> : vector<8x8xf32>
    %148 = tpu.matmul %145, %146, %cst_41 {dimension_numbers = #tpu.dot_dimension_numbers<[1], [1], [0], [0], [0, 0, 1, 0], [], []>} : vector<8x64xf32>, vector<8x64xf32>, vector<8x8xf32> -> vector<8x8xf32>
    %cst_42 = arith.constant 1.250000e-01 : f32
    %149 = vector.broadcast %cst_42 : f32 to vector<8x8xf32>
    %150 = arith.mulf %148, %149 : vector<8x8xf32>
    %151 = vector.broadcast %11 : vector<1x8xf32> to vector<8x8xf32>
    %152 = arith.addf %150, %151 : vector<8x8xf32>
    %cst_43 = arith.constant dense<0xFF800000> : vector<8xf32>
    %153 = vector.multi_reduction <maximumf>, %152, %cst_43 [1] : vector<8x8xf32> to vector<8xf32>
    %154 = vector.shape_cast %153 : vector<8xf32> to vector<8x1xf32>
    %155 = vector.broadcast %154 : vector<8x1xf32> to vector<8x8xf32>
    %156 = arith.subf %152, %155 : vector<8x8xf32>
    %157 = math.exp %156 : vector<8x8xf32>
    %cst_44 = arith.constant dense<0.000000e+00> : vector<8xf32>
    %158 = vector.multi_reduction <add>, %157, %cst_44 [1] : vector<8x8xf32> to vector<8xf32>
    %159 = vector.shape_cast %158 : vector<8xf32> to vector<8x1xf32>
    %160 = tpu.reciprocal %159 {approx = true} : vector<8x1xf32> -> vector<8x1xf32>
    %161 = vector.broadcast %160 : vector<8x1xf32> to vector<8x8xf32>
    %162 = arith.mulf %157, %161 : vector<8x8xf32>
    %cst_45 = arith.constant dense<0.000000e+00> : vector<8x64xf32>
    %163 = tpu.matmul %162, %147, %cst_45 {dimension_numbers = #tpu.dot_dimension_numbers<[1], [0], [0], [1], [0, 0, 1, 1], [], []>} : vector<8x8xf32>, vector<8x64xf32>, vector<8x64xf32> -> vector<8x64xf32>
    %164 = vector.extract_strided_slice %2 {offsets = [0, 512], sizes = [8, 64], strides = [1, 1]} : vector<8x768xf32> to vector<8x64xf32>
    %165 = vector.extract_strided_slice %3 {offsets = [0, 512], sizes = [8, 64], strides = [1, 1]} : vector<8x768xf32> to vector<8x64xf32>
    %166 = vector.extract_strided_slice %4 {offsets = [0, 512], sizes = [8, 64], strides = [1, 1]} : vector<8x768xf32> to vector<8x64xf32>
    %cst_46 = arith.constant dense<0.000000e+00> : vector<8x8xf32>
    %167 = tpu.matmul %164, %165, %cst_46 {dimension_numbers = #tpu.dot_dimension_numbers<[1], [1], [0], [0], [0, 0, 1, 0], [], []>} : vector<8x64xf32>, vector<8x64xf32>, vector<8x8xf32> -> vector<8x8xf32>
    %cst_47 = arith.constant 1.250000e-01 : f32
    %168 = vector.broadcast %cst_47 : f32 to vector<8x8xf32>
    %169 = arith.mulf %167, %168 : vector<8x8xf32>
    %170 = vector.broadcast %11 : vector<1x8xf32> to vector<8x8xf32>
    %171 = arith.addf %169, %170 : vector<8x8xf32>
    %cst_48 = arith.constant dense<0xFF800000> : vector<8xf32>
    %172 = vector.multi_reduction <maximumf>, %171, %cst_48 [1] : vector<8x8xf32> to vector<8xf32>
    %173 = vector.shape_cast %172 : vector<8xf32> to vector<8x1xf32>
    %174 = vector.broadcast %173 : vector<8x1xf32> to vector<8x8xf32>
    %175 = arith.subf %171, %174 : vector<8x8xf32>
    %176 = math.exp %175 : vector<8x8xf32>
    %cst_49 = arith.constant dense<0.000000e+00> : vector<8xf32>
    %177 = vector.multi_reduction <add>, %176, %cst_49 [1] : vector<8x8xf32> to vector<8xf32>
    %178 = vector.shape_cast %177 : vector<8xf32> to vector<8x1xf32>
    %179 = tpu.reciprocal %178 {approx = true} : vector<8x1xf32> -> vector<8x1xf32>
    %180 = vector.broadcast %179 : vector<8x1xf32> to vector<8x8xf32>
    %181 = arith.mulf %176, %180 : vector<8x8xf32>
    %cst_50 = arith.constant dense<0.000000e+00> : vector<8x64xf32>
    %182 = tpu.matmul %181, %166, %cst_50 {dimension_numbers = #tpu.dot_dimension_numbers<[1], [0], [0], [1], [0, 0, 1, 1], [], []>} : vector<8x8xf32>, vector<8x64xf32>, vector<8x64xf32> -> vector<8x64xf32>
    %183 = vector.extract_strided_slice %2 {offsets = [0, 576], sizes = [8, 64], strides = [1, 1]} : vector<8x768xf32> to vector<8x64xf32>
    %184 = vector.extract_strided_slice %3 {offsets = [0, 576], sizes = [8, 64], strides = [1, 1]} : vector<8x768xf32> to vector<8x64xf32>
    %185 = vector.extract_strided_slice %4 {offsets = [0, 576], sizes = [8, 64], strides = [1, 1]} : vector<8x768xf32> to vector<8x64xf32>
    %cst_51 = arith.constant dense<0.000000e+00> : vector<8x8xf32>
    %186 = tpu.matmul %183, %184, %cst_51 {dimension_numbers = #tpu.dot_dimension_numbers<[1], [1], [0], [0], [0, 0, 1, 0], [], []>} : vector<8x64xf32>, vector<8x64xf32>, vector<8x8xf32> -> vector<8x8xf32>
    %cst_52 = arith.constant 1.250000e-01 : f32
    %187 = vector.broadcast %cst_52 : f32 to vector<8x8xf32>
    %188 = arith.mulf %186, %187 : vector<8x8xf32>
    %189 = vector.broadcast %11 : vector<1x8xf32> to vector<8x8xf32>
    %190 = arith.addf %188, %189 : vector<8x8xf32>
    %cst_53 = arith.constant dense<0xFF800000> : vector<8xf32>
    %191 = vector.multi_reduction <maximumf>, %190, %cst_53 [1] : vector<8x8xf32> to vector<8xf32>
    %192 = vector.shape_cast %191 : vector<8xf32> to vector<8x1xf32>
    %193 = vector.broadcast %192 : vector<8x1xf32> to vector<8x8xf32>
    %194 = arith.subf %190, %193 : vector<8x8xf32>
    %195 = math.exp %194 : vector<8x8xf32>
    %cst_54 = arith.constant dense<0.000000e+00> : vector<8xf32>
    %196 = vector.multi_reduction <add>, %195, %cst_54 [1] : vector<8x8xf32> to vector<8xf32>
    %197 = vector.shape_cast %196 : vector<8xf32> to vector<8x1xf32>
    %198 = tpu.reciprocal %197 {approx = true} : vector<8x1xf32> -> vector<8x1xf32>
    %199 = vector.broadcast %198 : vector<8x1xf32> to vector<8x8xf32>
    %200 = arith.mulf %195, %199 : vector<8x8xf32>
    %cst_55 = arith.constant dense<0.000000e+00> : vector<8x64xf32>
    %201 = tpu.matmul %200, %185, %cst_55 {dimension_numbers = #tpu.dot_dimension_numbers<[1], [0], [0], [1], [0, 0, 1, 1], [], []>} : vector<8x8xf32>, vector<8x64xf32>, vector<8x64xf32> -> vector<8x64xf32>
    %202 = vector.extract_strided_slice %2 {offsets = [0, 640], sizes = [8, 64], strides = [1, 1]} : vector<8x768xf32> to vector<8x64xf32>
    %203 = vector.extract_strided_slice %3 {offsets = [0, 640], sizes = [8, 64], strides = [1, 1]} : vector<8x768xf32> to vector<8x64xf32>
    %204 = vector.extract_strided_slice %4 {offsets = [0, 640], sizes = [8, 64], strides = [1, 1]} : vector<8x768xf32> to vector<8x64xf32>
    %cst_56 = arith.constant dense<0.000000e+00> : vector<8x8xf32>
    %205 = tpu.matmul %202, %203, %cst_56 {dimension_numbers = #tpu.dot_dimension_numbers<[1], [1], [0], [0], [0, 0, 1, 0], [], []>} : vector<8x64xf32>, vector<8x64xf32>, vector<8x8xf32> -> vector<8x8xf32>
    %cst_57 = arith.constant 1.250000e-01 : f32
    %206 = vector.broadcast %cst_57 : f32 to vector<8x8xf32>
    %207 = arith.mulf %205, %206 : vector<8x8xf32>
    %208 = vector.broadcast %11 : vector<1x8xf32> to vector<8x8xf32>
    %209 = arith.addf %207, %208 : vector<8x8xf32>
    %cst_58 = arith.constant dense<0xFF800000> : vector<8xf32>
    %210 = vector.multi_reduction <maximumf>, %209, %cst_58 [1] : vector<8x8xf32> to vector<8xf32>
    %211 = vector.shape_cast %210 : vector<8xf32> to vector<8x1xf32>
    %212 = vector.broadcast %211 : vector<8x1xf32> to vector<8x8xf32>
    %213 = arith.subf %209, %212 : vector<8x8xf32>
    %214 = math.exp %213 : vector<8x8xf32>
    %cst_59 = arith.constant dense<0.000000e+00> : vector<8xf32>
    %215 = vector.multi_reduction <add>, %214, %cst_59 [1] : vector<8x8xf32> to vector<8xf32>
    %216 = vector.shape_cast %215 : vector<8xf32> to vector<8x1xf32>
    %217 = tpu.reciprocal %216 {approx = true} : vector<8x1xf32> -> vector<8x1xf32>
    %218 = vector.broadcast %217 : vector<8x1xf32> to vector<8x8xf32>
    %219 = arith.mulf %214, %218 : vector<8x8xf32>
    %cst_60 = arith.constant dense<0.000000e+00> : vector<8x64xf32>
    %220 = tpu.matmul %219, %204, %cst_60 {dimension_numbers = #tpu.dot_dimension_numbers<[1], [0], [0], [1], [0, 0, 1, 1], [], []>} : vector<8x8xf32>, vector<8x64xf32>, vector<8x64xf32> -> vector<8x64xf32>
    %221 = vector.extract_strided_slice %2 {offsets = [0, 704], sizes = [8, 64], strides = [1, 1]} : vector<8x768xf32> to vector<8x64xf32>
    %222 = vector.extract_strided_slice %3 {offsets = [0, 704], sizes = [8, 64], strides = [1, 1]} : vector<8x768xf32> to vector<8x64xf32>
    %223 = vector.extract_strided_slice %4 {offsets = [0, 704], sizes = [8, 64], strides = [1, 1]} : vector<8x768xf32> to vector<8x64xf32>
    %cst_61 = arith.constant dense<0.000000e+00> : vector<8x8xf32>
    %224 = tpu.matmul %221, %222, %cst_61 {dimension_numbers = #tpu.dot_dimension_numbers<[1], [1], [0], [0], [0, 0, 1, 0], [], []>} : vector<8x64xf32>, vector<8x64xf32>, vector<8x8xf32> -> vector<8x8xf32>
    %cst_62 = arith.constant 1.250000e-01 : f32
    %225 = vector.broadcast %cst_62 : f32 to vector<8x8xf32>
    %226 = arith.mulf %224, %225 : vector<8x8xf32>
    %227 = vector.broadcast %11 : vector<1x8xf32> to vector<8x8xf32>
    %228 = arith.addf %226, %227 : vector<8x8xf32>
    %cst_63 = arith.constant dense<0xFF800000> : vector<8xf32>
    %229 = vector.multi_reduction <maximumf>, %228, %cst_63 [1] : vector<8x8xf32> to vector<8xf32>
    %230 = vector.shape_cast %229 : vector<8xf32> to vector<8x1xf32>
    %231 = vector.broadcast %230 : vector<8x1xf32> to vector<8x8xf32>
    %232 = arith.subf %228, %231 : vector<8x8xf32>
    %233 = math.exp %232 : vector<8x8xf32>
    %cst_64 = arith.constant dense<0.000000e+00> : vector<8xf32>
    %234 = vector.multi_reduction <add>, %233, %cst_64 [1] : vector<8x8xf32> to vector<8xf32>
    %235 = vector.shape_cast %234 : vector<8xf32> to vector<8x1xf32>
    %236 = tpu.reciprocal %235 {approx = true} : vector<8x1xf32> -> vector<8x1xf32>
    %237 = vector.broadcast %236 : vector<8x1xf32> to vector<8x8xf32>
    %238 = arith.mulf %233, %237 : vector<8x8xf32>
    %cst_65 = arith.constant dense<0.000000e+00> : vector<8x64xf32>
    %239 = tpu.matmul %238, %223, %cst_65 {dimension_numbers = #tpu.dot_dimension_numbers<[1], [0], [0], [1], [0, 0, 1, 1], [], []>} : vector<8x8xf32>, vector<8x64xf32>, vector<8x64xf32> -> vector<8x64xf32>
    %240 = tpu.concatenate %30, %49, %68, %87, %106, %125, %144, %163, %182, %201, %220, %239 in 1 : vector<8x64xf32>, vector<8x64xf32>, vector<8x64xf32>, vector<8x64xf32>, vector<8x64xf32>, vector<8x64xf32>, vector<8x64xf32>, vector<8x64xf32>, vector<8x64xf32>, vector<8x64xf32>, vector<8x64xf32>, vector<8x64xf32> -> vector<8x768xf32>
    %c0_66 = arith.constant 0 : index
    %c0_67 = arith.constant 0 : index
    %c0_68 = arith.constant 0 : index
    %241 = vector.load %arg3[%c0_66, %c0_67, %c0_68] : memref<1x8x768xf32, #tpu.memory_space<vmem>>, vector<1x8x768xf32>
    %242 = vector.shape_cast %241 : vector<1x8x768xf32> to vector<8x768xf32>
    %243 = vector.shape_cast %240 : vector<8x768xf32> to vector<1x8x768xf32>
    tpu.vector_store %arg3[%c0_66, %c0_67, %c0_68], %243 {strides = array<i32>} : memref<1x8x768xf32, #tpu.memory_space<vmem>>, vector<1x8x768xf32>,
    return
  }
  func.func @transform_0(%arg0: i32) -> (i32, i32, i32) {
    %c0_i32 = arith.constant 0 : i32
    %c0_i32_0 = arith.constant 0 : i32
    %c0_i32_1 = arith.constant 0 : i32
    return %arg0, %c0_i32, %c0_i32_0 : i32, i32, i32
  }
  func.func @transform_1(%arg0: i32) -> (i32, i32, i32) {
    %c0_i32 = arith.constant 0 : i32
    %c0_i32_0 = arith.constant 0 : i32
    %c0_i32_1 = arith.constant 0 : i32
    return %arg0, %c0_i32, %c0_i32_0 : i32, i32, i32
  }
  func.func @transform_2(%arg0: i32) -> (i32, i32, i32) {
    %c0_i32 = arith.constant 0 : i32
    %c0_i32_0 = arith.constant 0 : i32
    %c0_i32_1 = arith.constant 0 : i32
    return %arg0, %c0_i32, %c0_i32_0 : i32, i32, i32
  }
}

module attributes {stable_mosaic.version = 11 : i64} {
  func.func @_ffn_kernel(%arg0: i32, %arg1: memref<16x768xf32, #tpu.memory_space<vmem>>, %arg2: memref<768x256xbf16, #tpu.memory_space<vmem>>, %arg3: memref<1x256xf32, #tpu.memory_space<vmem>>, %arg4: memref<256x768xbf16, #tpu.memory_space<vmem>>, %arg5: memref<1x768xf32, #tpu.memory_space<vmem>>, %arg6: memref<1x768xf32, #tpu.memory_space<vmem>>, %arg7: memref<1x768xf32, #tpu.memory_space<vmem>>, %arg8: memref<16x768xf32, #tpu.memory_space<vmem>>) attributes {dimension_semantics = [#tpu.dimension_semantics<arbitrary>], iteration_bounds = array<i64: 1>, scalar_prefetch = 0 : i64, scratch_operands = 0 : i64, tpu.core_type = #tpu.core_type<tc>, window_params = [{pipeline_mode = #tpu.pipeline_mode<synchronous>, transform_indices = @transform_0, window_bounds = array<i64: 16, 768>}, {pipeline_mode = #tpu.pipeline_mode<synchronous>, transform_indices = @transform_1, window_bounds = array<i64: 768, 256>}, {pipeline_mode = #tpu.pipeline_mode<synchronous>, transform_indices = @transform_2, window_bounds = array<i64: 1, 256>}, {pipeline_mode = #tpu.pipeline_mode<synchronous>, transform_indices = @transform_3, window_bounds = array<i64: 256, 768>}, {pipeline_mode = #tpu.pipeline_mode<synchronous>, transform_indices = @transform_4, window_bounds = array<i64: 1, 768>}, {pipeline_mode = #tpu.pipeline_mode<synchronous>, transform_indices = @transform_5, window_bounds = array<i64: 1, 768>}, {pipeline_mode = #tpu.pipeline_mode<synchronous>, transform_indices = @transform_6, window_bounds = array<i64: 1, 768>}, {pipeline_mode = #tpu.pipeline_mode<synchronous>, transform_indices = @transform_7, window_bounds = array<i64: 16, 768>}]} {
    %c0 = arith.constant 0 : index
    %c0_0 = arith.constant 0 : index
    %0 = vector.load %arg1[%c0, %c0_0] : memref<16x768xf32, #tpu.memory_space<vmem>>, vector<16x768xf32>
    %1 = arith.truncf %0 : vector<16x768xf32> to vector<16x768xbf16>
    %c0_1 = arith.constant 0 : index
    %c0_2 = arith.constant 0 : index
    %2 = vector.load %arg2[%c0_1, %c0_2] : memref<768x256xbf16, #tpu.memory_space<vmem>>, vector<768x256xbf16>
    %cst = arith.constant dense<0.000000e+00> : vector<16x256xf32>
    %3 = tpu.matmul %1, %2, %cst {dimension_numbers = #tpu.dot_dimension_numbers<[1], [0], [0], [1], [0, 0, 1, 1], [], []>} : vector<16x768xbf16>, vector<768x256xbf16>, vector<16x256xf32> -> vector<16x256xf32>
    %c0_3 = arith.constant 0 : index
    %c0_4 = arith.constant 0 : index
    %4 = vector.load %arg3[%c0_3, %c0_4] : memref<1x256xf32, #tpu.memory_space<vmem>>, vector<1x256xf32>
    %5 = vector.broadcast %4 : vector<1x256xf32> to vector<16x256xf32>
    %6 = arith.addf %3, %5 : vector<16x256xf32>
    %cst_5 = arith.constant 0.000000e+00 : f32
    %7 = vector.broadcast %cst_5 : f32 to vector<16x256xf32>
    %8 = arith.maximumf %6, %7 : vector<16x256xf32>
    %9 = arith.truncf %8 : vector<16x256xf32> to vector<16x256xbf16>
    %c0_6 = arith.constant 0 : index
    %c0_7 = arith.constant 0 : index
    %10 = vector.load %arg4[%c0_6, %c0_7] : memref<256x768xbf16, #tpu.memory_space<vmem>>, vector<256x768xbf16>
    %cst_8 = arith.constant dense<0.000000e+00> : vector<16x768xf32>
    %11 = tpu.matmul %9, %10, %cst_8 {dimension_numbers = #tpu.dot_dimension_numbers<[1], [0], [0], [1], [0, 0, 1, 1], [], []>} : vector<16x256xbf16>, vector<256x768xbf16>, vector<16x768xf32> -> vector<16x768xf32>
    %c0_9 = arith.constant 0 : index
    %c0_10 = arith.constant 0 : index
    %12 = vector.load %arg5[%c0_9, %c0_10] : memref<1x768xf32, #tpu.memory_space<vmem>>, vector<1x768xf32>
    %13 = vector.broadcast %12 : vector<1x768xf32> to vector<16x768xf32>
    %14 = arith.addf %11, %13 : vector<16x768xf32>
    %15 = arith.addf %14, %0 : vector<16x768xf32>
    %c0_11 = arith.constant 0 : index
    %c0_12 = arith.constant 0 : index
    %16 = vector.load %arg6[%c0_11, %c0_12] : memref<1x768xf32, #tpu.memory_space<vmem>>, vector<1x768xf32>
    %c0_13 = arith.constant 0 : index
    %c0_14 = arith.constant 0 : index
    %17 = vector.load %arg7[%c0_13, %c0_14] : memref<1x768xf32, #tpu.memory_space<vmem>>, vector<1x768xf32>
    %cst_15 = arith.constant dense<0.000000e+00> : vector<16xf32>
    %18 = vector.multi_reduction <add>, %15, %cst_15 [1] : vector<16x768xf32> to vector<16xf32>
    %19 = vector.shape_cast %18 : vector<16xf32> to vector<16x1xf32>
    %cst_16 = arith.constant 7.680000e+02 : f32
    %20 = vector.broadcast %cst_16 : f32 to vector<16x1xf32>
    %21 = arith.divf %19, %20 : vector<16x1xf32>
    %22 = vector.broadcast %21 : vector<16x1xf32> to vector<16x768xf32>
    %23 = arith.subf %15, %22 : vector<16x768xf32>
    %24 = arith.mulf %23, %23 : vector<16x768xf32>
    %cst_17 = arith.constant dense<0.000000e+00> : vector<16xf32>
    %25 = vector.multi_reduction <add>, %24, %cst_17 [1] : vector<16x768xf32> to vector<16xf32>
    %26 = vector.shape_cast %25 : vector<16xf32> to vector<16x1xf32>
    %cst_18 = arith.constant 7.680000e+02 : f32
    %27 = vector.broadcast %cst_18 : f32 to vector<16x1xf32>
    %28 = arith.divf %26, %27 : vector<16x1xf32>
    %29 = vector.broadcast %21 : vector<16x1xf32> to vector<16x768xf32>
    %30 = arith.subf %15, %29 : vector<16x768xf32>
    %cst_19 = arith.constant 9.99999974E-6 : f32
    %31 = vector.broadcast %cst_19 : f32 to vector<16x1xf32>
    %32 = arith.addf %28, %31 : vector<16x1xf32>
    %33 = math.rsqrt %32 : vector<16x1xf32>
    %34 = vector.broadcast %33 : vector<16x1xf32> to vector<16x768xf32>
    %35 = arith.mulf %30, %34 : vector<16x768xf32>
    %36 = vector.broadcast %16 : vector<1x768xf32> to vector<16x768xf32>
    %37 = arith.mulf %35, %36 : vector<16x768xf32>
    %38 = vector.broadcast %17 : vector<1x768xf32> to vector<16x768xf32>
    %39 = arith.addf %37, %38 : vector<16x768xf32>
    %c0_20 = arith.constant 0 : index
    %c0_21 = arith.constant 0 : index
    %40 = vector.load %arg8[%c0_20, %c0_21] : memref<16x768xf32, #tpu.memory_space<vmem>>, vector<16x768xf32>
    tpu.vector_store %arg8[%c0_20, %c0_21], %39 {strides = array<i32>} : memref<16x768xf32, #tpu.memory_space<vmem>>, vector<16x768xf32>,
    return
  }
  func.func @transform_0(%arg0: i32) -> (i32, i32) {
    %c0_i32 = arith.constant 0 : i32
    %c0_i32_0 = arith.constant 0 : i32
    %c0_i32_1 = arith.constant 0 : i32
    return %c0_i32, %c0_i32_0 : i32, i32
  }
  func.func @transform_1(%arg0: i32) -> (i32, i32) {
    %c0_i32 = arith.constant 0 : i32
    %c0_i32_0 = arith.constant 0 : i32
    %c0_i32_1 = arith.constant 0 : i32
    return %c0_i32, %c0_i32_0 : i32, i32
  }
  func.func @transform_2(%arg0: i32) -> (i32, i32) {
    %c0_i32 = arith.constant 0 : i32
    %c0_i32_0 = arith.constant 0 : i32
    %c0_i32_1 = arith.constant 0 : i32
    return %c0_i32, %c0_i32_0 : i32, i32
  }
  func.func @transform_3(%arg0: i32) -> (i32, i32) {
    %c0_i32 = arith.constant 0 : i32
    %c0_i32_0 = arith.constant 0 : i32
    %c0_i32_1 = arith.constant 0 : i32
    return %c0_i32, %c0_i32_0 : i32, i32
  }
  func.func @transform_4(%arg0: i32) -> (i32, i32) {
    %c0_i32 = arith.constant 0 : i32
    %c0_i32_0 = arith.constant 0 : i32
    %c0_i32_1 = arith.constant 0 : i32
    return %c0_i32, %c0_i32_0 : i32, i32
  }
  func.func @transform_5(%arg0: i32) -> (i32, i32) {
    %c0_i32 = arith.constant 0 : i32
    %c0_i32_0 = arith.constant 0 : i32
    %c0_i32_1 = arith.constant 0 : i32
    return %c0_i32, %c0_i32_0 : i32, i32
  }
  func.func @transform_6(%arg0: i32) -> (i32, i32) {
    %c0_i32 = arith.constant 0 : i32
    %c0_i32_0 = arith.constant 0 : i32
    %c0_i32_1 = arith.constant 0 : i32
    return %c0_i32, %c0_i32_0 : i32, i32
  }
  func.func @transform_7(%arg0: i32) -> (i32, i32) {
    %c0_i32 = arith.constant 0 : i32
    %c0_i32_0 = arith.constant 0 : i32
    %c0_i32_1 = arith.constant 0 : i32
    return %c0_i32, %c0_i32_0 : i32, i32
  }
}

module attributes {stable_mosaic.version = 11 : i64} {
  func.func @_linear_kernel(%arg0: i32, %arg1: memref<16x768xf32, #tpu.memory_space<vmem>>, %arg2: memref<768x64xbf16, #tpu.memory_space<vmem>>, %arg3: memref<1x64xf32, #tpu.memory_space<vmem>>, %arg4: memref<16x64xf32, #tpu.memory_space<vmem>>) attributes {dimension_semantics = [#tpu.dimension_semantics<parallel>], iteration_bounds = array<i64: 1>, scalar_prefetch = 0 : i64, scratch_operands = 0 : i64, tpu.core_type = #tpu.core_type<tc>, window_params = [{pipeline_mode = #tpu.pipeline_mode<synchronous>, transform_indices = @transform_0, window_bounds = array<i64: 16, 768>}, {transform_indices = @transform_1, window_bounds = array<i64: 768, 64>}, {transform_indices = @transform_2, window_bounds = array<i64: 1, 64>}, {transform_indices = @transform_3, window_bounds = array<i64: 16, 64>}]} {
    %c0 = arith.constant 0 : index
    %c0_0 = arith.constant 0 : index
    %0 = vector.load %arg1[%c0, %c0_0] : memref<16x768xf32, #tpu.memory_space<vmem>>, vector<16x768xf32>
    %1 = arith.truncf %0 : vector<16x768xf32> to vector<16x768xbf16>
    %c0_1 = arith.constant 0 : index
    %c0_2 = arith.constant 0 : index
    %2 = vector.load %arg2[%c0_1, %c0_2] : memref<768x64xbf16, #tpu.memory_space<vmem>>, vector<768x64xbf16>
    %cst = arith.constant dense<0.000000e+00> : vector<16x64xf32>
    %3 = tpu.matmul %1, %2, %cst {dimension_numbers = #tpu.dot_dimension_numbers<[1], [0], [0], [1], [0, 0, 1, 1], [], []>} : vector<16x768xbf16>, vector<768x64xbf16>, vector<16x64xf32> -> vector<16x64xf32>
    %c0_3 = arith.constant 0 : index
    %c0_4 = arith.constant 0 : index
    %4 = vector.load %arg3[%c0_3, %c0_4] : memref<1x64xf32, #tpu.memory_space<vmem>>, vector<1x64xf32>
    %5 = vector.broadcast %4 : vector<1x64xf32> to vector<16x64xf32>
    %6 = arith.addf %3, %5 : vector<16x64xf32>
    %c0_5 = arith.constant 0 : index
    %c0_6 = arith.constant 0 : index
    %7 = vector.load %arg4[%c0_5, %c0_6] : memref<16x64xf32, #tpu.memory_space<vmem>>, vector<16x64xf32>
    tpu.vector_store %arg4[%c0_5, %c0_6], %6 {strides = array<i32>} : memref<16x64xf32, #tpu.memory_space<vmem>>, vector<16x64xf32>,
    return
  }
  func.func @transform_0(%arg0: i32) -> (i32, i32) {
    %c0_i32 = arith.constant 0 : i32
    %c0_i32_0 = arith.constant 0 : i32
    %c0_i32_1 = arith.constant 0 : i32
    return %c0_i32, %c0_i32_0 : i32, i32
  }
  func.func @transform_1(%arg0: i32) -> (i32, i32) {
    %c0_i32 = arith.constant 0 : i32
    %c0_i32_0 = arith.constant 0 : i32
    return %c0_i32, %arg0 : i32, i32
  }
  func.func @transform_2(%arg0: i32) -> (i32, i32) {
    %c0_i32 = arith.constant 0 : i32
    %c0_i32_0 = arith.constant 0 : i32
    return %c0_i32, %arg0 : i32, i32
  }
  func.func @transform_3(%arg0: i32) -> (i32, i32) {
    %c0_i32 = arith.constant 0 : i32
    %c0_i32_0 = arith.constant 0 : i32
    return %c0_i32, %arg0 : i32, i32
  }
}

module attributes {stable_mosaic.version = 11 : i64} {
  func.func @_linear_kernel(%arg0: i32, %arg1: memref<16x64xf32, #tpu.memory_space<vmem>>, %arg2: memref<64x128xbf16, #tpu.memory_space<vmem>>, %arg3: memref<1x128xf32, #tpu.memory_space<vmem>>, %arg4: memref<16x128xf32, #tpu.memory_space<vmem>>) attributes {dimension_semantics = [#tpu.dimension_semantics<parallel>], iteration_bounds = array<i64: 1>, scalar_prefetch = 0 : i64, scratch_operands = 0 : i64, tpu.core_type = #tpu.core_type<tc>, window_params = [{pipeline_mode = #tpu.pipeline_mode<synchronous>, transform_indices = @transform_0, window_bounds = array<i64: 16, 64>}, {transform_indices = @transform_1, window_bounds = array<i64: 64, 128>}, {transform_indices = @transform_2, window_bounds = array<i64: 1, 128>}, {transform_indices = @transform_3, window_bounds = array<i64: 16, 128>}]} {
    %c0 = arith.constant 0 : index
    %c0_0 = arith.constant 0 : index
    %0 = vector.load %arg1[%c0, %c0_0] : memref<16x64xf32, #tpu.memory_space<vmem>>, vector<16x64xf32>
    %1 = arith.truncf %0 : vector<16x64xf32> to vector<16x64xbf16>
    %c0_1 = arith.constant 0 : index
    %c0_2 = arith.constant 0 : index
    %2 = vector.load %arg2[%c0_1, %c0_2] : memref<64x128xbf16, #tpu.memory_space<vmem>>, vector<64x128xbf16>
    %cst = arith.constant dense<0.000000e+00> : vector<16x128xf32>
    %3 = tpu.matmul %1, %2, %cst {dimension_numbers = #tpu.dot_dimension_numbers<[1], [0], [0], [1], [0, 0, 1, 1], [], []>} : vector<16x64xbf16>, vector<64x128xbf16>, vector<16x128xf32> -> vector<16x128xf32>
    %c0_3 = arith.constant 0 : index
    %c0_4 = arith.constant 0 : index
    %4 = vector.load %arg3[%c0_3, %c0_4] : memref<1x128xf32, #tpu.memory_space<vmem>>, vector<1x128xf32>
    %5 = vector.broadcast %4 : vector<1x128xf32> to vector<16x128xf32>
    %6 = arith.addf %3, %5 : vector<16x128xf32>
    %c0_5 = arith.constant 0 : index
    %c0_6 = arith.constant 0 : index
    %7 = vector.load %arg4[%c0_5, %c0_6] : memref<16x128xf32, #tpu.memory_space<vmem>>, vector<16x128xf32>
    tpu.vector_store %arg4[%c0_5, %c0_6], %6 {strides = array<i32>} : memref<16x128xf32, #tpu.memory_space<vmem>>, vector<16x128xf32>,
    return
  }
  func.func @transform_0(%arg0: i32) -> (i32, i32) {
    %c0_i32 = arith.constant 0 : i32
    %c0_i32_0 = arith.constant 0 : i32
    %c0_i32_1 = arith.constant 0 : i32
    return %c0_i32, %c0_i32_0 : i32, i32
  }
  func.func @transform_1(%arg0: i32) -> (i32, i32) {
    %c0_i32 = arith.constant 0 : i32
    %c0_i32_0 = arith.constant 0 : i32
    return %c0_i32, %arg0 : i32, i32
  }
  func.func @transform_2(%arg0: i32) -> (i32, i32) {
    %c0_i32 = arith.constant 0 : i32
    %c0_i32_0 = arith.constant 0 : i32
    return %c0_i32, %arg0 : i32, i32
  }
  func.func @transform_3(%arg0: i32) -> (i32, i32) {
    %c0_i32 = arith.constant 0 : i32
    %c0_i32_0 = arith.constant 0 : i32
    return %c0_i32, %arg0 : i32, i32
  }
}

module attributes {stable_mosaic.version = 11 : i64} {
  func.func @_linear_kernel(%arg0: i32, %arg1: memref<16x64xf32, #tpu.memory_space<vmem>>, %arg2: memref<64x192xbf16, #tpu.memory_space<vmem>>, %arg3: memref<1x192xf32, #tpu.memory_space<vmem>>, %arg4: memref<16x192xf32, #tpu.memory_space<vmem>>) attributes {dimension_semantics = [#tpu.dimension_semantics<parallel>], iteration_bounds = array<i64: 1>, scalar_prefetch = 0 : i64, scratch_operands = 0 : i64, tpu.core_type = #tpu.core_type<tc>, window_params = [{pipeline_mode = #tpu.pipeline_mode<synchronous>, transform_indices = @transform_0, window_bounds = array<i64: 16, 64>}, {transform_indices = @transform_1, window_bounds = array<i64: 64, 192>}, {transform_indices = @transform_2, window_bounds = array<i64: 1, 192>}, {transform_indices = @transform_3, window_bounds = array<i64: 16, 192>}]} {
    %c0 = arith.constant 0 : index
    %c0_0 = arith.constant 0 : index
    %0 = vector.load %arg1[%c0, %c0_0] : memref<16x64xf32, #tpu.memory_space<vmem>>, vector<16x64xf32>
    %1 = arith.truncf %0 : vector<16x64xf32> to vector<16x64xbf16>
    %c0_1 = arith.constant 0 : index
    %c0_2 = arith.constant 0 : index
    %2 = vector.load %arg2[%c0_1, %c0_2] : memref<64x192xbf16, #tpu.memory_space<vmem>>, vector<64x192xbf16>
    %cst = arith.constant dense<0.000000e+00> : vector<16x192xf32>
    %3 = tpu.matmul %1, %2, %cst {dimension_numbers = #tpu.dot_dimension_numbers<[1], [0], [0], [1], [0, 0, 1, 1], [], []>} : vector<16x64xbf16>, vector<64x192xbf16>, vector<16x192xf32> -> vector<16x192xf32>
    %c0_3 = arith.constant 0 : index
    %c0_4 = arith.constant 0 : index
    %4 = vector.load %arg3[%c0_3, %c0_4] : memref<1x192xf32, #tpu.memory_space<vmem>>, vector<1x192xf32>
    %5 = vector.broadcast %4 : vector<1x192xf32> to vector<16x192xf32>
    %6 = arith.addf %3, %5 : vector<16x192xf32>
    %c0_5 = arith.constant 0 : index
    %c0_6 = arith.constant 0 : index
    %7 = vector.load %arg4[%c0_5, %c0_6] : memref<16x192xf32, #tpu.memory_space<vmem>>, vector<16x192xf32>
    tpu.vector_store %arg4[%c0_5, %c0_6], %6 {strides = array<i32>} : memref<16x192xf32, #tpu.memory_space<vmem>>, vector<16x192xf32>,
    return
  }
  func.func @transform_0(%arg0: i32) -> (i32, i32) {
    %c0_i32 = arith.constant 0 : i32
    %c0_i32_0 = arith.constant 0 : i32
    %c0_i32_1 = arith.constant 0 : i32
    return %c0_i32, %c0_i32_0 : i32, i32
  }
  func.func @transform_1(%arg0: i32) -> (i32, i32) {
    %c0_i32 = arith.constant 0 : i32
    %c0_i32_0 = arith.constant 0 : i32
    return %c0_i32, %arg0 : i32, i32
  }
  func.func @transform_2(%arg0: i32) -> (i32, i32) {
    %c0_i32 = arith.constant 0 : i32
    %c0_i32_0 = arith.constant 0 : i32
    return %c0_i32, %arg0 : i32, i32
  }
  func.func @transform_3(%arg0: i32) -> (i32, i32) {
    %c0_i32 = arith.constant 0 : i32
    %c0_i32_0 = arith.constant 0 : i32
    return %c0_i32, %arg0 : i32, i32
  }
}

module attributes {stable_mosaic.version = 11 : i64} {
  func.func @_linear_kernel(%arg0: i32, %arg1: memref<16x3xf32, #tpu.memory_space<vmem>>, %arg2: memref<3x32xbf16, #tpu.memory_space<vmem>>, %arg3: memref<1x32xf32, #tpu.memory_space<vmem>>, %arg4: memref<16x32xf32, #tpu.memory_space<vmem>>) attributes {dimension_semantics = [#tpu.dimension_semantics<parallel>], iteration_bounds = array<i64: 1>, scalar_prefetch = 0 : i64, scratch_operands = 0 : i64, tpu.core_type = #tpu.core_type<tc>, window_params = [{pipeline_mode = #tpu.pipeline_mode<synchronous>, transform_indices = @transform_0, window_bounds = array<i64: 16, 3>}, {transform_indices = @transform_1, window_bounds = array<i64: 3, 32>}, {transform_indices = @transform_2, window_bounds = array<i64: 1, 32>}, {transform_indices = @transform_3, window_bounds = array<i64: 16, 32>}]} {
    %c0 = arith.constant 0 : index
    %c0_0 = arith.constant 0 : index
    %0 = vector.load %arg1[%c0, %c0_0] : memref<16x3xf32, #tpu.memory_space<vmem>>, vector<16x3xf32>
    %1 = arith.truncf %0 : vector<16x3xf32> to vector<16x3xbf16>
    %c0_1 = arith.constant 0 : index
    %c0_2 = arith.constant 0 : index
    %2 = vector.load %arg2[%c0_1, %c0_2] : memref<3x32xbf16, #tpu.memory_space<vmem>>, vector<3x32xbf16>
    %cst = arith.constant dense<0.000000e+00> : vector<16x32xf32>
    %3 = tpu.matmul %1, %2, %cst {dimension_numbers = #tpu.dot_dimension_numbers<[1], [0], [0], [1], [0, 0, 1, 1], [], []>} : vector<16x3xbf16>, vector<3x32xbf16>, vector<16x32xf32> -> vector<16x32xf32>
    %c0_3 = arith.constant 0 : index
    %c0_4 = arith.constant 0 : index
    %4 = vector.load %arg3[%c0_3, %c0_4] : memref<1x32xf32, #tpu.memory_space<vmem>>, vector<1x32xf32>
    %5 = vector.broadcast %4 : vector<1x32xf32> to vector<16x32xf32>
    %6 = arith.addf %3, %5 : vector<16x32xf32>
    %c0_5 = arith.constant 0 : index
    %c0_6 = arith.constant 0 : index
    %7 = vector.load %arg4[%c0_5, %c0_6] : memref<16x32xf32, #tpu.memory_space<vmem>>, vector<16x32xf32>
    tpu.vector_store %arg4[%c0_5, %c0_6], %6 {strides = array<i32>} : memref<16x32xf32, #tpu.memory_space<vmem>>, vector<16x32xf32>,
    return
  }
  func.func @transform_0(%arg0: i32) -> (i32, i32) {
    %c0_i32 = arith.constant 0 : i32
    %c0_i32_0 = arith.constant 0 : i32
    %c0_i32_1 = arith.constant 0 : i32
    return %c0_i32, %c0_i32_0 : i32, i32
  }
  func.func @transform_1(%arg0: i32) -> (i32, i32) {
    %c0_i32 = arith.constant 0 : i32
    %c0_i32_0 = arith.constant 0 : i32
    return %c0_i32, %arg0 : i32, i32
  }
  func.func @transform_2(%arg0: i32) -> (i32, i32) {
    %c0_i32 = arith.constant 0 : i32
    %c0_i32_0 = arith.constant 0 : i32
    return %c0_i32, %arg0 : i32, i32
  }
  func.func @transform_3(%arg0: i32) -> (i32, i32) {
    %c0_i32 = arith.constant 0 : i32
    %c0_i32_0 = arith.constant 0 : i32
    return %c0_i32, %arg0 : i32, i32
  }
}

module attributes {stable_mosaic.version = 11 : i64} {
  func.func @_self_attn_kernel(%arg0: i32, %arg1: memref<1x8x192xf32, #tpu.memory_space<vmem>>, %arg2: memref<1x1x8xi32, #tpu.memory_space<vmem>>, %arg3: memref<1x8x64xf32, #tpu.memory_space<vmem>>) attributes {dimension_semantics = [#tpu.dimension_semantics<parallel>], iteration_bounds = array<i64: 2>, scalar_prefetch = 0 : i64, scratch_operands = 0 : i64, tpu.core_type = #tpu.core_type<tc>, window_params = [{transform_indices = @transform_0, window_bounds = array<i64: 1, 8, 192>}, {transform_indices = @transform_1, window_bounds = array<i64: 1, 1, 8>}, {transform_indices = @transform_2, window_bounds = array<i64: 1, 8, 64>}]} {
    %c0 = arith.constant 0 : index
    %c0_0 = arith.constant 0 : index
    %c0_1 = arith.constant 0 : index
    %0 = vector.load %arg1[%c0, %c0_0, %c0_1] : memref<1x8x192xf32, #tpu.memory_space<vmem>>, vector<1x8x192xf32>
    %1 = vector.shape_cast %0 : vector<1x8x192xf32> to vector<8x192xf32>
    %2 = vector.extract_strided_slice %1 {offsets = [0, 0], sizes = [8, 64], strides = [1, 1]} : vector<8x192xf32> to vector<8x64xf32>
    %3 = vector.extract_strided_slice %1 {offsets = [0, 64], sizes = [8, 64], strides = [1, 1]} : vector<8x192xf32> to vector<8x64xf32>
    %4 = vector.extract_strided_slice %1 {offsets = [0, 128], sizes = [8, 64], strides = [1, 1]} : vector<8x192xf32> to vector<8x64xf32>
    %c0_2 = arith.constant 0 : index
    %c0_3 = arith.constant 0 : index
    %c0_4 = arith.constant 0 : index
    %5 = vector.load %arg2[%c0_2, %c0_3, %c0_4] : memref<1x1x8xi32, #tpu.memory_space<vmem>>, vector<1x1x8xi32>
    %6 = vector.shape_cast %5 : vector<1x1x8xi32> to vector<1x8xi32>
    %c0_i32 = arith.constant 0 : i32
    %7 = vector.broadcast %c0_i32 : i32 to vector<1x8xi32>
    %8 = arith.cmpi sgt, %6, %7 : vector<1x8xi32>
    %cst = arith.constant 0.000000e+00 : f32
    %cst_5 = arith.constant -1.000000e+09 : f32
    %9 = vector.broadcast %cst : f32 to vector<1x8xf32>
    %10 = vector.broadcast %cst_5 : f32 to vector<1x8xf32>
    %11 = arith.select %8, %9, %10 : vector<1x8xi1>, vector<1x8xf32>
    %12 = tpu.iota {dimensions = array<i32: 0>} : vector<8x8xi32>
    %13 = tpu.iota {dimensions = array<i32: 1>} : vector<8x8xi32>
    %14 = arith.cmpi sle, %13, %12 : vector<8x8xi32>
    %cst_6 = arith.constant 0.000000e+00 : f32
    %cst_7 = arith.constant -1.000000e+09 : f32
    %15 = vector.broadcast %cst_6 : f32 to vector<8x8xf32>
    %16 = vector.broadcast %cst_7 : f32 to vector<8x8xf32>
    %17 = arith.select %14, %15, %16 : vector<8x8xi1>, vector<8x8xf32>
    %18 = vector.broadcast %11 : vector<1x8xf32> to vector<8x8xf32>
    %19 = arith.addf %18, %17 : vector<8x8xf32>
    %20 = vector.extract_strided_slice %2 {offsets = [0, 0], sizes = [8, 16], strides = [1, 1]} : vector<8x64xf32> to vector<8x16xf32>
    %21 = vector.extract_strided_slice %3 {offsets = [0, 0], sizes = [8, 16], strides = [1, 1]} : vector<8x64xf32> to vector<8x16xf32>
    %22 = vector.extract_strided_slice %4 {offsets = [0, 0], sizes = [8, 16], strides = [1, 1]} : vector<8x64xf32> to vector<8x16xf32>
    %cst_8 = arith.constant dense<0.000000e+00> : vector<8x8xf32>
    %23 = tpu.matmul %20, %21, %cst_8 {dimension_numbers = #tpu.dot_dimension_numbers<[1], [1], [0], [0], [0, 0, 1, 0], [], []>} : vector<8x16xf32>, vector<8x16xf32>, vector<8x8xf32> -> vector<8x8xf32>
    %cst_9 = arith.constant 2.500000e-01 : f32
    %24 = vector.broadcast %cst_9 : f32 to vector<8x8xf32>
    %25 = arith.mulf %23, %24 : vector<8x8xf32>
    %26 = arith.addf %25, %19 : vector<8x8xf32>
    %cst_10 = arith.constant dense<0xFF800000> : vector<8xf32>
    %27 = vector.multi_reduction <maximumf>, %26, %cst_10 [1] : vector<8x8xf32> to vector<8xf32>
    %28 = vector.shape_cast %27 : vector<8xf32> to vector<8x1xf32>
    %29 = vector.broadcast %28 : vector<8x1xf32> to vector<8x8xf32>
    %30 = arith.subf %26, %29 : vector<8x8xf32>
    %31 = math.exp %30 : vector<8x8xf32>
    %cst_11 = arith.constant dense<0.000000e+00> : vector<8xf32>
    %32 = vector.multi_reduction <add>, %31, %cst_11 [1] : vector<8x8xf32> to vector<8xf32>
    %33 = vector.shape_cast %32 : vector<8xf32> to vector<8x1xf32>
    %34 = tpu.reciprocal %33 {approx = true} : vector<8x1xf32> -> vector<8x1xf32>
    %35 = vector.broadcast %34 : vector<8x1xf32> to vector<8x8xf32>
    %36 = arith.mulf %31, %35 : vector<8x8xf32>
    %cst_12 = arith.constant dense<0.000000e+00> : vector<8x16xf32>
    %37 = tpu.matmul %36, %22, %cst_12 {dimension_numbers = #tpu.dot_dimension_numbers<[1], [0], [0], [1], [0, 0, 1, 1], [], []>} : vector<8x8xf32>, vector<8x16xf32>, vector<8x16xf32> -> vector<8x16xf32>
    %38 = vector.extract_strided_slice %2 {offsets = [0, 16], sizes = [8, 16], strides = [1, 1]} : vector<8x64xf32> to vector<8x16xf32>
    %39 = vector.extract_strided_slice %3 {offsets = [0, 16], sizes = [8, 16], strides = [1, 1]} : vector<8x64xf32> to vector<8x16xf32>
    %40 = vector.extract_strided_slice %4 {offsets = [0, 16], sizes = [8, 16], strides = [1, 1]} : vector<8x64xf32> to vector<8x16xf32>
    %cst_13 = arith.constant dense<0.000000e+00> : vector<8x8xf32>
    %41 = tpu.matmul %38, %39, %cst_13 {dimension_numbers = #tpu.dot_dimension_numbers<[1], [1], [0], [0], [0, 0, 1, 0], [], []>} : vector<8x16xf32>, vector<8x16xf32>, vector<8x8xf32> -> vector<8x8xf32>
    %cst_14 = arith.constant 2.500000e-01 : f32
    %42 = vector.broadcast %cst_14 : f32 to vector<8x8xf32>
    %43 = arith.mulf %41, %42 : vector<8x8xf32>
    %44 = arith.addf %43, %19 : vector<8x8xf32>
    %cst_15 = arith.constant dense<0xFF800000> : vector<8xf32>
    %45 = vector.multi_reduction <maximumf>, %44, %cst_15 [1] : vector<8x8xf32> to vector<8xf32>
    %46 = vector.shape_cast %45 : vector<8xf32> to vector<8x1xf32>
    %47 = vector.broadcast %46 : vector<8x1xf32> to vector<8x8xf32>
    %48 = arith.subf %44, %47 : vector<8x8xf32>
    %49 = math.exp %48 : vector<8x8xf32>
    %cst_16 = arith.constant dense<0.000000e+00> : vector<8xf32>
    %50 = vector.multi_reduction <add>, %49, %cst_16 [1] : vector<8x8xf32> to vector<8xf32>
    %51 = vector.shape_cast %50 : vector<8xf32> to vector<8x1xf32>
    %52 = tpu.reciprocal %51 {approx = true} : vector<8x1xf32> -> vector<8x1xf32>
    %53 = vector.broadcast %52 : vector<8x1xf32> to vector<8x8xf32>
    %54 = arith.mulf %49, %53 : vector<8x8xf32>
    %cst_17 = arith.constant dense<0.000000e+00> : vector<8x16xf32>
    %55 = tpu.matmul %54, %40, %cst_17 {dimension_numbers = #tpu.dot_dimension_numbers<[1], [0], [0], [1], [0, 0, 1, 1], [], []>} : vector<8x8xf32>, vector<8x16xf32>, vector<8x16xf32> -> vector<8x16xf32>
    %56 = vector.extract_strided_slice %2 {offsets = [0, 32], sizes = [8, 16], strides = [1, 1]} : vector<8x64xf32> to vector<8x16xf32>
    %57 = vector.extract_strided_slice %3 {offsets = [0, 32], sizes = [8, 16], strides = [1, 1]} : vector<8x64xf32> to vector<8x16xf32>
    %58 = vector.extract_strided_slice %4 {offsets = [0, 32], sizes = [8, 16], strides = [1, 1]} : vector<8x64xf32> to vector<8x16xf32>
    %cst_18 = arith.constant dense<0.000000e+00> : vector<8x8xf32>
    %59 = tpu.matmul %56, %57, %cst_18 {dimension_numbers = #tpu.dot_dimension_numbers<[1], [1], [0], [0], [0, 0, 1, 0], [], []>} : vector<8x16xf32>, vector<8x16xf32>, vector<8x8xf32> -> vector<8x8xf32>
    %cst_19 = arith.constant 2.500000e-01 : f32
    %60 = vector.broadcast %cst_19 : f32 to vector<8x8xf32>
    %61 = arith.mulf %59, %60 : vector<8x8xf32>
    %62 = arith.addf %61, %19 : vector<8x8xf32>
    %cst_20 = arith.constant dense<0xFF800000> : vector<8xf32>
    %63 = vector.multi_reduction <maximumf>, %62, %cst_20 [1] : vector<8x8xf32> to vector<8xf32>
    %64 = vector.shape_cast %63 : vector<8xf32> to vector<8x1xf32>
    %65 = vector.broadcast %64 : vector<8x1xf32> to vector<8x8xf32>
    %66 = arith.subf %62, %65 : vector<8x8xf32>
    %67 = math.exp %66 : vector<8x8xf32>
    %cst_21 = arith.constant dense<0.000000e+00> : vector<8xf32>
    %68 = vector.multi_reduction <add>, %67, %cst_21 [1] : vector<8x8xf32> to vector<8xf32>
    %69 = vector.shape_cast %68 : vector<8xf32> to vector<8x1xf32>
    %70 = tpu.reciprocal %69 {approx = true} : vector<8x1xf32> -> vector<8x1xf32>
    %71 = vector.broadcast %70 : vector<8x1xf32> to vector<8x8xf32>
    %72 = arith.mulf %67, %71 : vector<8x8xf32>
    %cst_22 = arith.constant dense<0.000000e+00> : vector<8x16xf32>
    %73 = tpu.matmul %72, %58, %cst_22 {dimension_numbers = #tpu.dot_dimension_numbers<[1], [0], [0], [1], [0, 0, 1, 1], [], []>} : vector<8x8xf32>, vector<8x16xf32>, vector<8x16xf32> -> vector<8x16xf32>
    %74 = vector.extract_strided_slice %2 {offsets = [0, 48], sizes = [8, 16], strides = [1, 1]} : vector<8x64xf32> to vector<8x16xf32>
    %75 = vector.extract_strided_slice %3 {offsets = [0, 48], sizes = [8, 16], strides = [1, 1]} : vector<8x64xf32> to vector<8x16xf32>
    %76 = vector.extract_strided_slice %4 {offsets = [0, 48], sizes = [8, 16], strides = [1, 1]} : vector<8x64xf32> to vector<8x16xf32>
    %cst_23 = arith.constant dense<0.000000e+00> : vector<8x8xf32>
    %77 = tpu.matmul %74, %75, %cst_23 {dimension_numbers = #tpu.dot_dimension_numbers<[1], [1], [0], [0], [0, 0, 1, 0], [], []>} : vector<8x16xf32>, vector<8x16xf32>, vector<8x8xf32> -> vector<8x8xf32>
    %cst_24 = arith.constant 2.500000e-01 : f32
    %78 = vector.broadcast %cst_24 : f32 to vector<8x8xf32>
    %79 = arith.mulf %77, %78 : vector<8x8xf32>
    %80 = arith.addf %79, %19 : vector<8x8xf32>
    %cst_25 = arith.constant dense<0xFF800000> : vector<8xf32>
    %81 = vector.multi_reduction <maximumf>, %80, %cst_25 [1] : vector<8x8xf32> to vector<8xf32>
    %82 = vector.shape_cast %81 : vector<8xf32> to vector<8x1xf32>
    %83 = vector.broadcast %82 : vector<8x1xf32> to vector<8x8xf32>
    %84 = arith.subf %80, %83 : vector<8x8xf32>
    %85 = math.exp %84 : vector<8x8xf32>
    %cst_26 = arith.constant dense<0.000000e+00> : vector<8xf32>
    %86 = vector.multi_reduction <add>, %85, %cst_26 [1] : vector<8x8xf32> to vector<8xf32>
    %87 = vector.shape_cast %86 : vector<8xf32> to vector<8x1xf32>
    %88 = tpu.reciprocal %87 {approx = true} : vector<8x1xf32> -> vector<8x1xf32>
    %89 = vector.broadcast %88 : vector<8x1xf32> to vector<8x8xf32>
    %90 = arith.mulf %85, %89 : vector<8x8xf32>
    %cst_27 = arith.constant dense<0.000000e+00> : vector<8x16xf32>
    %91 = tpu.matmul %90, %76, %cst_27 {dimension_numbers = #tpu.dot_dimension_numbers<[1], [0], [0], [1], [0, 0, 1, 1], [], []>} : vector<8x8xf32>, vector<8x16xf32>, vector<8x16xf32> -> vector<8x16xf32>
    %92 = tpu.concatenate %37, %55, %73, %91 in 1 : vector<8x16xf32>, vector<8x16xf32>, vector<8x16xf32>, vector<8x16xf32> -> vector<8x64xf32>
    %c0_28 = arith.constant 0 : index
    %c0_29 = arith.constant 0 : index
    %c0_30 = arith.constant 0 : index
    %93 = vector.load %arg3[%c0_28, %c0_29, %c0_30] : memref<1x8x64xf32, #tpu.memory_space<vmem>>, vector<1x8x64xf32>
    %94 = vector.shape_cast %93 : vector<1x8x64xf32> to vector<8x64xf32>
    %95 = vector.shape_cast %92 : vector<8x64xf32> to vector<1x8x64xf32>
    tpu.vector_store %arg3[%c0_28, %c0_29, %c0_30], %95 {strides = array<i32>} : memref<1x8x64xf32, #tpu.memory_space<vmem>>, vector<1x8x64xf32>,
    return
  }
  func.func @transform_0(%arg0: i32) -> (i32, i32, i32) {
    %c0_i32 = arith.constant 0 : i32
    %c0_i32_0 = arith.constant 0 : i32
    %c0_i32_1 = arith.constant 0 : i32
    return %arg0, %c0_i32, %c0_i32_0 : i32, i32, i32
  }
  func.func @transform_1(%arg0: i32) -> (i32, i32, i32) {
    %c0_i32 = arith.constant 0 : i32
    %c0_i32_0 = arith.constant 0 : i32
    %c0_i32_1 = arith.constant 0 : i32
    return %arg0, %c0_i32, %c0_i32_0 : i32, i32, i32
  }
  func.func @transform_2(%arg0: i32) -> (i32, i32, i32) {
    %c0_i32 = arith.constant 0 : i32
    %c0_i32_0 = arith.constant 0 : i32
    %c0_i32_1 = arith.constant 0 : i32
    return %arg0, %c0_i32, %c0_i32_0 : i32, i32, i32
  }
}

module attributes {stable_mosaic.version = 11 : i64} {
  func.func @_linear_res_ln_kernel(%arg0: i32, %arg1: memref<16x64xf32, #tpu.memory_space<vmem>>, %arg2: memref<64x64xbf16, #tpu.memory_space<vmem>>, %arg3: memref<1x64xf32, #tpu.memory_space<vmem>>, %arg4: memref<16x64xf32, #tpu.memory_space<vmem>>, %arg5: memref<1x64xf32, #tpu.memory_space<vmem>>, %arg6: memref<1x64xf32, #tpu.memory_space<vmem>>, %arg7: memref<16x64xf32, #tpu.memory_space<vmem>>) attributes {dimension_semantics = [#tpu.dimension_semantics<arbitrary>], iteration_bounds = array<i64: 1>, scalar_prefetch = 0 : i64, scratch_operands = 0 : i64, tpu.core_type = #tpu.core_type<tc>, window_params = [{pipeline_mode = #tpu.pipeline_mode<synchronous>, transform_indices = @transform_0, window_bounds = array<i64: 16, 64>}, {pipeline_mode = #tpu.pipeline_mode<synchronous>, transform_indices = @transform_1, window_bounds = array<i64: 64, 64>}, {pipeline_mode = #tpu.pipeline_mode<synchronous>, transform_indices = @transform_2, window_bounds = array<i64: 1, 64>}, {pipeline_mode = #tpu.pipeline_mode<synchronous>, transform_indices = @transform_3, window_bounds = array<i64: 16, 64>}, {pipeline_mode = #tpu.pipeline_mode<synchronous>, transform_indices = @transform_4, window_bounds = array<i64: 1, 64>}, {pipeline_mode = #tpu.pipeline_mode<synchronous>, transform_indices = @transform_5, window_bounds = array<i64: 1, 64>}, {pipeline_mode = #tpu.pipeline_mode<synchronous>, transform_indices = @transform_6, window_bounds = array<i64: 16, 64>}]} {
    %c0 = arith.constant 0 : index
    %c0_0 = arith.constant 0 : index
    %0 = vector.load %arg1[%c0, %c0_0] : memref<16x64xf32, #tpu.memory_space<vmem>>, vector<16x64xf32>
    %1 = arith.truncf %0 : vector<16x64xf32> to vector<16x64xbf16>
    %c0_1 = arith.constant 0 : index
    %c0_2 = arith.constant 0 : index
    %2 = vector.load %arg2[%c0_1, %c0_2] : memref<64x64xbf16, #tpu.memory_space<vmem>>, vector<64x64xbf16>
    %cst = arith.constant dense<0.000000e+00> : vector<16x64xf32>
    %3 = tpu.matmul %1, %2, %cst {dimension_numbers = #tpu.dot_dimension_numbers<[1], [0], [0], [1], [0, 0, 1, 1], [], []>} : vector<16x64xbf16>, vector<64x64xbf16>, vector<16x64xf32> -> vector<16x64xf32>
    %c0_3 = arith.constant 0 : index
    %c0_4 = arith.constant 0 : index
    %4 = vector.load %arg3[%c0_3, %c0_4] : memref<1x64xf32, #tpu.memory_space<vmem>>, vector<1x64xf32>
    %5 = vector.broadcast %4 : vector<1x64xf32> to vector<16x64xf32>
    %6 = arith.addf %3, %5 : vector<16x64xf32>
    %c0_5 = arith.constant 0 : index
    %c0_6 = arith.constant 0 : index
    %7 = vector.load %arg4[%c0_5, %c0_6] : memref<16x64xf32, #tpu.memory_space<vmem>>, vector<16x64xf32>
    %8 = arith.addf %6, %7 : vector<16x64xf32>
    %c0_7 = arith.constant 0 : index
    %c0_8 = arith.constant 0 : index
    %9 = vector.load %arg5[%c0_7, %c0_8] : memref<1x64xf32, #tpu.memory_space<vmem>>, vector<1x64xf32>
    %c0_9 = arith.constant 0 : index
    %c0_10 = arith.constant 0 : index
    %10 = vector.load %arg6[%c0_9, %c0_10] : memref<1x64xf32, #tpu.memory_space<vmem>>, vector<1x64xf32>
    %cst_11 = arith.constant dense<0.000000e+00> : vector<16xf32>
    %11 = vector.multi_reduction <add>, %8, %cst_11 [1] : vector<16x64xf32> to vector<16xf32>
    %12 = vector.shape_cast %11 : vector<16xf32> to vector<16x1xf32>
    %cst_12 = arith.constant 6.400000e+01 : f32
    %13 = vector.broadcast %cst_12 : f32 to vector<16x1xf32>
    %14 = arith.divf %12, %13 : vector<16x1xf32>
    %15 = vector.broadcast %14 : vector<16x1xf32> to vector<16x64xf32>
    %16 = arith.subf %8, %15 : vector<16x64xf32>
    %17 = arith.mulf %16, %16 : vector<16x64xf32>
    %cst_13 = arith.constant dense<0.000000e+00> : vector<16xf32>
    %18 = vector.multi_reduction <add>, %17, %cst_13 [1] : vector<16x64xf32> to vector<16xf32>
    %19 = vector.shape_cast %18 : vector<16xf32> to vector<16x1xf32>
    %cst_14 = arith.constant 6.400000e+01 : f32
    %20 = vector.broadcast %cst_14 : f32 to vector<16x1xf32>
    %21 = arith.divf %19, %20 : vector<16x1xf32>
    %22 = vector.broadcast %14 : vector<16x1xf32> to vector<16x64xf32>
    %23 = arith.subf %8, %22 : vector<16x64xf32>
    %cst_15 = arith.constant 9.99999974E-6 : f32
    %24 = vector.broadcast %cst_15 : f32 to vector<16x1xf32>
    %25 = arith.addf %21, %24 : vector<16x1xf32>
    %26 = math.rsqrt %25 : vector<16x1xf32>
    %27 = vector.broadcast %26 : vector<16x1xf32> to vector<16x64xf32>
    %28 = arith.mulf %23, %27 : vector<16x64xf32>
    %29 = vector.broadcast %9 : vector<1x64xf32> to vector<16x64xf32>
    %30 = arith.mulf %28, %29 : vector<16x64xf32>
    %31 = vector.broadcast %10 : vector<1x64xf32> to vector<16x64xf32>
    %32 = arith.addf %30, %31 : vector<16x64xf32>
    %c0_16 = arith.constant 0 : index
    %c0_17 = arith.constant 0 : index
    %33 = vector.load %arg7[%c0_16, %c0_17] : memref<16x64xf32, #tpu.memory_space<vmem>>, vector<16x64xf32>
    tpu.vector_store %arg7[%c0_16, %c0_17], %32 {strides = array<i32>} : memref<16x64xf32, #tpu.memory_space<vmem>>, vector<16x64xf32>,
    return
  }
  func.func @transform_0(%arg0: i32) -> (i32, i32) {
    %c0_i32 = arith.constant 0 : i32
    %c0_i32_0 = arith.constant 0 : i32
    %c0_i32_1 = arith.constant 0 : i32
    return %c0_i32, %c0_i32_0 : i32, i32
  }
  func.func @transform_1(%arg0: i32) -> (i32, i32) {
    %c0_i32 = arith.constant 0 : i32
    %c0_i32_0 = arith.constant 0 : i32
    %c0_i32_1 = arith.constant 0 : i32
    return %c0_i32, %c0_i32_0 : i32, i32
  }
  func.func @transform_2(%arg0: i32) -> (i32, i32) {
    %c0_i32 = arith.constant 0 : i32
    %c0_i32_0 = arith.constant 0 : i32
    %c0_i32_1 = arith.constant 0 : i32
    return %c0_i32, %c0_i32_0 : i32, i32
  }
  func.func @transform_3(%arg0: i32) -> (i32, i32) {
    %c0_i32 = arith.constant 0 : i32
    %c0_i32_0 = arith.constant 0 : i32
    %c0_i32_1 = arith.constant 0 : i32
    return %c0_i32, %c0_i32_0 : i32, i32
  }
  func.func @transform_4(%arg0: i32) -> (i32, i32) {
    %c0_i32 = arith.constant 0 : i32
    %c0_i32_0 = arith.constant 0 : i32
    %c0_i32_1 = arith.constant 0 : i32
    return %c0_i32, %c0_i32_0 : i32, i32
  }
  func.func @transform_5(%arg0: i32) -> (i32, i32) {
    %c0_i32 = arith.constant 0 : i32
    %c0_i32_0 = arith.constant 0 : i32
    %c0_i32_1 = arith.constant 0 : i32
    return %c0_i32, %c0_i32_0 : i32, i32
  }
  func.func @transform_6(%arg0: i32) -> (i32, i32) {
    %c0_i32 = arith.constant 0 : i32
    %c0_i32_0 = arith.constant 0 : i32
    %c0_i32_1 = arith.constant 0 : i32
    return %c0_i32, %c0_i32_0 : i32, i32
  }
}

module attributes {stable_mosaic.version = 11 : i64} {
  func.func @_linear_kernel(%arg0: i32, %arg1: memref<16x64xf32, #tpu.memory_space<vmem>>, %arg2: memref<64x64xbf16, #tpu.memory_space<vmem>>, %arg3: memref<1x64xf32, #tpu.memory_space<vmem>>, %arg4: memref<16x64xf32, #tpu.memory_space<vmem>>) attributes {dimension_semantics = [#tpu.dimension_semantics<parallel>], iteration_bounds = array<i64: 1>, scalar_prefetch = 0 : i64, scratch_operands = 0 : i64, tpu.core_type = #tpu.core_type<tc>, window_params = [{pipeline_mode = #tpu.pipeline_mode<synchronous>, transform_indices = @transform_0, window_bounds = array<i64: 16, 64>}, {transform_indices = @transform_1, window_bounds = array<i64: 64, 64>}, {transform_indices = @transform_2, window_bounds = array<i64: 1, 64>}, {transform_indices = @transform_3, window_bounds = array<i64: 16, 64>}]} {
    %c0 = arith.constant 0 : index
    %c0_0 = arith.constant 0 : index
    %0 = vector.load %arg1[%c0, %c0_0] : memref<16x64xf32, #tpu.memory_space<vmem>>, vector<16x64xf32>
    %1 = arith.truncf %0 : vector<16x64xf32> to vector<16x64xbf16>
    %c0_1 = arith.constant 0 : index
    %c0_2 = arith.constant 0 : index
    %2 = vector.load %arg2[%c0_1, %c0_2] : memref<64x64xbf16, #tpu.memory_space<vmem>>, vector<64x64xbf16>
    %cst = arith.constant dense<0.000000e+00> : vector<16x64xf32>
    %3 = tpu.matmul %1, %2, %cst {dimension_numbers = #tpu.dot_dimension_numbers<[1], [0], [0], [1], [0, 0, 1, 1], [], []>} : vector<16x64xbf16>, vector<64x64xbf16>, vector<16x64xf32> -> vector<16x64xf32>
    %c0_3 = arith.constant 0 : index
    %c0_4 = arith.constant 0 : index
    %4 = vector.load %arg3[%c0_3, %c0_4] : memref<1x64xf32, #tpu.memory_space<vmem>>, vector<1x64xf32>
    %5 = vector.broadcast %4 : vector<1x64xf32> to vector<16x64xf32>
    %6 = arith.addf %3, %5 : vector<16x64xf32>
    %c0_5 = arith.constant 0 : index
    %c0_6 = arith.constant 0 : index
    %7 = vector.load %arg4[%c0_5, %c0_6] : memref<16x64xf32, #tpu.memory_space<vmem>>, vector<16x64xf32>
    tpu.vector_store %arg4[%c0_5, %c0_6], %6 {strides = array<i32>} : memref<16x64xf32, #tpu.memory_space<vmem>>, vector<16x64xf32>,
    return
  }
  func.func @transform_0(%arg0: i32) -> (i32, i32) {
    %c0_i32 = arith.constant 0 : i32
    %c0_i32_0 = arith.constant 0 : i32
    %c0_i32_1 = arith.constant 0 : i32
    return %c0_i32, %c0_i32_0 : i32, i32
  }
  func.func @transform_1(%arg0: i32) -> (i32, i32) {
    %c0_i32 = arith.constant 0 : i32
    %c0_i32_0 = arith.constant 0 : i32
    return %c0_i32, %arg0 : i32, i32
  }
  func.func @transform_2(%arg0: i32) -> (i32, i32) {
    %c0_i32 = arith.constant 0 : i32
    %c0_i32_0 = arith.constant 0 : i32
    return %c0_i32, %arg0 : i32, i32
  }
  func.func @transform_3(%arg0: i32) -> (i32, i32) {
    %c0_i32 = arith.constant 0 : i32
    %c0_i32_0 = arith.constant 0 : i32
    return %c0_i32, %arg0 : i32, i32
  }
}

module attributes {stable_mosaic.version = 11 : i64} {
  func.func @_cross_attn_kernel(%arg0: i32, %arg1: memref<1x8x64xf32, #tpu.memory_space<vmem>>, %arg2: memref<1x8x128xf32, #tpu.memory_space<vmem>>, %arg3: memref<1x1x8xi32, #tpu.memory_space<vmem>>, %arg4: memref<1x8x64xf32, #tpu.memory_space<vmem>>) attributes {dimension_semantics = [#tpu.dimension_semantics<parallel>], iteration_bounds = array<i64: 2>, scalar_prefetch = 0 : i64, scratch_operands = 0 : i64, tpu.core_type = #tpu.core_type<tc>, window_params = [{transform_indices = @transform_0, window_bounds = array<i64: 1, 8, 64>}, {transform_indices = @transform_1, window_bounds = array<i64: 1, 8, 128>}, {transform_indices = @transform_2, window_bounds = array<i64: 1, 1, 8>}, {transform_indices = @transform_3, window_bounds = array<i64: 1, 8, 64>}]} {
    %c0 = arith.constant 0 : index
    %c0_0 = arith.constant 0 : index
    %c0_1 = arith.constant 0 : index
    %0 = vector.load %arg1[%c0, %c0_0, %c0_1] : memref<1x8x64xf32, #tpu.memory_space<vmem>>, vector<1x8x64xf32>
    %1 = vector.shape_cast %0 : vector<1x8x64xf32> to vector<8x64xf32>
    %c0_2 = arith.constant 0 : index
    %c0_3 = arith.constant 0 : index
    %c0_4 = arith.constant 0 : index
    %2 = vector.load %arg2[%c0_2, %c0_3, %c0_4] : memref<1x8x128xf32, #tpu.memory_space<vmem>>, vector<1x8x128xf32>
    %3 = vector.shape_cast %2 : vector<1x8x128xf32> to vector<8x128xf32>
    %4 = vector.extract_strided_slice %3 {offsets = [0, 0], sizes = [8, 64], strides = [1, 1]} : vector<8x128xf32> to vector<8x64xf32>
    %5 = vector.extract_strided_slice %3 {offsets = [0, 64], sizes = [8, 64], strides = [1, 1]} : vector<8x128xf32> to vector<8x64xf32>
    %c0_5 = arith.constant 0 : index
    %c0_6 = arith.constant 0 : index
    %c0_7 = arith.constant 0 : index
    %6 = vector.load %arg3[%c0_5, %c0_6, %c0_7] : memref<1x1x8xi32, #tpu.memory_space<vmem>>, vector<1x1x8xi32>
    %7 = vector.shape_cast %6 : vector<1x1x8xi32> to vector<1x8xi32>
    %c0_i32 = arith.constant 0 : i32
    %8 = vector.broadcast %c0_i32 : i32 to vector<1x8xi32>
    %9 = arith.cmpi sgt, %7, %8 : vector<1x8xi32>
    %cst = arith.constant 0.000000e+00 : f32
    %cst_8 = arith.constant -1.000000e+09 : f32
    %10 = vector.broadcast %cst : f32 to vector<1x8xf32>
    %11 = vector.broadcast %cst_8 : f32 to vector<1x8xf32>
    %12 = arith.select %9, %10, %11 : vector<1x8xi1>, vector<1x8xf32>
    %13 = vector.extract_strided_slice %1 {offsets = [0, 0], sizes = [8, 16], strides = [1, 1]} : vector<8x64xf32> to vector<8x16xf32>
    %14 = vector.extract_strided_slice %4 {offsets = [0, 0], sizes = [8, 16], strides = [1, 1]} : vector<8x64xf32> to vector<8x16xf32>
    %15 = vector.extract_strided_slice %5 {offsets = [0, 0], sizes = [8, 16], strides = [1, 1]} : vector<8x64xf32> to vector<8x16xf32>
    %cst_9 = arith.constant dense<0.000000e+00> : vector<8x8xf32>
    %16 = tpu.matmul %13, %14, %cst_9 {dimension_numbers = #tpu.dot_dimension_numbers<[1], [1], [0], [0], [0, 0, 1, 0], [], []>} : vector<8x16xf32>, vector<8x16xf32>, vector<8x8xf32> -> vector<8x8xf32>
    %cst_10 = arith.constant 2.500000e-01 : f32
    %17 = vector.broadcast %cst_10 : f32 to vector<8x8xf32>
    %18 = arith.mulf %16, %17 : vector<8x8xf32>
    %19 = vector.broadcast %12 : vector<1x8xf32> to vector<8x8xf32>
    %20 = arith.addf %18, %19 : vector<8x8xf32>
    %cst_11 = arith.constant dense<0xFF800000> : vector<8xf32>
    %21 = vector.multi_reduction <maximumf>, %20, %cst_11 [1] : vector<8x8xf32> to vector<8xf32>
    %22 = vector.shape_cast %21 : vector<8xf32> to vector<8x1xf32>
    %23 = vector.broadcast %22 : vector<8x1xf32> to vector<8x8xf32>
    %24 = arith.subf %20, %23 : vector<8x8xf32>
    %25 = math.exp %24 : vector<8x8xf32>
    %cst_12 = arith.constant dense<0.000000e+00> : vector<8xf32>
    %26 = vector.multi_reduction <add>, %25, %cst_12 [1] : vector<8x8xf32> to vector<8xf32>
    %27 = vector.shape_cast %26 : vector<8xf32> to vector<8x1xf32>
    %28 = tpu.reciprocal %27 {approx = true} : vector<8x1xf32> -> vector<8x1xf32>
    %29 = vector.broadcast %28 : vector<8x1xf32> to vector<8x8xf32>
    %30 = arith.mulf %25, %29 : vector<8x8xf32>
    %cst_13 = arith.constant dense<0.000000e+00> : vector<8x16xf32>
    %31 = tpu.matmul %30, %15, %cst_13 {dimension_numbers = #tpu.dot_dimension_numbers<[1], [0], [0], [1], [0, 0, 1, 1], [], []>} : vector<8x8xf32>, vector<8x16xf32>, vector<8x16xf32> -> vector<8x16xf32>
    %32 = vector.extract_strided_slice %1 {offsets = [0, 16], sizes = [8, 16], strides = [1, 1]} : vector<8x64xf32> to vector<8x16xf32>
    %33 = vector.extract_strided_slice %4 {offsets = [0, 16], sizes = [8, 16], strides = [1, 1]} : vector<8x64xf32> to vector<8x16xf32>
    %34 = vector.extract_strided_slice %5 {offsets = [0, 16], sizes = [8, 16], strides = [1, 1]} : vector<8x64xf32> to vector<8x16xf32>
    %cst_14 = arith.constant dense<0.000000e+00> : vector<8x8xf32>
    %35 = tpu.matmul %32, %33, %cst_14 {dimension_numbers = #tpu.dot_dimension_numbers<[1], [1], [0], [0], [0, 0, 1, 0], [], []>} : vector<8x16xf32>, vector<8x16xf32>, vector<8x8xf32> -> vector<8x8xf32>
    %cst_15 = arith.constant 2.500000e-01 : f32
    %36 = vector.broadcast %cst_15 : f32 to vector<8x8xf32>
    %37 = arith.mulf %35, %36 : vector<8x8xf32>
    %38 = vector.broadcast %12 : vector<1x8xf32> to vector<8x8xf32>
    %39 = arith.addf %37, %38 : vector<8x8xf32>
    %cst_16 = arith.constant dense<0xFF800000> : vector<8xf32>
    %40 = vector.multi_reduction <maximumf>, %39, %cst_16 [1] : vector<8x8xf32> to vector<8xf32>
    %41 = vector.shape_cast %40 : vector<8xf32> to vector<8x1xf32>
    %42 = vector.broadcast %41 : vector<8x1xf32> to vector<8x8xf32>
    %43 = arith.subf %39, %42 : vector<8x8xf32>
    %44 = math.exp %43 : vector<8x8xf32>
    %cst_17 = arith.constant dense<0.000000e+00> : vector<8xf32>
    %45 = vector.multi_reduction <add>, %44, %cst_17 [1] : vector<8x8xf32> to vector<8xf32>
    %46 = vector.shape_cast %45 : vector<8xf32> to vector<8x1xf32>
    %47 = tpu.reciprocal %46 {approx = true} : vector<8x1xf32> -> vector<8x1xf32>
    %48 = vector.broadcast %47 : vector<8x1xf32> to vector<8x8xf32>
    %49 = arith.mulf %44, %48 : vector<8x8xf32>
    %cst_18 = arith.constant dense<0.000000e+00> : vector<8x16xf32>
    %50 = tpu.matmul %49, %34, %cst_18 {dimension_numbers = #tpu.dot_dimension_numbers<[1], [0], [0], [1], [0, 0, 1, 1], [], []>} : vector<8x8xf32>, vector<8x16xf32>, vector<8x16xf32> -> vector<8x16xf32>
    %51 = vector.extract_strided_slice %1 {offsets = [0, 32], sizes = [8, 16], strides = [1, 1]} : vector<8x64xf32> to vector<8x16xf32>
    %52 = vector.extract_strided_slice %4 {offsets = [0, 32], sizes = [8, 16], strides = [1, 1]} : vector<8x64xf32> to vector<8x16xf32>
    %53 = vector.extract_strided_slice %5 {offsets = [0, 32], sizes = [8, 16], strides = [1, 1]} : vector<8x64xf32> to vector<8x16xf32>
    %cst_19 = arith.constant dense<0.000000e+00> : vector<8x8xf32>
    %54 = tpu.matmul %51, %52, %cst_19 {dimension_numbers = #tpu.dot_dimension_numbers<[1], [1], [0], [0], [0, 0, 1, 0], [], []>} : vector<8x16xf32>, vector<8x16xf32>, vector<8x8xf32> -> vector<8x8xf32>
    %cst_20 = arith.constant 2.500000e-01 : f32
    %55 = vector.broadcast %cst_20 : f32 to vector<8x8xf32>
    %56 = arith.mulf %54, %55 : vector<8x8xf32>
    %57 = vector.broadcast %12 : vector<1x8xf32> to vector<8x8xf32>
    %58 = arith.addf %56, %57 : vector<8x8xf32>
    %cst_21 = arith.constant dense<0xFF800000> : vector<8xf32>
    %59 = vector.multi_reduction <maximumf>, %58, %cst_21 [1] : vector<8x8xf32> to vector<8xf32>
    %60 = vector.shape_cast %59 : vector<8xf32> to vector<8x1xf32>
    %61 = vector.broadcast %60 : vector<8x1xf32> to vector<8x8xf32>
    %62 = arith.subf %58, %61 : vector<8x8xf32>
    %63 = math.exp %62 : vector<8x8xf32>
    %cst_22 = arith.constant dense<0.000000e+00> : vector<8xf32>
    %64 = vector.multi_reduction <add>, %63, %cst_22 [1] : vector<8x8xf32> to vector<8xf32>
    %65 = vector.shape_cast %64 : vector<8xf32> to vector<8x1xf32>
    %66 = tpu.reciprocal %65 {approx = true} : vector<8x1xf32> -> vector<8x1xf32>
    %67 = vector.broadcast %66 : vector<8x1xf32> to vector<8x8xf32>
    %68 = arith.mulf %63, %67 : vector<8x8xf32>
    %cst_23 = arith.constant dense<0.000000e+00> : vector<8x16xf32>
    %69 = tpu.matmul %68, %53, %cst_23 {dimension_numbers = #tpu.dot_dimension_numbers<[1], [0], [0], [1], [0, 0, 1, 1], [], []>} : vector<8x8xf32>, vector<8x16xf32>, vector<8x16xf32> -> vector<8x16xf32>
    %70 = vector.extract_strided_slice %1 {offsets = [0, 48], sizes = [8, 16], strides = [1, 1]} : vector<8x64xf32> to vector<8x16xf32>
    %71 = vector.extract_strided_slice %4 {offsets = [0, 48], sizes = [8, 16], strides = [1, 1]} : vector<8x64xf32> to vector<8x16xf32>
    %72 = vector.extract_strided_slice %5 {offsets = [0, 48], sizes = [8, 16], strides = [1, 1]} : vector<8x64xf32> to vector<8x16xf32>
    %cst_24 = arith.constant dense<0.000000e+00> : vector<8x8xf32>
    %73 = tpu.matmul %70, %71, %cst_24 {dimension_numbers = #tpu.dot_dimension_numbers<[1], [1], [0], [0], [0, 0, 1, 0], [], []>} : vector<8x16xf32>, vector<8x16xf32>, vector<8x8xf32> -> vector<8x8xf32>
    %cst_25 = arith.constant 2.500000e-01 : f32
    %74 = vector.broadcast %cst_25 : f32 to vector<8x8xf32>
    %75 = arith.mulf %73, %74 : vector<8x8xf32>
    %76 = vector.broadcast %12 : vector<1x8xf32> to vector<8x8xf32>
    %77 = arith.addf %75, %76 : vector<8x8xf32>
    %cst_26 = arith.constant dense<0xFF800000> : vector<8xf32>
    %78 = vector.multi_reduction <maximumf>, %77, %cst_26 [1] : vector<8x8xf32> to vector<8xf32>
    %79 = vector.shape_cast %78 : vector<8xf32> to vector<8x1xf32>
    %80 = vector.broadcast %79 : vector<8x1xf32> to vector<8x8xf32>
    %81 = arith.subf %77, %80 : vector<8x8xf32>
    %82 = math.exp %81 : vector<8x8xf32>
    %cst_27 = arith.constant dense<0.000000e+00> : vector<8xf32>
    %83 = vector.multi_reduction <add>, %82, %cst_27 [1] : vector<8x8xf32> to vector<8xf32>
    %84 = vector.shape_cast %83 : vector<8xf32> to vector<8x1xf32>
    %85 = tpu.reciprocal %84 {approx = true} : vector<8x1xf32> -> vector<8x1xf32>
    %86 = vector.broadcast %85 : vector<8x1xf32> to vector<8x8xf32>
    %87 = arith.mulf %82, %86 : vector<8x8xf32>
    %cst_28 = arith.constant dense<0.000000e+00> : vector<8x16xf32>
    %88 = tpu.matmul %87, %72, %cst_28 {dimension_numbers = #tpu.dot_dimension_numbers<[1], [0], [0], [1], [0, 0, 1, 1], [], []>} : vector<8x8xf32>, vector<8x16xf32>, vector<8x16xf32> -> vector<8x16xf32>
    %89 = tpu.concatenate %31, %50, %69, %88 in 1 : vector<8x16xf32>, vector<8x16xf32>, vector<8x16xf32>, vector<8x16xf32> -> vector<8x64xf32>
    %c0_29 = arith.constant 0 : index
    %c0_30 = arith.constant 0 : index
    %c0_31 = arith.constant 0 : index
    %90 = vector.load %arg4[%c0_29, %c0_30, %c0_31] : memref<1x8x64xf32, #tpu.memory_space<vmem>>, vector<1x8x64xf32>
    %91 = vector.shape_cast %90 : vector<1x8x64xf32> to vector<8x64xf32>
    %92 = vector.shape_cast %89 : vector<8x64xf32> to vector<1x8x64xf32>
    tpu.vector_store %arg4[%c0_29, %c0_30, %c0_31], %92 {strides = array<i32>} : memref<1x8x64xf32, #tpu.memory_space<vmem>>, vector<1x8x64xf32>,
    return
  }
  func.func @transform_0(%arg0: i32) -> (i32, i32, i32) {
    %c0_i32 = arith.constant 0 : i32
    %c0_i32_0 = arith.constant 0 : i32
    %c0_i32_1 = arith.constant 0 : i32
    return %arg0, %c0_i32, %c0_i32_0 : i32, i32, i32
  }
  func.func @transform_1(%arg0: i32) -> (i32, i32, i32) {
    %c0_i32 = arith.constant 0 : i32
    %c0_i32_0 = arith.constant 0 : i32
    %c0_i32_1 = arith.constant 0 : i32
    return %arg0, %c0_i32, %c0_i32_0 : i32, i32, i32
  }
  func.func @transform_2(%arg0: i32) -> (i32, i32, i32) {
    %c0_i32 = arith.constant 0 : i32
    %c0_i32_0 = arith.constant 0 : i32
    %c0_i32_1 = arith.constant 0 : i32
    return %arg0, %c0_i32, %c0_i32_0 : i32, i32, i32
  }
  func.func @transform_3(%arg0: i32) -> (i32, i32, i32) {
    %c0_i32 = arith.constant 0 : i32
    %c0_i32_0 = arith.constant 0 : i32
    %c0_i32_1 = arith.constant 0 : i32
    return %arg0, %c0_i32, %c0_i32_0 : i32, i32, i32
  }
}

module attributes {stable_mosaic.version = 11 : i64} {
  func.func @_ffn_kernel(%arg0: i32, %arg1: memref<16x64xf32, #tpu.memory_space<vmem>>, %arg2: memref<64x128xbf16, #tpu.memory_space<vmem>>, %arg3: memref<1x128xf32, #tpu.memory_space<vmem>>, %arg4: memref<128x64xbf16, #tpu.memory_space<vmem>>, %arg5: memref<1x64xf32, #tpu.memory_space<vmem>>, %arg6: memref<1x64xf32, #tpu.memory_space<vmem>>, %arg7: memref<1x64xf32, #tpu.memory_space<vmem>>, %arg8: memref<16x64xf32, #tpu.memory_space<vmem>>) attributes {dimension_semantics = [#tpu.dimension_semantics<arbitrary>], iteration_bounds = array<i64: 1>, scalar_prefetch = 0 : i64, scratch_operands = 0 : i64, tpu.core_type = #tpu.core_type<tc>, window_params = [{pipeline_mode = #tpu.pipeline_mode<synchronous>, transform_indices = @transform_0, window_bounds = array<i64: 16, 64>}, {pipeline_mode = #tpu.pipeline_mode<synchronous>, transform_indices = @transform_1, window_bounds = array<i64: 64, 128>}, {pipeline_mode = #tpu.pipeline_mode<synchronous>, transform_indices = @transform_2, window_bounds = array<i64: 1, 128>}, {pipeline_mode = #tpu.pipeline_mode<synchronous>, transform_indices = @transform_3, window_bounds = array<i64: 128, 64>}, {pipeline_mode = #tpu.pipeline_mode<synchronous>, transform_indices = @transform_4, window_bounds = array<i64: 1, 64>}, {pipeline_mode = #tpu.pipeline_mode<synchronous>, transform_indices = @transform_5, window_bounds = array<i64: 1, 64>}, {pipeline_mode = #tpu.pipeline_mode<synchronous>, transform_indices = @transform_6, window_bounds = array<i64: 1, 64>}, {pipeline_mode = #tpu.pipeline_mode<synchronous>, transform_indices = @transform_7, window_bounds = array<i64: 16, 64>}]} {
    %c0 = arith.constant 0 : index
    %c0_0 = arith.constant 0 : index
    %0 = vector.load %arg1[%c0, %c0_0] : memref<16x64xf32, #tpu.memory_space<vmem>>, vector<16x64xf32>
    %1 = arith.truncf %0 : vector<16x64xf32> to vector<16x64xbf16>
    %c0_1 = arith.constant 0 : index
    %c0_2 = arith.constant 0 : index
    %2 = vector.load %arg2[%c0_1, %c0_2] : memref<64x128xbf16, #tpu.memory_space<vmem>>, vector<64x128xbf16>
    %cst = arith.constant dense<0.000000e+00> : vector<16x128xf32>
    %3 = tpu.matmul %1, %2, %cst {dimension_numbers = #tpu.dot_dimension_numbers<[1], [0], [0], [1], [0, 0, 1, 1], [], []>} : vector<16x64xbf16>, vector<64x128xbf16>, vector<16x128xf32> -> vector<16x128xf32>
    %c0_3 = arith.constant 0 : index
    %c0_4 = arith.constant 0 : index
    %4 = vector.load %arg3[%c0_3, %c0_4] : memref<1x128xf32, #tpu.memory_space<vmem>>, vector<1x128xf32>
    %5 = vector.broadcast %4 : vector<1x128xf32> to vector<16x128xf32>
    %6 = arith.addf %3, %5 : vector<16x128xf32>
    %cst_5 = arith.constant 0.000000e+00 : f32
    %7 = vector.broadcast %cst_5 : f32 to vector<16x128xf32>
    %8 = arith.maximumf %6, %7 : vector<16x128xf32>
    %9 = arith.truncf %8 : vector<16x128xf32> to vector<16x128xbf16>
    %c0_6 = arith.constant 0 : index
    %c0_7 = arith.constant 0 : index
    %10 = vector.load %arg4[%c0_6, %c0_7] : memref<128x64xbf16, #tpu.memory_space<vmem>>, vector<128x64xbf16>
    %cst_8 = arith.constant dense<0.000000e+00> : vector<16x64xf32>
    %11 = tpu.matmul %9, %10, %cst_8 {dimension_numbers = #tpu.dot_dimension_numbers<[1], [0], [0], [1], [0, 0, 1, 1], [], []>} : vector<16x128xbf16>, vector<128x64xbf16>, vector<16x64xf32> -> vector<16x64xf32>
    %c0_9 = arith.constant 0 : index
    %c0_10 = arith.constant 0 : index
    %12 = vector.load %arg5[%c0_9, %c0_10] : memref<1x64xf32, #tpu.memory_space<vmem>>, vector<1x64xf32>
    %13 = vector.broadcast %12 : vector<1x64xf32> to vector<16x64xf32>
    %14 = arith.addf %11, %13 : vector<16x64xf32>
    %15 = arith.addf %14, %0 : vector<16x64xf32>
    %c0_11 = arith.constant 0 : index
    %c0_12 = arith.constant 0 : index
    %16 = vector.load %arg6[%c0_11, %c0_12] : memref<1x64xf32, #tpu.memory_space<vmem>>, vector<1x64xf32>
    %c0_13 = arith.constant 0 : index
    %c0_14 = arith.constant 0 : index
    %17 = vector.load %arg7[%c0_13, %c0_14] : memref<1x64xf32, #tpu.memory_space<vmem>>, vector<1x64xf32>
    %cst_15 = arith.constant dense<0.000000e+00> : vector<16xf32>
    %18 = vector.multi_reduction <add>, %15, %cst_15 [1] : vector<16x64xf32> to vector<16xf32>
    %19 = vector.shape_cast %18 : vector<16xf32> to vector<16x1xf32>
    %cst_16 = arith.constant 6.400000e+01 : f32
    %20 = vector.broadcast %cst_16 : f32 to vector<16x1xf32>
    %21 = arith.divf %19, %20 : vector<16x1xf32>
    %22 = vector.broadcast %21 : vector<16x1xf32> to vector<16x64xf32>
    %23 = arith.subf %15, %22 : vector<16x64xf32>
    %24 = arith.mulf %23, %23 : vector<16x64xf32>
    %cst_17 = arith.constant dense<0.000000e+00> : vector<16xf32>
    %25 = vector.multi_reduction <add>, %24, %cst_17 [1] : vector<16x64xf32> to vector<16xf32>
    %26 = vector.shape_cast %25 : vector<16xf32> to vector<16x1xf32>
    %cst_18 = arith.constant 6.400000e+01 : f32
    %27 = vector.broadcast %cst_18 : f32 to vector<16x1xf32>
    %28 = arith.divf %26, %27 : vector<16x1xf32>
    %29 = vector.broadcast %21 : vector<16x1xf32> to vector<16x64xf32>
    %30 = arith.subf %15, %29 : vector<16x64xf32>
    %cst_19 = arith.constant 9.99999974E-6 : f32
    %31 = vector.broadcast %cst_19 : f32 to vector<16x1xf32>
    %32 = arith.addf %28, %31 : vector<16x1xf32>
    %33 = math.rsqrt %32 : vector<16x1xf32>
    %34 = vector.broadcast %33 : vector<16x1xf32> to vector<16x64xf32>
    %35 = arith.mulf %30, %34 : vector<16x64xf32>
    %36 = vector.broadcast %16 : vector<1x64xf32> to vector<16x64xf32>
    %37 = arith.mulf %35, %36 : vector<16x64xf32>
    %38 = vector.broadcast %17 : vector<1x64xf32> to vector<16x64xf32>
    %39 = arith.addf %37, %38 : vector<16x64xf32>
    %c0_20 = arith.constant 0 : index
    %c0_21 = arith.constant 0 : index
    %40 = vector.load %arg8[%c0_20, %c0_21] : memref<16x64xf32, #tpu.memory_space<vmem>>, vector<16x64xf32>
    tpu.vector_store %arg8[%c0_20, %c0_21], %39 {strides = array<i32>} : memref<16x64xf32, #tpu.memory_space<vmem>>, vector<16x64xf32>,
    return
  }
  func.func @transform_0(%arg0: i32) -> (i32, i32) {
    %c0_i32 = arith.constant 0 : i32
    %c0_i32_0 = arith.constant 0 : i32
    %c0_i32_1 = arith.constant 0 : i32
    return %c0_i32, %c0_i32_0 : i32, i32
  }
  func.func @transform_1(%arg0: i32) -> (i32, i32) {
    %c0_i32 = arith.constant 0 : i32
    %c0_i32_0 = arith.constant 0 : i32
    %c0_i32_1 = arith.constant 0 : i32
    return %c0_i32, %c0_i32_0 : i32, i32
  }
  func.func @transform_2(%arg0: i32) -> (i32, i32) {
    %c0_i32 = arith.constant 0 : i32
    %c0_i32_0 = arith.constant 0 : i32
    %c0_i32_1 = arith.constant 0 : i32
    return %c0_i32, %c0_i32_0 : i32, i32
  }
  func.func @transform_3(%arg0: i32) -> (i32, i32) {
    %c0_i32 = arith.constant 0 : i32
    %c0_i32_0 = arith.constant 0 : i32
    %c0_i32_1 = arith.constant 0 : i32
    return %c0_i32, %c0_i32_0 : i32, i32
  }
  func.func @transform_4(%arg0: i32) -> (i32, i32) {
    %c0_i32 = arith.constant 0 : i32
    %c0_i32_0 = arith.constant 0 : i32
    %c0_i32_1 = arith.constant 0 : i32
    return %c0_i32, %c0_i32_0 : i32, i32
  }
  func.func @transform_5(%arg0: i32) -> (i32, i32) {
    %c0_i32 = arith.constant 0 : i32
    %c0_i32_0 = arith.constant 0 : i32
    %c0_i32_1 = arith.constant 0 : i32
    return %c0_i32, %c0_i32_0 : i32, i32
  }
  func.func @transform_6(%arg0: i32) -> (i32, i32) {
    %c0_i32 = arith.constant 0 : i32
    %c0_i32_0 = arith.constant 0 : i32
    %c0_i32_1 = arith.constant 0 : i32
    return %c0_i32, %c0_i32_0 : i32, i32
  }
  func.func @transform_7(%arg0: i32) -> (i32, i32) {
    %c0_i32 = arith.constant 0 : i32
    %c0_i32_0 = arith.constant 0 : i32
    %c0_i32_1 = arith.constant 0 : i32
    return %c0_i32, %c0_i32_0 : i32, i32
  }
}

module attributes {stable_mosaic.version = 11 : i64} {
  func.func @_softmax_head_kernel(%arg0: i32, %arg1: memref<16x64xf32, #tpu.memory_space<vmem>>, %arg2: memref<64x128xbf16, #tpu.memory_space<vmem>>, %arg3: memref<1x128xf32, #tpu.memory_space<vmem>>, %arg4: memref<16x128xf32, #tpu.memory_space<vmem>>) attributes {dimension_semantics = [#tpu.dimension_semantics<arbitrary>], iteration_bounds = array<i64: 1>, scalar_prefetch = 0 : i64, scratch_operands = 0 : i64, tpu.core_type = #tpu.core_type<tc>, window_params = [{pipeline_mode = #tpu.pipeline_mode<synchronous>, transform_indices = @transform_0, window_bounds = array<i64: 16, 64>}, {pipeline_mode = #tpu.pipeline_mode<synchronous>, transform_indices = @transform_1, window_bounds = array<i64: 64, 128>}, {pipeline_mode = #tpu.pipeline_mode<synchronous>, transform_indices = @transform_2, window_bounds = array<i64: 1, 128>}, {pipeline_mode = #tpu.pipeline_mode<synchronous>, transform_indices = @transform_3, window_bounds = array<i64: 16, 128>}]} {
    %c0 = arith.constant 0 : index
    %c0_0 = arith.constant 0 : index
    %0 = vector.load %arg1[%c0, %c0_0] : memref<16x64xf32, #tpu.memory_space<vmem>>, vector<16x64xf32>
    %1 = arith.truncf %0 : vector<16x64xf32> to vector<16x64xbf16>
    %c0_1 = arith.constant 0 : index
    %c0_2 = arith.constant 0 : index
    %2 = vector.load %arg2[%c0_1, %c0_2] : memref<64x128xbf16, #tpu.memory_space<vmem>>, vector<64x128xbf16>
    %cst = arith.constant dense<0.000000e+00> : vector<16x128xf32>
    %3 = tpu.matmul %1, %2, %cst {dimension_numbers = #tpu.dot_dimension_numbers<[1], [0], [0], [1], [0, 0, 1, 1], [], []>} : vector<16x64xbf16>, vector<64x128xbf16>, vector<16x128xf32> -> vector<16x128xf32>
    %c0_3 = arith.constant 0 : index
    %c0_4 = arith.constant 0 : index
    %4 = vector.load %arg3[%c0_3, %c0_4] : memref<1x128xf32, #tpu.memory_space<vmem>>, vector<1x128xf32>
    %5 = vector.broadcast %4 : vector<1x128xf32> to vector<16x128xf32>
    %6 = arith.addf %3, %5 : vector<16x128xf32>
    %cst_5 = arith.constant dense<0xFF800000> : vector<16xf32>
    %7 = vector.multi_reduction <maximumf>, %6, %cst_5 [1] : vector<16x128xf32> to vector<16xf32>
    %8 = vector.shape_cast %7 : vector<16xf32> to vector<16x1xf32>
    %9 = vector.broadcast %8 : vector<16x1xf32> to vector<16x128xf32>
    %10 = arith.subf %6, %9 : vector<16x128xf32>
    %11 = math.exp %10 : vector<16x128xf32>
    %cst_6 = arith.constant dense<0.000000e+00> : vector<16xf32>
    %12 = vector.multi_reduction <add>, %11, %cst_6 [1] : vector<16x128xf32> to vector<16xf32>
    %13 = vector.shape_cast %12 : vector<16xf32> to vector<16x1xf32>
    %14 = vector.broadcast %13 : vector<16x1xf32> to vector<16x128xf32>
    %15 = arith.divf %11, %14 : vector<16x128xf32>
    %c0_7 = arith.constant 0 : index
    %c0_8 = arith.constant 0 : index
    %16 = vector.load %arg4[%c0_7, %c0_8] : memref<16x128xf32, #tpu.memory_space<vmem>>, vector<16x128xf32>
    tpu.vector_store %arg4[%c0_7, %c0_8], %15 {strides = array<i32>} : memref<16x128xf32, #tpu.memory_space<vmem>>, vector<16x128xf32>,
    return
  }
  func.func @transform_0(%arg0: i32) -> (i32, i32) {
    %c0_i32 = arith.constant 0 : i32
    %c0_i32_0 = arith.constant 0 : i32
    %c0_i32_1 = arith.constant 0 : i32
    return %c0_i32, %c0_i32_0 : i32, i32
  }
  func.func @transform_1(%arg0: i32) -> (i32, i32) {
    %c0_i32 = arith.constant 0 : i32
    %c0_i32_0 = arith.constant 0 : i32
    %c0_i32_1 = arith.constant 0 : i32
    return %c0_i32, %c0_i32_0 : i32, i32
  }
  func.func @transform_2(%arg0: i32) -> (i32, i32) {
    %c0_i32 = arith.constant 0 : i32
    %c0_i32_0 = arith.constant 0 : i32
    %c0_i32_1 = arith.constant 0 : i32
    return %c0_i32, %c0_i32_0 : i32, i32
  }
  func.func @transform_3(%arg0: i32) -> (i32, i32) {
    %c0_i32 = arith.constant 0 : i32
    %c0_i32_0 = arith.constant 0 : i32
    %c0_i32_1 = arith.constant 0 : i32
    return %c0_i32, %c0_i32_0 : i32, i32
  }
}

</mosaic_0001>

<bundles_post_ra>
// kernel: category_transformer_forward.24
= control target key start
LH: loop header
LB: loop body
LE: loop exit
PB: predicated region body
PF: predicated region fallthrough
CT: control target
= control target key end

     0   :  { %v198_v22 = vmov 768.0   ;;  %s373_s0 = inlined_call_operand.vmem [shape: f32[16,768], index: 0, kind: input, shape index: {}]   ;;  %s374_s1 = inlined_call_operand.vmem [shape: f32[1,768], index: 1, kind: input, shape index: {}]   ;;  %s375_s2 = inlined_call_operand.vmem [shape: f32[1,768], index: 2, kind: input, shape index: {}]   ;;  %s376_s3 = inlined_call_operand.vmem [shape: f32[16,768], index: 3, kind: output, shape index: {}]  }
   0x1   :  { %v14_v0 = vld [vmem:[%s373_s0] sm:$0xff]  ;;  %v15_v1 = vld [vmem:[%s373_s0 + $0x8] sm:$0xff]  ;;  %v16_v2 = vld [vmem:[%s373_s0 + $0x10] sm:$0xff]  ;;  %192 = vrcp.f32 %v198_v22 }
   0x2   :  { %v17_v3 = vld [vmem:[%s373_s0 + $0x18] sm:$0xff]  ;;  %v28_v4 = vadd.f32 %v15_v1, %v14_v0  ;;  %v20_v5 = vld [vmem:[%s373_s0 + $0x30] sm:$0xff]  ;;  %v22_v7 = vld [vmem:[%s373_s0 + $0x40] sm:$0xff] }
   0x3   :  { %v21_v6 = vld [vmem:[%s373_s0 + $0x38] sm:$0xff]  ;;  %v18_v10 = vld [vmem:[%s373_s0 + $0x20] sm:$0xff]  ;;  %v23_v11 = vld [vmem:[%s373_s0 + $0x48] sm:$0xff] }
   0x4   :  { %v29_v8 = vadd.f32 %v28_v4, %v16_v2  ;;  %v35_v9 = vadd.f32 %v21_v6, %v20_v5  ;;  %v19_v14 = vld [vmem:[%s373_s0 + $0x28] sm:$0xff]  ;;  %v24_v17 = vld [vmem:[%s373_s0 + $0x50] sm:$0xff]  ;;  %v25_v20 = vld [vmem:[%s373_s0 + $0x58] sm:$0xff] }
   0x6   :  { %v30_v12 = vadd.f32 %v29_v8, %v17_v3  ;;  %v36_v13 = vadd.f32 %v35_v9, %v22_v7 }
   0x7   :  { %v193_v23 = vpop.eup %192 }
   0x8   :  { %v31_v15 = vadd.f32 %v30_v12, %v18_v10  ;;  %v37_v16 = vadd.f32 %v36_v13, %v23_v11  ;;  %v43_v24 = vmul.f32 768.0, %v193_v23  ;;  %vm47_vm0 = vweird.f32 %v193_v23  ;;  %v306_v12 = vld [vmem:[%s374_s1] sm:$0x3f] }
   0xa   :  { %v32_v18 = vadd.f32 %v31_v15, %v19_v14  ;;  %v38_v19 = vadd.f32 %v37_v16, %v24_v17  ;;  %v44_v25 = vsub.f32 1.0, %v43_v24  ;;  %v131_v24 = vperm.slane %v306_v12, 5 }
   0xc   :  { %33 = vadd.xlane.f32.xlu0 %v32_v18  ;;  %v39_v21 = vadd.f32 %v38_v19, %v25_v20  ;;  %v45_v26 = vmul.f32 %v193_v23, %v44_v25  ;;  %v127_v18 = vperm.slane %v306_v12, 1  ;;  %v128_v19 = vperm.slane %v306_v12, 2 }
   0xe   :  { %v46_v27 = vadd.f32 %v193_v23, %v45_v26 }
  0x10   :  { %v48_v28 = vsel %vm47_vm0, %v193_v23, %v46_v27 }
  0x14   :  { %40 = vadd.xlane.f32.xlu0 %v39_v21  ;;  %v130_v21 = vperm.slane %v306_v12, 4 }
  0x7f   :  { %v34_v29 = vpop.xlane.xlu0 %33 }
  0x80   :  { %v49_v30 = vmul.f32 %v48_v28, %v34_v29 }
  0x82   :  { %v255_v31 = vsub.f32 %v14_v0, %v49_v30  ;;  %v257_v32 = vsub.f32 %v15_v1, %v49_v30  ;;  %v259_v33 = vsub.f32 %v16_v2, %v49_v30  ;;  %v261_v34 = vsub.f32 %v17_v3, %v49_v30 }
  0x83   :  { %v267_v37 = vsub.f32 %v18_v10, %v49_v30  ;;  %v271_v41 = vsub.f32 %v19_v14, %v49_v30  ;;  %v311_v14 = vld [vmem:[%s375_s2] sm:$0x3f] }
  0x84   :  { %v63_v35 = vmul.f32 %v255_v31, %v255_v31  ;;  %v64_v36 = vmul.f32 %v257_v32, %v257_v32  ;;  %v65_v38 = vmul.f32 %v259_v33, %v259_v33  ;;  %v66_v43 = vmul.f32 %v261_v34, %v261_v34 }
  0x85   :  { %v67_v45 = vmul.f32 %v267_v37, %v267_v37  ;;  %v68_v50 = vmul.f32 %v271_v41, %v271_v41  ;;  %v151_v25 = vperm.slane %v311_v14, 0  ;;  %v152_v26 = vperm.slane %v311_v14, 1 }
  0x86   :  { %v75_v39 = vadd.f32 %v64_v36, %v63_v35  ;;  %v153_v27 = vperm.slane %v311_v14, 2  ;;  %v155_v29 = vperm.slane %v311_v14, 4 }
  0x87   :  { %v41_v40 = vpop.xlane.xlu0 %40 }
  0x88   :  { %v50_v42 = vmul.f32 %v48_v28, %v41_v40  ;;  %v76_v44 = vadd.f32 %v75_v39, %v65_v38 }
  0x8a   :  { %v77_v46 = vadd.f32 %v76_v44, %v66_v43  ;;  %v277_v47 = vsub.f32 %v20_v5, %v50_v42  ;;  %v279_v48 = vsub.f32 %v21_v6, %v50_v42  ;;  %v281_v49 = vsub.f32 %v22_v7, %v50_v42 }
  0x8b   :  { %v285_v52 = vsub.f32 %v23_v11, %v50_v42  ;;  %v291_v56 = vsub.f32 %v24_v17, %v50_v42  ;;  %v295_v59 = vsub.f32 %v25_v20, %v50_v42  ;;  %v126_v17 = vperm.slane %v306_v12, 0 }
  0x8c   :  { %v78_v51 = vadd.f32 %v77_v46, %v67_v45  ;;  %v69_v53 = vmul.f32 %v277_v47, %v277_v47  ;;  %v70_v54 = vmul.f32 %v279_v48, %v279_v48  ;;  %v71_v57 = vmul.f32 %v281_v49, %v281_v49 }
  0x8d   :  { %v72_v60 = vmul.f32 %v285_v52, %v285_v52  ;;  %v73_v62 = vmul.f32 %v291_v56, %v291_v56  ;;  %v74_v0 = vmul.f32 %v295_v59, %v295_v59  ;;  %v129_v20 = vperm.slane %v306_v12, 3 }
  0x8e   :  { %v79_v55 = vadd.f32 %v78_v51, %v68_v50  ;;  %v82_v58 = vadd.f32 %v70_v54, %v69_v53  ;;  %v156_v42 = vperm.slane %v311_v14, 5 }
  0x90   :  { %80 = vadd.xlane.f32.xlu1 %v79_v55  ;;  %v83_v61 = vadd.f32 %v82_v58, %v71_v57 }
  0x92   :  { %v84_v63 = vadd.f32 %v83_v61, %v72_v60 }
  0x94   :  { %v85_v1 = vadd.f32 %v84_v63, %v73_v62 }
  0x96   :  { %v86_v2 = vadd.f32 %v85_v1, %v74_v0 }
  0x98   :  { %87 = vadd.xlane.f32.xlu1 %v86_v2 }
 0x103   :  { %v81_v3 = vpop.xlane.xlu1 %80 }
 0x104   :  { %v89_v4 = vmul.f32 %v81_v3, %v48_v28 }
 0x106   :  { %v91_v5 = vadd.f32 1e-05, %v89_v4 }
 0x108   :  { %194 = vrsqrt.f32 %v91_v5  ;;  %vm99_vm2 = vweird.f32 %v91_v5 }
 0x10b   :  { %v88_v6 = vpop.xlane.xlu1 %87 }
 0x10c   :  { %v90_v7 = vmul.f32 %v88_v6, %v48_v28  ;;  %v154_v28 = vperm.slane %v311_v14, 3 }
 0x10e   :  { %v195_v8 = vpop.eup %194  ;;  %v92_v9 = vadd.f32 1e-05, %v90_v7 }
 0x10f   :  { %v94_v10 = vmul.f32 %v195_v8, %v91_v5  ;;  %vm100_vm1 = vweird.f32 %v195_v8 }
 0x110   :  { %196 = vrsqrt.f32 %v92_v9  ;;  %vm101_vm3 = vmor %vm99_vm2, %vm100_vm1  ;;  %vm109_vm5 = vweird.f32 %v92_v9 }
 0x111   :  { %v95_v11 = vmul.f32 %v195_v8, %v94_v10 }
 0x113   :  { %v96_v13 = vmul.f32 0.5, %v95_v11 }
 0x115   :  { %v97_v15 = vsub.f32 1.5, %v96_v13 }
 0x116   :  { %v197_v16 = vpop.eup %196 }
 0x117   :  { %v98_v22 = vmul.f32 %v195_v8, %v97_v15  ;;  %v104_v23 = vmul.f32 %v197_v16, %v92_v9  ;;  %vm110_vm4 = vweird.f32 %v197_v16 }
 0x118   :  { %vm111_vm6 = vmor %vm109_vm5, %vm110_vm4 }
 0x119   :  { %v102_v30 = vsel %vm101_vm3, %v195_v8, %v98_v22  ;;  %v105_v35 = vmul.f32 %v197_v16, %v104_v23 }
 0x11a   :  { %v113_v36 = vmul.f32 %v102_v30, %v255_v31  ;;  %v114_v38 = vmul.f32 %v102_v30, %v257_v32  ;;  %v115_v39 = vmul.f32 %v102_v30, %v259_v33  ;;  %v116_v40 = vmul.f32 %v102_v30, %v261_v34 }
 0x11b   :  { %v117_v43 = vmul.f32 %v102_v30, %v267_v37  ;;  %v118_v44 = vmul.f32 %v102_v30, %v271_v41  ;;  %v106_v45 = vmul.f32 0.5, %v105_v35 }
 0x11c   :  { %v138_v46 = vmul.f32 %v126_v17, %v113_v36  ;;  %v139_v50 = vmul.f32 %v127_v18, %v114_v38  ;;  %v140_v51 = vmul.f32 %v128_v19, %v115_v39  ;;  %v141_v53 = vmul.f32 %v129_v20, %v116_v40 }
 0x11d   :  { %v142_v54 = vmul.f32 %v130_v21, %v117_v43  ;;  %v143_v55 = vmul.f32 %v131_v24, %v118_v44  ;;  %v107_v31 = vsub.f32 1.5, %v106_v45 }
 0x11e   :  { %v163_v32 = vadd.f32 %v151_v25, %v138_v46  ;;  %v164_v57 = vadd.f32 %v152_v26, %v139_v50  ;;  %v165_v33 = vadd.f32 %v153_v27, %v140_v51  ;;  %v166_v58 = vadd.f32 %v154_v28, %v141_v53 }
 0x11f   :  { %v108_v34 = vmul.f32 %v197_v16, %v107_v31  ;;  %v167_v60 = vadd.f32 %v155_v29, %v142_v54  ;;  %v168_v37 = vadd.f32 %v156_v42, %v143_v55 }
 0x120   :  { %175 = vst [vmem:[%s376_s3] sm:$0xff] %v163_v32 }
 0x121   :  { %176 = vst [vmem:[%s376_s3 + $0x8] sm:$0xff] %v164_v57  ;;  %v112_v41 = vsel %vm111_vm6, %v197_v16, %v108_v34 }
 0x122   :  { %177 = vst [vmem:[%s376_s3 + $0x10] sm:$0xff] %v165_v33  ;;  %v119_v61 = vmul.f32 %v112_v41, %v277_v47  ;;  %v120_v62 = vmul.f32 %v112_v41, %v279_v48  ;;  %v121_v63 = vmul.f32 %v112_v41, %v281_v49  ;;  %v122_v0 = vmul.f32 %v112_v41, %v285_v52 }
 0x123   :  { %178 = vst [vmem:[%s376_s3 + $0x18] sm:$0xff] %v166_v58  ;;  %v123_v1 = vmul.f32 %v112_v41, %v291_v56  ;;  %v124_v2 = vmul.f32 %v112_v41, %v295_v59 }
 0x124   :  { %179 = vst [vmem:[%s376_s3 + $0x20] sm:$0xff] %v167_v60  ;;  %v144_v3 = vmul.f32 %v126_v17, %v119_v61  ;;  %v145_v47 = vmul.f32 %v127_v18, %v120_v62  ;;  %v146_v4 = vmul.f32 %v128_v19, %v121_v63  ;;  %v147_v48 = vmul.f32 %v129_v20, %v122_v0 }
 0x125   :  { %180 = vst [vmem:[%s376_s3 + $0x28] sm:$0xff] %v168_v37  ;;  %v148_v49 = vmul.f32 %v130_v21, %v123_v1  ;;  %v149_v52 = vmul.f32 %v131_v24, %v124_v2 }
 0x126   :  { %v169_v5 = vadd.f32 %v151_v25, %v144_v3  ;;  %v170_v6 = vadd.f32 %v152_v26, %v145_v47  ;;  %v171_v7 = vadd.f32 %v153_v27, %v146_v4  ;;  %v172_v56 = vadd.f32 %v154_v28, %v147_v48 }
 0x127   :  { %v173_v8 = vadd.f32 %v155_v29, %v148_v49  ;;  %v174_v59 = vadd.f32 %v156_v42, %v149_v52 }
 0x128   :  { %181 = vst [vmem:[%s376_s3 + $0x30] sm:$0xff] %v169_v5 }
 0x129   :  { %182 = vst [vmem:[%s376_s3 + $0x38] sm:$0xff] %v170_v6 }
 0x12a   :  { %183 = vst [vmem:[%s376_s3 + $0x40] sm:$0xff] %v171_v7 }
 0x12b   :  { %184 = vst [vmem:[%s376_s3 + $0x48] sm:$0xff] %v172_v56 }
 0x12c   :  { %185 = vst [vmem:[%s376_s3 + $0x50] sm:$0xff] %v173_v8 }
 0x12d   :  { %186 = vst [vmem:[%s376_s3 + $0x58] sm:$0xff] %v174_v59 }

// kernel: category_transformer_forward.25
= control target key start
LH: loop header
LB: loop body
LE: loop exit
PB: predicated region body
PF: predicated region fallthrough
CT: control target
= control target key end

     0   :  { %8 = vsyncpa [#allocation3], 0  ;;  %s2075_s0 = inlined_call_operand.vmem [shape: f32[16,768], index: 0, kind: input, shape index: {}]   ;;  %s2076_s1 = inlined_call_operand.hbm [shape: bf16[768,2304], index: 1, kind: input, shape index: {}]   ;;  %s2077_s2 = inlined_call_operand.vmem [shape: f32[1,2304], index: 2, kind: input, shape index: {}]   ;;  %s2078_s3 = inlined_call_operand.vmem [shape: f32[16,2304], index: 3, kind: output, shape index: {}]  }
   0x1   :  { %10 = vsyncpa [#allocation3 + $0x1], 0  ;;  %s1712_s12 = smov 0   ;;  %s1714_s13 = smov 0  }
   0x2   :  { %s1716_s14 = smov 0   ;;  %s1718_s15 = smov 0  }
   0x3 LB: > { %s1731_s16 = sadd.s32 4294967295, %s1687_s15   ;;  %s1734_s17 = sadd.s32 1, %s1687_s15   ;;  %s1687_s15 = sphi %s1718_s15, %s2085_s15   ;;  %s1683_s14 = sphi %s1716_s14, %s2084_s14   ;;  %s1679_s13 = sphi %s1714_s13, %s2083_s13   ;;  %s1675_s12 = sphi %s1712_s12, %s2082_s12  }
   0x4   : > { %s41_s18 = ssub.s32 %s1687_s15, %s1734_s17  ;;  %s44_s19 = sadd.s32 1, %s1683_s14 }
   0x5   : > { %p42_p0 = scmp.eq.s32.totalorder %s41_s18, 0  ;;  %p51_p1 = scmp.ne.s32.totalorder %s1683_s14, %s1679_s13 }
   0x6   : > { %p52_p2 = scmp.eq.s32.totalorder %s1687_s15, 0  ;;  %p57_p3 = scmp.ne.s32.totalorder %s1679_s13, %s1675_s12 }
   0x7   : > { %s1744_s20 = scalar_select %p42_p0, %s1683_s14, %s44_s19  }
   0x8   : > { %p53_p4 = por %p52_p2, %p51_p1  ;;  %p58_p5 = scmp.eq.s32.totalorder %s1731_s16, 0 }
   0x9   : > { %p107_p6 = scmp.eq.s32.totalorder %s1731_s16, 8  ;;  %p1587_p8 = scmp.lt.s32.totalorder %s1687_s15, 9 }
   0xa   : > { %p1748_p7 = por %p58_p5, %p57_p3  ;;  %s136_s23 = sand.u32 1, %s1683_s14  }
   0xb   : > { %p1753_p9 = por %p107_p6, %p51_p1  ;;  %s1579_s24 = smul.u32 768, %s136_s23 }
   0xc   : > { %s1481_s25 = sshll.u32 %s1687_s15, 3  ;;  %p1759_p10 = pnand %p1587_p8, %p53_p4 }
   0xd   : > { %s145_s29 = scalar_lea.hbm %s2076_s1, %s1481_s25  ;;  %s140_s4 = scalar_lea.vmem [#allocation2], %s1579_s24 }
   0xe   : > { %s146_s30 = sshll.u32 %s145_s29, 4  ;;  %s148_s5 = sshll.u32 %s140_s4, 4  ;;  %s147_s30 = int_to_ptr.hbm [resolvable:$true] %s146_s30  ;;  %s149_s5 = int_to_ptr.vmem [resolvable:$true] %s148_s5 }
   0xf   : > { %s137_s6 = scalar_lea.sflag [#allocation3], %s136_s23  ;;  %s1623_s7 = sshra.s32 %s147_s30, 4  ;;  %s1624_s7 = int_to_ptr.hbm [resolvable:$true] %s1623_s7 }
  0x10   : > { %s1625_s8 = scalar_lea.hbm %s1624_s7, 768  ;;  %p1627_p12 = pneg %p1759_p10 }
  0x11   : > { %p1626_p11 = scmp.ne.s32.totalorder %s1624_s7, %s1625_s8  ;;  %s1630_s11 = scalar_lea.hbm %s2076_s1, 6912 }
  0x12   : > { %p1631_p1 = scmp.lt.s32.totalorder %s1624_s7, %s2076_s1  ;;  %p1632_p2 = scmp.lt.s32.totalorder %s1630_s11, %s1625_s8 }
  0x13   : > { %p1628_p13 = pnand %p1627_p12, %p1626_p11 }
  0x14   : > { %p1633_p3 = por %p1632_p2, %p1631_p1 }
  0x15   : > { %p1629_p0 = pneg %p1628_p13 }
  0x17   : > { %p1634_p4 = pnand %p1633_p3, %p1629_p0 }
  0x19   : > { %1637 = shalt.err (!%p1634_p4)
}
  0x1a   : > { %s1689_s19 = smov 1152   ;;  %s1690_s23 = smov 128  }
  0x1b   : > { %s1691_s24 = smov 8   ;;  %p1089_p5 = scmp.ge.s32.totalorder %s1687_s15, 1 }
  0x1c   : > { %1586 = dma.hbm_to_vmem [thread:$0]  (!%p1759_p10), %s147_s30, 12288, %s149_s5, %s137_s6, %s1689_s19, %s1690_s23, %s1691_s24  }
  0x1d   : > { %p164_p6 = scmp.lt.s32.totalorder %s1687_s15, 10 }
  0x1f   : > { %p165_p8 = pnand %p1089_p5, %p164_p6 }
  0x20   : > { %s1779_s25 = sand.u32 (!%p165_p8), 1, %s1679_s13  }
  0x21   : > { %168 = sbr.rel (%p165_p8) target bundleno = 292 (0x124), region = 32  ;;  %s171_s28 = scalar_lea.sflag (!%p165_p8), [#allocation3], %s1779_s25 }
  0x22   : > { %s1580_s27 = smul.u32 (!%p165_p8), 768, %s1779_s25 }
  0x24   : > { %s1783_s29 = scalar_lea.vmem (!%p165_p8), [#allocation2], %s1580_s27 }
  0x26   : > { %1670 = dma.done.wait (%p1748_p7), %s171_s28, 12288  }
  0x27   : > { %1672 = vsyncadd (%p1748_p7), %s171_s28, 4294955008  ;;  %v1150_v0 = vld [vmem:[%s1783_s29 + $0x70] sm:$0xf]  ;;  %v1497_v1 = vld [vmem:[%s1783_s29 + $0x74] sm:$0xf0]  ;;  %s1090_s8 = sshll.u32 %s1779_s25, 5 }
  0x28   : > { %v1214_v2 = vld [vmem:[%s1783_s29 + $0xf0] sm:$0xf]  ;;  %v1151_v3 = vor.u32 %v1497_v1, %v1150_v0  ;;  %v1513_v4 = vld [vmem:[%s1783_s29 + $0xf4] sm:$0xf0]  ;;  %v1142_v11 = vld [vmem:[%s1783_s29 + $0x60] sm:$0xf] }
  0x29   : > { %v1278_v5 = vld [vmem:[%s1783_s29 + $0x170] sm:$0xf]  ;;  %v1529_v6 = vld [vmem:[%s1783_s29 + $0x174] sm:$0xf0]  ;;  %v1215_v7 = vor.u32 %v1513_v4, %v1214_v2  ;;  %v1495_v13 = vld [vmem:[%s1783_s29 + $0x64] sm:$0xf0] }
  0x2a   : > { %v1279_v8 = vor.u32 %v1529_v6, %v1278_v5  ;;  %v1342_v9 = vld [vmem:[%s1783_s29 + $0x1f0] sm:$0xf]  ;;  %v1545_v10 = vld [vmem:[%s1783_s29 + $0x1f4] sm:$0xf0]  ;;  %808 = vmatpush.bf16.msra.mxu0 %v1151_v3  ;;  %v1206_v14 = vld [vmem:[%s1783_s29 + $0xe0] sm:$0xf]  ;;  %v1143_v16 = vor.u32 %v1495_v13, %v1142_v11 }
  0x2b   : > { %v1343_v12 = vor.u32 %v1545_v10, %v1342_v9  ;;  %v1511_v15 = vld [vmem:[%s1783_s29 + $0xe4] sm:$0xf0]  ;;  %822 = vmatpush.bf16.msra.mxu1 %v1215_v7  ;;  %v1270_v18 = vld [vmem:[%s1783_s29 + $0x160] sm:$0xf]  ;;  %v1134_v23 = vld [vmem:[%s1783_s29 + $0x50] sm:$0xf] }
  0x2c   : > { %836 = vmatpush.bf16.msra.mxu2 %v1279_v8  ;;  %v1207_v17 = vor.u32 %v1511_v15, %v1206_v14  ;;  %v1527_v19 = vld [vmem:[%s1783_s29 + $0x164] sm:$0xf0]  ;;  %v1334_v20 = vld [vmem:[%s1783_s29 + $0x1e0] sm:$0xf]  ;;  %v1493_v24 = vld [vmem:[%s1783_s29 + $0x54] sm:$0xf0] }
  0x2d   : > { %850 = vmatpush.bf16.msra.mxu3 %v1343_v12  ;;  %v1271_v21 = vor.u32 %v1527_v19, %v1270_v18  ;;  %v1543_v22 = vld [vmem:[%s1783_s29 + $0x1e4] sm:$0xf0]  ;;  %v1198_v26 = vld [vmem:[%s1783_s29 + $0xd0] sm:$0xf]  ;;  %v1509_v27 = vld [vmem:[%s1783_s29 + $0xd4] sm:$0xf0]  ;;  %v1135_v29 = vor.u32 %v1493_v24, %v1134_v23 }
  0x2e   : > { %v1335_v25 = vor.u32 %v1543_v22, %v1334_v20  ;;  %v1262_v28 = vld [vmem:[%s1783_s29 + $0x150] sm:$0xf]  ;;  %809 = vmatpush.bf16.msra.mxu0 %v1143_v16  ;;  %v1525_v30 = vld [vmem:[%s1783_s29 + $0x154] sm:$0xf0]  ;;  %v1199_v33 = vor.u32 %v1509_v27, %v1198_v26  ;;  %v1126_v35 = vld [vmem:[%s1783_s29 + $0x40] sm:$0xf] }
  0x2f   : > { %v1326_v31 = vld [vmem:[%s1783_s29 + $0x1d0] sm:$0xf]  ;;  %v1541_v32 = vld [vmem:[%s1783_s29 + $0x1d4] sm:$0xf0]  ;;  %823 = vmatpush.bf16.msra.mxu1 %v1207_v17  ;;  %v1263_v34 = vor.u32 %v1525_v30, %v1262_v28  ;;  %v1491_v36 = vld [vmem:[%s1783_s29 + $0x44] sm:$0xf0] }
  0x30   : > { %837 = vmatpush.bf16.msra.mxu2 %v1271_v21  ;;  %v1190_v37 = vld [vmem:[%s1783_s29 + $0xc0] sm:$0xf]  ;;  %v1327_v38 = vor.u32 %v1541_v32, %v1326_v31  ;;  %v1507_v39 = vld [vmem:[%s1783_s29 + $0xc4] sm:$0xf0]  ;;  %v1127_v44 = vor.u32 %v1491_v36, %v1126_v35  ;;  %v1118_v47 = vld [vmem:[%s1783_s29 + $0x30] sm:$0xf] }
  0x31   : > { %851 = vmatpush.bf16.msra.mxu3 %v1335_v25  ;;  %v1254_v40 = vld [vmem:[%s1783_s29 + $0x140] sm:$0xf]  ;;  %v1523_v41 = vld [vmem:[%s1783_s29 + $0x144] sm:$0xf0]  ;;  %v1191_v45 = vor.u32 %v1507_v39, %v1190_v37  ;;  %v1489_v48 = vld [vmem:[%s1783_s29 + $0x34] sm:$0xf0] }
  0x32   : > { %v1318_v42 = vld [vmem:[%s1783_s29 + $0x1c0] sm:$0xf]  ;;  %v1539_v43 = vld [vmem:[%s1783_s29 + $0x1c4] sm:$0xf0]  ;;  %810 = vmatpush.bf16.msra.mxu0 %v1135_v29  ;;  %v1255_v46 = vor.u32 %v1523_v41, %v1254_v40  ;;  %v1182_v49 = vld [vmem:[%s1783_s29 + $0xb0] sm:$0xf]  ;;  %v1119_v56 = vor.u32 %v1489_v48, %v1118_v47 }
  0x33   : > { %824 = vmatpush.bf16.msra.mxu1 %v1199_v33  ;;  %v1319_v50 = vor.u32 %v1539_v43, %v1318_v42  ;;  %v1505_v51 = vld [vmem:[%s1783_s29 + $0xb4] sm:$0xf0]  ;;  %v1246_v52 = vld [vmem:[%s1783_s29 + $0x130] sm:$0xf]  ;;  %v1110_v59 = vld [vmem:[%s1783_s29 + $0x20] sm:$0xf] }
  0x34   : > { %838 = vmatpush.bf16.msra.mxu2 %v1263_v34  ;;  %v1521_v53 = vld [vmem:[%s1783_s29 + $0x134] sm:$0xf0]  ;;  %v1310_v54 = vld [vmem:[%s1783_s29 + $0x1b0] sm:$0xf]  ;;  %v1183_v57 = vor.u32 %v1505_v51, %v1182_v49  ;;  %v1487_v60 = vld [vmem:[%s1783_s29 + $0x24] sm:$0xf0] }
  0x35   : > { %852 = vmatpush.bf16.msra.mxu3 %v1327_v38  ;;  %v1537_v55 = vld [vmem:[%s1783_s29 + $0x1b4] sm:$0xf0]  ;;  %v1247_v58 = vor.u32 %v1521_v53, %v1246_v52  ;;  %v1174_v61 = vld [vmem:[%s1783_s29 + $0xa0] sm:$0xf]  ;;  %v1503_v63 = vld [vmem:[%s1783_s29 + $0xa4] sm:$0xf0]  ;;  %v1111_v4 = vor.u32 %v1487_v60, %v1110_v59 }
  0x36   : > { %811 = vmatpush.bf16.msra.mxu0 %v1127_v44  ;;  %v1311_v62 = vor.u32 %v1537_v55, %v1310_v54  ;;  %v1238_v0 = vld [vmem:[%s1783_s29 + $0x120] sm:$0xf]  ;;  %v1519_v1 = vld [vmem:[%s1783_s29 + $0x124] sm:$0xf0]  ;;  %v1175_v5 = vor.u32 %v1503_v63, %v1174_v61  ;;  %v1102_v7 = vld [vmem:[%s1783_s29 + $0x10] sm:$0xf] }
  0x37   : > { %825 = vmatpush.bf16.msra.mxu1 %v1191_v45  ;;  %v1302_v2 = vld [vmem:[%s1783_s29 + $0x1a0] sm:$0xf]  ;;  %v1535_v3 = vld [vmem:[%s1783_s29 + $0x1a4] sm:$0xf0]  ;;  %v1239_v6 = vor.u32 %v1519_v1, %v1238_v0  ;;  %v1485_v8 = vld [vmem:[%s1783_s29 + $0x14] sm:$0xf0] }
  0x38   : > { %839 = vmatpush.bf16.msra.mxu2 %v1255_v46  ;;  %v1166_v9 = vld [vmem:[%s1783_s29 + $0x90] sm:$0xf]  ;;  %v1303_v10 = vor.u32 %v1535_v3, %v1302_v2  ;;  %v1501_v11 = vld [vmem:[%s1783_s29 + $0x94] sm:$0xf0]  ;;  %v1103_v16 = vor.u32 %v1485_v8, %v1102_v7  ;;  %v1094_v17 = vld [vmem:[%s1783_s29] sm:$0xf] }
  0x39   : > { %853 = vmatpush.bf16.msra.mxu3 %v1319_v50  ;;  %v1230_v12 = vld [vmem:[%s1783_s29 + $0x110] sm:$0xf]  ;;  %v1517_v13 = vld [vmem:[%s1783_s29 + $0x114] sm:$0xf0]  ;;  %v1483_v18 = vld [vmem:[%s1783_s29 + $0x4] sm:$0xf0]  ;;  %v1167_v19 = vor.u32 %v1501_v11, %v1166_v9 }
  0x3a   : > { %812 = vmatpush.bf16.msra.mxu0 %v1119_v56  ;;  %v1294_v14 = vld [vmem:[%s1783_s29 + $0x190] sm:$0xf]  ;;  %v1533_v15 = vld [vmem:[%s1783_s29 + $0x194] sm:$0xf0]  ;;  %v1231_v20 = vor.u32 %v1517_v13, %v1230_v12  ;;  %v1158_v21 = vld [vmem:[%s1783_s29 + $0x80] sm:$0xf]  ;;  %v1095_v31 = vor.u32 %v1483_v18, %v1094_v17 }
  0x3b   : > { %826 = vmatpush.bf16.msra.mxu1 %v1183_v57  ;;  %v1499_v22 = vld [vmem:[%s1783_s29 + $0x84] sm:$0xf0]  ;;  %v1222_v23 = vld [vmem:[%s1783_s29 + $0x100] sm:$0xf]  ;;  %v1295_v24 = vor.u32 %v1533_v15, %v1294_v14  ;;  %v1406_v28 = vld [vmem:[%s1783_s29 + $0x270] sm:$0xf] }
  0x3c   : > { %840 = vmatpush.bf16.msra.mxu2 %v1247_v58  ;;  %v1515_v25 = vld [vmem:[%s1783_s29 + $0x104] sm:$0xf0]  ;;  %v1286_v26 = vld [vmem:[%s1783_s29 + $0x180] sm:$0xf]  ;;  %v1561_v29 = vld [vmem:[%s1783_s29 + $0x274] sm:$0xf0]  ;;  %v1159_v35 = vor.u32 %v1499_v22, %v1158_v21 }
  0x3d   : > { %854 = vmatpush.bf16.msra.mxu3 %v1311_v62  ;;  %v1531_v27 = vld [vmem:[%s1783_s29 + $0x184] sm:$0xf0]  ;;  %v1470_v30 = vld [vmem:[%s1783_s29 + $0x2f0] sm:$0xf]  ;;  %v1577_v32 = vld [vmem:[%s1783_s29 + $0x2f4] sm:$0xf0]  ;;  %v1223_v36 = vor.u32 %v1515_v25, %v1222_v23  ;;  %v1407_v40 = vor.u32 %v1561_v29, %v1406_v28 }
  0x3e   : > { %813 = vmatpush.bf16.msra.mxu0 %v1111_v4  ;;  %v1496_v33 = vld [vmem:[%s1783_s29 + $0x74] sm:$0xf]  ;;  %v1152_v34 = vld [vmem:[%s1783_s29 + $0x78] sm:$0xf0]  ;;  %v1287_v39 = vor.u32 %v1531_v27, %v1286_v26  ;;  %v1398_v41 = vld [vmem:[%s1783_s29 + $0x260] sm:$0xf]  ;;  %v1471_v42 = vor.u32 %v1577_v32, %v1470_v30 }
  0x3f   : > { %827 = vmatpush.bf16.msra.mxu1 %v1175_v5  ;;  %v1512_v37 = vld [vmem:[%s1783_s29 + $0xf4] sm:$0xf]  ;;  %v1216_v38 = vld [vmem:[%s1783_s29 + $0xf8] sm:$0xf0]  ;;  %v1155_v43 = vor.u32 %v1496_v33, %v1152_v34  ;;  %v1559_v44 = vld [vmem:[%s1783_s29 + $0x264] sm:$0xf0] }
  0x40   : > { %841 = vmatpush.bf16.msra.mxu2 %v1239_v6  ;;  %v1462_v45 = vld [vmem:[%s1783_s29 + $0x2e0] sm:$0xf]  ;;  %v1575_v46 = vld [vmem:[%s1783_s29 + $0x2e4] sm:$0xf0]  ;;  %v1219_v47 = vor.u32 %v1512_v37, %v1216_v38  ;;  %v1494_v48 = vld [vmem:[%s1783_s29 + $0x64] sm:$0xf]  ;;  %v1399_v54 = vor.u32 %v1559_v44, %v1398_v41 }
  0x41   : > { %855 = vmatpush.bf16.msra.mxu3 %v1303_v10  ;;  %v1144_v49 = vld [vmem:[%s1783_s29 + $0x68] sm:$0xf0]  ;;  %v1510_v50 = vld [vmem:[%s1783_s29 + $0xe4] sm:$0xf]  ;;  %v214_v53 = vld [vmem:[%s2075_s0 + $0x30] sm:$0xff]  ;;  %v1463_v59 = vor.u32 %v1575_v46, %v1462_v45  ;;  %s2046_s9 = scalar_lea.vmem [#allocation4], %s1090_s8 }
  0x42   : > { %814 = vmatpush.bf16.msra.mxu0 %v1103_v16  ;;  %v1208_v51 = vld [vmem:[%s1783_s29 + $0xe8] sm:$0xf0]  ;;  %v208_v52 = vld [vmem:[%s2075_s0] sm:$0xff]  ;;  %v1390_v55 = vld [vmem:[%s1783_s29 + $0x250] sm:$0xf]  ;;  %v1147_v60 = vor.u32 %v1494_v48, %v1144_v49  ;;  %s1578_s25 = sshll.u32 (%p1753_p9), %s1731_s16, 4 }
  0x43   : > { %828 = vmatpush.bf16.msra.mxu1 %v1167_v19  ;;  %v1557_v56 = vld [vmem:[%s1783_s29 + $0x254] sm:$0xf0]  ;;  %v1454_v57 = vld [vmem:[%s1783_s29 + $0x2d0] sm:$0xf]  ;;  %v1878_v58 = vpack.c.bf16 %v214_v53, %v208_v52  ;;  %v1492_v62 = vld [vmem:[%s1783_s29 + $0x54] sm:$0xf]  ;;  %v1211_v0 = vor.u32 %v1510_v50, %v1208_v51  ;;  %s989_s12 = scalar_lea.vmem (%p1753_p9), %s2078_s3, %s1578_s25 }
  0x44   : > { %842 = vmatpush.bf16.msra.mxu2 %v1231_v20  ;;  %v1573_v61 = vld [vmem:[%s1783_s29 + $0x2d4] sm:$0xf0]  ;;  %v1136_v63 = vld [vmem:[%s1783_s29 + $0x58] sm:$0xf0]  ;;  %v1508_v1 = vld [vmem:[%s1783_s29 + $0xd4] sm:$0xf]  ;;  %v1391_v8 = vor.u32 %v1557_v56, %v1390_v55 }
  0x45   : > { %856 = vmatpush.bf16.msra.mxu3 %v1295_v24  ;;  %v209_v2 = vld [vmem:[%s2075_s0 + $0x8] sm:$0xff]  ;;  %v215_v3 = vld [vmem:[%s2075_s0 + $0x38] sm:$0xff]  ;;  %v210_v6 = vld [vmem:[%s2075_s0 + $0x10] sm:$0xff]  ;;  %v1455_v12 = vor.u32 %v1573_v61, %v1454_v57  ;;  %v1139_v13 = vor.u32 %v1492_v62, %v1136_v63 }
  0x46   : > { %815 = vmatpush.bf16.msra.mxu0 %v1095_v31  ;;  %v1200_v4 = vld [vmem:[%s1783_s29 + $0xd8] sm:$0xf0]  ;;  %v1892_v5 = vpack.c.bf16 %v215_v3, %v209_v2  ;;  %v216_v7 = vld [vmem:[%s2075_s0 + $0x40] sm:$0xff]  ;;  %v1555_v10 = vld [vmem:[%s1783_s29 + $0x244] sm:$0xf0] }
  0x47   : > { %829 = vmatpush.bf16.msra.mxu1 %v1159_v35  ;;  %v1382_v9 = vld [vmem:[%s1783_s29 + $0x240] sm:$0xf]  ;;  %v1902_v11 = vpack.c.bf16 %v216_v7, %v210_v6  ;;  %v1571_v15 = vld [vmem:[%s1783_s29 + $0x2c4] sm:$0xf0]  ;;  %v1490_v16 = vld [vmem:[%s1783_s29 + $0x44] sm:$0xf]  ;;  %v1203_v17 = vor.u32 %v1508_v1, %v1200_v4 }
  0x48   : > { %843 = vmatpush.bf16.msra.mxu2 %v1223_v36  ;;  %v1446_v14 = vld [vmem:[%s1783_s29 + $0x2c0] sm:$0xf]  ;;  %v1128_v18 = vld [vmem:[%s1783_s29 + $0x48] sm:$0xf0]  ;;  %v211_v19 = vld [vmem:[%s2075_s0 + $0x18] sm:$0xff]  ;;  %v1383_v24 = vor.u32 %v1555_v10, %v1382_v9 }
  0x49   : > { %857 = vmatpush.bf16.msra.mxu3 %v1287_v39  ;;  %816 = vmatmul.bf16.vlgmr.msra.gmra.mxu0 %v1878_v58  ;;  %v217_v20 = vld [vmem:[%s2075_s0 + $0x48] sm:$0xff]  ;;  %v1506_v21 = vld [vmem:[%s1783_s29 + $0xc4] sm:$0xf]  ;;  %v1447_v25 = vor.u32 %v1571_v15, %v1446_v14  ;;  %v1131_v26 = vor.u32 %v1490_v16, %v1128_v18  ;;  %v1374_v27 = vld [vmem:[%s1783_s29 + $0x230] sm:$0xf] }
  0x4a   : > { %864 = vmatpush.bf16.msrb.mxu0 %v1407_v40  ;;  %830 = vmatmul.bf16.vlgmr.msra.gmra.mxu1 %v1892_v5  ;;  %v1192_v22 = vld [vmem:[%s1783_s29 + $0xc8] sm:$0xf0]  ;;  %v1918_v23 = vpack.c.bf16 %v217_v20, %v211_v19  ;;  %v1553_v28 = vld [vmem:[%s1783_s29 + $0x234] sm:$0xf0]  ;;  %v1438_v29 = vld [vmem:[%s1783_s29 + $0x2b0] sm:$0xf] }
  0x4b   : > { %878 = vmatpush.bf16.msrb.mxu1 %v1471_v42  ;;  %844 = vmatmul.bf16.vlgmr.msra.gmra.mxu2 %v1902_v11  ;;  %v1195_v30 = vor.u32 %v1506_v21, %v1192_v22  ;;  %v1569_v31 = vld [vmem:[%s1783_s29 + $0x2b4] sm:$0xf0]  ;;  %v1488_v32 = vld [vmem:[%s1783_s29 + $0x34] sm:$0xf]  ;;  %v1120_v33 = vld [vmem:[%s1783_s29 + $0x38] sm:$0xf0]  ;;  %v1375_v36 = vor.u32 %v1553_v28, %v1374_v27 }
  0x4c   : > { %892 = vmatpush.bf16.msrb.mxu2 %v1155_v43  ;;  %v1504_v34 = vld [vmem:[%s1783_s29 + $0xb4] sm:$0xf]  ;;  %v1184_v35 = vld [vmem:[%s1783_s29 + $0xb8] sm:$0xf0]  ;;  %858 = vmatmul.bf16.vlgmr.msra.gmra.mxu3 %v1918_v23  ;;  %v1439_v37 = vor.u32 %v1569_v31, %v1438_v29  ;;  %v1123_v38 = vor.u32 %v1488_v32, %v1120_v33  ;;  %v1366_v39 = vld [vmem:[%s1783_s29 + $0x220] sm:$0xf] }
  0x4d   : > { %906 = vmatpush.bf16.msrb.mxu3 %v1219_v47  ;;  %v1551_v40 = vld [vmem:[%s1783_s29 + $0x224] sm:$0xf0]  ;;  %v1430_v41 = vld [vmem:[%s1783_s29 + $0x2a0] sm:$0xf]  ;;  %v1187_v42 = vor.u32 %v1504_v34, %v1184_v35  ;;  %v1486_v44 = vld [vmem:[%s1783_s29 + $0x24] sm:$0xf] }
  0x4e   : > { %865 = vmatpush.bf16.msrb.mxu0 %v1399_v54  ;;  %v1567_v43 = vld [vmem:[%s1783_s29 + $0x2a4] sm:$0xf0]  ;;  %v1112_v45 = vld [vmem:[%s1783_s29 + $0x28] sm:$0xf0]  ;;  %v1502_v46 = vld [vmem:[%s1783_s29 + $0xa4] sm:$0xf]  ;;  %v1367_v48 = vor.u32 %v1551_v40, %v1366_v39 }
  0x4f   : > { %879 = vmatpush.bf16.msrb.mxu1 %v1463_v59  ;;  %v1176_v47 = vld [vmem:[%s1783_s29 + $0xa8] sm:$0xf0]  ;;  %v1431_v49 = vor.u32 %v1567_v43, %v1430_v41  ;;  %v1115_v50 = vor.u32 %v1486_v44, %v1112_v45  ;;  %v1358_v51 = vld [vmem:[%s1783_s29 + $0x210] sm:$0xf]  ;;  %v1549_v52 = vld [vmem:[%s1783_s29 + $0x214] sm:$0xf0] }
  0x50   : > { %893 = vmatpush.bf16.msrb.mxu2 %v1147_v60  ;;  %v1422_v53 = vld [vmem:[%s1783_s29 + $0x290] sm:$0xf]  ;;  %v1179_v54 = vor.u32 %v1502_v46, %v1176_v47  ;;  %v1565_v55 = vld [vmem:[%s1783_s29 + $0x294] sm:$0xf0]  ;;  %v1484_v56 = vld [vmem:[%s1783_s29 + $0x14] sm:$0xf]  ;;  %v1359_v61 = vor.u32 %v1549_v52, %v1358_v51 }
  0x51   : > { %907 = vmatpush.bf16.msrb.mxu3 %v1211_v0  ;;  %v1104_v57 = vld [vmem:[%s1783_s29 + $0x18] sm:$0xf0]  ;;  %v1500_v59 = vld [vmem:[%s1783_s29 + $0x94] sm:$0xf]  ;;  %v1350_v62 = vld [vmem:[%s1783_s29 + $0x200] sm:$0xf]  ;;  %v1423_v1 = vor.u32 %v1565_v55, %v1422_v53 }
  0x52   : > { %866 = vmatpush.bf16.msrb.mxu0 %v1391_v8  ;;  %v1168_v60 = vld [vmem:[%s1783_s29 + $0x98] sm:$0xf0]  ;;  %v1547_v63 = vld [vmem:[%s1783_s29 + $0x204] sm:$0xf0]  ;;  %v1414_v0 = vld [vmem:[%s1783_s29 + $0x280] sm:$0xf]  ;;  %v1107_v2 = vor.u32 %v1484_v56, %v1104_v57 }
  0x53   : > { %880 = vmatpush.bf16.msrb.mxu1 %v1455_v12  ;;  %v1563_v3 = vld [vmem:[%s1783_s29 + $0x284] sm:$0xf0]  ;;  %v1482_v4 = vld [vmem:[%s1783_s29 + $0x4] sm:$0xf]  ;;  %v1096_v6 = vld [vmem:[%s1783_s29 + $0x8] sm:$0xf0]  ;;  %v1171_v7 = vor.u32 %v1500_v59, %v1168_v60  ;;  %v1351_v15 = vor.u32 %v1547_v63, %v1350_v62 }
  0x54   : > { %894 = vmatpush.bf16.msrb.mxu2 %v1139_v13  ;;  %v1498_v8 = vld [vmem:[%s1783_s29 + $0x84] sm:$0xf]  ;;  %v1160_v9 = vld [vmem:[%s1783_s29 + $0x88] sm:$0xf0]  ;;  %v1528_v10 = vld [vmem:[%s1783_s29 + $0x174] sm:$0xf]  ;;  %v1415_v19 = vor.u32 %v1563_v3, %v1414_v0  ;;  %v1099_v20 = vor.u32 %v1482_v4, %v1096_v6 }
  0x55   : > { %908 = vmatpush.bf16.msrb.mxu3 %v1203_v17  ;;  %v1280_v12 = vld [vmem:[%s1783_s29 + $0x178] sm:$0xf0]  ;;  %v1544_v13 = vld [vmem:[%s1783_s29 + $0x1f4] sm:$0xf]  ;;  %v212_v22 = vld [vmem:[%s2075_s0 + $0x20] sm:$0xff] }
  0x56   : > { %867 = vmatpush.bf16.msrb.mxu0 %v1383_v24  ;;  %v1344_v14 = vld [vmem:[%s1783_s29 + $0x1f8] sm:$0xf0]  ;;  %v1560_v16 = vld [vmem:[%s1783_s29 + $0x274] sm:$0xf]  ;;  %v213_v27 = vld [vmem:[%s2075_s0 + $0x28] sm:$0xff] }
  0x57   : > { %881 = vmatpush.bf16.msrb.mxu1 %v1447_v25  ;;  %v1408_v17 = vld [vmem:[%s1783_s29 + $0x278] sm:$0xf0]  ;;  %v1576_v18 = vld [vmem:[%s1783_s29 + $0x2f4] sm:$0xf]  ;;  %v1163_v25 = vor.u32 %v1498_v8, %v1160_v9  ;;  %v1347_v29 = vor.u32 %v1544_v13, %v1344_v14  ;;  %v1526_v31 = vld [vmem:[%s1783_s29 + $0x164] sm:$0xf] }
  0x58   : > { %895 = vmatpush.bf16.msrb.mxu2 %v1131_v26  ;;  %v1472_v21 = vld [vmem:[%s1783_s29 + $0x2f8] sm:$0xf0]  ;;  %v218_v24 = vld [vmem:[%s2075_s0 + $0x50] sm:$0xff]  ;;  %v1283_v26 = vor.u32 %v1528_v10, %v1280_v12  ;;  %v1272_v32 = vld [vmem:[%s1783_s29 + $0x168] sm:$0xf0] }
  0x59   : > { %909 = vmatpush.bf16.msrb.mxu3 %v1195_v30  ;;  %v219_v28 = vld [vmem:[%s2075_s0 + $0x58] sm:$0xff]  ;;  %v1411_v30 = vor.u32 %v1560_v16, %v1408_v17  ;;  %v1542_v33 = vld [vmem:[%s1783_s29 + $0x1e4] sm:$0xf]  ;;  %v1475_v34 = vor.u32 %v1576_v18, %v1472_v21  ;;  %v1976_v35 = vpack.c.bf16 %v218_v24, %v212_v22  ;;  %v1464_v41 = vld [vmem:[%s1783_s29 + $0x2e8] sm:$0xf0] }
  0x5a   : > { %868 = vmatpush.bf16.msrb.mxu0 %v1375_v36  ;;  %v1336_v36 = vld [vmem:[%s1783_s29 + $0x1e8] sm:$0xf0]  ;;  %v1981_v39 = vpack.c.bf16 %v219_v28, %v213_v27  ;;  %v1574_v40 = vld [vmem:[%s1783_s29 + $0x2e4] sm:$0xf]  ;;  %v1524_v45 = vld [vmem:[%s1783_s29 + $0x154] sm:$0xf] }
  0x5b   : > { %882 = vmatpush.bf16.msrb.mxu1 %v1439_v37  ;;  %v1558_v37 = vld [vmem:[%s1783_s29 + $0x264] sm:$0xf]  ;;  %v1339_v43 = vor.u32 %v1542_v33, %v1336_v36  ;;  %v1264_v46 = vld [vmem:[%s1783_s29 + $0x158] sm:$0xf0]  ;;  %v1540_v47 = vld [vmem:[%s1783_s29 + $0x1d4] sm:$0xf] }
  0x5c   : > { %896 = vmatpush.bf16.msrb.mxu2 %v1123_v38  ;;  %v1400_v38 = vld [vmem:[%s1783_s29 + $0x268] sm:$0xf0]  ;;  %v1392_v51 = vld [vmem:[%s1783_s29 + $0x258] sm:$0xf0]  ;;  %v1572_v52 = vld [vmem:[%s1783_s29 + $0x2d4] sm:$0xf] }
  0x5d   : > { %910 = vmatpush.bf16.msrb.mxu3 %v1187_v42  ;;  %v1275_v42 = vor.u32 %v1526_v31, %v1272_v32  ;;  %v1403_v44 = vor.u32 %v1558_v37, %v1400_v38  ;;  %v1456_v53 = vld [vmem:[%s1783_s29 + $0x2d8] sm:$0xf0]  ;;  %v1522_v57 = vld [vmem:[%s1783_s29 + $0x144] sm:$0xf]  ;;  %v1256_v59 = vld [vmem:[%s1783_s29 + $0x148] sm:$0xf0] }
  0x5e   : > { %869 = vmatpush.bf16.msrb.mxu0 %v1367_v48  ;;  %v1467_v48 = vor.u32 %v1574_v40, %v1464_v41  ;;  %v1538_v60 = vld [vmem:[%s1783_s29 + $0x1c4] sm:$0xf]  ;;  %v1384_v63 = vld [vmem:[%s1783_s29 + $0x248] sm:$0xf0]  ;;  %v1520_v4 = vld [vmem:[%s1783_s29 + $0x134] sm:$0xf] }
  0x5f   : > { %883 = vmatpush.bf16.msrb.mxu1 %v1431_v49  ;;  %v1328_v49 = vld [vmem:[%s1783_s29 + $0x1d8] sm:$0xf0]  ;;  %v1554_v62 = vld [vmem:[%s1783_s29 + $0x244] sm:$0xf]  ;;  %v1552_v10 = vld [vmem:[%s1783_s29 + $0x234] sm:$0xf] }
  0x60   : > { %897 = vmatpush.bf16.msrb.mxu2 %v1115_v50  ;;  %v1556_v50 = vld [vmem:[%s1783_s29 + $0x254] sm:$0xf]  ;;  %v1331_v55 = vor.u32 %v1540_v47, %v1328_v49  ;;  %v1570_v0 = vld [vmem:[%s1783_s29 + $0x2c4] sm:$0xf]  ;;  %v1387_v3 = vor.u32 %v1554_v62, %v1384_v63  ;;  %v1248_v6 = vld [vmem:[%s1783_s29 + $0x138] sm:$0xf0] }
  0x61   : > { %911 = vmatpush.bf16.msrb.mxu3 %v1179_v54  ;;  %v1267_v54 = vor.u32 %v1524_v45, %v1264_v46  ;;  %v1395_v56 = vor.u32 %v1556_v50, %v1392_v51  ;;  %v1312_v9 = vld [vmem:[%s1783_s29 + $0x1b8] sm:$0xf0]  ;;  %v1568_v13 = vld [vmem:[%s1783_s29 + $0x2b4] sm:$0xf]  ;;  %v1518_v18 = vld [vmem:[%s1783_s29 + $0x124] sm:$0xf] }
  0x62   : > { %870 = vmatpush.bf16.msrb.mxu0 %v1359_v61  ;;  %v1320_v61 = vld [vmem:[%s1783_s29 + $0x1c8] sm:$0xf0]  ;;  %v1376_v12 = vld [vmem:[%s1783_s29 + $0x238] sm:$0xf0]  ;;  %v1550_v24 = vld [vmem:[%s1783_s29 + $0x224] sm:$0xf] }
  0x63   : > { %884 = vmatpush.bf16.msrb.mxu1 %v1423_v1  ;;  %v1259_v1 = vor.u32 %v1522_v57, %v1256_v59  ;;  %v1440_v14 = vld [vmem:[%s1783_s29 + $0x2b8] sm:$0xf0]  ;;  %v1379_v17 = vor.u32 %v1552_v10, %v1376_v12  ;;  %v1304_v22 = vld [vmem:[%s1783_s29 + $0x1a8] sm:$0xf0]  ;;  %v1516_v31 = vld [vmem:[%s1783_s29 + $0x114] sm:$0xf] }
  0x64   : > { %898 = vmatpush.bf16.msrb.mxu2 %v1107_v2  ;;  %v1323_v2 = vor.u32 %v1538_v60, %v1320_v61  ;;  %v1443_v21 = vor.u32 %v1568_v13, %v1440_v14  ;;  %v1432_v27 = vld [vmem:[%s1783_s29 + $0x2a8] sm:$0xf0]  ;;  %v1232_v32 = vld [vmem:[%s1783_s29 + $0x118] sm:$0xf0]  ;;  %v1532_v33 = vld [vmem:[%s1783_s29 + $0x194] sm:$0xf] }
  0x65   : > { %912 = vmatpush.bf16.msrb.mxu3 %v1171_v7  ;;  %v1536_v7 = vld [vmem:[%s1783_s29 + $0x1b4] sm:$0xf]  ;;  %v1296_v36 = vld [vmem:[%s1783_s29 + $0x198] sm:$0xf0]  ;;  %v1514_v45 = vld [vmem:[%s1783_s29 + $0x104] sm:$0xf] }
  0x66   : > { %871 = vmatpush.bf16.msrb.mxu0 %v1351_v15  ;;  %v1251_v15 = vor.u32 %v1520_v4, %v1248_v6  ;;  %v1315_v16 = vor.u32 %v1536_v7, %v1312_v9  ;;  %v1548_v37 = vld [vmem:[%s1783_s29 + $0x214] sm:$0xf]  ;;  %v1360_v38 = vld [vmem:[%s1783_s29 + $0x218] sm:$0xf0]  ;;  %v1224_v46 = vld [vmem:[%s1783_s29 + $0x108] sm:$0xf0] }
  0x67   : > { %885 = vmatpush.bf16.msrb.mxu1 %v1415_v19  ;;  %v1240_v19 = vld [vmem:[%s1783_s29 + $0x128] sm:$0xf0]  ;;  %v1564_v40 = vld [vmem:[%s1783_s29 + $0x294] sm:$0xf]  ;;  %v1424_v41 = vld [vmem:[%s1783_s29 + $0x298] sm:$0xf0] }
  0x68   : > { %899 = vmatpush.bf16.msrb.mxu2 %v1099_v20  ;;  %v1534_v20 = vld [vmem:[%s1783_s29 + $0x1a4] sm:$0xf]  ;;  %v1243_v28 = vor.u32 %v1518_v18, %v1240_v19  ;;  %v1288_v49 = vld [vmem:[%s1783_s29 + $0x188] sm:$0xf0] }
  0x69   : > { %913 = vmatpush.bf16.msrb.mxu3 %v1163_v25  ;;  %872 = vmatmul.bf16.vlgmr.msrb.gmra.mxu0 %v1976_v35  ;;  %v1368_v25 = vld [vmem:[%s1783_s29 + $0x228] sm:$0xf0]  ;;  %v1530_v47 = vld [vmem:[%s1783_s29 + $0x184] sm:$0xf] }
  0x6a   : > { %920 = vmatpush.bf16.msra.mxu0 %v1283_v26  ;;  %886 = vmatmul.bf16.vlgmr.msrb.gmra.mxu1 %v1981_v39  ;;  %v1566_v26 = vld [vmem:[%s1783_s29 + $0x2a4] sm:$0xf]  ;;  %v1352_v51 = vld [vmem:[%s1783_s29 + $0x208] sm:$0xf0] }
  0x6b   : > { %934 = vmatpush.bf16.msra.mxu1 %v1347_v29  ;;  %900 = vmatmul.bf16.vlgmr.msrb.gmra.mxu2 %v1878_v58  ;;  %v1459_v58 = vor.u32 %v1572_v52, %v1456_v53  ;;  %v1307_v29 = vor.u32 %v1534_v20, %v1304_v22  ;;  %v1546_v50 = vld [vmem:[%s1783_s29 + $0x204] sm:$0xf]  ;;  %v1416_v53 = vld [vmem:[%s1783_s29 + $0x288] sm:$0xf0] }
  0x6c   : > { %948 = vmatpush.bf16.msra.mxu2 %v1411_v30  ;;  %914 = vmatmul.bf16.vlgmr.msrb.gmra.mxu3 %v1892_v5  ;;  %v1448_v5 = vld [vmem:[%s1783_s29 + $0x2c8] sm:$0xf0]  ;;  %v1371_v30 = vor.u32 %v1550_v24, %v1368_v25  ;;  %v1562_v52 = vld [vmem:[%s1783_s29 + $0x284] sm:$0xf]  ;;  %s1091_s29 = sshll.u32 %s1731_s16, 1 }
  0x6d   : > { %962 = vmatpush.bf16.msra.mxu3 %v1475_v34  ;;  %v1451_v8 = vor.u32 %v1570_v0, %v1448_v5  ;;  %v1435_v34 = vor.u32 %v1566_v26, %v1432_v27  ;;  %v1419_v57 = vor.u32 %v1562_v52, %v1416_v53  ;;  %p203_p7 = scmp.lt.s32.totalorder %s1091_s29, 17 }
  0x6e   : > { %921 = vmatpush.bf16.msra.mxu0 %v1275_v42  ;;  %v1235_v42 = vor.u32 %v1516_v31, %v1232_v32 }
  0x6f   : > { %935 = vmatpush.bf16.msra.mxu1 %v1339_v43  ;;  %v1299_v43 = vor.u32 %v1532_v33, %v1296_v36  ;;  %s2087_s29 = smov (!%p203_p7, %s1091_s29), 17 }
  0x70   : > { %949 = vmatpush.bf16.msra.mxu2 %v1403_v44  ;;  %v1363_v44 = vor.u32 %v1548_v37, %v1360_v38  ;;  %s205_s7 = scalar_lea.vmem %s2077_s2, %s2087_s29 }
  0x71   : > { %963 = vmatpush.bf16.msra.mxu3 %v1467_v48  ;;  %v1427_v48 = vor.u32 %v1564_v40, %v1424_v41  ;;  %v322_v59 = vld [vmem:[%s205_s7] sm:$0x3] }
  0x72   : > { %922 = vmatpush.bf16.msra.mxu0 %v1267_v54  ;;  %v1227_v54 = vor.u32 %v1514_v45, %v1224_v46  ;;  %v325_v19 = vperm.slane %v322_v59, 1 }
  0x73   : > { %936 = vmatpush.bf16.msra.mxu1 %v1331_v55  ;;  %v1291_v55 = vor.u32 %v1530_v47, %v1288_v49 }
  0x74   : > { %950 = vmatpush.bf16.msra.mxu2 %v1395_v56  ;;  %v1355_v56 = vor.u32 %v1546_v50, %v1352_v51 }
  0x75   : > { %964 = vmatpush.bf16.msra.mxu3 %v1459_v58  ;;  %v324_v58 = vperm.slane %v322_v59, 0 }
  0x76   : > { %923 = vmatpush.bf16.msra.mxu0 %v1259_v1 }
  0x77   : > { %937 = vmatpush.bf16.msra.mxu1 %v1323_v2 }
  0x78   : > { %951 = vmatpush.bf16.msra.mxu2 %v1387_v3 }
  0x79   : > { %965 = vmatpush.bf16.msra.mxu3 %v1451_v8 }
  0x7a   : > { %924 = vmatpush.bf16.msra.mxu0 %v1251_v15 }
  0x7b   : > { %938 = vmatpush.bf16.msra.mxu1 %v1315_v16 }
  0x7c   : > { %952 = vmatpush.bf16.msra.mxu2 %v1379_v17 }
  0x7d   : > { %966 = vmatpush.bf16.msra.mxu3 %v1443_v21 }
  0x7e   : > { %925 = vmatpush.bf16.msra.mxu0 %v1243_v28 }
  0x7f   : > { %939 = vmatpush.bf16.msra.mxu1 %v1307_v29 }
  0x80   : > { %953 = vmatpush.bf16.msra.mxu2 %v1371_v30 }
  0x81   : > { %967 = vmatpush.bf16.msra.mxu3 %v1435_v34 }
  0x82   : > { %926 = vmatpush.bf16.msra.mxu0 %v1235_v42 }
  0x83   : > { %940 = vmatpush.bf16.msra.mxu1 %v1299_v43 }
  0x84   : > { %954 = vmatpush.bf16.msra.mxu2 %v1363_v44 }
  0x85   : > { %968 = vmatpush.bf16.msra.mxu3 %v1427_v48 }
  0x86   : > { %927 = vmatpush.bf16.msra.mxu0 %v1227_v54 }
  0x87   : > { %941 = vmatpush.bf16.msra.mxu1 %v1291_v55 }
  0x88   : > { %955 = vmatpush.bf16.msra.mxu2 %v1355_v56 }
  0x89   : > { %969 = vmatpush.bf16.msra.mxu3 %v1419_v57  ;;  %928 = vmatmul.bf16.vlgmr.msra.gmra.mxu0 %v1902_v11 }
  0x8a   : > { %942 = vmatmul.bf16.vlgmr.msra.gmra.mxu1 %v1918_v23 }
  0x8b   : > { %956 = vmatmul.bf16.vlgmr.msra.gmra.mxu2 %v1976_v35 }
  0x8c   : > { %970 = vmatmul.bf16.vlgmr.msra.gmra.mxu3 %v1981_v39 }
  0xc6   : > { %v817_v60 = vpop.f32.mrf.mxu0 }
  0xc7   : > { %v831_v61 = vpop.f32.mrf.mxu1  ;;  %v818_v62 = vadd.f32 %v817_v60, %v324_v58 }
  0xc9   : > { %v832_v63 = vadd.f32 %v831_v61, %v818_v62 }
  0xce   : > { %v845_v11 = vpop.f32.mrf.mxu2  ;;  %v819_v23 = vpop.f32.mrf.mxu0 }
  0xcf   : > { %v833_v0 = vpop.f32.mrf.mxu1  ;;  %v859_v35 = vpop.f32.mrf.mxu3  ;;  %v820_v5 = vadd.f32 %v819_v23, %v324_v58  ;;  %v846_v39 = vadd.f32 %v845_v11, %v832_v63 }
  0xd1   : > { %v834_v1 = vadd.f32 %v833_v0, %v820_v5  ;;  %v860_v2 = vadd.f32 %v859_v35, %v846_v39 }
  0xd6   : > { %v847_v3 = vpop.f32.mrf.mxu2 }
  0xd7   : > { %v848_v8 = vadd.f32 %v847_v3, %v834_v1  ;;  %v861_v9 = vpop.f32.mrf.mxu3 }
  0xd9   : > { %v862_v12 = vadd.f32 %v861_v9, %v848_v8 }
  0xe6   : > { %v873_v4 = vpop.f32.mrf.mxu0 }
  0xe7   : > { %v874_v6 = vadd.f32 %v873_v4, %v860_v2  ;;  %v887_v7 = vpop.f32.mrf.mxu1 }
  0xe9   : > { %v888_v10 = vadd.f32 %v887_v7, %v874_v6 }
  0xeb   : > { %976 = vst [vmem:[%s2046_s9] sm:$0xff] %v888_v10 }
  0xee   : > { %v875_v13 = vpop.f32.mrf.mxu0  ;;  %v901_v17 = vpop.f32.mrf.mxu2 }
  0xef   : > { %v876_v14 = vadd.f32 %v875_v13, %v862_v12  ;;  %v889_v15 = vpop.f32.mrf.mxu1  ;;  %v915_v18 = vpop.f32.mrf.mxu3  ;;  %v902_v20 = vadd.f32 %v901_v17, %v325_v19 }
  0xf1   : > { %v890_v16 = vadd.f32 %v889_v15, %v876_v14  ;;  %v916_v22 = vadd.f32 %v915_v18, %v902_v20 }
  0xf2   : > { %v1002_v45 = vld [vmem:[%s2046_s9] sm:$0xff] (%p1753_p9) }
  0xf3   : > { %978 = vst [vmem:[%s2046_s9 + $0x10] sm:$0xff] %v890_v16 }
  0xf4   : > { %1003 = vst [vmem:[%s989_s12] sm:$0xff] (%p1753_p9), %v1002_v45 }
  0xf6   : > { %v903_v21 = vpop.f32.mrf.mxu2 }
  0xf7   : > { %v917_v24 = vpop.f32.mrf.mxu3  ;;  %v904_v28 = vadd.f32 %v903_v21, %v325_v19 }
  0xf9   : > { %v918_v31 = vadd.f32 %v917_v24, %v904_v28 }
  0xfa   : > { %v1006_v47 = vld [vmem:[%s2046_s9 + $0x10] sm:$0xff] (%p1753_p9) }
  0xfb   : > { %1007 = vst [vmem:[%s989_s12 + $0x90] sm:$0xff] (%p1753_p9), %v1006_v47 }
 0x106   : > { %v929_v25 = vpop.f32.mrf.mxu0 }
 0x107   : > { %v930_v26 = vadd.f32 %v929_v25, %v916_v22  ;;  %v943_v27 = vpop.f32.mrf.mxu1 }
 0x109   : > { %v944_v29 = vadd.f32 %v943_v27, %v930_v26 }
 0x10e   : > { %v957_v30 = vpop.f32.mrf.mxu2  ;;  %v931_v34 = vpop.f32.mrf.mxu0 }
 0x10f   : > { %v958_v32 = vadd.f32 %v957_v30, %v944_v29  ;;  %v971_v33 = vpop.f32.mrf.mxu3  ;;  %v932_v37 = vadd.f32 %v931_v34, %v918_v31  ;;  %v945_v38 = vpop.f32.mrf.mxu1 }
 0x111   : > { %v972_v36 = vadd.f32 %v971_v33, %v958_v32  ;;  %v946_v40 = vadd.f32 %v945_v38, %v932_v37 }
 0x113   : > { %977 = vst [vmem:[%s2046_s9 + $0x8] sm:$0xff] %v972_v36 }
 0x116   : > { %v959_v41 = vpop.f32.mrf.mxu2 }
 0x117   : > { %v960_v42 = vadd.f32 %v959_v41, %v946_v40  ;;  %v973_v43 = vpop.f32.mrf.mxu3  ;;  %986 = sbr.rel (!%p1753_p9) target bundleno = 292 (0x124), region = 40 }
 0x119   : > { %v974_v44 = vadd.f32 %v973_v43, %v960_v42 }
 0x11a   : > { %v1004_v46 = vld [vmem:[%s2046_s9 + $0x8] sm:$0xff] (%p1753_p9) }
 0x11b   : > { %979 = vst [vmem:[%s2046_s9 + $0x18] sm:$0xff] %v974_v44 }
 0x11c   : > { %1005 = vst [vmem:[%s989_s12 + $0x8] sm:$0xff] %v1004_v46 }
 0x122   : > { %v1008_v48 = vld [vmem:[%s2046_s9 + $0x18] sm:$0xff] }
 0x123   : > { %1009 = vst [vmem:[%s989_s12 + $0x98] sm:$0xff] %v1008_v48 }
 0x124 PF: > { %p13_p9 = scmp.ge.s32.totalorder %s1734_s17, 11   ;;  %s2082_s12 = smov %s1679_s13 }
 0x125   : > { %s2083_s13 = smov %s1683_s14  ;;  %s2084_s14 = smov %s1744_s20 }
 0x126   : > { %s2085_s15 = smov %s1734_s17  ;;  %15 = sbr.rel (!%p13_p9) target bundleno = 3 (0x3), region = 98 }
 0x12b   :  { %1025 = vsyncpa [#allocation3], 1 }
 0x12c   :  { %1027 = vsyncpa [#allocation3 + $0x1], 1 }

// kernel: category_transformer_forward.26
= control target key start
LH: loop header
LB: loop body
LE: loop exit
PB: predicated region body
PF: predicated region fallthrough
CT: control target
= control target key end

     0   :  { %7 = vsyncpa [#allocation3], 0  ;;  %s1652_s0 = inlined_call_operand.vmem [shape: f32[2,8,2304], index: 0, kind: input, shape index: {}]   ;;  %s1653_s1 = inlined_call_operand.hbm [shape: s32[2,1,8], index: 1, kind: input, shape index: {}]   ;;  %s1654_s2 = inlined_call_operand.vmem [shape: f32[2,8,768], index: 2, kind: output, shape index: {}]  }
   0x1   :  { %9 = vsyncpa [#allocation3 + $0x1], 0  ;;  %s1329_s9 = smov 0   ;;  %s1331_s10 = smov 0  }
   0x2   :  { %s1333_s11 = smov 0   ;;  %s1335_s12 = smov 0  }
   0x3 LB: > { %s1348_s13 = sadd.s32 4294967295, %s1310_s12   ;;  %s1351_s14 = sadd.s32 1, %s1310_s12   ;;  %s1310_s12 = sphi %s1335_s12, %s1660_s12   ;;  %s1306_s11 = sphi %s1333_s11, %s1659_s11   ;;  %s1302_s10 = sphi %s1331_s10, %s1658_s10   ;;  %s1298_s9 = sphi %s1329_s9, %s1657_s9  }
   0x4   : > { %s45_s15 = ssub.s32 %s1310_s12, %s1351_s14  ;;  %s48_s16 = sadd.s32 1, %s1306_s11 }
   0x5   : > { %p46_p0 = scmp.eq.s32.totalorder %s45_s15, 0  ;;  %p55_p1 = scmp.ne.s32.totalorder %s1306_s11, %s1302_s10 }
   0x6   : > { %p56_p2 = scmp.eq.s32.totalorder %s1310_s12, 0  ;;  %p61_p3 = scmp.ne.s32.totalorder %s1302_s10, %s1298_s9 }
   0x7   : > { %s1361_s17 = scalar_select %p46_p0, %s1306_s11, %s48_s16  }
   0x8   : > { %p57_p4 = por %p56_p2, %p55_p1  ;;  %p62_p5 = scmp.eq.s32.totalorder %s1348_s13, 0 }
   0x9   : > { %p1148_p6 = scmp.lt.s32.totalorder %s1310_s12, 2  ;;  %s119_s19 = sand.u32 1, %s1306_s11  }
   0xa   : > { %p1365_p7 = por %p62_p5, %p61_p3  ;;  %s125_s22 = scalar_lea.hbm %s1653_s1, %s1310_s12 }
   0xb   : > { %s122_s23 = scalar_lea.vmem [#allocation2], %s119_s19  ;;  %s127_s25 = sshll.u32 %s125_s22, 4  ;;  %s128_s25 = int_to_ptr.hbm [resolvable:$true] %s127_s25 }
   0xc   : > { %s129_s24 = sshll.u32 %s122_s23, 4  ;;  %p1374_p8 = pnand %p1148_p6, %p57_p4  ;;  %s130_s24 = int_to_ptr.vmem [resolvable:$true] %s129_s24 }
   0xd   : > { %p1099_p9 = scmp.ge.s32.totalorder %s1310_s12, 1  ;;  %p134_p10 = scmp.lt.s32.totalorder %s1310_s12, 3 }
   0xe   : > { %s120_s27 = scalar_lea.sflag [#allocation3], %s119_s19  ;;  %s1246_s28 = sshra.s32 %s128_s25, 4  ;;  %s1247_s28 = int_to_ptr.hbm [resolvable:$true] %s1246_s28 }
   0xf   : > { %s1248_s29 = scalar_lea.hbm %s1247_s28, 1  ;;  %p1250_p12 = pneg %p1374_p8 }
  0x10   : > { %p1249_p11 = scmp.ne.s32.totalorder %s1247_s28, %s1248_s29  ;;  %s1253_s4 = scalar_lea.hbm %s1653_s1, 2 }
  0x11   : > { %p1254_p1 = scmp.lt.s32.totalorder %s1247_s28, %s1653_s1  ;;  %p1255_p2 = scmp.lt.s32.totalorder %s1253_s4, %s1248_s29 }
  0x12   : > { %p1251_p13 = pnand %p1250_p12, %p1249_p11 }
  0x13   : > { %p1256_p3 = por %p1255_p2, %p1254_p1 }
  0x14   : > { %p1252_p0 = pneg %p1251_p13 }
  0x16   : > { %p1257_p4 = pnand %p1256_p3, %p1252_p0 }
  0x18   : > { %1260 = shalt.err (!%p1257_p4)
}
  0x19   : > { %1147 = dma.hbm_to_vmem [thread:$0]  (!%p1374_p8), %s128_s25, 16, %s130_s24, %s120_s27  }
  0x1a   : > { %p135_p5 = pnand %p1099_p9, %p134_p10 }
  0x1b   : > { %s140_s7 = sand.u32 (!%p135_p5), 1, %s1302_s10  }
  0x1c   : > { %138 = sbr.rel (%p135_p5) target bundleno = 1103 (0x44f), region = 28  ;;  %s141_s8 = scalar_lea.sflag (!%p135_p5), [#allocation3], %s140_s7 }
  0x1d   : > { %s143_s9 = scalar_lea.vmem (!%p135_p5), [#allocation2], %s140_s7 }
  0x21   : > { %1293 = dma.done.wait (%p1365_p7), %s141_s8, 16  }
  0x22   : > { %1295 = vsyncadd (%p1365_p7), %s141_s8, 4294967280  ;;  %p169_p6 = scmp.lt.s32.totalorder %s1348_s13, 1  ;;  %vm200_vm0 = vcmask 523264   ;;  %s1312_s18 = smov 64   ;;  %v197_v3 = vld [vmem:[%s143_s9] sm:$0x1] }
  0x23   : > { %vm198_vm1 = vcmp.gt.s32.totalorder %v197_v3, 0  ;;  %v1313_v5 = vmov -1e+09   ;;  %vm232_vm2 = vcmask 64512  }
  0x24   : > { %s1662_s13 = smov (!%p169_p6, %s1348_s13), 1  ;;  %v199_v6 = vsel %vm198_vm1, 0.0, %v1313_v5 }
  0x25   : > { %s1140_s15 = smul.u32 144, %s1662_s13  ;;  %v1423_v7 = vperm.slane %v199_v6, 0 }
  0x26   : > { %s1141_s20 = smul.u32 48, %s1662_s13 }
  0x27   : > { %s1407_s19 = scalar_lea.vmem %s1652_s0, %s1140_s15 }
  0x28   : > { %v185_v0 = vld [vmem:[%s1407_s19 + $0x30] sm:$0xff]  ;;  %v179_v1 = vld [vmem:[%s1407_s19] sm:$0xff]  ;;  %v1414_v2 = vld [vmem:[%s1407_s19 + $0x8] sm:$0xff]  ;;  %s178_s23 = scalar_lea.vmem %s1654_s2, %s1141_s20 }
  0x29   : > { %1102 = vmatpush.xpose.msk.msra.mxu0 %vm200_vm0, %v185_v0  ;;  %397 = vrot.lane.b32.xlu1 %v1414_v2, %s1312_s18  ;;  %v1419_v4 = vld [vmem:[%s1407_s19 + $0x40] sm:$0xff]  ;;  %v1428_v12 = vld [vmem:[%s1407_s19 + $0x18] sm:$0xff]  ;;  %v1431_v13 = vld [vmem:[%s1407_s19 + $0x10] sm:$0xff] }
  0x2a   : > { %527 = vrot.lane.b32.xlu2 %v1431_v13, %s1312_s18  ;;  %v189_v14 = vld [vmem:[%s1407_s19 + $0x50] sm:$0xff]  ;;  %v188_v15 = vld [vmem:[%s1407_s19 + $0x48] sm:$0xff]  ;;  %v186_v16 = vld [vmem:[%s1407_s19 + $0x38] sm:$0xff] }
  0x2b   : > { %v1443_v17 = vld [vmem:[%s1407_s19 + $0x20] sm:$0xff]  ;;  %v190_v18 = vld [vmem:[%s1407_s19 + $0x58] sm:$0xff]  ;;  %v1453_v19 = vld [vmem:[%s1407_s19 + $0x28] sm:$0xff] }
  0x2c   : > { %1103 = vmatmul.msk.f32.vlgmr.msra.gmra.mxu0 %vm200_vm0, %v179_v1  ;;  %v1471_v37 = vld [vmem:[%s1407_s19 + $0x60] sm:$0xff] }
  0x2d   : > { %262 = vmatpush.msra.mxu1 %v1471_v37 }
  0x2f   : > { %1108 = vmatpush.xpose.msk.msrb.mxu1 %vm200_vm0, %v186_v16 }
  0x31   : > { %529 = vrot.lane.b32.xlu1 %v1419_v4, %s1312_s18 }
  0x32   : > { %659 = vrot.lane.b32.xlu2 %v188_v15, %s1312_s18 }
  0x39   : > { %657 = vrot.lane.b32.xlu1 %v1428_v12, %s1312_s18 }
  0x41   : > { %789 = vrot.lane.b32.xlu1 %v189_v14, %s1312_s18 }
  0x49   : > { %787 = vrot.lane.b32.xlu1 %v1443_v17, %s1312_s18 }
  0x51   : > { %919 = vrot.lane.b32.xlu1 %v190_v18, %s1312_s18 }
  0x84   : > { %v528_v28 = vpop.permute.xlu2 %527 }
  0x8c   : > { %v660_v31 = vpop.permute.xlu2 %659 }
  0x9b   : > { %v398_v20 = vpop.permute.xlu1 %397 }
  0xa3   : > { %v530_v21 = vpop.permute.xlu1 %529 }
  0xa9   : > { %v224_v8 = vpop.f32.mrf.mxu0 }
  0xaa   : > { %v227_v9 = vmul.f32 0.125, %v224_v8 }
  0xab   : > { %v658_v25 = vpop.permute.xlu1 %657 }
  0xac   : > { %v231_v10 = vadd.f32 %v1423_v7, %v227_v9 }
  0xae   : > { %v233_v11 = vsel %vm232_vm2, %v231_v10, -inf }
  0xaf   : > { %234 = vmax.xlane.f32.xlu0 %v233_v11 }
  0xb3   : > { %v790_v29 = vpop.permute.xlu1 %789 }
  0xbb   : > { %v788_v33 = vpop.permute.xlu1 %787 }
  0xc3   : > { %399 = vrot.lane.b32.xlu0 %v186_v16, %s1312_s18  ;;  %v920_v35 = vpop.permute.xlu1 %919 }
  0xcb   : > { %269 = vrot.lane.b32.xlu0 %v185_v0, %s1312_s18 }
  0xd3   : > { %267 = vrot.lane.b32.xlu0 %v179_v1, %s1312_s18 }
  0xdb   : > { %917 = vrot.lane.b32.xlu0 %v1453_v19, %s1312_s18 }
 0x122   : > { %v235_v22 = vpop.xlane.xlu0 %234 }
 0x123   : > { %v236_v23 = vsub.f32 %v231_v10, %v235_v22 }
 0x125   : > { %v237_v24 = vmul.f32 1.442695, %v236_v23 }
 0x127   : > { %1198 = vpow2.f32 %v237_v24  ;;  %v1527_v24 = vld [vmem:[%s1407_s19 + $0x68] sm:$0xff] }
 0x12d   : > { %v1199_v26 = vpop.eup %1198 }
 0x12e   : > { %v239_v27 = vsel %vm232_vm2, %v1199_v26, 0.0 }
 0x12f   : > { %240 = vadd.xlane.f32.xlu2 %v239_v27 }
 0x135   : > { %v400_v30 = vpop.permute.xlu0 %399 }
 0x136   : > { %1111 = vmatpush.xpose.msk.msrb.mxu0 %vm200_vm0, %v400_v30 }
 0x139   : > { %1112 = vmatmul.msk.f32.vlgmr.msrb.gmra.mxu0 %vm200_vm0, %v398_v20 }
 0x13a   : > { %1117 = vmatpush.xpose.msk.msra.mxu0 %vm200_vm0, %v530_v21 }
 0x13d   : > { %v270_v32 = vpop.permute.xlu0 %269 }
 0x13e   : > { %1123 = vmatpush.xpose.msk.msrb.mxu0 %vm200_vm0, %v660_v31  ;;  %1105 = vmatpush.xpose.msk.msra.mxu2 %vm200_vm0, %v270_v32 }
 0x141   : > { %1118 = vmatmul.msk.f32.vlgmr.msra.gmra.mxu0 %vm200_vm0, %v528_v28 }
 0x142   : > { %1129 = vmatpush.xpose.msk.msra.mxu0 %vm200_vm0, %v790_v29 }
 0x145   : > { %v268_v34 = vpop.permute.xlu0 %267 }
 0x146   : > { %1106 = vmatmul.msk.f32.vlgmr.msra.gmra.mxu2 %vm200_vm0, %v268_v34 }
 0x149   : > { %1124 = vmatmul.msk.f32.vlgmr.msrb.gmra.mxu0 %vm200_vm0, %v658_v25  ;;  %v1530_v25 = vld [vmem:[%s1407_s19 + $0x70] sm:$0xff] }
 0x14a   : > { %1135 = vmatpush.xpose.msk.msrb.mxu0 %vm200_vm0, %v920_v35  ;;  %v1183_v30 = vpack.i.bf16 %v1530_v25, %v1527_v24 }
 0x14d   : > { %v918_v36 = vpop.permute.xlu0 %917 }
 0x151   : > { %1130 = vmatmul.msk.f32.vlgmr.msra.gmra.mxu0 %vm200_vm0, %v788_v33 }
 0x159   : > { %1136 = vmatmul.msk.f32.vlgmr.msrb.gmra.mxu0 %vm200_vm0, %v918_v36 }
 0x1a2   : > { %v241_v38 = vpop.xlane.xlu2 %240 }
 0x1a3   : > { %1200 = vrcp.f32 %v241_v38 }
 0x1a9   : > { %v1201_v39 = vpop.eup %1200 }
 0x1aa   : > { %v243_v40 = vmul.f32 %v1201_v39, %v1199_v26 }
 0x1ac   : > { %1104 = vmatmul.msk.f32.vlgmr.msra.gmra.mxu1 %vm232_vm2, %v243_v40 }
 0x1ad   : > { %1114 = vmatpush.xpose.msk.msra.mxu1 %vm200_vm0, %v1419_v4 }
 0x1b4   : > { %1109 = vmatmul.msk.f32.vlgmr.msrb.gmra.mxu1 %vm200_vm0, %v1414_v2 }
 0x1b5   : > { %1120 = vmatpush.xpose.msk.msrb.mxu1 %vm200_vm0, %v188_v15 }
 0x1b6   : > { %v422_v41 = vpop.f32.mrf.mxu0 }
 0x1b7   : > { %v425_v42 = vmul.f32 0.125, %v422_v41 }
 0x1b9   : > { %v426_v43 = vadd.f32 %v425_v42, %v1423_v7 }
 0x1bb   : > { %v427_v44 = vsel %vm232_vm2, %v426_v43, -inf }
 0x1bc   : > { %1115 = vmatmul.msk.f32.vlgmr.msra.gmra.mxu1 %vm200_vm0, %v1431_v13  ;;  %428 = vmax.xlane.f32.xlu1 %v427_v44 }
 0x1bd   : > { %1126 = vmatpush.xpose.msk.msra.mxu1 %vm200_vm0, %v189_v14 }
 0x1be   : > { %v552_v45 = vpop.f32.mrf.mxu0 }
 0x1bf   : > { %v555_v46 = vmul.f32 0.125, %v552_v45 }
 0x1c1   : > { %v556_v47 = vadd.f32 %v555_v46, %v1423_v7 }
 0x1c3   : > { %v557_v48 = vsel %vm232_vm2, %v556_v47, -inf }
 0x1c4   : > { %1121 = vmatmul.msk.f32.vlgmr.msrb.gmra.mxu1 %vm200_vm0, %v1428_v12  ;;  %558 = vmax.xlane.f32.xlu0 %v557_v48 }
 0x1c5   : > { %1132 = vmatpush.xpose.msk.msrb.mxu1 %vm200_vm0, %v190_v18 }
 0x1c6   : > { %v682_v49 = vpop.f32.mrf.mxu0 }
 0x1c7   : > { %v685_v53 = vmul.f32 0.125, %v682_v49 }
 0x1c9   : > { %v292_v50 = vpop.f32.mrf.mxu2  ;;  %v686_v56 = vadd.f32 %v685_v53, %v1423_v7  ;;  %v1557_v53 = vld [vmem:[%s1407_s19 + $0x78] sm:$0xff] }
 0x1ca   : > { %v295_v51 = vmul.f32 0.125, %v292_v50 }
 0x1cb   : > { %v687_v57 = vsel %vm232_vm2, %v686_v56, -inf }
 0x1cc   : > { %1127 = vmatmul.msk.f32.vlgmr.msra.gmra.mxu1 %vm200_vm0, %v1443_v17  ;;  %v1494_v52 = vadd.f32 %v295_v51, %v1423_v7 }
 0x1ce   : > { %v297_v54 = vsel %vm232_vm2, %v1494_v52, -inf  ;;  %v812_v55 = vpop.f32.mrf.mxu0 }
 0x1cf   : > { %298 = vmax.xlane.f32.xlu2 %v297_v54  ;;  %v815_v58 = vmul.f32 0.125, %v812_v55  ;;  %v1560_v54 = vld [vmem:[%s1407_s19 + $0x80] sm:$0xff] }
 0x1d1   : > { %v816_v59 = vadd.f32 %v815_v58, %v1423_v7 }
 0x1d3   : > { %v817_v61 = vsel %vm232_vm2, %v816_v59, -inf }
 0x1d4   : > { %1133 = vmatmul.msk.f32.vlgmr.msrb.gmra.mxu1 %vm200_vm0, %v1453_v19 }
 0x1d6   : > { %v942_v60 = vpop.f32.mrf.mxu0 }
 0x1d7   : > { %688 = vmax.xlane.f32.xlu2 %v687_v57  ;;  %v945_v62 = vmul.f32 0.125, %v942_v60 }
 0x1d9   : > { %v946_v63 = vadd.f32 %v945_v62, %v1423_v7 }
 0x1db   : > { %v947_v0 = vsel %vm232_vm2, %v946_v63, -inf }
 0x1df   : > { %818 = vmax.xlane.f32.xlu2 %v817_v61 }
 0x1e7   : > { %948 = vmax.xlane.f32.xlu2 %v947_v0 }
 0x229   : > { %v1506_v1 = vpop.f32.mrf.mxu1 }
 0x22f   : > { %v429_v2 = vpop.xlane.xlu1 %428 }
 0x230   : > { %v430_v3 = vsub.f32 %v426_v43, %v429_v2 }
 0x231   : > { %v358_v4 = vpop.f32.mrf.mxu1 }
 0x232   : > { %v431_v5 = vmul.f32 1.442695, %v430_v3  ;;  %v361_v6 = vmul.f32 0.125, %v358_v4 }
 0x234   : > { %1202 = vpow2.f32 %v431_v5  ;;  %v1509_v8 = vadd.f32 %v361_v6, %v1423_v7 }
 0x236   : > { %v363_v9 = vsel %vm232_vm2, %v1509_v8, -inf }
 0x237   : > { %364 = vmax.xlane.f32.xlu2 %v363_v9  ;;  %v559_v10 = vpop.xlane.xlu0 %558 }
 0x238   : > { %v560_v11 = vsub.f32 %v556_v47, %v559_v10 }
 0x239   : > { %v488_v12 = vpop.f32.mrf.mxu1 }
 0x23a   : > { %v1513_v13 = vpop.eup %1202  ;;  %v561_v14 = vmul.f32 1.442695, %v560_v11  ;;  %v491_v44 = vmul.f32 0.125, %v488_v12 }
 0x23b   : > { %v433_v15 = vsel %vm232_vm2, %v1513_v13, 0.0 }
 0x23c   : > { %1204 = vpow2.f32 %v561_v14  ;;  %434 = vadd.xlane.f32.xlu0 %v433_v15  ;;  %v1551_v48 = vadd.f32 %v491_v44, %v1423_v7  ;;  %v1581_v15 = vld [vmem:[%s1407_s19 + $0x88] sm:$0xff] }
 0x23e   : > { %v493_v50 = vsel %vm232_vm2, %v1551_v48, -inf }
 0x241   : > { %v618_v16 = vpop.f32.mrf.mxu1 }
 0x242   : > { %v1517_v17 = vpop.eup %1204  ;;  %v621_v18 = vmul.f32 0.125, %v618_v16  ;;  %v299_v19 = vpop.xlane.xlu2 %298 }
 0x243   : > { %v563_v20 = vsel %vm232_vm2, %v1517_v17, 0.0  ;;  %v300_v51 = vsub.f32 %v1494_v52, %v299_v19 }
 0x244   : > { %564 = vadd.xlane.f32.xlu1 %v563_v20  ;;  %v1522_v21 = vadd.f32 %v621_v18, %v1423_v7  ;;  %v1193_v20 = vpack.i.bf16 %v1581_v15, %v1471_v37 }
 0x245   : > { %v301_v57 = vmul.f32 1.442695, %v300_v51 }
 0x246   : > { %v623_v22 = vsel %vm232_vm2, %v1522_v21, -inf }
 0x247   : > { %624 = vmax.xlane.f32.xlu2 %v623_v22 }
 0x249   : > { %v748_v23 = vpop.f32.mrf.mxu1 }
 0x24a   : > { %v751_v26 = vmul.f32 0.125, %v748_v23  ;;  %v689_v27 = vpop.xlane.xlu2 %688 }
 0x24b   : > { %v690_v28 = vsub.f32 %v686_v56, %v689_v27  ;;  %v1188_v56 = vpack.i.bf16 %v1560_v54, %v1557_v53 }
 0x24c   : > { %v752_v29 = vadd.f32 %v751_v26, %v1423_v7 }
 0x24d   : > { %v691_v31 = vmul.f32 1.442695, %v690_v28 }
 0x24e   : > { %v753_v32 = vsel %vm232_vm2, %v752_v29, -inf }
 0x24f   : > { %1206 = vpow2.f32 %v691_v31  ;;  %754 = vmax.xlane.f32.xlu2 %v753_v32 }
 0x250   : > { %1184 = vrot.lane.b32.xlu0 %v1183_v30, %s1312_s18 }
 0x251   : > { %v878_v33 = vpop.f32.mrf.mxu1 }
 0x252   : > { %v881_v34 = vmul.f32 0.125, %v878_v33  ;;  %v819_v35 = vpop.xlane.xlu2 %818 }
 0x253   : > { %v820_v36 = vsub.f32 %v816_v59, %v819_v35 }
 0x254   : > { %v1538_v38 = vadd.f32 %v881_v34, %v1423_v7 }
 0x255   : > { %v1540_v39 = vpop.eup %1206  ;;  %v821_v40 = vmul.f32 1.442695, %v820_v36 }
 0x256   : > { %v883_v41 = vsel %vm232_vm2, %v1538_v38, -inf  ;;  %v693_v42 = vsel %vm232_vm2, %v1540_v39, 0.0 }
 0x257   : > { %1208 = vpow2.f32 %v821_v40  ;;  %884 = vmax.xlane.f32.xlu2 %v883_v41  ;;  %694 = vadd.xlane.f32.xlu1 %v693_v42 }
 0x25a   : > { %v949_v43 = vpop.xlane.xlu2 %948 }
 0x25b   : > { %v950_v46 = vsub.f32 %v946_v63, %v949_v43 }
 0x25d   : > { %v1546_v45 = vpop.eup %1208  ;;  %v951_v49 = vmul.f32 1.442695, %v950_v46 }
 0x25e   : > { %v823_v47 = vsel %vm232_vm2, %v1546_v45, 0.0 }
 0x25f   : > { %824 = vadd.xlane.f32.xlu1 %v823_v47  ;;  %1210 = vpow2.f32 %v951_v49 }
 0x260   : > { %1212 = vpow2.f32 %v301_v57 }
 0x265   : > { %v1562_v55 = vpop.eup %1210 }
 0x266   : > { %v953_v7 = vsel %vm232_vm2, %v1562_v55, 0.0  ;;  %v1569_v58 = vpop.eup %1212 }
 0x267   : > { %494 = vmax.xlane.f32.xlu1 %v493_v50  ;;  %v303_v52 = vsel %vm232_vm2, %v1569_v58, 0.0 }
 0x26f   : > { %954 = vadd.xlane.f32.xlu1 %v953_v7  ;;  %1189 = vrot.lane.b32.xlu2 %v1188_v56, %s1312_s18 }
 0x27a   : > { %304 = vadd.xlane.f32.xlu0 %v303_v52 }
 0x2aa   : > { %v365_v59 = vpop.xlane.xlu2 %364 }
 0x2ab   : > { %v366_v60 = vsub.f32 %v1509_v8, %v365_v59 }
 0x2ad   : > { %v367_v61 = vmul.f32 1.442695, %v366_v60 }
 0x2af   : > { %1214 = vpow2.f32 %v367_v61  ;;  %v435_v0 = vpop.xlane.xlu0 %434 }
 0x2b0   : > { %1216 = vrcp.f32 %v435_v0 }
 0x2b5   : > { %v1574_v62 = vpop.eup %1214 }
 0x2b6   : > { %v369_v63 = vsel %vm232_vm2, %v1574_v62, 0.0  ;;  %v1217_v4 = vpop.eup %1216 }
 0x2b7   : > { %370 = vadd.xlane.f32.xlu1 %v369_v63  ;;  %v565_v3 = vpop.xlane.xlu1 %564  ;;  %v437_v11 = vmul.f32 %v1217_v4, %v1513_v13 }
 0x2b8   : > { %1218 = vrcp.f32 %v565_v3 }
 0x2ba   : > { %v625_v2 = vpop.xlane.xlu2 %624 }
 0x2bb   : > { %v626_v41 = vsub.f32 %v1522_v21, %v625_v2 }
 0x2bd   : > { %v627_v42 = vmul.f32 1.442695, %v626_v41 }
 0x2be   : > { %v1219_v14 = vpop.eup %1218 }
 0x2bf   : > { %v567_v22 = vmul.f32 %v1219_v14, %v1517_v17 }
 0x2c2   : > { %v755_v5 = vpop.xlane.xlu2 %754  ;;  %v1185_v6 = vpop.permute.xlu0 %1184 }
 0x2c3   : > { %v756_v9 = vsub.f32 %v752_v29, %v755_v5  ;;  %v1187_v10 = vunpack.i.h.bf16 %v1185_v6  ;;  %v1186_v8 = vunpack.i.l.bf16 %v1185_v6 }
 0x2c5   : > { %v757_v12 = vmul.f32 1.442695, %v756_v9  ;;  %460 = vmatpush.msrb.mxu2 %v1186_v8 }
 0x2c6   : > { %1113 = vmatmul.msk.f32.vlgmr.msrb.gmra.mxu2 %vm232_vm2, %v437_v11 }
 0x2c7   : > { %1220 = vpow2.f32 %v757_v12  ;;  %590 = vmatpush.msra.mxu2 %v1187_v10 }
 0x2ca   : > { %v885_v16 = vpop.xlane.xlu2 %884  ;;  %v695_v18 = vpop.xlane.xlu1 %694 }
 0x2cb   : > { %v886_v19 = vsub.f32 %v1538_v38, %v885_v16  ;;  %1222 = vrcp.f32 %v695_v18 }
 0x2cd   : > { %v1587_v13 = vpop.eup %1220  ;;  %v887_v23 = vmul.f32 1.442695, %v886_v19 }
 0x2ce   : > { %1119 = vmatmul.msk.f32.vlgmr.msra.gmra.mxu2 %vm232_vm2, %v567_v22  ;;  %v759_v26 = vsel %vm232_vm2, %v1587_v13, 0.0 }
 0x2cf   : > { %1224 = vpow2.f32 %v887_v23  ;;  %760 = vadd.xlane.f32.xlu0 %v759_v26 }
 0x2d0   : > { %1194 = vrot.lane.b32.xlu1 %v1193_v20, %s1312_s18 }
 0x2d1   : > { %v1223_v27 = vpop.eup %1222 }
 0x2d2   : > { %v1190_v28 = vpop.permute.xlu2 %1189  ;;  %v825_v29 = vpop.xlane.xlu1 %824  ;;  %v697_v37 = vmul.f32 %v1223_v27, %v1540_v39 }
 0x2d3   : > { %v1192_v30 = vunpack.i.h.bf16 %v1190_v28  ;;  %v1191_v31 = vunpack.i.l.bf16 %v1190_v28  ;;  %1226 = vrcp.f32 %v825_v29 }
 0x2d5   : > { %v1594_v17 = vpop.eup %1224  ;;  %720 = vmatpush.msrb.mxu2 %v1191_v31 }
 0x2d6   : > { %1125 = vmatmul.msk.f32.vlgmr.msrb.gmra.mxu2 %vm232_vm2, %v697_v37  ;;  %v889_v32 = vsel %vm232_vm2, %v1594_v17, 0.0 }
 0x2d7   : > { %890 = vadd.xlane.f32.xlu0 %v889_v32  ;;  %850 = vmatpush.msra.mxu2 %v1192_v30 }
 0x2d9   : > { %v1227_v33 = vpop.eup %1226 }
 0x2da   : > { %v495_v34 = vpop.xlane.xlu1 %494  ;;  %v827_v36 = vmul.f32 %v1227_v33, %v1546_v45 }
 0x2db   : > { %v496_v35 = vsub.f32 %v1551_v48, %v495_v34 }
 0x2dd   : > { %v497_v38 = vmul.f32 1.442695, %v496_v35 }
 0x2de   : > { %1131 = vmatmul.msk.f32.vlgmr.msra.gmra.mxu2 %vm232_vm2, %v827_v36 }
 0x2df   : > { %1228 = vpow2.f32 %v497_v38 }
 0x2e0   : > { %1230 = vpow2.f32 %v627_v42 }
 0x2e2   : > { %v955_v46 = vpop.xlane.xlu1 %954 }
 0x2e3   : > { %1232 = vrcp.f32 %v955_v46 }
 0x2e5   : > { %v1229_v39 = vpop.eup %1228 }
 0x2e6   : > { %v499_v40 = vsel %vm232_vm2, %v1229_v39, 0.0  ;;  %v1231_v43 = vpop.eup %1230 }
 0x2e7   : > { %500 = vadd.xlane.f32.xlu2 %v499_v40  ;;  %v629_v44 = vsel %vm232_vm2, %v1231_v43, 0.0 }
 0x2e9   : > { %v1233_v48 = vpop.eup %1232 }
 0x2ea   : > { %v957_v57 = vmul.f32 %v1233_v48, %v1562_v55 }
 0x2ed   : > { %v305_v47 = vpop.xlane.xlu0 %304 }
 0x2ee   : > { %1234 = vrcp.f32 %v305_v47 }
 0x2f4   : > { %v1235_v49 = vpop.eup %1234 }
 0x2f5   : > { %v307_v21 = vmul.f32 %v1235_v49, %v1569_v58 }
 0x2fa   : > { %630 = vadd.xlane.f32.xlu1 %v629_v44 }
 0x32a   : > { %v371_v45 = vpop.xlane.xlu1 %370 }
 0x32b   : > { %1236 = vrcp.f32 %v371_v45 }
 0x331   : > { %v1237_v7 = vpop.eup %1236 }
 0x332   : > { %v373_v59 = vmul.f32 %v1237_v7, %v1574_v62 }
 0x342   : > { %v1195_v50 = vpop.permute.xlu1 %1194  ;;  %v761_v63 = vpop.xlane.xlu0 %760 }
 0x343   : > { %v1197_v51 = vunpack.i.h.bf16 %v1195_v50  ;;  %v1196_v56 = vunpack.i.l.bf16 %v1195_v50 }
 0x345   : > { %330 = vmatpush.msra.mxu3 %v1196_v56  ;;  %980 = vmatpush.msrb.mxu2 %v1197_v51 }
 0x346   : > { %1107 = vmatmul.msk.f32.vlgmr.msra.gmra.mxu3 %vm232_vm2, %v307_v21  ;;  %1137 = vmatmul.msk.f32.vlgmr.msrb.gmra.mxu2 %vm232_vm2, %v957_v57 }
 0x347   : > { %392 = vmatpush.msrb.mxu3 %v1527_v24 }
 0x349   : > { %522 = vmatpush.msra.mxu3 %v1530_v25  ;;  %v462_v52 = vpop.f32.mrf.mxu2 }
 0x34a   : > { %990 = vrot.lane.b32.xlu2 %v462_v52, %s1312_s18 }
 0x34e   : > { %1110 = vmatmul.msk.f32.vlgmr.msrb.gmra.mxu3 %vm232_vm2, %v373_v59 }
 0x34f   : > { %652 = vmatpush.msrb.mxu3 %v1557_v53  ;;  %v891_v53 = vpop.xlane.xlu0 %890 }
 0x351   : > { %v592_v55 = vpop.f32.mrf.mxu2 }
 0x359   : > { %v722_v58 = vpop.f32.mrf.mxu2 }
 0x35a   : > { %v501_v60 = vpop.xlane.xlu2 %500  ;;  %998 = vrot.lane.b32.xlu1 %v722_v58, %s1312_s18 }
 0x35b   : > { %1238 = vrcp.f32 %v501_v60 }
 0x361   : > { %v1239_v61 = vpop.eup %1238  ;;  %v852_v5 = vpop.f32.mrf.mxu2 }
 0x362   : > { %v503_v24 = vmul.f32 %v1239_v61, %v1229_v39 }
 0x364   : > { %1116 = vmatmul.msk.f32.vlgmr.msra.gmra.mxu3 %vm232_vm2, %v503_v24 }
 0x365   : > { %782 = vmatpush.msra.mxu3 %v1560_v54 }
 0x36d   : > { %v631_v25 = vpop.xlane.xlu1 %630 }
 0x36e   : > { %1240 = vrcp.f32 %v631_v25 }
 0x36f   : > { %1242 = vrcp.f32 %v761_v63 }
 0x370   : > { %1244 = vrcp.f32 %v891_v53 }
 0x374   : > { %v1241_v62 = vpop.eup %1240 }
 0x375   : > { %v633_v0 = vmul.f32 %v1241_v62, %v1231_v43  ;;  %v1243_v2 = vpop.eup %1242 }
 0x376   : > { %v763_v3 = vmul.f32 %v1243_v2, %v1587_v13  ;;  %v1245_v4 = vpop.eup %1244 }
 0x377   : > { %1122 = vmatmul.msk.f32.vlgmr.msrb.gmra.mxu3 %vm232_vm2, %v633_v0  ;;  %v893_v54 = vmul.f32 %v1245_v4, %v1594_v17 }
 0x378   : > { %912 = vmatpush.msrb.mxu3 %v1581_v15 }
 0x37f   : > { %1128 = vmatmul.msk.f32.vlgmr.msra.gmra.mxu3 %vm232_vm2, %v763_v3 }
 0x387   : > { %1134 = vmatmul.msk.f32.vlgmr.msrb.gmra.mxu3 %vm232_vm2, %v893_v54 }
 0x3a4   : > { %v991_v10 = vpop.permute.xlu2 %990 }
 0x3c9   : > { %v332_v6 = vpop.f32.mrf.mxu3  ;;  %v982_v9 = vpop.f32.mrf.mxu2 }
 0x3ca   : > { %986 = vrot.lane.b32.xlu0 %v332_v6, %s1312_s18  ;;  %1006 = vrot.lane.b32.xlu2 %v982_v9, %s1312_s18 }
 0x3cc   : > { %v999_v14 = vpop.permute.xlu1 %998 }
 0x3d1   : > { %v394_v8 = vpop.f32.mrf.mxu3 }
 0x3d2   : > { %v1010_v11 = vsel %vm200_vm0, %v394_v8, %v991_v10  ;;  %994 = vrot.lane.b32.xlu0 %v592_v55, %s1312_s18 }
 0x3d3   : > { %1016 = vst [vmem:[%s178_s23 + $0x8] sm:$0xff] %v1010_v11 }
 0x3da   : > { %1002 = vrot.lane.b32.xlu0 %v852_v5, %s1312_s18 }
 0x3e7   : > { %v524_v12 = vpop.f32.mrf.mxu3 }
 0x3fa   : > { %v654_v15 = vpop.f32.mrf.mxu3 }
 0x3fb   : > { %v1012_v16 = vsel %vm200_vm0, %v654_v15, %v999_v14 }
 0x3fc   : > { %1018 = vst [vmem:[%s178_s23 + $0x18] sm:$0xff] %v1012_v16 }
 0x402   : > { %v784_v18 = vpop.f32.mrf.mxu3 }
 0x40a   : > { %v914_v19 = vpop.f32.mrf.mxu3 }
 0x424   : > { %v1007_v20 = vpop.permute.xlu2 %1006 }
 0x425   : > { %v1014_v22 = vsel %vm200_vm0, %v914_v19, %v1007_v20 }
 0x426   : > { %1020 = vst [vmem:[%s178_s23 + $0x28] sm:$0xff] %v1014_v22 }
 0x43c   : > { %v987_v13 = vpop.permute.xlu0 %986 }
 0x43d   : > { %v1009_v23 = vsel %vm200_vm0, %v1506_v1, %v987_v13 }
 0x43e   : > { %1015 = vst [vmem:[%s178_s23] sm:$0xff] %v1009_v23 }
 0x444   : > { %v995_v26 = vpop.permute.xlu0 %994 }
 0x445   : > { %v1011_v27 = vsel %vm200_vm0, %v524_v12, %v995_v26 }
 0x446   : > { %1017 = vst [vmem:[%s178_s23 + $0x10] sm:$0xff] %v1011_v27 }
 0x44c   : > { %v1003_v28 = vpop.permute.xlu0 %1002 }
 0x44d   : > { %v1013_v29 = vsel %vm200_vm0, %v784_v18, %v1003_v28 }
 0x44e   : > { %1019 = vst [vmem:[%s178_s23 + $0x20] sm:$0xff] %v1013_v29 }
 0x44f PF: > { %p12_p7 = scmp.ge.s32.totalorder %s1351_s14, 4   ;;  %s1657_s9 = smov %s1302_s10 }
 0x450   : > { %s1658_s10 = smov %s1306_s11  ;;  %s1659_s11 = smov %s1361_s17 }
 0x451   : > { %s1660_s12 = smov %s1351_s14  ;;  %14 = sbr.rel (!%p12_p7) target bundleno = 3 (0x3), region = 71 }
 0x456   :  { %1042 = vsyncpa [#allocation3], 1 }
 0x457   :  { %1044 = vsyncpa [#allocation3 + $0x1], 1 }

// kernel: category_transformer_forward.27
= control target key start
LH: loop header
LB: loop body
LE: loop exit
PB: predicated region body
PF: predicated region fallthrough
CT: control target
= control target key end

     0   :  { %11 = vsyncpa [#allocation3], 0  ;;  %s3970_s24 = smov [#allocation2]   ;;  %s3971_s26 = smov 384   ;;  %s4309_s0 = inlined_call_operand.vmem [shape: f32[16,768], index: 0, kind: input, shape index: {}]   ;;  %s4310_s1 = inlined_call_operand.hbm [shape: bf16[768,768], index: 1, kind: input, shape index: {}]   ;;  %s4311_s2 = inlined_call_operand.vmem [shape: f32[1,768], index: 2, kind: input, shape index: {}]   ;;  %s4312_s3 = inlined_call_operand.vmem [shape: f32[16,768], index: 3, kind: input, shape index: {}]   ;;  %s4313_s4 = inlined_call_operand.vmem [shape: f32[1,768], index: 4, kind: input, shape index: {}]   ;;  %s4314_s5 = inlined_call_operand.vmem [shape: f32[1,768], index: 5, kind: input, shape index: {}]   ;;  %s4315_s6 = inlined_call_operand.vmem [shape: f32[16,768], index: 6, kind: output, shape index: {}]  }
   0x1   :  { %s18_s23 = sshll.u32 %s4310_s1, 4  ;;  %s20_s25 = sshll.u32 %s3970_s24, 4  ;;  %s19_s23 = int_to_ptr.hbm [resolvable:$true] %s18_s23  ;;  %s21_s25 = int_to_ptr.vmem [resolvable:$true] %s20_s25 }
   0x2   :  { %s3972_s27 = smov 24  }
   0x3   :  { %26 = dma.hbm_to_vmem [thread:$0]  %s19_s23, 36864, %s21_s25, [#allocation3], %s3971_s26, %s3971_s26, %s3972_s27  }
   0x4   :  { %3968 = dma.done.wait [#allocation3], 36864  }
   0x5   :  { %3969 = vsyncadd [#allocation3], 4294930432  ;;  %v2663_v0 = vld [vmem:[#allocation2 + $0x150] sm:$0xf]  ;;  %v3690_v1 = vld [vmem:[#allocation2 + $0x164] sm:$0xf0] }
   0x6   :  { %v2855_v2 = vld [vmem:[#allocation2 + $0x2d0] sm:$0xf]  ;;  %v2664_v3 = vor.u32 %v3690_v1, %v2663_v0  ;;  %v3738_v4 = vld [vmem:[#allocation2 + $0x2e4] sm:$0xf0]  ;;  %v2639_v11 = vld [vmem:[#allocation2 + $0x120] sm:$0xf] }
   0x7   :  { %v3047_v5 = vld [vmem:[#allocation2 + $0x450] sm:$0xf]  ;;  %v3786_v6 = vld [vmem:[#allocation2 + $0x464] sm:$0xf0]  ;;  %v2856_v7 = vor.u32 %v3738_v4, %v2855_v2  ;;  %v3684_v13 = vld [vmem:[#allocation2 + $0x134] sm:$0xf0] }
   0x8   :  { %v3048_v8 = vor.u32 %v3786_v6, %v3047_v5  ;;  %v3239_v9 = vld [vmem:[#allocation2 + $0x5d0] sm:$0xf]  ;;  %v3834_v10 = vld [vmem:[#allocation2 + $0x5e4] sm:$0xf0]  ;;  %1799 = vmatpush.bf16.msra.mxu0 %v2664_v3  ;;  %v2831_v14 = vld [vmem:[#allocation2 + $0x2a0] sm:$0xf]  ;;  %v2640_v16 = vor.u32 %v3684_v13, %v2639_v11 }
   0x9   :  { %v3240_v12 = vor.u32 %v3834_v10, %v3239_v9  ;;  %v3732_v15 = vld [vmem:[#allocation2 + $0x2b4] sm:$0xf0]  ;;  %1813 = vmatpush.bf16.msra.mxu1 %v2856_v7  ;;  %v3023_v18 = vld [vmem:[#allocation2 + $0x420] sm:$0xf]  ;;  %v2615_v23 = vld [vmem:[#allocation2 + $0xf0] sm:$0xf] }
   0xa   :  { %1827 = vmatpush.bf16.msra.mxu2 %v3048_v8  ;;  %v2832_v17 = vor.u32 %v3732_v15, %v2831_v14  ;;  %v3780_v19 = vld [vmem:[#allocation2 + $0x434] sm:$0xf0]  ;;  %v3215_v20 = vld [vmem:[#allocation2 + $0x5a0] sm:$0xf]  ;;  %v3678_v24 = vld [vmem:[#allocation2 + $0x104] sm:$0xf0] }
   0xb   :  { %1841 = vmatpush.bf16.msra.mxu3 %v3240_v12  ;;  %v3024_v21 = vor.u32 %v3780_v19, %v3023_v18  ;;  %v3828_v22 = vld [vmem:[#allocation2 + $0x5b4] sm:$0xf0]  ;;  %v2807_v26 = vld [vmem:[#allocation2 + $0x270] sm:$0xf]  ;;  %v3726_v27 = vld [vmem:[#allocation2 + $0x284] sm:$0xf0]  ;;  %v2616_v29 = vor.u32 %v3678_v24, %v2615_v23 }
   0xc   :  { %v3216_v25 = vor.u32 %v3828_v22, %v3215_v20  ;;  %v2999_v28 = vld [vmem:[#allocation2 + $0x3f0] sm:$0xf]  ;;  %1800 = vmatpush.bf16.msra.mxu0 %v2640_v16  ;;  %v3774_v30 = vld [vmem:[#allocation2 + $0x404] sm:$0xf0]  ;;  %v2808_v33 = vor.u32 %v3726_v27, %v2807_v26  ;;  %v2591_v35 = vld [vmem:[#allocation2 + $0xc0] sm:$0xf] }
   0xd   :  { %v3191_v31 = vld [vmem:[#allocation2 + $0x570] sm:$0xf]  ;;  %v3822_v32 = vld [vmem:[#allocation2 + $0x584] sm:$0xf0]  ;;  %1814 = vmatpush.bf16.msra.mxu1 %v2832_v17  ;;  %v3000_v34 = vor.u32 %v3774_v30, %v2999_v28  ;;  %v3672_v36 = vld [vmem:[#allocation2 + $0xd4] sm:$0xf0] }
   0xe   :  { %1828 = vmatpush.bf16.msra.mxu2 %v3024_v21  ;;  %v2783_v37 = vld [vmem:[#allocation2 + $0x240] sm:$0xf]  ;;  %v3192_v38 = vor.u32 %v3822_v32, %v3191_v31  ;;  %v3720_v39 = vld [vmem:[#allocation2 + $0x254] sm:$0xf0]  ;;  %v2592_v44 = vor.u32 %v3672_v36, %v2591_v35  ;;  %v2567_v47 = vld [vmem:[#allocation2 + $0x90] sm:$0xf] }
   0xf   :  { %1842 = vmatpush.bf16.msra.mxu3 %v3216_v25  ;;  %v2975_v40 = vld [vmem:[#allocation2 + $0x3c0] sm:$0xf]  ;;  %v3768_v41 = vld [vmem:[#allocation2 + $0x3d4] sm:$0xf0]  ;;  %v2784_v45 = vor.u32 %v3720_v39, %v2783_v37  ;;  %v3666_v48 = vld [vmem:[#allocation2 + $0xa4] sm:$0xf0] }
  0x10   :  { %v3167_v42 = vld [vmem:[#allocation2 + $0x540] sm:$0xf]  ;;  %v3816_v43 = vld [vmem:[#allocation2 + $0x554] sm:$0xf0]  ;;  %1801 = vmatpush.bf16.msra.mxu0 %v2616_v29  ;;  %v2976_v46 = vor.u32 %v3768_v41, %v2975_v40  ;;  %v2759_v49 = vld [vmem:[#allocation2 + $0x210] sm:$0xf]  ;;  %v2568_v56 = vor.u32 %v3666_v48, %v2567_v47 }
  0x11   :  { %1815 = vmatpush.bf16.msra.mxu1 %v2808_v33  ;;  %v3168_v50 = vor.u32 %v3816_v43, %v3167_v42  ;;  %v3714_v51 = vld [vmem:[#allocation2 + $0x224] sm:$0xf0]  ;;  %v2951_v52 = vld [vmem:[#allocation2 + $0x390] sm:$0xf]  ;;  %v2543_v59 = vld [vmem:[#allocation2 + $0x60] sm:$0xf] }
  0x12   :  { %1829 = vmatpush.bf16.msra.mxu2 %v3000_v34  ;;  %v3762_v53 = vld [vmem:[#allocation2 + $0x3a4] sm:$0xf0]  ;;  %v3143_v54 = vld [vmem:[#allocation2 + $0x510] sm:$0xf]  ;;  %v2760_v57 = vor.u32 %v3714_v51, %v2759_v49  ;;  %v3660_v60 = vld [vmem:[#allocation2 + $0x74] sm:$0xf0] }
  0x13   :  { %1843 = vmatpush.bf16.msra.mxu3 %v3192_v38  ;;  %v3810_v55 = vld [vmem:[#allocation2 + $0x524] sm:$0xf0]  ;;  %v2952_v58 = vor.u32 %v3762_v53, %v2951_v52  ;;  %v2735_v61 = vld [vmem:[#allocation2 + $0x1e0] sm:$0xf]  ;;  %v3708_v63 = vld [vmem:[#allocation2 + $0x1f4] sm:$0xf0]  ;;  %v2544_v4 = vor.u32 %v3660_v60, %v2543_v59 }
  0x14   :  { %1802 = vmatpush.bf16.msra.mxu0 %v2592_v44  ;;  %v3144_v62 = vor.u32 %v3810_v55, %v3143_v54  ;;  %v2927_v0 = vld [vmem:[#allocation2 + $0x360] sm:$0xf]  ;;  %v3756_v1 = vld [vmem:[#allocation2 + $0x374] sm:$0xf0]  ;;  %v2736_v5 = vor.u32 %v3708_v63, %v2735_v61  ;;  %v2519_v7 = vld [vmem:[#allocation2 + $0x30] sm:$0xf] }
  0x15   :  { %1816 = vmatpush.bf16.msra.mxu1 %v2784_v45  ;;  %v3119_v2 = vld [vmem:[#allocation2 + $0x4e0] sm:$0xf]  ;;  %v3804_v3 = vld [vmem:[#allocation2 + $0x4f4] sm:$0xf0]  ;;  %v2928_v6 = vor.u32 %v3756_v1, %v2927_v0  ;;  %v3654_v8 = vld [vmem:[#allocation2 + $0x44] sm:$0xf0] }
  0x16   :  { %1830 = vmatpush.bf16.msra.mxu2 %v2976_v46  ;;  %v2711_v9 = vld [vmem:[#allocation2 + $0x1b0] sm:$0xf]  ;;  %v3120_v10 = vor.u32 %v3804_v3, %v3119_v2  ;;  %v3702_v11 = vld [vmem:[#allocation2 + $0x1c4] sm:$0xf0]  ;;  %v2520_v16 = vor.u32 %v3654_v8, %v2519_v7  ;;  %v2495_v17 = vld [vmem:[#allocation2] sm:$0xf] }
  0x17   :  { %1844 = vmatpush.bf16.msra.mxu3 %v3168_v50  ;;  %v2903_v12 = vld [vmem:[#allocation2 + $0x330] sm:$0xf]  ;;  %v3750_v13 = vld [vmem:[#allocation2 + $0x344] sm:$0xf0]  ;;  %v3648_v18 = vld [vmem:[#allocation2 + $0x14] sm:$0xf0]  ;;  %v2712_v19 = vor.u32 %v3702_v11, %v2711_v9 }
  0x18   :  { %1803 = vmatpush.bf16.msra.mxu0 %v2568_v56  ;;  %v3095_v14 = vld [vmem:[#allocation2 + $0x4b0] sm:$0xf]  ;;  %v3798_v15 = vld [vmem:[#allocation2 + $0x4c4] sm:$0xf0]  ;;  %v2904_v20 = vor.u32 %v3750_v13, %v2903_v12  ;;  %v2687_v21 = vld [vmem:[#allocation2 + $0x180] sm:$0xf]  ;;  %v2496_v31 = vor.u32 %v3648_v18, %v2495_v17 }
  0x19   :  { %1817 = vmatpush.bf16.msra.mxu1 %v2760_v57  ;;  %v3696_v22 = vld [vmem:[#allocation2 + $0x194] sm:$0xf0]  ;;  %v2879_v23 = vld [vmem:[#allocation2 + $0x300] sm:$0xf]  ;;  %v3096_v24 = vor.u32 %v3798_v15, %v3095_v14  ;;  %v3431_v28 = vld [vmem:[#allocation2 + $0x750] sm:$0xf] }
  0x1a   :  { %1831 = vmatpush.bf16.msra.mxu2 %v2952_v58  ;;  %v3744_v25 = vld [vmem:[#allocation2 + $0x314] sm:$0xf0]  ;;  %v3071_v26 = vld [vmem:[#allocation2 + $0x480] sm:$0xf]  ;;  %v3882_v29 = vld [vmem:[#allocation2 + $0x764] sm:$0xf0]  ;;  %v2688_v35 = vor.u32 %v3696_v22, %v2687_v21 }
  0x1b   :  { %1845 = vmatpush.bf16.msra.mxu3 %v3144_v62  ;;  %v3792_v27 = vld [vmem:[#allocation2 + $0x494] sm:$0xf0]  ;;  %v3623_v30 = vld [vmem:[#allocation2 + $0x8d0] sm:$0xf]  ;;  %v3930_v32 = vld [vmem:[#allocation2 + $0x8e4] sm:$0xf0]  ;;  %v2880_v36 = vor.u32 %v3744_v25, %v2879_v23  ;;  %v3432_v40 = vor.u32 %v3882_v29, %v3431_v28 }
  0x1c   :  { %1804 = vmatpush.bf16.msra.mxu0 %v2544_v4  ;;  %v3687_v33 = vld [vmem:[#allocation2 + $0x154] sm:$0xf]  ;;  %v2665_v34 = vld [vmem:[#allocation2 + $0x168] sm:$0xf0]  ;;  %v3072_v39 = vor.u32 %v3792_v27, %v3071_v26  ;;  %v3407_v41 = vld [vmem:[#allocation2 + $0x720] sm:$0xf]  ;;  %v3624_v42 = vor.u32 %v3930_v32, %v3623_v30 }
  0x1d   :  { %1818 = vmatpush.bf16.msra.mxu1 %v2736_v5  ;;  %v3735_v37 = vld [vmem:[#allocation2 + $0x2d4] sm:$0xf]  ;;  %v2857_v38 = vld [vmem:[#allocation2 + $0x2e8] sm:$0xf0]  ;;  %v2668_v43 = vor.u32 %v3687_v33, %v2665_v34  ;;  %v3876_v44 = vld [vmem:[#allocation2 + $0x734] sm:$0xf0] }
  0x1e   :  { %1832 = vmatpush.bf16.msra.mxu2 %v2928_v6  ;;  %v3599_v45 = vld [vmem:[#allocation2 + $0x8a0] sm:$0xf]  ;;  %v3924_v46 = vld [vmem:[#allocation2 + $0x8b4] sm:$0xf0]  ;;  %v2860_v47 = vor.u32 %v3735_v37, %v2857_v38  ;;  %v3681_v48 = vld [vmem:[#allocation2 + $0x124] sm:$0xf]  ;;  %v3408_v54 = vor.u32 %v3876_v44, %v3407_v41 }
  0x1f   :  { %1846 = vmatpush.bf16.msra.mxu3 %v3120_v10  ;;  %v2641_v49 = vld [vmem:[#allocation2 + $0x138] sm:$0xf0]  ;;  %v3729_v50 = vld [vmem:[#allocation2 + $0x2a4] sm:$0xf]  ;;  %v45_v53 = vld [vmem:[%s4309_s0 + $0x30] sm:$0xff]  ;;  %v3600_v58 = vor.u32 %v3924_v46, %v3599_v45 }
  0x20   :  { %1805 = vmatpush.bf16.msra.mxu0 %v2520_v16  ;;  %v2833_v51 = vld [vmem:[#allocation2 + $0x2b8] sm:$0xf0]  ;;  %v39_v52 = vld [vmem:[%s4309_s0] sm:$0xff]  ;;  %v3383_v55 = vld [vmem:[#allocation2 + $0x6f0] sm:$0xf]  ;;  %v2644_v59 = vor.u32 %v3681_v48, %v2641_v49 }
  0x21   :  { %1819 = vmatpush.bf16.msra.mxu1 %v2712_v19  ;;  %v3870_v56 = vld [vmem:[#allocation2 + $0x704] sm:$0xf0]  ;;  %v4018_v57 = vpack.c.bf16 %v45_v53, %v39_v52  ;;  %v3575_v60 = vld [vmem:[#allocation2 + $0x870] sm:$0xf]  ;;  %v3675_v62 = vld [vmem:[#allocation2 + $0xf4] sm:$0xf]  ;;  %v2836_v63 = vor.u32 %v3729_v50, %v2833_v51 }
  0x22   :  { %1833 = vmatpush.bf16.msra.mxu2 %v2904_v20  ;;  %v3918_v61 = vld [vmem:[#allocation2 + $0x884] sm:$0xf0]  ;;  %v2617_v0 = vld [vmem:[#allocation2 + $0x108] sm:$0xf0]  ;;  %v46_v2 = vld [vmem:[%s4309_s0 + $0x38] sm:$0xff]  ;;  %v3384_v7 = vor.u32 %v3870_v56, %v3383_v55 }
  0x23   :  { %1847 = vmatpush.bf16.msra.mxu3 %v3096_v24  ;;  %v40_v1 = vld [vmem:[%s4309_s0 + $0x8] sm:$0xff]  ;;  %v3723_v3 = vld [vmem:[#allocation2 + $0x274] sm:$0xf]  ;;  %v3359_v5 = vld [vmem:[#allocation2 + $0x6c0] sm:$0xf]  ;;  %v3576_v11 = vor.u32 %v3918_v61, %v3575_v60  ;;  %v2620_v12 = vor.u32 %v3675_v62, %v2617_v0 }
  0x24   :  { %1806 = vmatpush.bf16.msra.mxu0 %v2496_v31  ;;  %v2809_v4 = vld [vmem:[#allocation2 + $0x288] sm:$0xf0]  ;;  %v4027_v6 = vpack.c.bf16 %v46_v2, %v40_v1  ;;  %v3864_v8 = vld [vmem:[#allocation2 + $0x6d4] sm:$0xf0]  ;;  %v3551_v9 = vld [vmem:[#allocation2 + $0x840] sm:$0xf] }
  0x25   :  { %1820 = vmatpush.bf16.msra.mxu1 %v2688_v35  ;;  %v3912_v10 = vld [vmem:[#allocation2 + $0x854] sm:$0xf0]  ;;  %v3669_v13 = vld [vmem:[#allocation2 + $0xc4] sm:$0xf]  ;;  %v2593_v14 = vld [vmem:[#allocation2 + $0xd8] sm:$0xf0]  ;;  %v2812_v16 = vor.u32 %v3723_v3, %v2809_v4  ;;  %v3360_v24 = vor.u32 %v3864_v8, %v3359_v5 }
  0x26   :  { %1834 = vmatpush.bf16.msra.mxu2 %v2880_v36  ;;  %v41_v15 = vld [vmem:[%s4309_s0 + $0x10] sm:$0xff]  ;;  %v47_v17 = vld [vmem:[%s4309_s0 + $0x40] sm:$0xff]  ;;  %v42_v18 = vld [vmem:[%s4309_s0 + $0x18] sm:$0xff]  ;;  %v3552_v25 = vor.u32 %v3912_v10, %v3551_v9  ;;  %v2596_v26 = vor.u32 %v3669_v13, %v2593_v14 }
  0x27   :  { %1848 = vmatpush.bf16.msra.mxu3 %v3072_v39  ;;  %1807 = vmatmul.bf16.vlgmr.msra.gmra.mxu0 %v4018_v57  ;;  %v48_v19 = vld [vmem:[%s4309_s0 + $0x48] sm:$0xff]  ;;  %v3717_v20 = vld [vmem:[#allocation2 + $0x244] sm:$0xf]  ;;  %v2785_v21 = vld [vmem:[#allocation2 + $0x258] sm:$0xf0]  ;;  %v4042_v22 = vpack.c.bf16 %v47_v17, %v41_v15 }
  0x28   :  { %1855 = vmatpush.bf16.msrb.mxu0 %v3432_v40  ;;  %1821 = vmatmul.bf16.vlgmr.msra.gmra.mxu1 %v4027_v6  ;;  %v4044_v23 = vpack.c.bf16 %v48_v19, %v42_v18  ;;  %v3335_v27 = vld [vmem:[#allocation2 + $0x690] sm:$0xf]  ;;  %v3858_v28 = vld [vmem:[#allocation2 + $0x6a4] sm:$0xf0]  ;;  %v2788_v30 = vor.u32 %v3717_v20, %v2785_v21  ;;  %v3663_v32 = vld [vmem:[#allocation2 + $0x94] sm:$0xf] }
  0x29   :  { %1869 = vmatpush.bf16.msrb.mxu1 %v3624_v42  ;;  %v3527_v29 = vld [vmem:[#allocation2 + $0x810] sm:$0xf]  ;;  %v3906_v31 = vld [vmem:[#allocation2 + $0x824] sm:$0xf0]  ;;  %v2569_v33 = vld [vmem:[#allocation2 + $0xa8] sm:$0xf0]  ;;  %1835 = vmatmul.bf16.vlgmr.msra.gmra.mxu2 %v4042_v22  ;;  %v3336_v36 = vor.u32 %v3858_v28, %v3335_v27 }
  0x2a   :  { %1883 = vmatpush.bf16.msrb.mxu2 %v2668_v43  ;;  %v3711_v34 = vld [vmem:[#allocation2 + $0x214] sm:$0xf]  ;;  %v2761_v35 = vld [vmem:[#allocation2 + $0x228] sm:$0xf0]  ;;  %1849 = vmatmul.bf16.vlgmr.msra.gmra.mxu3 %v4044_v23  ;;  %v3528_v37 = vor.u32 %v3906_v31, %v3527_v29  ;;  %v2572_v38 = vor.u32 %v3663_v32, %v2569_v33  ;;  %v3311_v39 = vld [vmem:[#allocation2 + $0x660] sm:$0xf] }
  0x2b   :  { %1897 = vmatpush.bf16.msrb.mxu3 %v2860_v47  ;;  %v3852_v40 = vld [vmem:[#allocation2 + $0x674] sm:$0xf0]  ;;  %v3503_v41 = vld [vmem:[#allocation2 + $0x7e0] sm:$0xf]  ;;  %v2764_v42 = vor.u32 %v3711_v34, %v2761_v35  ;;  %v3657_v44 = vld [vmem:[#allocation2 + $0x64] sm:$0xf] }
  0x2c   :  { %1856 = vmatpush.bf16.msrb.mxu0 %v3408_v54  ;;  %v3900_v43 = vld [vmem:[#allocation2 + $0x7f4] sm:$0xf0]  ;;  %v2545_v45 = vld [vmem:[#allocation2 + $0x78] sm:$0xf0]  ;;  %v3705_v46 = vld [vmem:[#allocation2 + $0x1e4] sm:$0xf]  ;;  %v3312_v48 = vor.u32 %v3852_v40, %v3311_v39 }
  0x2d   :  { %1870 = vmatpush.bf16.msrb.mxu1 %v3600_v58  ;;  %v2737_v47 = vld [vmem:[#allocation2 + $0x1f8] sm:$0xf0]  ;;  %v3504_v49 = vor.u32 %v3900_v43, %v3503_v41  ;;  %v2548_v50 = vor.u32 %v3657_v44, %v2545_v45  ;;  %v3287_v51 = vld [vmem:[#allocation2 + $0x630] sm:$0xf]  ;;  %v3846_v52 = vld [vmem:[#allocation2 + $0x644] sm:$0xf0] }
  0x2e   :  { %1884 = vmatpush.bf16.msrb.mxu2 %v2644_v59  ;;  %v3479_v53 = vld [vmem:[#allocation2 + $0x7b0] sm:$0xf]  ;;  %v2740_v54 = vor.u32 %v3705_v46, %v2737_v47  ;;  %v3894_v55 = vld [vmem:[#allocation2 + $0x7c4] sm:$0xf0]  ;;  %v3651_v56 = vld [vmem:[#allocation2 + $0x34] sm:$0xf]  ;;  %v3288_v61 = vor.u32 %v3846_v52, %v3287_v51 }
  0x2f   :  { %1898 = vmatpush.bf16.msrb.mxu3 %v2836_v63  ;;  %v2521_v58 = vld [vmem:[#allocation2 + $0x48] sm:$0xf0]  ;;  %v3699_v59 = vld [vmem:[#allocation2 + $0x1b4] sm:$0xf]  ;;  %v3263_v62 = vld [vmem:[#allocation2 + $0x600] sm:$0xf]  ;;  %v3480_v1 = vor.u32 %v3894_v55, %v3479_v53 }
  0x30   :  { %1857 = vmatpush.bf16.msrb.mxu0 %v3384_v7  ;;  %v2713_v60 = vld [vmem:[#allocation2 + $0x1c8] sm:$0xf0]  ;;  %v3840_v63 = vld [vmem:[#allocation2 + $0x614] sm:$0xf0]  ;;  %v3455_v0 = vld [vmem:[#allocation2 + $0x780] sm:$0xf]  ;;  %v2524_v2 = vor.u32 %v3651_v56, %v2521_v58 }
  0x31   :  { %1871 = vmatpush.bf16.msrb.mxu1 %v3576_v11  ;;  %v3888_v3 = vld [vmem:[#allocation2 + $0x794] sm:$0xf0]  ;;  %v3645_v4 = vld [vmem:[#allocation2 + $0x4] sm:$0xf]  ;;  %v2497_v5 = vld [vmem:[#allocation2 + $0x18] sm:$0xf0]  ;;  %v2716_v7 = vor.u32 %v3699_v59, %v2713_v60  ;;  %v3264_v14 = vor.u32 %v3840_v63, %v3263_v62 }
  0x32   :  { %1885 = vmatpush.bf16.msrb.mxu2 %v2620_v12  ;;  %v3693_v8 = vld [vmem:[#allocation2 + $0x184] sm:$0xf]  ;;  %v2689_v9 = vld [vmem:[#allocation2 + $0x198] sm:$0xf0]  ;;  %v3783_v10 = vld [vmem:[#allocation2 + $0x454] sm:$0xf]  ;;  %v3456_v18 = vor.u32 %v3888_v3, %v3455_v0  ;;  %v2500_v19 = vor.u32 %v3645_v4, %v2497_v5 }
  0x33   :  { %1899 = vmatpush.bf16.msrb.mxu3 %v2812_v16  ;;  %v3049_v11 = vld [vmem:[#allocation2 + $0x468] sm:$0xf0]  ;;  %v3831_v12 = vld [vmem:[#allocation2 + $0x5d4] sm:$0xf]  ;;  %v43_v21 = vld [vmem:[%s4309_s0 + $0x20] sm:$0xff] }
  0x34   :  { %1858 = vmatpush.bf16.msrb.mxu0 %v3360_v24  ;;  %v3241_v13 = vld [vmem:[#allocation2 + $0x5e8] sm:$0xf0]  ;;  %v3879_v15 = vld [vmem:[#allocation2 + $0x754] sm:$0xf]  ;;  %v50_v28 = vld [vmem:[%s4309_s0 + $0x58] sm:$0xff] }
  0x35   :  { %1872 = vmatpush.bf16.msrb.mxu1 %v3552_v25  ;;  %v3433_v16 = vld [vmem:[#allocation2 + $0x768] sm:$0xf0]  ;;  %v3927_v17 = vld [vmem:[#allocation2 + $0x8d4] sm:$0xf]  ;;  %v2692_v25 = vor.u32 %v3693_v8, %v2689_v9  ;;  %v3244_v29 = vor.u32 %v3831_v12, %v3241_v13  ;;  %v3777_v31 = vld [vmem:[#allocation2 + $0x424] sm:$0xf] }
  0x36   :  { %1886 = vmatpush.bf16.msrb.mxu2 %v2596_v26  ;;  %v3625_v20 = vld [vmem:[#allocation2 + $0x8e8] sm:$0xf0]  ;;  %v49_v24 = vld [vmem:[%s4309_s0 + $0x50] sm:$0xff]  ;;  %v3052_v26 = vor.u32 %v3783_v10, %v3049_v11  ;;  %v3025_v32 = vld [vmem:[#allocation2 + $0x438] sm:$0xf0] }
  0x37   :  { %1900 = vmatpush.bf16.msrb.mxu3 %v2788_v30  ;;  %v44_v27 = vld [vmem:[%s4309_s0 + $0x28] sm:$0xff]  ;;  %v3436_v30 = vor.u32 %v3879_v15, %v3433_v16  ;;  %v3825_v33 = vld [vmem:[#allocation2 + $0x5a4] sm:$0xf]  ;;  %v3628_v34 = vor.u32 %v3927_v17, %v3625_v20  ;;  %v4060_v35 = vpack.c.bf16 %v49_v24, %v43_v21  ;;  %v3601_v41 = vld [vmem:[#allocation2 + $0x8b8] sm:$0xf0] }
  0x38   :  { %1859 = vmatpush.bf16.msrb.mxu0 %v3336_v36  ;;  %v3217_v36 = vld [vmem:[#allocation2 + $0x5b8] sm:$0xf0]  ;;  %v4062_v39 = vpack.c.bf16 %v50_v28, %v44_v27  ;;  %v3921_v40 = vld [vmem:[#allocation2 + $0x8a4] sm:$0xf]  ;;  %v3771_v45 = vld [vmem:[#allocation2 + $0x3f4] sm:$0xf] }
  0x39   :  { %1873 = vmatpush.bf16.msrb.mxu1 %v3528_v37  ;;  %v3873_v37 = vld [vmem:[#allocation2 + $0x724] sm:$0xf]  ;;  %v3220_v43 = vor.u32 %v3825_v33, %v3217_v36  ;;  %v3001_v46 = vld [vmem:[#allocation2 + $0x408] sm:$0xf0]  ;;  %v3819_v47 = vld [vmem:[#allocation2 + $0x574] sm:$0xf] }
  0x3a   :  { %1887 = vmatpush.bf16.msrb.mxu2 %v2572_v38  ;;  %v3409_v38 = vld [vmem:[#allocation2 + $0x738] sm:$0xf0]  ;;  %v3385_v51 = vld [vmem:[#allocation2 + $0x708] sm:$0xf0]  ;;  %v3915_v52 = vld [vmem:[#allocation2 + $0x874] sm:$0xf] }
  0x3b   :  { %1901 = vmatpush.bf16.msrb.mxu3 %v2764_v42  ;;  %v3028_v42 = vor.u32 %v3777_v31, %v3025_v32  ;;  %v3412_v44 = vor.u32 %v3873_v37, %v3409_v38  ;;  %v3577_v53 = vld [vmem:[#allocation2 + $0x888] sm:$0xf0]  ;;  %v3765_v58 = vld [vmem:[#allocation2 + $0x3c4] sm:$0xf]  ;;  %v2977_v59 = vld [vmem:[#allocation2 + $0x3d8] sm:$0xf0] }
  0x3c   :  { %1860 = vmatpush.bf16.msrb.mxu0 %v3312_v48  ;;  %v3604_v48 = vor.u32 %v3921_v40, %v3601_v41  ;;  %v3813_v60 = vld [vmem:[#allocation2 + $0x544] sm:$0xf]  ;;  %v3169_v62 = vld [vmem:[#allocation2 + $0x558] sm:$0xf0]  ;;  %v2980_v3 = vor.u32 %v3765_v58, %v2977_v59  ;;  %v2953_v8 = vld [vmem:[#allocation2 + $0x3a8] sm:$0xf0] }
  0x3d   :  { %1874 = vmatpush.bf16.msrb.mxu1 %v3504_v49  ;;  %v3193_v49 = vld [vmem:[#allocation2 + $0x588] sm:$0xf0]  ;;  %v3861_v63 = vld [vmem:[#allocation2 + $0x6c4] sm:$0xf]  ;;  %v3361_v0 = vld [vmem:[#allocation2 + $0x6d8] sm:$0xf0]  ;;  %v3172_v4 = vor.u32 %v3813_v60, %v3169_v62 }
  0x3e   :  { %1888 = vmatpush.bf16.msrb.mxu2 %v2548_v50  ;;  %v3867_v50 = vld [vmem:[#allocation2 + $0x6f4] sm:$0xf]  ;;  %v3196_v55 = vor.u32 %v3819_v47, %v3193_v49  ;;  %v3364_v5 = vor.u32 %v3861_v63, %v3361_v0  ;;  %v3145_v11 = vld [vmem:[#allocation2 + $0x528] sm:$0xf0]  ;;  %v2929_v20 = vld [vmem:[#allocation2 + $0x378] sm:$0xf0] }
  0x3f   :  { %1902 = vmatpush.bf16.msrb.mxu3 %v2740_v54  ;;  %v3004_v54 = vor.u32 %v3771_v45, %v3001_v46  ;;  %v3388_v56 = vor.u32 %v3867_v50, %v3385_v51  ;;  %v3807_v9 = vld [vmem:[#allocation2 + $0x514] sm:$0xf]  ;;  %v3337_v13 = vld [vmem:[#allocation2 + $0x6a8] sm:$0xf0]  ;;  %v3801_v21 = vld [vmem:[#allocation2 + $0x4e4] sm:$0xf] }
  0x40   :  { %1861 = vmatpush.bf16.msrb.mxu0 %v3288_v61  ;;  %v3580_v61 = vor.u32 %v3915_v52, %v3577_v53  ;;  %v3855_v12 = vld [vmem:[#allocation2 + $0x694] sm:$0xf]  ;;  %v3529_v15 = vld [vmem:[#allocation2 + $0x828] sm:$0xf0]  ;;  %v3148_v17 = vor.u32 %v3807_v9, %v3145_v11  ;;  %v3313_v27 = vld [vmem:[#allocation2 + $0x678] sm:$0xf0] }
  0x41   :  { %1875 = vmatpush.bf16.msrb.mxu1 %v3480_v1  ;;  %v3909_v1 = vld [vmem:[#allocation2 + $0x844] sm:$0xf]  ;;  %v3747_v33 = vld [vmem:[#allocation2 + $0x334] sm:$0xf]  ;;  %v3097_v38 = vld [vmem:[#allocation2 + $0x4c8] sm:$0xf0] }
  0x42   :  { %1889 = vmatpush.bf16.msrb.mxu2 %v2524_v2  ;;  %v3553_v2 = vld [vmem:[#allocation2 + $0x858] sm:$0xf0]  ;;  %v3897_v28 = vld [vmem:[#allocation2 + $0x7e4] sm:$0xf]  ;;  %v3795_v36 = vld [vmem:[#allocation2 + $0x4b4] sm:$0xf] }
  0x43   :  { %1903 = vmatpush.bf16.msrb.mxu3 %v2716_v7  ;;  %v3759_v7 = vld [vmem:[#allocation2 + $0x394] sm:$0xf]  ;;  %v3556_v10 = vor.u32 %v3909_v1, %v3553_v2  ;;  %v3289_v41 = vld [vmem:[#allocation2 + $0x648] sm:$0xf0]  ;;  %v3741_v45 = vld [vmem:[#allocation2 + $0x304] sm:$0xf]  ;;  %v3100_v47 = vor.u32 %v3795_v36, %v3097_v38 }
  0x44   :  { %1862 = vmatpush.bf16.msrb.mxu0 %v3264_v14  ;;  %v3903_v14 = vld [vmem:[#allocation2 + $0x814] sm:$0xf]  ;;  %v2956_v16 = vor.u32 %v3759_v7, %v2953_v8  ;;  %v2881_v46 = vld [vmem:[#allocation2 + $0x318] sm:$0xf0]  ;;  %v3789_v49 = vld [vmem:[#allocation2 + $0x484] sm:$0xf] }
  0x45   :  { %1876 = vmatpush.bf16.msrb.mxu1 %v3456_v18  ;;  %v3340_v18 = vor.u32 %v3855_v12, %v3337_v13  ;;  %v3532_v24 = vor.u32 %v3903_v14, %v3529_v15  ;;  %v3843_v40 = vld [vmem:[#allocation2 + $0x634] sm:$0xf]  ;;  %v3073_v50 = vld [vmem:[#allocation2 + $0x498] sm:$0xf0]  ;;  %v3837_v51 = vld [vmem:[#allocation2 + $0x604] sm:$0xf]  ;;  %v2884_v60 = vor.u32 %v3741_v45, %v2881_v46 }
  0x46   :  { %1890 = vmatpush.bf16.msrb.mxu2 %v2500_v19  ;;  %v3753_v19 = vld [vmem:[#allocation2 + $0x364] sm:$0xf]  ;;  %v3265_v53 = vld [vmem:[#allocation2 + $0x618] sm:$0xf0]  ;;  %v3691_v58 = vld [vmem:[#allocation2 + $0x16c] sm:$0xf0]  ;;  %v3076_v0 = vor.u32 %v3789_v49, %v3073_v50 }
  0x47   :  { %1904 = vmatpush.bf16.msrb.mxu3 %v2692_v25  ;;  %1863 = vmatmul.bf16.vlgmr.msrb.gmra.mxu0 %v4060_v35  ;;  %v3121_v25 = vld [vmem:[#allocation2 + $0x4f8] sm:$0xf0]  ;;  %v2863_v59 = vld [vmem:[#allocation2 + $0x2d8] sm:$0xf]  ;;  %v3787_v63 = vld [vmem:[#allocation2 + $0x46c] sm:$0xf0]  ;;  %v3268_v1 = vor.u32 %v3837_v51, %v3265_v53 }
  0x48   :  { %1911 = vmatpush.bf16.msra.mxu0 %v3052_v26  ;;  %1877 = vmatmul.bf16.vlgmr.msrb.gmra.mxu1 %v4062_v39  ;;  %v3849_v26 = vld [vmem:[#allocation2 + $0x664] sm:$0xf]  ;;  %v3124_v31 = vor.u32 %v3801_v21, %v3121_v25  ;;  %v3055_v62 = vld [vmem:[#allocation2 + $0x458] sm:$0xf]  ;;  %v2647_v9 = vld [vmem:[#allocation2 + $0x128] sm:$0xf] }
  0x49   :  { %1925 = vmatpush.bf16.msra.mxu1 %v3244_v29  ;;  %1891 = vmatmul.bf16.vlgmr.msrb.gmra.mxu2 %v4018_v57  ;;  %v3505_v29 = vld [vmem:[#allocation2 + $0x7f8] sm:$0xf0]  ;;  %v3316_v32 = vor.u32 %v3849_v26, %v3313_v27  ;;  %v3247_v2 = vld [vmem:[#allocation2 + $0x5d8] sm:$0xf]  ;;  %v3056_v8 = vor.u32 %v3787_v63, %v3055_v62  ;;  %v2839_v11 = vld [vmem:[#allocation2 + $0x2a8] sm:$0xf] }
  0x4a   :  { %1939 = vmatpush.bf16.msra.mxu2 %v3436_v30  ;;  %1905 = vmatmul.bf16.vlgmr.msrb.gmra.mxu3 %v4027_v6  ;;  %v2932_v30 = vor.u32 %v3753_v19, %v2929_v20  ;;  %v3508_v37 = vor.u32 %v3897_v28, %v3505_v29  ;;  %v3733_v13 = vld [vmem:[#allocation2 + $0x2bc] sm:$0xf0]  ;;  %v3031_v14 = vld [vmem:[#allocation2 + $0x428] sm:$0xf]  ;;  %v2623_v21 = vld [vmem:[#allocation2 + $0xf8] sm:$0xf] }
  0x4b   :  { %1953 = vmatpush.bf16.msra.mxu3 %v3628_v34  ;;  %v2905_v34 = vld [vmem:[#allocation2 + $0x348] sm:$0xf0]  ;;  %v3781_v15 = vld [vmem:[#allocation2 + $0x43c] sm:$0xf0]  ;;  %v2840_v19 = vor.u32 %v3733_v13, %v2839_v11  ;;  %v2815_v25 = vld [vmem:[#allocation2 + $0x278] sm:$0xf] }
  0x4c   :  { %1912 = vmatpush.bf16.msra.mxu0 %v3028_v42  ;;  %v3891_v42 = vld [vmem:[#allocation2 + $0x7b4] sm:$0xf]  ;;  %v3032_v20 = vor.u32 %v3781_v15, %v3031_v14  ;;  %v3727_v27 = vld [vmem:[#allocation2 + $0x28c] sm:$0xf0]  ;;  %v3007_v28 = vld [vmem:[#allocation2 + $0x3f8] sm:$0xf] }
  0x4d   :  { %1926 = vmatpush.bf16.msra.mxu1 %v3220_v43  ;;  %v3481_v43 = vld [vmem:[#allocation2 + $0x7c8] sm:$0xf0]  ;;  %v3775_v29 = vld [vmem:[#allocation2 + $0x40c] sm:$0xf0]  ;;  %v2599_v36 = vld [vmem:[#allocation2 + $0xc8] sm:$0xf] }
  0x4e   :  { %1940 = vmatpush.bf16.msra.mxu2 %v3412_v44  ;;  %v2908_v44 = vor.u32 %v3747_v33, %v2905_v34  ;;  %v3484_v52 = vor.u32 %v3891_v42, %v3481_v43  ;;  %v2816_v33 = vor.u32 %v3727_v27, %v2815_v25  ;;  %v3008_v34 = vor.u32 %v3775_v29, %v3007_v28  ;;  %v2791_v38 = vld [vmem:[#allocation2 + $0x248] sm:$0xf]  ;;  %v3769_v43 = vld [vmem:[#allocation2 + $0x3dc] sm:$0xf0]  ;;  %v2575_v49 = vld [vmem:[#allocation2 + $0x98] sm:$0xf] }
  0x4f   :  { %1954 = vmatpush.bf16.msra.mxu3 %v3604_v48  ;;  %v3292_v48 = vor.u32 %v3843_v40, %v3289_v41  ;;  %v3721_v41 = vld [vmem:[#allocation2 + $0x25c] sm:$0xf0]  ;;  %v2983_v42 = vld [vmem:[#allocation2 + $0x3c8] sm:$0xf]  ;;  %v3667_v50 = vld [vmem:[#allocation2 + $0xac] sm:$0xf0] }
  0x50   :  { %1913 = vmatpush.bf16.msra.mxu0 %v3004_v54  ;;  %v3885_v54 = vld [vmem:[#allocation2 + $0x784] sm:$0xf]  ;;  %v3817_v45 = vld [vmem:[#allocation2 + $0x55c] sm:$0xf0]  ;;  %v2767_v51 = vld [vmem:[#allocation2 + $0x218] sm:$0xf] }
  0x51   :  { %1927 = vmatpush.bf16.msra.mxu1 %v3196_v55  ;;  %v3457_v55 = vld [vmem:[#allocation2 + $0x798] sm:$0xf0]  ;;  %v3715_v53 = vld [vmem:[#allocation2 + $0x22c] sm:$0xf0]  ;;  %v2551_v62 = vld [vmem:[#allocation2 + $0x68] sm:$0xf] }
  0x52   :  { %1941 = vmatpush.bf16.msra.mxu2 %v3388_v56  ;;  %v2671_v56 = vld [vmem:[#allocation2 + $0x158] sm:$0xf]  ;;  %v3661_v63 = vld [vmem:[#allocation2 + $0x7c] sm:$0xf0]  ;;  %v3703_v15 = vld [vmem:[#allocation2 + $0x1cc] sm:$0xf0] }
  0x53   :  { %1955 = vmatpush.bf16.msra.mxu3 %v3580_v61  ;;  %v3739_v61 = vld [vmem:[#allocation2 + $0x2ec] sm:$0xf0]  ;;  %v2527_v11 = vld [vmem:[#allocation2 + $0x38] sm:$0xf]  ;;  %v2695_v27 = vld [vmem:[#allocation2 + $0x188] sm:$0xf] }
  0x54   :  { %1914 = vmatpush.bf16.msra.mxu0 %v2980_v3  ;;  %v3835_v3 = vld [vmem:[#allocation2 + $0x5ec] sm:$0xf0]  ;;  %v2864_v7 = vor.u32 %v3739_v61, %v2863_v59  ;;  %v2576_v59 = vor.u32 %v3667_v50, %v2575_v49  ;;  %v2719_v13 = vld [vmem:[#allocation2 + $0x1b8] sm:$0xf]  ;;  %v3697_v28 = vld [vmem:[#allocation2 + $0x19c] sm:$0xf0] }
  0x55   :  { %1928 = vmatpush.bf16.msra.mxu1 %v3172_v4  ;;  %v3460_v4 = vor.u32 %v3885_v54, %v3457_v55  ;;  %v3248_v12 = vor.u32 %v3835_v3, %v3247_v2  ;;  %v2959_v54 = vld [vmem:[#allocation2 + $0x398] sm:$0xf]  ;;  %v3763_v55 = vld [vmem:[#allocation2 + $0x3ac] sm:$0xf0]  ;;  %v3709_v2 = vld [vmem:[#allocation2 + $0x1fc] sm:$0xf0]  ;;  %v2720_v25 = vor.u32 %v3703_v15, %v2719_v13 }
  0x56   :  { %1942 = vmatpush.bf16.msra.mxu2 %v3364_v5  ;;  %v2672_v5 = vor.u32 %v3691_v58, %v2671_v56  ;;  %v3151_v56 = vld [vmem:[#allocation2 + $0x518] sm:$0xf]  ;;  %v3811_v58 = vld [vmem:[#allocation2 + $0x52c] sm:$0xf0]  ;;  %v2960_v61 = vor.u32 %v3763_v55, %v2959_v54  ;;  %v2935_v3 = vld [vmem:[#allocation2 + $0x368] sm:$0xf] }
  0x57   :  { %1956 = vmatpush.bf16.msra.mxu3 %v3556_v10  ;;  %v3685_v10 = vld [vmem:[#allocation2 + $0x13c] sm:$0xf0]  ;;  %v2887_v29 = vld [vmem:[#allocation2 + $0x308] sm:$0xf] }
  0x58   :  { %1915 = vmatpush.bf16.msra.mxu0 %v2956_v16  ;;  %v3223_v16 = vld [vmem:[#allocation2 + $0x5a8] sm:$0xf]  ;;  %v3925_v55 = vld [vmem:[#allocation2 + $0x8bc] sm:$0xf0] }
  0x59   :  { %1929 = vmatpush.bf16.msra.mxu1 %v3148_v17  ;;  %v3829_v17 = vld [vmem:[#allocation2 + $0x5bc] sm:$0xf0]  ;;  %v3367_v13 = vld [vmem:[#allocation2 + $0x6c8] sm:$0xf] }
  0x5a   :  { %1943 = vmatpush.bf16.msra.mxu2 %v3340_v18  ;;  %v2648_v18 = vor.u32 %v3685_v10, %v2647_v9  ;;  %v3224_v26 = vor.u32 %v3829_v17, %v3223_v16  ;;  %v2911_v16 = vld [vmem:[#allocation2 + $0x338] sm:$0xf]  ;;  %v3751_v17 = vld [vmem:[#allocation2 + $0x34c] sm:$0xf0]  ;;  %v3559_v15 = vld [vmem:[#allocation2 + $0x848] sm:$0xf] }
  0x5b   :  { %1957 = vmatpush.bf16.msra.mxu3 %v3532_v24  ;;  %v3679_v24 = vld [vmem:[#allocation2 + $0x10c] sm:$0xf0] }
  0x5c   :  { %1916 = vmatpush.bf16.msra.mxu0 %v2932_v30  ;;  %v3199_v30 = vld [vmem:[#allocation2 + $0x578] sm:$0xf] }
  0x5d   :  { %1930 = vmatpush.bf16.msra.mxu1 %v3124_v31  ;;  %v3823_v31 = vld [vmem:[#allocation2 + $0x58c] sm:$0xf0] }
  0x5e   :  { %1944 = vmatpush.bf16.msra.mxu2 %v3316_v32  ;;  %v2624_v32 = vor.u32 %v3679_v24, %v2623_v21  ;;  %v3200_v40 = vor.u32 %v3823_v31, %v3199_v30  ;;  %v2503_v21 = vld [vmem:[#allocation2 + $0x8] sm:$0xf]  ;;  %v3649_v24 = vld [vmem:[#allocation2 + $0x1c] sm:$0xf0] }
  0x5f   :  { %1958 = vmatpush.bf16.msra.mxu3 %v3508_v37  ;;  %v3673_v37 = vld [vmem:[#allocation2 + $0xdc] sm:$0xf0] }
  0x60   :  { %1917 = vmatpush.bf16.msra.mxu0 %v2908_v44  ;;  %v3175_v44 = vld [vmem:[#allocation2 + $0x548] sm:$0xf]  ;;  %v2600_v46 = vor.u32 %v3673_v37, %v2599_v36  ;;  %v3745_v31 = vld [vmem:[#allocation2 + $0x31c] sm:$0xf0]  ;;  %v3883_v36 = vld [vmem:[#allocation2 + $0x76c] sm:$0xf0] }
  0x61   :  { %1931 = vmatpush.bf16.msra.mxu1 %v3100_v47  ;;  %v2792_v47 = vor.u32 %v3721_v41, %v2791_v38  ;;  %v3631_v37 = vld [vmem:[#allocation2 + $0x8d8] sm:$0xf]  ;;  %v2504_v38 = vor.u32 %v3649_v24, %v2503_v21  ;;  %v3688_v41 = vld [vmem:[#allocation2 + $0x15c] sm:$0xf]  ;;  %v2793_v21 = vld [vmem:[#allocation2 + $0x260] sm:$0xf0] }
  0x62   :  { %1945 = vmatpush.bf16.msra.mxu2 %v3292_v48  ;;  %v2984_v48 = vor.u32 %v3769_v43, %v2983_v42  ;;  %v2673_v42 = vld [vmem:[#allocation2 + $0x170] sm:$0xf0]  ;;  %v2696_v43 = vor.u32 %v3697_v28, %v2695_v27  ;;  %v3343_v27 = vld [vmem:[#allocation2 + $0x698] sm:$0xf]  ;;  %v3859_v28 = vld [vmem:[#allocation2 + $0x6ac] sm:$0xf0] }
  0x63   :  { %1959 = vmatpush.bf16.msra.mxu3 %v3484_v52  ;;  %v3176_v52 = vor.u32 %v3817_v45, %v3175_v44  ;;  %v2888_v44 = vor.u32 %v3745_v31, %v2887_v29  ;;  %v3736_v45 = vld [vmem:[#allocation2 + $0x2dc] sm:$0xf]  ;;  %v2676_v50 = vor.u32 %v3688_v41, %v2673_v42  ;;  %v3535_v29 = vld [vmem:[#allocation2 + $0x818] sm:$0xf]  ;;  %v3907_v31 = vld [vmem:[#allocation2 + $0x82c] sm:$0xf0] }
  0x64   :  { %1918 = vmatpush.bf16.msra.mxu0 %v2884_v60  ;;  %v2768_v60 = vor.u32 %v3715_v53, %v2767_v51  ;;  %v3415_v51 = vld [vmem:[#allocation2 + $0x728] sm:$0xf]  ;;  %v3853_v42 = vld [vmem:[#allocation2 + $0x67c] sm:$0xf0] }
  0x65   :  { %1932 = vmatpush.bf16.msra.mxu1 %v3076_v0  ;;  %v2743_v0 = vld [vmem:[#allocation2 + $0x1e8] sm:$0xf] }
  0x66   :  { %1946 = vmatpush.bf16.msra.mxu2 %v3268_v1  ;;  %v3152_v1 = vor.u32 %v3811_v58, %v3151_v56  ;;  %v2744_v9 = vor.u32 %v3709_v2, %v2743_v0  ;;  %v3607_v53 = vld [vmem:[#allocation2 + $0x8a8] sm:$0xf]  ;;  %v3682_v56 = vld [vmem:[#allocation2 + $0x12c] sm:$0xf]  ;;  %v2649_v58 = vld [vmem:[#allocation2 + $0x140] sm:$0xf0] }
  0x67   :  { %1960 = vmatpush.bf16.msra.mxu3 %v3460_v4  ;;  %1919 = vmatmul.bf16.vlgmr.msra.gmra.mxu0 %v4042_v22  ;;  %v3757_v4 = vld [vmem:[#allocation2 + $0x37c] sm:$0xf0]  ;;  %v3391_v0 = vld [vmem:[#allocation2 + $0x6f8] sm:$0xf]  ;;  %v3319_v41 = vld [vmem:[#allocation2 + $0x668] sm:$0xf] }
  0x68   :  { %1967 = vmatpush.bf16.msrb.mxu0 %v2672_v5  ;;  %1933 = vmatmul.bf16.vlgmr.msra.gmra.mxu1 %v4044_v23  ;;  %v3127_v5 = vld [vmem:[#allocation2 + $0x4e8] sm:$0xf]  ;;  %v2936_v10 = vor.u32 %v3757_v4, %v2935_v3  ;;  %v3583_v2 = vld [vmem:[#allocation2 + $0x878] sm:$0xf]  ;;  %v3919_v4 = vld [vmem:[#allocation2 + $0x88c] sm:$0xf0] }
  0x69   :  { %1981 = vmatpush.bf16.msrb.mxu1 %v2864_v7  ;;  %1947 = vmatmul.bf16.vlgmr.msra.gmra.mxu2 %v4060_v35  ;;  %v3805_v7 = vld [vmem:[#allocation2 + $0x4fc] sm:$0xf0] }
  0x6a   :  { %1995 = vmatpush.bf16.msrb.mxu2 %v3056_v8  ;;  %1961 = vmatmul.bf16.vlgmr.msra.gmra.mxu3 %v4062_v39  ;;  %v2552_v8 = vor.u32 %v3661_v63, %v2551_v62  ;;  %v3128_v14 = vor.u32 %v3805_v7, %v3127_v5  ;;  %v3608_v62 = vor.u32 %v3925_v55, %v3607_v53  ;;  %v3676_v5 = vld [vmem:[#allocation2 + $0xfc] sm:$0xf]  ;;  %v2625_v7 = vld [vmem:[#allocation2 + $0x110] sm:$0xf0]  ;;  %v3295_v53 = vld [vmem:[#allocation2 + $0x638] sm:$0xf] }
  0x6b   :  { %2009 = vmatpush.bf16.msrb.mxu3 %v3248_v12  ;;  %v3655_v12 = vld [vmem:[#allocation2 + $0x4c] sm:$0xf0]  ;;  %v2652_v63 = vor.u32 %v3682_v56, %v2649_v58  ;;  %v3487_v55 = vld [vmem:[#allocation2 + $0x7b8] sm:$0xf] }
  0x6c   :  { %1968 = vmatpush.bf16.msrb.mxu0 %v2648_v18  ;;  %v3103_v18 = vld [vmem:[#allocation2 + $0x4b8] sm:$0xf]  ;;  %v3895_v58 = vld [vmem:[#allocation2 + $0x7cc] sm:$0xf0] }
  0x6d   :  { %1982 = vmatpush.bf16.msrb.mxu1 %v2840_v19  ;;  %v3799_v19 = vld [vmem:[#allocation2 + $0x4cc] sm:$0xf0] }
  0x6e   :  { %1996 = vmatpush.bf16.msrb.mxu2 %v3032_v20  ;;  %v2528_v20 = vor.u32 %v3655_v12, %v2527_v11  ;;  %v3104_v30 = vor.u32 %v3799_v19, %v3103_v18  ;;  %v3584_v11 = vor.u32 %v3919_v4, %v3583_v2  ;;  %v2628_v12 = vor.u32 %v3676_v5, %v2625_v7  ;;  %v3670_v18 = vld [vmem:[#allocation2 + $0xcc] sm:$0xf]  ;;  %v2601_v19 = vld [vmem:[#allocation2 + $0xe0] sm:$0xf0]  ;;  %v3463_v4 = vld [vmem:[#allocation2 + $0x788] sm:$0xf] }
  0x6f   :  { %2010 = vmatpush.bf16.msrb.mxu3 %v3224_v26  ;;  %v2912_v26 = vor.u32 %v3751_v17, %v2911_v16  ;;  %v3913_v17 = vld [vmem:[#allocation2 + $0x85c] sm:$0xf0]  ;;  %v3488_v2 = vor.u32 %v3895_v58, %v3487_v55  ;;  %v3646_v7 = vld [vmem:[#allocation2 + $0xc] sm:$0xf] }
  0x70   :  { %1969 = vmatpush.bf16.msrb.mxu0 %v2624_v32  ;;  %v3079_v32 = vld [vmem:[#allocation2 + $0x488] sm:$0xf]  ;;  %v3889_v5 = vld [vmem:[#allocation2 + $0x79c] sm:$0xf0]  ;;  %v3766_v58 = vld [vmem:[#allocation2 + $0x3cc] sm:$0xf] }
  0x71   :  { %1983 = vmatpush.bf16.msrb.mxu1 %v2816_v33  ;;  %v3793_v33 = vld [vmem:[#allocation2 + $0x49c] sm:$0xf0] }
  0x72   :  { %1997 = vmatpush.bf16.msrb.mxu2 %v3008_v34  ;;  %v3439_v34 = vld [vmem:[#allocation2 + $0x758] sm:$0xf] }
  0x73   :  { %2011 = vmatpush.bf16.msrb.mxu3 %v3200_v40  ;;  %v3931_v40 = vld [vmem:[#allocation2 + $0x8ec] sm:$0xf0] }
  0x74   :  { %1970 = vmatpush.bf16.msrb.mxu0 %v2600_v46  ;;  %v2865_v46 = vld [vmem:[#allocation2 + $0x2f0] sm:$0xf0]  ;;  %v3632_v49 = vor.u32 %v3931_v40, %v3631_v37  ;;  %v3344_v37 = vor.u32 %v3859_v28, %v3343_v27 }
  0x75   :  { %1984 = vmatpush.bf16.msrb.mxu1 %v2792_v47  ;;  %v3080_v47 = vor.u32 %v3793_v33, %v3079_v32  ;;  %v2868_v54 = vor.u32 %v3736_v45, %v2865_v46  ;;  %v3664_v32 = vld [vmem:[#allocation2 + $0x9c] sm:$0xf]  ;;  %v2577_v33 = vld [vmem:[#allocation2 + $0xb0] sm:$0xf0]  ;;  %v3901_v45 = vld [vmem:[#allocation2 + $0x7fc] sm:$0xf0] }
  0x76   :  { %1998 = vmatpush.bf16.msrb.mxu2 %v2984_v48  ;;  %v3440_v48 = vor.u32 %v3883_v36, %v3439_v34  ;;  %v3712_v34 = vld [vmem:[#allocation2 + $0x21c] sm:$0xf]  ;;  %v2769_v36 = vld [vmem:[#allocation2 + $0x230] sm:$0xf0]  ;;  %v2580_v40 = vor.u32 %v3664_v32, %v2577_v33  ;;  %v3658_v46 = vld [vmem:[#allocation2 + $0x6c] sm:$0xf] }
  0x77   :  { %2012 = vmatpush.bf16.msrb.mxu3 %v3176_v52  ;;  %v3877_v52 = vld [vmem:[#allocation2 + $0x73c] sm:$0xf0]  ;;  %v3225_v33 = vld [vmem:[#allocation2 + $0x5c0] sm:$0xf0] }
  0x78   :  { %1971 = vmatpush.bf16.msrb.mxu0 %v2576_v59  ;;  %v3730_v59 = vld [vmem:[#allocation2 + $0x2ac] sm:$0xf] }
  0x79   :  { %1985 = vmatpush.bf16.msrb.mxu1 %v2768_v60  ;;  %v2841_v60 = vld [vmem:[#allocation2 + $0x2c0] sm:$0xf0] }
  0x7a   :  { %1999 = vmatpush.bf16.msrb.mxu2 %v2960_v61  ;;  %v3416_v61 = vor.u32 %v3877_v52, %v3415_v51  ;;  %v2844_v3 = vor.u32 %v3730_v59, %v2841_v60  ;;  %v3652_v59 = vld [vmem:[#allocation2 + $0x3c] sm:$0xf]  ;;  %v2529_v60 = vld [vmem:[#allocation2 + $0x50] sm:$0xf0] }
  0x7b   :  { %2013 = vmatpush.bf16.msrb.mxu3 %v3152_v1  ;;  %v3871_v1 = vld [vmem:[#allocation2 + $0x70c] sm:$0xf0] }
  0x7c   :  { %1972 = vmatpush.bf16.msrb.mxu0 %v2552_v8  ;;  %v3724_v8 = vld [vmem:[#allocation2 + $0x27c] sm:$0xf] }
  0x7d   :  { %1986 = vmatpush.bf16.msrb.mxu1 %v2744_v9  ;;  %v2817_v9 = vld [vmem:[#allocation2 + $0x290] sm:$0xf0] }
  0x7e   :  { %2000 = vmatpush.bf16.msrb.mxu2 %v2936_v10  ;;  %v3392_v10 = vor.u32 %v3871_v1, %v3391_v0  ;;  %v2820_v16 = vor.u32 %v3724_v8, %v2817_v9  ;;  %v3271_v0 = vld [vmem:[#allocation2 + $0x608] sm:$0xf]  ;;  %v3841_v1 = vld [vmem:[#allocation2 + $0x61c] sm:$0xf0]  ;;  %v2505_v9 = vld [vmem:[#allocation2 + $0x20] sm:$0xf0] }
  0x7f   :  { %2014 = vmatpush.bf16.msrb.mxu3 %v3128_v14  ;;  %v3865_v14 = vld [vmem:[#allocation2 + $0x6dc] sm:$0xf0] }
  0x80   :  { %1973 = vmatpush.bf16.msrb.mxu0 %v2528_v20  ;;  %v3718_v20 = vld [vmem:[#allocation2 + $0x24c] sm:$0xf]  ;;  %v3368_v24 = vor.u32 %v3865_v14, %v3367_v13  ;;  %v3057_v13 = vld [vmem:[#allocation2 + $0x470] sm:$0xf0]  ;;  %v3832_v14 = vld [vmem:[#allocation2 + $0x5dc] sm:$0xf] }
  0x81   :  { %1987 = vmatpush.bf16.msrb.mxu1 %v2720_v25  ;;  %v3560_v25 = vor.u32 %v3913_v17, %v3559_v15  ;;  %v3272_v15 = vor.u32 %v3841_v1, %v3271_v0  ;;  %v3880_v17 = vld [vmem:[#allocation2 + $0x75c] sm:$0xf]  ;;  %v3369_v0 = vld [vmem:[#allocation2 + $0x6e0] sm:$0xf0]  ;;  %v3910_v1 = vld [vmem:[#allocation2 + $0x84c] sm:$0xf] }
  0x82   :  { %2001 = vmatpush.bf16.msrb.mxu2 %v2912_v26  ;;  %v2604_v26 = vor.u32 %v3670_v18, %v2601_v19  ;;  %v3441_v18 = vld [vmem:[#allocation2 + $0x770] sm:$0xf0]  ;;  %v3464_v19 = vor.u32 %v3889_v5, %v3463_v4 }
  0x83   :  { %2015 = vmatpush.bf16.msrb.mxu3 %v3104_v30  ;;  %v2796_v30 = vor.u32 %v3718_v20, %v2793_v21  ;;  %v2508_v20 = vor.u32 %v3646_v7, %v2505_v9  ;;  %v3928_v21 = vld [vmem:[#allocation2 + $0x8dc] sm:$0xf]  ;;  %v3444_v28 = vor.u32 %v3880_v17, %v3441_v18  ;;  %v3537_v17 = vld [vmem:[#allocation2 + $0x830] sm:$0xf0] }
  0x84   :  { %1974 = vmatpush.bf16.msrb.mxu0 %v2504_v38  ;;  %v3536_v38 = vor.u32 %v3907_v31, %v3535_v29  ;;  %v3778_v29 = vld [vmem:[#allocation2 + $0x42c] sm:$0xf]  ;;  %v3760_v9 = vld [vmem:[#allocation2 + $0x39c] sm:$0xf] }
  0x85   :  { %1988 = vmatpush.bf16.msrb.mxu1 %v2696_v43  ;;  %v3511_v43 = vld [vmem:[#allocation2 + $0x7e8] sm:$0xf]  ;;  %v3826_v31 = vld [vmem:[#allocation2 + $0x5ac] sm:$0xf] }
  0x86   :  { %2002 = vmatpush.bf16.msrb.mxu2 %v2888_v44  ;;  %v2772_v44 = vor.u32 %v3712_v34, %v2769_v36  ;;  %v3512_v51 = vor.u32 %v3901_v45, %v3511_v43  ;;  %v3874_v34 = vld [vmem:[#allocation2 + $0x72c] sm:$0xf]  ;;  %v3417_v36 = vld [vmem:[#allocation2 + $0x740] sm:$0xf0]  ;;  %v3820_v45 = vld [vmem:[#allocation2 + $0x57c] sm:$0xf] }
  0x87   :  { %2016 = vmatpush.bf16.msrb.mxu3 %v3080_v47  ;;  %1975 = vmatmul.bf16.vlgmr.msrb.gmra.mxu0 %v4018_v57  ;;  %v2553_v47 = vld [vmem:[#allocation2 + $0x80] sm:$0xf0]  ;;  %v3420_v43 = vor.u32 %v3874_v34, %v3417_v36 }
  0x88   :  { %2023 = vmatpush.bf16.msra.mxu0 %v3440_v48  ;;  %1989 = vmatmul.bf16.vlgmr.msrb.gmra.mxu1 %v4027_v6  ;;  %v3706_v48 = vld [vmem:[#allocation2 + $0x1ec] sm:$0xf]  ;;  %v2556_v52 = vor.u32 %v3658_v46, %v2553_v47  ;;  %v4079_v46 = vld [vmem:[%s4311_s2] sm:$0x3f] }
  0x89   :  { %2037 = vmatpush.bf16.msra.mxu1 %v3632_v49  ;;  %2003 = vmatmul.bf16.vlgmr.msrb.gmra.mxu2 %v4042_v22  ;;  %v2745_v49 = vld [vmem:[#allocation2 + $0x200] sm:$0xf0] }
  0x8a   :  { %2051 = vmatpush.bf16.msra.mxu2 %v2676_v50  ;;  %2017 = vmatmul.bf16.vlgmr.msrb.gmra.mxu3 %v4044_v23  ;;  %v3320_v50 = vor.u32 %v3853_v42, %v3319_v41  ;;  %v2748_v56 = vor.u32 %v3706_v48, %v2745_v49  ;;  %v3772_v41 = vld [vmem:[#allocation2 + $0x3fc] sm:$0xf]  ;;  %v3228_v42 = vor.u32 %v3826_v31, %v3225_v33  ;;  %v3201_v48 = vld [vmem:[#allocation2 + $0x590] sm:$0xf0]  ;;  %v3321_v31 = vld [vmem:[#allocation2 + $0x680] sm:$0xf0] }
  0x8b   :  { %2065 = vmatpush.bf16.msra.mxu3 %v2868_v54  ;;  %v3847_v54 = vld [vmem:[#allocation2 + $0x64c] sm:$0xf0]  ;;  %v3868_v49 = vld [vmem:[#allocation2 + $0x6fc] sm:$0xf]  ;;  %v3204_v55 = vor.u32 %v3820_v45, %v3201_v48  ;;  %v3513_v33 = vld [vmem:[#allocation2 + $0x800] sm:$0xf0] }
  0x8c   :  { %2024 = vmatpush.bf16.msra.mxu0 %v3416_v61  ;;  %v3700_v61 = vld [vmem:[#allocation2 + $0x1bc] sm:$0xf]  ;;  %v3105_v45 = vld [vmem:[#allocation2 + $0x4d0] sm:$0xf0] }
  0x8d   :  { %2038 = vmatpush.bf16.msra.mxu1 %v3608_v62  ;;  %v2721_v62 = vld [vmem:[#allocation2 + $0x1d0] sm:$0xf0] }
  0x8e   :  { %2052 = vmatpush.bf16.msra.mxu2 %v2652_v63  ;;  %v3296_v63 = vor.u32 %v3847_v54, %v3295_v53  ;;  %v2724_v8 = vor.u32 %v3700_v61, %v2721_v62  ;;  %v347_v54 = vperm.slane %v4079_v46, 0  ;;  %v3177_v62 = vld [vmem:[#allocation2 + $0x560] sm:$0xf0]  ;;  %v3297_v48 = vld [vmem:[#allocation2 + $0x650] sm:$0xf0] }
  0x8f   :  { %2066 = vmatpush.bf16.msra.mxu3 %v2844_v3  ;;  %v2532_v3 = vor.u32 %v3652_v59, %v2529_v60  ;;  %v2985_v59 = vld [vmem:[#allocation2 + $0x3e0] sm:$0xf0]  ;;  %v3814_v60 = vld [vmem:[#allocation2 + $0x54c] sm:$0xf] }
  0x90   :  { %2025 = vmatpush.bf16.msra.mxu0 %v3392_v10  ;;  %v3694_v10 = vld [vmem:[#allocation2 + $0x18c] sm:$0xf]  ;;  %v2988_v4 = vor.u32 %v3766_v58, %v2985_v59  ;;  %v3180_v7 = vor.u32 %v3814_v60, %v3177_v62  ;;  %v3081_v60 = vld [vmem:[#allocation2 + $0x4a0] sm:$0xf0] }
  0x91   :  { %2039 = vmatpush.bf16.msra.mxu1 %v3584_v11  ;;  %v2697_v11 = vld [vmem:[#allocation2 + $0x1a0] sm:$0xf0]  ;;  %v3790_v59 = vld [vmem:[#allocation2 + $0x48c] sm:$0xf] }
  0x92   :  { %2053 = vmatpush.bf16.msra.mxu2 %v2628_v12  ;;  %v3784_v12 = vld [vmem:[#allocation2 + $0x45c] sm:$0xf] }
  0x93   :  { %2067 = vmatpush.bf16.msra.mxu3 %v2820_v16  ;;  %v3249_v16 = vld [vmem:[#allocation2 + $0x5f0] sm:$0xf0] }
  0x94   :  { %2026 = vmatpush.bf16.msra.mxu0 %v3368_v24  ;;  %v3633_v24 = vld [vmem:[#allocation2 + $0x8f0] sm:$0xf0]  ;;  %v3252_v27 = vor.u32 %v3832_v14, %v3249_v16  ;;  %v3856_v14 = vld [vmem:[#allocation2 + $0x69c] sm:$0xf] }
  0x95   :  { %2040 = vmatpush.bf16.msra.mxu1 %v3560_v25  ;;  %v2700_v25 = vor.u32 %v3694_v10, %v2697_v11  ;;  %v3636_v32 = vor.u32 %v3928_v21, %v3633_v24  ;;  %v2961_v10 = vld [vmem:[#allocation2 + $0x3b0] sm:$0xf0]  ;;  %v3808_v11 = vld [vmem:[#allocation2 + $0x51c] sm:$0xf] }
  0x96   :  { %2054 = vmatpush.bf16.msra.mxu2 %v2604_v26  ;;  %v3060_v26 = vor.u32 %v3784_v12, %v3057_v13  ;;  %v3153_v13 = vld [vmem:[#allocation2 + $0x530] sm:$0xf0]  ;;  %v3904_v16 = vld [vmem:[#allocation2 + $0x81c] sm:$0xf] }
  0x97   :  { %2068 = vmatpush.bf16.msra.mxu3 %v2796_v30  ;;  %v3033_v30 = vld [vmem:[#allocation2 + $0x440] sm:$0xf0]  ;;  %v3156_v21 = vor.u32 %v3808_v11, %v3153_v13  ;;  %v3063_v11 = vld [vmem:[#allocation2 + $0x460] sm:$0xf] }
  0x98   :  { %2027 = vmatpush.bf16.msra.mxu0 %v3344_v37  ;;  %v3922_v37 = vld [vmem:[#allocation2 + $0x8ac] sm:$0xf] }
  0x99   :  { %2041 = vmatpush.bf16.msra.mxu1 %v3536_v38  ;;  %v3609_v38 = vld [vmem:[#allocation2 + $0x8c0] sm:$0xf0] }
  0x9a   :  { %2055 = vmatpush.bf16.msra.mxu2 %v2580_v40  ;;  %v3036_v40 = vor.u32 %v3778_v29, %v3033_v30  ;;  %v3612_v47 = vor.u32 %v3922_v37, %v3609_v38  ;;  %v3129_v29 = vld [vmem:[#allocation2 + $0x500] sm:$0xf0]  ;;  %v3850_v30 = vld [vmem:[#allocation2 + $0x66c] sm:$0xf] }
  0x9b   :  { %2069 = vmatpush.bf16.msra.mxu3 %v2772_v44  ;;  %v3009_v44 = vld [vmem:[#allocation2 + $0x410] sm:$0xf0] }
  0x9c   :  { %2028 = vmatpush.bf16.msra.mxu0 %v3320_v50  ;;  %v3393_v50 = vld [vmem:[#allocation2 + $0x710] sm:$0xf0]  ;;  %v3012_v53 = vor.u32 %v3772_v41, %v3009_v44  ;;  %v3748_v41 = vld [vmem:[#allocation2 + $0x33c] sm:$0xf] }
  0x9d   :  { %2042 = vmatpush.bf16.msra.mxu1 %v3512_v51  ;;  %v3916_v51 = vld [vmem:[#allocation2 + $0x87c] sm:$0xf] }
  0x9e   :  { %2056 = vmatpush.bf16.msra.mxu2 %v2556_v52  ;;  %v3585_v52 = vld [vmem:[#allocation2 + $0x890] sm:$0xf0] }
  0x9f   :  { %2070 = vmatpush.bf16.msra.mxu3 %v2748_v56  ;;  %v3396_v56 = vor.u32 %v3868_v49, %v3393_v50  ;;  %v3588_v61 = vor.u32 %v3916_v51, %v3585_v52  ;;  %v3892_v49 = vld [vmem:[#allocation2 + $0x7bc] sm:$0xf]  ;;  %v3489_v50 = vld [vmem:[#allocation2 + $0x7d0] sm:$0xf0] }
  0xa0   :  { %2029 = vmatpush.bf16.msra.mxu0 %v3296_v63  ;;  %v3862_v63 = vld [vmem:[#allocation2 + $0x6cc] sm:$0xf] }
  0xa1   :  { %2043 = vmatpush.bf16.msra.mxu1 %v3488_v2  ;;  %v3561_v2 = vld [vmem:[#allocation2 + $0x860] sm:$0xf0] }
  0xa2   :  { %2057 = vmatpush.bf16.msra.mxu2 %v2532_v3  ;;  %v3564_v12 = vor.u32 %v3910_v1, %v3561_v2  ;;  %v3886_v1 = vld [vmem:[#allocation2 + $0x78c] sm:$0xf]  ;;  %v3465_v2 = vld [vmem:[#allocation2 + $0x7a0] sm:$0xf0] }
  0xa3   :  { %2071 = vmatpush.bf16.msra.mxu3 %v2724_v8  ;;  %v3372_v8 = vor.u32 %v3862_v63, %v3369_v0  ;;  %v3492_v63 = vor.u32 %v3892_v49, %v3489_v50  ;;  %v3273_v0 = vld [vmem:[#allocation2 + $0x620] sm:$0xf0]  ;;  %v3207_v50 = vld [vmem:[#allocation2 + $0x580] sm:$0xf] }
  0xa4   :  { %2030 = vmatpush.bf16.msra.mxu0 %v3272_v15  ;;  %v1808_v3 = vpop.f32.mrf.mxu0  ;;  %v3345_v15 = vld [vmem:[#allocation2 + $0x6b0] sm:$0xf0] }
  0xa5   :  { %2044 = vmatpush.bf16.msra.mxu1 %v3464_v19  ;;  %v1809_v5 = vadd.f32 %v1808_v3, %v347_v54  ;;  %v1822_v18 = vpop.f32.mrf.mxu1  ;;  %v2964_v19 = vor.u32 %v3760_v9, %v2961_v10  ;;  %v3348_v24 = vor.u32 %v3856_v14, %v3345_v15  ;;  %v3740_v10 = vld [vmem:[#allocation2 + $0x2f4] sm:$0xf0]  ;;  %v3084_v14 = vor.u32 %v3790_v59, %v3081_v60  ;;  %v3722_v60 = vld [vmem:[#allocation2 + $0x264] sm:$0xf0] }
  0xa6   :  { %2058 = vmatpush.bf16.msra.mxu2 %v2508_v20 }
  0xa7   :  { %2072 = vmatpush.bf16.msra.mxu3 %v2700_v25  ;;  %2031 = vmatmul.bf16.vlgmr.msra.gmra.mxu0 %v4060_v35  ;;  %v1823_v20 = vadd.f32 %v1822_v18, %v1809_v5  ;;  %v3754_v25 = vld [vmem:[#allocation2 + $0x36c] sm:$0xf]  ;;  %v2679_v5 = vld [vmem:[#allocation2 + $0x160] sm:$0xf]  ;;  %v3468_v18 = vor.u32 %v3886_v1, %v3465_v2  ;;  %v3818_v1 = vld [vmem:[#allocation2 + $0x564] sm:$0xf0] }
  0xa8   :  { %2079 = vmatpush.bf16.msrb.mxu0 %v3060_v26  ;;  %2045 = vmatmul.bf16.vlgmr.msra.gmra.mxu1 %v4062_v39  ;;  %v2937_v26 = vld [vmem:[#allocation2 + $0x380] sm:$0xf0] }
  0xa9   :  { %2093 = vmatpush.bf16.msrb.mxu1 %v3252_v27  ;;  %2059 = vmatmul.bf16.vlgmr.msra.gmra.mxu2 %v4018_v57  ;;  %v3802_v27 = vld [vmem:[#allocation2 + $0x4ec] sm:$0xf]  ;;  %v2940_v36 = vor.u32 %v3754_v25, %v2937_v26  ;;  %v3686_v25 = vld [vmem:[#allocation2 + $0x144] sm:$0xf0]  ;;  %v2847_v26 = vld [vmem:[#allocation2 + $0x2b0] sm:$0xf] }
  0xaa   :  { %2107 = vmatpush.bf16.msrb.mxu2 %v3444_v28  ;;  %2073 = vmatmul.bf16.vlgmr.msra.gmra.mxu3 %v4027_v6  ;;  %v3540_v28 = vor.u32 %v3904_v16, %v3537_v17  ;;  %v3132_v38 = vor.u32 %v3802_v27, %v3129_v29  ;;  %v3255_v16 = vld [vmem:[#allocation2 + $0x5e0] sm:$0xf]  ;;  %v3836_v17 = vld [vmem:[#allocation2 + $0x5f4] sm:$0xf0]  ;;  %v3039_v29 = vld [vmem:[#allocation2 + $0x430] sm:$0xf] }
  0xab   :  { %2121 = vmatpush.bf16.msrb.mxu3 %v3636_v32  ;;  %v3898_v32 = vld [vmem:[#allocation2 + $0x7ec] sm:$0xf]  ;;  %v3256_v27 = vor.u32 %v3836_v17, %v3255_v16  ;;  %v3764_v16 = vld [vmem:[#allocation2 + $0x3b4] sm:$0xf0]  ;;  %v3159_v17 = vld [vmem:[#allocation2 + $0x520] sm:$0xf] }
  0xac   :  { %2080 = vmatpush.bf16.msrb.mxu0 %v3036_v40  ;;  %v1810_v34 = vpop.f32.mrf.mxu0  ;;  %v3324_v40 = vor.u32 %v3850_v30, %v3321_v31  ;;  %v3516_v44 = vor.u32 %v3898_v32, %v3513_v33  ;;  %v1836_v62 = vpop.f32.mrf.mxu2  ;;  %v3782_v30 = vld [vmem:[#allocation2 + $0x444] sm:$0xf0]  ;;  %v3231_v31 = vld [vmem:[#allocation2 + $0x5b0] sm:$0xf] }
  0xad   :  { %2094 = vmatpush.bf16.msrb.mxu1 %v3228_v42  ;;  %v1811_v37 = vadd.f32 %v1810_v34, %v347_v54  ;;  %v2913_v42 = vld [vmem:[#allocation2 + $0x350] sm:$0xf0]  ;;  %v1824_v51 = vpop.f32.mrf.mxu1  ;;  %v1837_v3 = vadd.f32 %v1836_v62, %v1823_v20  ;;  %v3830_v32 = vld [vmem:[#allocation2 + $0x5c4] sm:$0xf0] }
  0xae   :  { %2108 = vmatpush.bf16.msrb.mxu2 %v3420_v43  ;;  %v3796_v43 = vld [vmem:[#allocation2 + $0x4bc] sm:$0xf]  ;;  %v2916_v52 = vor.u32 %v3748_v41, %v2913_v42  ;;  %v2631_v41 = vld [vmem:[#allocation2 + $0x100] sm:$0xf]  ;;  %v3680_v42 = vld [vmem:[#allocation2 + $0x114] sm:$0xf0] }
  0xaf   :  { %2122 = vmatpush.bf16.msrb.mxu3 %v3612_v47  ;;  %v3844_v47 = vld [vmem:[#allocation2 + $0x63c] sm:$0xf]  ;;  %v1825_v54 = vadd.f32 %v1824_v51, %v1811_v37  ;;  %v3824_v51 = vld [vmem:[#allocation2 + $0x594] sm:$0xf0]  ;;  %v3770_v62 = vld [vmem:[#allocation2 + $0x3e4] sm:$0xf0] }
  0xb0   :  { %2081 = vmatpush.bf16.msrb.mxu0 %v3012_v53  ;;  %v3742_v53 = vld [vmem:[#allocation2 + $0x30c] sm:$0xf]  ;;  %v3300_v58 = vor.u32 %v3844_v47, %v3297_v48  ;;  %v3015_v47 = vld [vmem:[#allocation2 + $0x400] sm:$0xf]  ;;  %v3776_v48 = vld [vmem:[#allocation2 + $0x414] sm:$0xf0]  ;;  %v3208_v59 = vor.u32 %v3824_v51, %v3207_v50 }
  0xb1   :  { %2095 = vmatpush.bf16.msrb.mxu1 %v3204_v55  ;;  %v2889_v55 = vld [vmem:[#allocation2 + $0x320] sm:$0xf0] }
  0xb2   :  { %2109 = vmatpush.bf16.msrb.mxu2 %v3396_v56  ;;  %v3108_v56 = vor.u32 %v3796_v43, %v3105_v45  ;;  %v2892_v9 = vor.u32 %v3742_v53, %v2889_v55  ;;  %v2823_v43 = vld [vmem:[#allocation2 + $0x280] sm:$0xf]  ;;  %v3728_v45 = vld [vmem:[#allocation2 + $0x294] sm:$0xf0]  ;;  %v3016_v55 = vor.u32 %v3776_v48, %v3015_v47 }
  0xb3   :  { %2123 = vmatpush.bf16.msrb.mxu3 %v3588_v61  ;;  %v3838_v61 = vld [vmem:[#allocation2 + $0x60c] sm:$0xf]  ;;  %v2824_v53 = vor.u32 %v3728_v45, %v2823_v43  ;;  %v3656_v45 = vld [vmem:[#allocation2 + $0x54] sm:$0xf0]  ;;  %v2727_v47 = vld [vmem:[#allocation2 + $0x1c0] sm:$0xf] }
  0xb4   :  { %2082 = vmatpush.bf16.msrb.mxu0 %v2988_v4  ;;  %v1850_v4 = vpop.f32.mrf.mxu3  ;;  %v3276_v15 = vor.u32 %v3838_v61, %v3273_v0  ;;  %v1838_v33 = vpop.f32.mrf.mxu2  ;;  %v2991_v61 = vld [vmem:[#allocation2 + $0x3d0] sm:$0xf] }
  0xb5   :  { %2096 = vmatpush.bf16.msrb.mxu1 %v3180_v7  ;;  %v3692_v7 = vld [vmem:[#allocation2 + $0x174] sm:$0xf0]  ;;  %v4086_v13 = vadd.f32 %v1850_v4, %v1837_v3  ;;  %v3183_v0 = vld [vmem:[#allocation2 + $0x550] sm:$0xf] }
  0xb6   :  { %2110 = vmatpush.bf16.msrb.mxu2 %v3372_v8  ;;  %v2871_v8 = vld [vmem:[#allocation2 + $0x2e0] sm:$0xf] }
  0xb7   :  { %2124 = vmatpush.bf16.msrb.mxu3 %v3564_v12  ;;  %v3788_v12 = vld [vmem:[#allocation2 + $0x474] sm:$0xf0]  ;;  %v2872_v20 = vor.u32 %v3740_v10, %v2871_v8  ;;  %v2583_v8 = vld [vmem:[#allocation2 + $0xa0] sm:$0xf] }
  0xb8   :  { %2083 = vmatpush.bf16.msrb.mxu0 %v2964_v19  ;;  %v2680_v19 = vor.u32 %v3692_v7, %v2679_v5  ;;  %v2992_v7 = vor.u32 %v3770_v62, %v2991_v61  ;;  %v2775_v10 = vld [vmem:[#allocation2 + $0x220] sm:$0xf]  ;;  %v2703_v62 = vld [vmem:[#allocation2 + $0x190] sm:$0xf] }
  0xb9   :  { %2097 = vmatpush.bf16.msrb.mxu1 %v3156_v21  ;;  %v3064_v21 = vor.u32 %v3788_v12, %v3063_v11  ;;  %v3184_v11 = vor.u32 %v3818_v1, %v3183_v0  ;;  %v2895_v0 = vld [vmem:[#allocation2 + $0x310] sm:$0xf] }
  0xba   :  { %2111 = vmatpush.bf16.msrb.mxu2 %v3348_v24  ;;  %v2655_v24 = vld [vmem:[#allocation2 + $0x130] sm:$0xf] }
  0xbb   :  { %2125 = vmatpush.bf16.msrb.mxu3 %v3540_v28  ;;  %v3734_v28 = vld [vmem:[#allocation2 + $0x2c4] sm:$0xf0]  ;;  %v2656_v34 = vor.u32 %v3686_v25, %v2655_v24  ;;  %v2559_v24 = vld [vmem:[#allocation2 + $0x70] sm:$0xf] }
  0xbc   :  { %2084 = vmatpush.bf16.msrb.mxu0 %v2940_v36  ;;  %v1839_v36 = vadd.f32 %v1838_v33, %v1825_v54  ;;  %v1852_v37 = vpop.f32.mrf.mxu3  ;;  %v2607_v54 = vld [vmem:[#allocation2 + $0xd0] sm:$0xf]  ;;  %v3662_v25 = vld [vmem:[#allocation2 + $0x84] sm:$0xf0] }
  0xbd   :  { %2098 = vmatpush.bf16.msrb.mxu1 %v3132_v38  ;;  %v2848_v38 = vor.u32 %v3734_v28, %v2847_v26  ;;  %v2751_v26 = vld [vmem:[#allocation2 + $0x1f0] sm:$0xf]  ;;  %v3710_v28 = vld [vmem:[#allocation2 + $0x204] sm:$0xf0] }
  0xbe   :  { %2112 = vmatpush.bf16.msrb.mxu2 %v3324_v40  ;;  %v3040_v40 = vor.u32 %v3782_v30, %v3039_v29  ;;  %v4089_v49 = vadd.f32 %v1852_v37, %v1839_v36  ;;  %v2943_v29 = vld [vmem:[#allocation2 + $0x370] sm:$0xf]  ;;  %v3758_v30 = vld [vmem:[#allocation2 + $0x384] sm:$0xf0] }
  0xbf   :  { %2126 = vmatpush.bf16.msrb.mxu3 %v3516_v44  ;;  %v3232_v44 = vor.u32 %v3830_v32, %v3231_v31  ;;  %v3135_v33 = vld [vmem:[#allocation2 + $0x4f0] sm:$0xf]  ;;  %v2944_v43 = vor.u32 %v3758_v30, %v2943_v29  ;;  %v3878_v29 = vld [vmem:[#allocation2 + $0x744] sm:$0xf0] }
  0xc0   :  { %2085 = vmatpush.bf16.msrb.mxu0 %v2916_v52  ;;  %v2632_v52 = vor.u32 %v3680_v42, %v2631_v41  ;;  %v2752_v42 = vor.u32 %v3710_v28, %v2751_v26  ;;  %v3615_v30 = vld [vmem:[#allocation2 + $0x8b0] sm:$0xf] }
  0xc1   :  { %2099 = vmatpush.bf16.msrb.mxu1 %v3108_v56  ;;  %v3674_v56 = vld [vmem:[#allocation2 + $0xe4] sm:$0xf0] }
  0xc2   :  { %2113 = vmatpush.bf16.msrb.mxu2 %v3300_v58  ;;  %v2799_v58 = vld [vmem:[#allocation2 + $0x250] sm:$0xf]  ;;  %v2608_v3 = vor.u32 %v3674_v56, %v2607_v54  ;;  %v3111_v54 = vld [vmem:[#allocation2 + $0x4c0] sm:$0xf] }
  0xc3   :  { %2127 = vmatpush.bf16.msrb.mxu3 %v3492_v63  ;;  %v2800_v5 = vor.u32 %v3722_v60, %v2799_v58  ;;  %v2511_v58 = vld [vmem:[#allocation2 + $0x10] sm:$0xf] }
  0xc4   :  { %2086 = vmatpush.bf16.msrb.mxu0 %v2892_v9  ;;  %v1864_v63 = vpop.f32.mrf.mxu0  ;;  %v3668_v9 = vld [vmem:[#allocation2 + $0xb4] sm:$0xf0] }
  0xc5   :  { %2100 = vmatpush.bf16.msrb.mxu1 %v3084_v14  ;;  %v1865_v2 = vadd.f32 %v1864_v63, %v4086_v13  ;;  %v1878_v4 = vpop.f32.mrf.mxu1  ;;  %v3716_v14 = vld [vmem:[#allocation2 + $0x234] sm:$0xf0]  ;;  %v348_v13 = vperm.slane %v4079_v46, 1  ;;  %v3698_v63 = vld [vmem:[#allocation2 + $0x1a4] sm:$0xf0] }
  0xc6   :  { %2114 = vmatpush.bf16.msrb.mxu2 %v3276_v15  ;;  %v2967_v15 = vld [vmem:[#allocation2 + $0x3a0] sm:$0xf] }
  0xc7   :  { %2128 = vmatpush.bf16.msrb.mxu3 %v3468_v18  ;;  %2087 = vmatmul.bf16.vlgmr.msrb.gmra.mxu0 %v4042_v22  ;;  %v4095_v12 = vadd.f32 %v1878_v4, %v1865_v2  ;;  %v3812_v18 = vld [vmem:[#allocation2 + $0x534] sm:$0xf0]  ;;  %v3746_v2 = vld [vmem:[#allocation2 + $0x324] sm:$0xf0] }
  0xc8   :  { %2135 = vmatpush.bf16.msra.mxu0 %v2680_v19  ;;  %2101 = vmatmul.bf16.vlgmr.msrb.gmra.mxu1 %v4044_v23  ;;  %v2584_v19 = vor.u32 %v3668_v9, %v2583_v8  ;;  %v3794_v4 = vld [vmem:[#allocation2 + $0x4a4] sm:$0xf0]  ;;  %v3884_v8 = vld [vmem:[#allocation2 + $0x774] sm:$0xf0]  ;;  %v3639_v9 = vld [vmem:[#allocation2 + $0x8e0] sm:$0xf] }
  0xc9   :  { %2149 = vmatpush.bf16.msra.mxu1 %v2872_v20  ;;  %2115 = vmatmul.bf16.vlgmr.msrb.gmra.mxu2 %v4060_v35  ;;  %v2776_v20 = vor.u32 %v3716_v14, %v2775_v10  ;;  %v3932_v14 = vld [vmem:[#allocation2 + $0x8f4] sm:$0xf0] }
  0xca   :  { %2163 = vmatpush.bf16.msra.mxu2 %v3064_v21  ;;  %2129 = vmatmul.bf16.vlgmr.msrb.gmra.mxu3 %v4062_v39  ;;  %v2968_v21 = vor.u32 %v3764_v16, %v2967_v15  ;;  %v3689_v15 = vld [vmem:[#allocation2 + $0x164] sm:$0xf]  ;;  %v2681_v16 = vld [vmem:[#allocation2 + $0x178] sm:$0xf0] }
  0xcb   :  { %2177 = vmatpush.bf16.msra.mxu3 %v3256_v27  ;;  %v3160_v27 = vor.u32 %v3812_v18, %v3159_v17  ;;  %v2704_v18 = vor.u32 %v3698_v63, %v2703_v62  ;;  %v2684_v28 = vor.u32 %v3689_v15, %v2681_v16  ;;  %v3914_v62 = vld [vmem:[#allocation2 + $0x864] sm:$0xf0]  ;;  %v3671_v63 = vld [vmem:[#allocation2 + $0xd4] sm:$0xf] }
  0xcc   :  { %2136 = vmatpush.bf16.msra.mxu0 %v2656_v34  ;;  %v1892_v31 = vpop.f32.mrf.mxu2  ;;  %v1866_v32 = vpop.f32.mrf.mxu0  ;;  %v3806_v34 = vld [vmem:[#allocation2 + $0x504] sm:$0xf0] }
  0xcd   :  { %2150 = vmatpush.bf16.msra.mxu1 %v2848_v38  ;;  %v1893_v36 = vadd.f32 %v1892_v31, %v348_v13  ;;  %v1906_v37 = vpop.f32.mrf.mxu3  ;;  %v1867_v38 = vadd.f32 %v1866_v32, %v4089_v49  ;;  %v1880_v41 = vpop.f32.mrf.mxu1  ;;  %v3136_v50 = vor.u32 %v3806_v34, %v3135_v33  ;;  %v3800_v49 = vld [vmem:[#allocation2 + $0x4d4] sm:$0xf0]  ;;  %v3926_v32 = vld [vmem:[#allocation2 + $0x8c4] sm:$0xf0]  ;;  %v3683_v33 = vld [vmem:[#allocation2 + $0x134] sm:$0xf] }
  0xce   :  { %2164 = vmatpush.bf16.msra.mxu2 %v3040_v40  ;;  %v2560_v40 = vor.u32 %v3662_v25, %v2559_v24  ;;  %v3112_v1 = vor.u32 %v3800_v49, %v3111_v54  ;;  %v2657_v34 = vld [vmem:[#allocation2 + $0x148] sm:$0xf0] }
  0xcf   :  { %2178 = vmatpush.bf16.msra.mxu3 %v3232_v44  ;;  %v2535_v44 = vld [vmem:[#allocation2 + $0x40] sm:$0xf]  ;;  %v4099_v48 = vadd.f32 %v1906_v37, %v1893_v36  ;;  %v4101_v51 = vadd.f32 %v1880_v41, %v1867_v38  ;;  %v3731_v36 = vld [vmem:[#allocation2 + $0x2b4] sm:$0xf]  ;;  %v2849_v37 = vld [vmem:[#allocation2 + $0x2c8] sm:$0xf0]  ;;  %v2660_v41 = vor.u32 %v3683_v33, %v2657_v34 }
  0xd0   :  { %2137 = vmatpush.bf16.msra.mxu0 %v2632_v52  ;;  %v3704_v52 = vld [vmem:[#allocation2 + $0x1d4] sm:$0xf0]  ;;  %v2536_v56 = vor.u32 %v3656_v45, %v2535_v44  ;;  %v3591_v44 = vld [vmem:[#allocation2 + $0x880] sm:$0xf]  ;;  %v2852_v45 = vor.u32 %v3731_v36, %v2849_v37  ;;  %v2561_v33 = vld [vmem:[#allocation2 + $0x88] sm:$0xf0] }
  0xd1   :  { %2151 = vmatpush.bf16.msra.mxu1 %v2824_v53  ;;  %v2919_v53 = vld [vmem:[#allocation2 + $0x340] sm:$0xf]  ;;  %v2728_v60 = vor.u32 %v3704_v52, %v2727_v47  ;;  %v3920_v47 = vld [vmem:[#allocation2 + $0x894] sm:$0xf0]  ;;  %v2633_v52 = vld [vmem:[#allocation2 + $0x118] sm:$0xf0] }
  0xd2   :  { %2165 = vmatpush.bf16.msra.mxu2 %v3016_v55  ;;  %v3752_v55 = vld [vmem:[#allocation2 + $0x354] sm:$0xf0]  ;;  %v3592_v49 = vor.u32 %v3920_v47, %v3591_v44 }
  0xd3   :  { %2179 = vmatpush.bf16.msra.mxu3 %v3208_v59  ;;  %v3650_v59 = vld [vmem:[#allocation2 + $0x24] sm:$0xf0]  ;;  %v2920_v61 = vor.u32 %v3752_v55, %v2919_v53  ;;  %v3725_v53 = vld [vmem:[#allocation2 + $0x284] sm:$0xf]  ;;  %v2825_v55 = vld [vmem:[#allocation2 + $0x298] sm:$0xf0] }
  0xd4   :  { %2138 = vmatpush.bf16.msra.mxu0 %v2608_v3  ;;  %v3087_v3 = vld [vmem:[#allocation2 + $0x490] sm:$0xf] }
  0xd5   :  { %2152 = vmatpush.bf16.msra.mxu1 %v2800_v5  ;;  %v1894_v5 = vpop.f32.mrf.mxu2  ;;  %v1908_v17 = vpop.f32.mrf.mxu3  ;;  %v3088_v25 = vor.u32 %v3794_v4, %v3087_v3  ;;  %v2801_v3 = vld [vmem:[#allocation2 + $0x268] sm:$0xf0] }
  0xd6   :  { %2166 = vmatpush.bf16.msra.mxu2 %v2992_v7  ;;  %v3447_v7 = vld [vmem:[#allocation2 + $0x760] sm:$0xf]  ;;  %v1895_v10 = vadd.f32 %v1894_v5, %v348_v13  ;;  %v3423_v13 = vld [vmem:[#allocation2 + $0x730] sm:$0xf] }
  0xd7   :  { %2180 = vmatpush.bf16.msra.mxu3 %v3184_v11  ;;  %v2512_v11 = vor.u32 %v3650_v59, %v2511_v58  ;;  %v3448_v26 = vor.u32 %v3884_v8, %v3447_v7  ;;  %v3424_v38 = vor.u32 %v3878_v29, %v3423_v13  ;;  %v3375_v58 = vld [vmem:[#allocation2 + $0x6d0] sm:$0xf]  ;;  %v3866_v59 = vld [vmem:[#allocation2 + $0x6e4] sm:$0xf0] }
  0xd8   :  { %2139 = vmatpush.bf16.msra.mxu0 %v2584_v19  ;;  %v2896_v19 = vor.u32 %v3746_v2, %v2895_v0  ;;  %v4103_v24 = vadd.f32 %v1908_v17, %v1895_v10  ;;  %v2609_v0 = vld [vmem:[#allocation2 + $0xe8] sm:$0xf0]  ;;  %v3719_v2 = vld [vmem:[#allocation2 + $0x254] sm:$0xf]  ;;  %v3376_v5 = vor.u32 %v3866_v59, %v3375_v58  ;;  %v3351_v10 = vld [vmem:[#allocation2 + $0x6a0] sm:$0xf] }
  0xd9   :  { %2153 = vmatpush.bf16.msra.mxu1 %v2776_v20  ;;  %v3737_v20 = vld [vmem:[#allocation2 + $0x2e4] sm:$0xf]  ;;  %v2804_v15 = vor.u32 %v3719_v2, %v2801_v3  ;;  %v3908_v17 = vld [vmem:[#allocation2 + $0x834] sm:$0xf0]  ;;  %v3519_v13 = vld [vmem:[#allocation2 + $0x7f0] sm:$0xf] }
  0xda   :  { %2167 = vmatpush.bf16.msra.mxu2 %v2968_v21  ;;  %v2873_v21 = vld [vmem:[#allocation2 + $0x2f8] sm:$0xf0]  ;;  %v3701_v59 = vld [vmem:[#allocation2 + $0x1c4] sm:$0xf]  ;;  %v3890_v2 = vld [vmem:[#allocation2 + $0x7a4] sm:$0xf0] }
  0xdb   :  { %2181 = vmatpush.bf16.msra.mxu3 %v3160_v27  ;;  %v3640_v27 = vor.u32 %v3932_v14, %v3639_v9  ;;  %v2876_v31 = vor.u32 %v3737_v20, %v2873_v21  ;;  %v2612_v9 = vor.u32 %v3671_v63, %v2609_v0  ;;  %v3543_v14 = vld [vmem:[#allocation2 + $0x820] sm:$0xf]  ;;  %v3713_v20 = vld [vmem:[#allocation2 + $0x224] sm:$0xf]  ;;  %v2777_v21 = vld [vmem:[#allocation2 + $0x238] sm:$0xf0] }
  0xdc   :  { %2140 = vmatpush.bf16.msra.mxu0 %v2560_v40  ;;  %v3616_v40 = vor.u32 %v3926_v32, %v3615_v30  ;;  %v2780_v29 = vor.u32 %v3713_v20, %v2777_v21  ;;  %v3659_v32 = vld [vmem:[#allocation2 + $0x74] sm:$0xf]  ;;  %v2537_v58 = vld [vmem:[#allocation2 + $0x58] sm:$0xf0] }
  0xdd   :  { %2154 = vmatpush.bf16.msra.mxu1 %v2752_v42  ;;  %v3399_v42 = vld [vmem:[#allocation2 + $0x700] sm:$0xf]  ;;  %v2564_v47 = vor.u32 %v3659_v32, %v2561_v33  ;;  %v3647_v3 = vld [vmem:[#allocation2 + $0x14] sm:$0xf]  ;;  %v3449_v20 = vld [vmem:[#allocation2 + $0x778] sm:$0xf0] }
  0xde   :  { %2168 = vmatpush.bf16.msra.mxu2 %v2944_v43  ;;  %v3872_v43 = vld [vmem:[#allocation2 + $0x714] sm:$0xf0]  ;;  %v3041_v32 = vld [vmem:[#allocation2 + $0x448] sm:$0xf0]  ;;  %v3827_v33 = vld [vmem:[#allocation2 + $0x5b4] sm:$0xf] }
  0xdf   :  { %2182 = vmatpush.bf16.msra.mxu3 %v3136_v50  ;;  %v3677_v50 = vld [vmem:[#allocation2 + $0x104] sm:$0xf]  ;;  %v3400_v54 = vor.u32 %v3872_v43, %v3399_v42 }
  0xe0   :  { %2141 = vmatpush.bf16.msra.mxu0 %v2536_v56  ;;  %v2636_v56 = vor.u32 %v3677_v50, %v2633_v52  ;;  %v3303_v50 = vld [vmem:[#allocation2 + $0x640] sm:$0xf]  ;;  %v3848_v52 = vld [vmem:[#allocation2 + $0x654] sm:$0xf0] }
  0xe1   :  { %2155 = vmatpush.bf16.msra.mxu1 %v2728_v60  ;;  %v3567_v60 = vld [vmem:[#allocation2 + $0x850] sm:$0xf] }
  0xe2   :  { %2169 = vmatpush.bf16.msra.mxu2 %v2920_v61  ;;  %v2828_v61 = vor.u32 %v3725_v53, %v2825_v55  ;;  %v3568_v8 = vor.u32 %v3914_v62, %v3567_v60  ;;  %v3495_v53 = vld [vmem:[#allocation2 + $0x7c0] sm:$0xf]  ;;  %v2729_v60 = vld [vmem:[#allocation2 + $0x1d8] sm:$0xf0]  ;;  %v3842_v62 = vld [vmem:[#allocation2 + $0x624] sm:$0xf0] }
  0xe3   :  { %2183 = vmatpush.bf16.msra.mxu3 %v3112_v1 }
  0xe4   :  { %2142 = vmatpush.bf16.msra.mxu0 %v2512_v11  ;;  %v1920_v1 = vpop.f32.mrf.mxu0  ;;  %v3860_v11 = vld [vmem:[#allocation2 + $0x6b4] sm:$0xf0] }
  0xe5   :  { %2156 = vmatpush.bf16.msra.mxu1 %v2704_v18  ;;  %v1921_v4 = vadd.f32 %v1920_v1, %v4099_v48  ;;  %v1934_v7 = vpop.f32.mrf.mxu1  ;;  %v3665_v18 = vld [vmem:[#allocation2 + $0xa4] sm:$0xf]  ;;  %v3544_v48 = vor.u32 %v3908_v17, %v3543_v14  ;;  %v3471_v1 = vld [vmem:[#allocation2 + $0x790] sm:$0xf] }
  0xe6   :  { %2170 = vmatpush.bf16.msra.mxu2 %v2896_v19  ;;  %v2585_v19 = vld [vmem:[#allocation2 + $0xb8] sm:$0xf0]  ;;  %v3785_v14 = vld [vmem:[#allocation2 + $0x464] sm:$0xf] }
  0xe7   :  { %2184 = vmatpush.bf16.msra.mxu3 %v3088_v25  ;;  %2143 = vmatmul.bf16.vlgmr.msra.gmra.mxu0 %v4018_v57  ;;  %v1935_v16 = vadd.f32 %v1934_v7, %v1921_v4  ;;  %v3352_v25 = vor.u32 %v3860_v11, %v3351_v10  ;;  %v2732_v4 = vor.u32 %v3701_v59, %v2729_v60  ;;  %v2513_v7 = vld [vmem:[#allocation2 + $0x28] sm:$0xf0]  ;;  %v349_v60 = vperm.slane %v4079_v46, 2 }
  0xe8   :  { %2191 = vmatpush.bf16.msrb.mxu0 %v3448_v26  ;;  %2157 = vmatmul.bf16.vlgmr.msra.gmra.mxu1 %v4027_v6  ;;  %v2588_v26 = vor.u32 %v3665_v18, %v2585_v19  ;;  %v3257_v18 = vld [vmem:[#allocation2 + $0x5f8] sm:$0xf0]  ;;  %v3881_v19 = vld [vmem:[#allocation2 + $0x764] sm:$0xf] }
  0xe9   :  { %2205 = vmatpush.bf16.msrb.mxu1 %v3640_v27  ;;  %2171 = vmatmul.bf16.vlgmr.msra.gmra.mxu2 %v4042_v22  ;;  %v3327_v27 = vld [vmem:[#allocation2 + $0x670] sm:$0xf] }
  0xea   :  { %2219 = vmatpush.bf16.msrb.mxu2 %v2684_v28  ;;  %2185 = vmatmul.bf16.vlgmr.msra.gmra.mxu3 %v4044_v23  ;;  %v3854_v28 = vld [vmem:[#allocation2 + $0x684] sm:$0xf0] }
  0xeb   :  { %2233 = vmatpush.bf16.msrb.mxu3 %v2876_v31  ;;  %v3902_v31 = vld [vmem:[#allocation2 + $0x804] sm:$0xf0]  ;;  %v3328_v42 = vor.u32 %v3854_v28, %v3327_v27  ;;  %v3641_v27 = vld [vmem:[#allocation2 + $0x8f8] sm:$0xf0] }
  0xec   :  { %2192 = vmatpush.bf16.msrb.mxu0 %v3424_v38  ;;  %v1948_v30 = vpop.f32.mrf.mxu2  ;;  %v1922_v36 = vpop.f32.mrf.mxu0  ;;  %v3707_v38 = vld [vmem:[#allocation2 + $0x1f4] sm:$0xf] }
  0xed   :  { %2206 = vmatpush.bf16.msrb.mxu1 %v3616_v40  ;;  %v1949_v34 = vadd.f32 %v1948_v30, %v1935_v16  ;;  %v1962_v37 = vpop.f32.mrf.mxu3  ;;  %v2753_v40 = vld [vmem:[#allocation2 + $0x208] sm:$0xf0]  ;;  %v1936_v43 = vpop.f32.mrf.mxu1  ;;  %v3833_v16 = vld [vmem:[#allocation2 + $0x5e4] sm:$0xf]  ;;  %v3452_v30 = vor.u32 %v3881_v19, %v3449_v20  ;;  %v3353_v19 = vld [vmem:[#allocation2 + $0x6b8] sm:$0xf0] }
  0xee   :  { %2220 = vmatpush.bf16.msrb.mxu2 %v2660_v41  ;;  %v1923_v41 = vadd.f32 %v1922_v36, %v4103_v24  ;;  %v2756_v55 = vor.u32 %v3707_v38, %v2753_v40  ;;  %v3304_v24 = vor.u32 %v3848_v52, %v3303_v50  ;;  %v3233_v36 = vld [vmem:[#allocation2 + $0x5c8] sm:$0xf0]  ;;  %v3923_v40 = vld [vmem:[#allocation2 + $0x8b4] sm:$0xf]  ;;  %v3017_v50 = vld [vmem:[#allocation2 + $0x418] sm:$0xf0] }
  0xef   :  { %2234 = vmatpush.bf16.msrb.mxu3 %v2852_v45  ;;  %v4111_v44 = vadd.f32 %v1962_v37, %v1949_v34  ;;  %v3520_v45 = vor.u32 %v3902_v31, %v3519_v13  ;;  %v3779_v31 = vld [vmem:[#allocation2 + $0x434] sm:$0xf]  ;;  %v3425_v38 = vld [vmem:[#allocation2 + $0x748] sm:$0xf0]  ;;  %v3821_v52 = vld [vmem:[#allocation2 + $0x584] sm:$0xf] }
  0xf0   :  { %2193 = vmatpush.bf16.msrb.mxu0 %v3400_v54  ;;  %v1937_v54 = vadd.f32 %v1936_v43, %v1923_v41  ;;  %v3875_v37 = vld [vmem:[#allocation2 + $0x734] sm:$0xf]  ;;  %v3617_v41 = vld [vmem:[#allocation2 + $0x8c8] sm:$0xf0]  ;;  %v3236_v43 = vor.u32 %v3827_v33, %v3233_v36 }
  0xf1   :  { %2207 = vmatpush.bf16.msrb.mxu1 %v3592_v49  ;;  %v3896_v49 = vld [vmem:[#allocation2 + $0x7d4] sm:$0xf0]  ;;  %v3851_v33 = vld [vmem:[#allocation2 + $0x674] sm:$0xf] }
  0xf2   :  { %2221 = vmatpush.bf16.msrb.mxu2 %v2636_v56  ;;  %v3653_v56 = vld [vmem:[#allocation2 + $0x44] sm:$0xf]  ;;  %v3496_v63 = vor.u32 %v3896_v49, %v3495_v53  ;;  %v3620_v53 = vor.u32 %v3923_v40, %v3617_v41  ;;  %v3401_v49 = vld [vmem:[#allocation2 + $0x718] sm:$0xf0] }
  0xf3   :  { %2235 = vmatpush.bf16.msrb.mxu3 %v2828_v61  ;;  %v3279_v61 = vld [vmem:[#allocation2 + $0x610] sm:$0xf]  ;;  %v2540_v0 = vor.u32 %v3653_v56, %v2537_v58  ;;  %v3917_v56 = vld [vmem:[#allocation2 + $0x884] sm:$0xf]  ;;  %v3593_v58 = vld [vmem:[#allocation2 + $0x898] sm:$0xf0] }
  0xf4   :  { %2194 = vmatpush.bf16.msrb.mxu0 %v3376_v5  ;;  %v1950_v5 = vpop.f32.mrf.mxu2  ;;  %v3280_v17 = vor.u32 %v3842_v62, %v3279_v61  ;;  %v3767_v62 = vld [vmem:[#allocation2 + $0x3d4] sm:$0xf] }
  0xf5   :  { %2208 = vmatpush.bf16.msrb.mxu1 %v3568_v8  ;;  %v3695_v8 = vld [vmem:[#allocation2 + $0x194] sm:$0xf]  ;;  %v1951_v10 = vadd.f32 %v1950_v5, %v1937_v54  ;;  %v1964_v11 = vpop.f32.mrf.mxu3  ;;  %v3869_v54 = vld [vmem:[#allocation2 + $0x704] sm:$0xf]  ;;  %v3569_v5 = vld [vmem:[#allocation2 + $0x868] sm:$0xf0] }
  0xf6   :  { %2222 = vmatpush.bf16.msrb.mxu2 %v2612_v9  ;;  %v2705_v9 = vld [vmem:[#allocation2 + $0x1a8] sm:$0xf0]  ;;  %v3404_v61 = vor.u32 %v3869_v54, %v3401_v49 }
  0xf7   :  { %2236 = vmatpush.bf16.msrb.mxu3 %v2804_v15  ;;  %v3065_v15 = vld [vmem:[#allocation2 + $0x478] sm:$0xf0]  ;;  %v4113_v21 = vadd.f32 %v1964_v11, %v1951_v10  ;;  %v2708_v28 = vor.u32 %v3695_v8, %v2705_v9  ;;  %v3761_v11 = vld [vmem:[#allocation2 + $0x3a4] sm:$0xf] }
  0xf8   :  { %2195 = vmatpush.bf16.msrb.mxu0 %v3352_v25  ;;  %v3472_v25 = vor.u32 %v3890_v2, %v3471_v1  ;;  %v3068_v13 = vor.u32 %v3785_v14, %v3065_v15  ;;  %v3596_v1 = vor.u32 %v3917_v56, %v3593_v58  ;;  %v3185_v2 = vld [vmem:[#allocation2 + $0x568] sm:$0xf0]  ;;  %v2969_v14 = vld [vmem:[#allocation2 + $0x3b8] sm:$0xf0]  ;;  %v3809_v15 = vld [vmem:[#allocation2 + $0x524] sm:$0xf] }
  0xf9   :  { %2209 = vmatpush.bf16.msrb.mxu1 %v3544_v48  ;;  %v2516_v48 = vor.u32 %v3647_v3, %v2513_v7  ;;  %v3863_v3 = vld [vmem:[#allocation2 + $0x6d4] sm:$0xf]  ;;  %v3113_v58 = vld [vmem:[#allocation2 + $0x4d8] sm:$0xf0] }
  0xfa   :  { %2223 = vmatpush.bf16.msrb.mxu2 %v2588_v26  ;;  %v3929_v26 = vld [vmem:[#allocation2 + $0x8e4] sm:$0xf] }
  0xfb   :  { %2237 = vmatpush.bf16.msrb.mxu3 %v2780_v29  ;;  %v3260_v29 = vor.u32 %v3833_v16, %v3257_v18  ;;  %v3644_v34 = vor.u32 %v3929_v26, %v3641_v27  ;;  %v3857_v18 = vld [vmem:[#allocation2 + $0x6a4] sm:$0xf]  ;;  %v2972_v26 = vor.u32 %v3761_v11, %v2969_v14 }
  0xfc   :  { %2196 = vmatpush.bf16.msrb.mxu0 %v3328_v42  ;;  %v3044_v42 = vor.u32 %v3779_v31, %v3041_v32  ;;  %v3137_v32 = vld [vmem:[#allocation2 + $0x508] sm:$0xf0] }
  0xfd   :  { %2210 = vmatpush.bf16.msrb.mxu1 %v3520_v45  ;;  %v3428_v45 = vor.u32 %v3875_v37, %v3425_v38  ;;  %v3899_v37 = vld [vmem:[#allocation2 + $0x7f4] sm:$0xf]  ;;  %v3521_v38 = vld [vmem:[#allocation2 + $0x808] sm:$0xf0] }
  0xfe   :  { %2224 = vmatpush.bf16.msrb.mxu2 %v2564_v47  ;;  %v3773_v47 = vld [vmem:[#allocation2 + $0x404] sm:$0xf]  ;;  %v3524_v56 = vor.u32 %v3899_v37, %v3521_v38 }
  0xff   :  { %2238 = vmatpush.bf16.msrb.mxu3 %v2756_v55  ;;  %v3209_v55 = vld [vmem:[#allocation2 + $0x598] sm:$0xf0]  ;;  %v3020_v59 = vor.u32 %v3773_v47, %v3017_v50 }
 0x100   :  { %2197 = vmatpush.bf16.msrb.mxu0 %v3304_v24  ;;  %v3212_v24 = vor.u32 %v3821_v52, %v3209_v55  ;;  %v3749_v52 = vld [vmem:[#allocation2 + $0x344] sm:$0xf] }
 0x101   :  { %2211 = vmatpush.bf16.msrb.mxu1 %v3496_v63  ;;  %v2993_v63 = vld [vmem:[#allocation2 + $0x3e8] sm:$0xf0]  ;;  %v3797_v55 = vld [vmem:[#allocation2 + $0x4c4] sm:$0xf] }
 0x102   :  { %2225 = vmatpush.bf16.msrb.mxu2 %v2540_v0  ;;  %v3815_v0 = vld [vmem:[#allocation2 + $0x554] sm:$0xf]  ;;  %v2996_v8 = vor.u32 %v3767_v62, %v2993_v63  ;;  %v3893_v62 = vld [vmem:[#allocation2 + $0x7c4] sm:$0xf]  ;;  %v3497_v63 = vld [vmem:[#allocation2 + $0x7d8] sm:$0xf0] }
 0x103   :  { %2239 = vmatpush.bf16.msrb.mxu3 %v2732_v4  ;;  %v3911_v4 = vld [vmem:[#allocation2 + $0x854] sm:$0xf]  ;;  %v3188_v46 = vor.u32 %v3815_v0, %v3185_v2  ;;  %v3116_v0 = vor.u32 %v3797_v55, %v3113_v58 }
 0x104   :  { %2198 = vmatpush.bf16.msrb.mxu0 %v3280_v17  ;;  %v1976_v7 = vpop.f32.mrf.mxu0  ;;  %v3572_v16 = vor.u32 %v3911_v4, %v3569_v5  ;;  %v3161_v17 = vld [vmem:[#allocation2 + $0x538] sm:$0xf0]  ;;  %v3743_v2 = vld [vmem:[#allocation2 + $0x314] sm:$0xf]  ;;  %v3500_v4 = vor.u32 %v3893_v62, %v3497_v63  ;;  %v3089_v5 = vld [vmem:[#allocation2 + $0x4a8] sm:$0xf0] }
 0x105   :  { %2212 = vmatpush.bf16.msrb.mxu1 %v3472_v25  ;;  %v1990_v9 = vpop.f32.mrf.mxu1  ;;  %v3905_v25 = vld [vmem:[#allocation2 + $0x824] sm:$0xf]  ;;  %v3164_v27 = vor.u32 %v3809_v15, %v3161_v17 }
 0x106   :  { %2226 = vmatpush.bf16.msrb.mxu2 %v2516_v48  ;;  %v3545_v48 = vld [vmem:[#allocation2 + $0x838] sm:$0xf0] }
 0x107   :  { %2240 = vmatpush.bf16.msrb.mxu3 %v2708_v28  ;;  %2199 = vmatmul.bf16.vlgmr.msrb.gmra.mxu0 %v4060_v35  ;;  %v3356_v28 = vor.u32 %v3857_v18, %v3353_v19  ;;  %v3548_v31 = vor.u32 %v3905_v25, %v3545_v48 }
 0x108   :  { %2247 = vmatpush.bf16.msra.mxu0 %v3068_v13  ;;  %2213 = vmatmul.bf16.vlgmr.msrb.gmra.mxu1 %v4062_v39  ;;  %v3755_v13 = vld [vmem:[#allocation2 + $0x374] sm:$0xf] }
 0x109   :  { %2261 = vmatpush.bf16.msra.mxu1 %v3260_v29  ;;  %2227 = vmatmul.bf16.vlgmr.msrb.gmra.mxu2 %v4018_v57  ;;  %v3377_v57 = vld [vmem:[#allocation2 + $0x6e8] sm:$0xf0] }
 0x10a   :  { %2275 = vmatpush.bf16.msra.mxu2 %v3452_v30  ;;  %2241 = vmatmul.bf16.vlgmr.msrb.gmra.mxu3 %v4027_v6  ;;  %v1977_v6 = vadd.f32 %v1976_v7, %v349_v60  ;;  %v3380_v10 = vor.u32 %v3863_v3, %v3377_v57  ;;  %v2945_v29 = vld [vmem:[#allocation2 + $0x388] sm:$0xf0]  ;;  %v3803_v30 = vld [vmem:[#allocation2 + $0x4f4] sm:$0xf] }
 0x10b   :  { %2289 = vmatpush.bf16.msra.mxu3 %v3644_v34  ;;  %v3329_v34 = vld [vmem:[#allocation2 + $0x688] sm:$0xf0]  ;;  %v3140_v47 = vor.u32 %v3803_v30, %v3137_v32  ;;  %v3791_v57 = vld [vmem:[#allocation2 + $0x494] sm:$0xf] }
 0x10c   :  { %2248 = vmatpush.bf16.msra.mxu0 %v3044_v42  ;;  %v1991_v20 = vadd.f32 %v1990_v9, %v1977_v6  ;;  %v2004_v36 = vpop.f32.mrf.mxu2  ;;  %v1978_v40 = vpop.f32.mrf.mxu0  ;;  %v3332_v50 = vor.u32 %v3851_v33, %v3329_v34  ;;  %v2897_v3 = vld [vmem:[#allocation2 + $0x328] sm:$0xf0]  ;;  %v3839_v7 = vld [vmem:[#allocation2 + $0x614] sm:$0xf]  ;;  %v3092_v15 = vor.u32 %v3791_v57, %v3089_v5 }
 0x10d   :  { %2262 = vmatpush.bf16.msra.mxu1 %v3236_v43  ;;  %v2018_v42 = vpop.f32.mrf.mxu3  ;;  %v2948_v43 = vor.u32 %v3755_v13, %v2945_v29  ;;  %v1992_v54 = vpop.f32.mrf.mxu1  ;;  %v3887_v9 = vld [vmem:[#allocation2 + $0x794] sm:$0xf]  ;;  %v2900_v14 = vor.u32 %v3743_v2, %v2897_v3 }
 0x10e   :  { %2276 = vmatpush.bf16.msra.mxu2 %v3428_v45  ;;  %v2005_v41 = vadd.f32 %v2004_v36, %v1991_v20  ;;  %v1979_v45 = vadd.f32 %v1978_v40, %v349_v60 }
 0x10f   :  { %2290 = vmatpush.bf16.msra.mxu3 %v3620_v53  ;;  %v2921_v53 = vld [vmem:[#allocation2 + $0x358] sm:$0xf0] }
 0x110   :  { %2249 = vmatpush.bf16.msra.mxu0 %v3020_v59  ;;  %v4120_v49 = vadd.f32 %v2018_v42, %v2005_v41  ;;  %v3845_v59 = vld [vmem:[#allocation2 + $0x644] sm:$0xf]  ;;  %v2924_v60 = vor.u32 %v3749_v52, %v2921_v53 }
 0x111   :  { %2263 = vmatpush.bf16.msra.mxu1 %v3212_v24  ;;  %v3305_v24 = vld [vmem:[#allocation2 + $0x658] sm:$0xf0]  ;;  %v3943_v41 = vld [vmem:[%s4311_s2] sm:$0x3f] }
 0x112   :  { %2277 = vmatpush.bf16.msra.mxu2 %v3404_v61  ;;  %v1993_v61 = vadd.f32 %v1992_v54, %v1979_v45  ;;  %v350_v42 = vperm.slane %v3943_v41, 3  ;;  %v351_v45 = vperm.slane %v3943_v41, 4 }
 0x113   :  { %2291 = vmatpush.bf16.msra.mxu3 %v3596_v1  ;;  %v3308_v1 = vor.u32 %v3845_v59, %v3305_v24 }
 0x114   :  { %2250 = vmatpush.bf16.msra.mxu0 %v2996_v8  ;;  %v3281_v8 = vld [vmem:[#allocation2 + $0x628] sm:$0xf0]  ;;  %v2006_v6 = vpop.f32.mrf.mxu2 }
 0x115   :  { %2264 = vmatpush.bf16.msra.mxu1 %v3188_v46  ;;  %v3473_v46 = vld [vmem:[#allocation2 + $0x7a8] sm:$0xf0]  ;;  %v2020_v11 = vpop.f32.mrf.mxu3 }
 0x116   :  { %2278 = vmatpush.bf16.msra.mxu2 %v3380_v10  ;;  %v2007_v10 = vadd.f32 %v2006_v6, %v1993_v61  ;;  %v3476_v18 = vor.u32 %v3887_v9, %v3473_v46 }
 0x117   :  { %2292 = vmatpush.bf16.msra.mxu3 %v3572_v16  ;;  %v3284_v16 = vor.u32 %v3839_v7, %v3281_v8  ;;  %v2304_v8 = vld [vmem:[%s4312_s3 + $0x8] sm:$0xff] }
 0x118   :  { %2251 = vmatpush.bf16.msra.mxu0 %v2972_v26  ;;  %v4122_v17 = vadd.f32 %v2020_v11, %v2007_v10  ;;  %v2303_v10 = vld [vmem:[%s4312_s3] sm:$0xff] }
 0x119   :  { %2265 = vmatpush.bf16.msra.mxu1 %v3164_v27 }
 0x11a   :  { %2279 = vmatpush.bf16.msra.mxu2 %v3356_v28 }
 0x11b   :  { %2293 = vmatpush.bf16.msra.mxu3 %v3548_v31 }
 0x11c   :  { %2252 = vmatpush.bf16.msra.mxu0 %v2948_v43 }
 0x11d   :  { %2266 = vmatpush.bf16.msra.mxu1 %v3140_v47 }
 0x11e   :  { %2280 = vmatpush.bf16.msra.mxu2 %v3332_v50 }
 0x11f   :  { %2294 = vmatpush.bf16.msra.mxu3 %v3524_v56 }
 0x120   :  { %2253 = vmatpush.bf16.msra.mxu0 %v2924_v60 }
 0x121   :  { %2267 = vmatpush.bf16.msra.mxu1 %v3116_v0  ;;  %v352_v0 = vperm.slane %v3943_v41, 5  ;;  %v2309_v41 = vld [vmem:[%s4312_s3 + $0x30] sm:$0xff] }
 0x122   :  { %2281 = vmatpush.bf16.msra.mxu2 %v3308_v1 }
 0x123   :  { %2295 = vmatpush.bf16.msra.mxu3 %v3500_v4 }
 0x124   :  { %2254 = vmatpush.bf16.msra.mxu0 %v2900_v14  ;;  %v2032_v19 = vpop.f32.mrf.mxu0 }
 0x125   :  { %2268 = vmatpush.bf16.msra.mxu1 %v3092_v15  ;;  %v2046_v20 = vpop.f32.mrf.mxu1  ;;  %v2033_v2 = vadd.f32 %v2032_v19, %v4120_v49  ;;  %v2305_v49 = vld [vmem:[%s4312_s3 + $0x10] sm:$0xff] }
 0x126   :  { %2282 = vmatpush.bf16.msra.mxu2 %v3284_v16 }
 0x127   :  { %2296 = vmatpush.bf16.msra.mxu3 %v3476_v18  ;;  %2255 = vmatmul.bf16.vlgmr.msra.gmra.mxu0 %v4042_v22  ;;  %v2047_v9 = vadd.f32 %v2046_v20, %v2033_v2 }
 0x128   :  { %2269 = vmatmul.bf16.vlgmr.msra.gmra.mxu1 %v4044_v23 }
 0x129   :  { %2283 = vmatmul.bf16.vlgmr.msra.gmra.mxu2 %v4060_v35 }
 0x12a   :  { %2297 = vmatmul.bf16.vlgmr.msra.gmra.mxu3 %v4062_v39 }
 0x12c   :  { %v2060_v25 = vpop.f32.mrf.mxu2  ;;  %v2034_v26 = vpop.f32.mrf.mxu0 }
 0x12d   :  { %v2074_v48 = vpop.f32.mrf.mxu3  ;;  %v4128_v27 = vpop.f32.mrf.mxu1  ;;  %v2061_v50 = vadd.f32 %v2060_v25, %v350_v42  ;;  %v4146_v25 = vadd.f32 %v2304_v8, %v4111_v44 }
 0x12f   :  { %v2075_v54 = vadd.f32 %v2074_v48, %v2061_v50 }
 0x134   :  { %v2062_v28 = vpop.f32.mrf.mxu2 }
 0x135   :  { %v2076_v13 = vpop.f32.mrf.mxu3  ;;  %v2063_v61 = vadd.f32 %v2062_v28, %v350_v42  ;;  %v4149_v28 = vadd.f32 %v2303_v10, %v4095_v12  ;;  %v2307_v12 = vld [vmem:[%s4312_s3 + $0x20] sm:$0xff] }
 0x137   :  { %v2077_v57 = vadd.f32 %v2076_v13, %v2063_v61  ;;  %v4151_v13 = vadd.f32 %v2305_v49, %v2047_v9  ;;  %v2329_v44 = vadd.f32 %v4146_v25, %v4149_v28 }
 0x144   :  { %v2088_v29 = vpop.f32.mrf.mxu0 }
 0x145   :  { %v2102_v30 = vpop.f32.mrf.mxu1  ;;  %v2089_v59 = vadd.f32 %v2088_v29, %v2075_v54  ;;  %v2035_v29 = vadd.f32 %v2034_v26, %v4122_v17  ;;  %v2310_v17 = vld [vmem:[%s4312_s3 + $0x38] sm:$0xff] }
 0x147   :  { %v2103_v1 = vadd.f32 %v2102_v30, %v2089_v59  ;;  %v2306_v30 = vld [vmem:[%s4312_s3 + $0x18] sm:$0xff]  ;;  %v2321_v59 = vadd.f32 %v2309_v41, %v4101_v51 }
 0x14c   :  { %v2116_v31 = vpop.f32.mrf.mxu2  ;;  %v2090_v22 = vpop.f32.mrf.mxu0 }
 0x14d   :  { %v2130_v32 = vpop.f32.mrf.mxu3  ;;  %v2104_v33 = vpop.f32.mrf.mxu1  ;;  %v2117_v6 = vadd.f32 %v2116_v31, %v2103_v1  ;;  %v2091_v11 = vadd.f32 %v2090_v22, %v2077_v57 }
 0x14f   :  { %v2131_v48 = vadd.f32 %v2130_v32, %v2117_v6  ;;  %v2105_v22 = vadd.f32 %v2104_v33, %v2091_v11  ;;  %v2049_v33 = vadd.f32 %v4128_v27, %v2035_v29  ;;  %v2308_v27 = vld [vmem:[%s4312_s3 + $0x28] sm:$0xff]  ;;  %v3973_v11 = vmov 768.0  }
 0x150   :  { %3937 = vrcp.f32 %v3973_v11 }
 0x151   :  { %v2318_v26 = vadd.f32 %v2306_v30, %v2131_v48 }
 0x154   :  { %v2118_v23 = vpop.f32.mrf.mxu2 }
 0x155   :  { %v4130_v34 = vpop.f32.mrf.mxu3  ;;  %v2119_v32 = vadd.f32 %v2118_v23, %v2105_v22  ;;  %v2311_v23 = vld [vmem:[%s4312_s3 + $0x40] sm:$0xff] }
 0x164   :  { %v2144_v35 = vpop.f32.mrf.mxu0 }
 0x165   :  { %v2158_v39 = vpop.f32.mrf.mxu1  ;;  %v2145_v53 = vadd.f32 %v2144_v35, %v351_v45 }
 0x167   :  { %v2159_v56 = vadd.f32 %v2158_v39, %v2145_v53  ;;  %v2322_v53 = vadd.f32 %v2310_v17, %v4113_v21  ;;  %v2323_v21 = vadd.f32 %v2311_v23, %v2049_v33 }
 0x169   :  { %v2336_v1 = vadd.f32 %v2322_v53, %v2321_v59 }
 0x16c   :  { %v2172_v36 = vpop.f32.mrf.mxu2  ;;  %v2146_v38 = vpop.f32.mrf.mxu0 }
 0x16d   :  { %v2186_v37 = vpop.f32.mrf.mxu3  ;;  %v2160_v40 = vpop.f32.mrf.mxu1  ;;  %v2147_v62 = vadd.f32 %v2146_v38, %v351_v45  ;;  %v2173_v63 = vadd.f32 %v2172_v36, %v2159_v56  ;;  %v2330_v38 = vadd.f32 %v2329_v44, %v4151_v13 }
 0x16f   :  { %v2161_v4 = vadd.f32 %v2160_v40, %v2147_v62  ;;  %v2187_v5 = vadd.f32 %v2186_v37, %v2173_v63 }
 0x174   :  { %v2174_v43 = vpop.f32.mrf.mxu2 }
 0x175   :  { %v2188_v47 = vpop.f32.mrf.mxu3  ;;  %v2175_v15 = vadd.f32 %v2174_v43, %v2161_v4 }
 0x177   :  { %v2189_v39 = vadd.f32 %v2188_v47, %v2175_v15 }
 0x184   :  { %v2200_v52 = vpop.f32.mrf.mxu0 }
 0x185   :  { %v2214_v55 = vpop.f32.mrf.mxu1  ;;  %v2201_v14 = vadd.f32 %v2200_v52, %v2187_v5  ;;  %v2337_v5 = vadd.f32 %v2336_v1, %v2323_v21 }
 0x187   :  { %v2215_v35 = vadd.f32 %v2214_v55, %v2201_v14  ;;  %v2133_v55 = vadd.f32 %v4130_v34, %v2119_v32  ;;  %v3938_v14 = vpop.eup %3937 }
 0x188   :  { %v2344_v15 = vmul.f32 768.0, %v3938_v14  ;;  %vm2348_vm0 = vweird.f32 %v3938_v14 }
 0x189   :  { %v2319_v42 = vadd.f32 %v2307_v12, %v2215_v35 }
 0x18c   :  { %v2228_v58 = vpop.f32.mrf.mxu2  ;;  %v2202_v60 = vpop.f32.mrf.mxu0 }
 0x18d   :  { %v2242_v24 = vpop.f32.mrf.mxu3  ;;  %v2216_v3 = vpop.f32.mrf.mxu1  ;;  %v2229_v7 = vadd.f32 %v2228_v58, %v352_v0  ;;  %v2203_v43 = vadd.f32 %v2202_v60, %v2189_v39  ;;  %v2331_v58 = vadd.f32 %v2330_v38, %v2318_v26  ;;  %v2313_v60 = vld [vmem:[%s4312_s3 + $0x50] sm:$0xff] }
 0x18f   :  { %v2243_v16 = vadd.f32 %v2242_v24, %v2229_v7  ;;  %v2312_v24 = vld [vmem:[%s4312_s3 + $0x48] sm:$0xff]  ;;  %v2217_v61 = vadd.f32 %v2216_v3, %v2203_v43  ;;  %v2332_v63 = vadd.f32 %v2331_v58, %v2319_v42  ;;  %v2314_v3 = vld [vmem:[%s4312_s3 + $0x58] sm:$0xff] }
 0x190   :  { %v2324_v34 = vadd.f32 %v2312_v24, %v2133_v55 }
 0x191   :  { %v2325_v51 = vadd.f32 %v2313_v60, %v2217_v61 }
 0x192   :  { %v2338_v6 = vadd.f32 %v2337_v5, %v2324_v34  ;;  %v4242_v5 = vld [vmem:[%s4313_s4] sm:$0x3f] }
 0x194   :  { %v2230_v46 = vpop.f32.mrf.mxu2  ;;  %v2339_v10 = vadd.f32 %v2338_v6, %v2325_v51  ;;  %v2427_v6 = vperm.slane %v4242_v5, 0 }
 0x195   :  { %v2244_v18 = vpop.f32.mrf.mxu3  ;;  %v2231_v36 = vadd.f32 %v2230_v46, %v352_v0 }
 0x197   :  { %v2245_v45 = vadd.f32 %v2244_v18, %v2231_v36 }
 0x1a4   :  { %v2256_v19 = vpop.f32.mrf.mxu0 }
 0x1a5   :  { %v2257_v20 = vadd.f32 %v2256_v19, %v2243_v16  ;;  %v2270_v31 = vpop.f32.mrf.mxu1  ;;  %v2345_v16 = vsub.f32 1.0, %v2344_v15  ;;  %v2432_v15 = vperm.slane %v4242_v5, 5 }
 0x1a7   :  { %v2271_v37 = vadd.f32 %v2270_v31, %v2257_v20  ;;  %v2346_v18 = vmul.f32 %v3938_v14, %v2345_v16 }
 0x1a9   :  { %v2347_v19 = vadd.f32 %v3938_v14, %v2346_v18 }
 0x1ab   :  { %v2349_v48 = vsel %vm2348_vm0, %v3938_v14, %v2347_v19 }
 0x1ac   :  { %v2284_v40 = vpop.f32.mrf.mxu2  ;;  %v2258_v52 = vpop.f32.mrf.mxu0 }
 0x1ad   :  { %v2285_v47 = vadd.f32 %v2284_v40, %v2271_v37  ;;  %v2298_v50 = vpop.f32.mrf.mxu3  ;;  %v2259_v56 = vadd.f32 %v2258_v52, %v2245_v45  ;;  %v2272_v0 = vpop.f32.mrf.mxu1 }
 0x1af   :  { %v2299_v54 = vadd.f32 %v2298_v50, %v2285_v47  ;;  %v2273_v2 = vadd.f32 %v2272_v0, %v2259_v56 }
 0x1b1   :  { %v2320_v62 = vadd.f32 %v2308_v27, %v2299_v54 }
 0x1b3   :  { %v2333_v57 = vadd.f32 %v2332_v63, %v2320_v62 }
 0x1b4   :  { %v2286_v4 = vpop.f32.mrf.mxu2 }
 0x1b5   :  { %v2287_v7 = vadd.f32 %v2286_v4, %v2273_v2  ;;  %2334 = vadd.xlane.f32.xlu0 %v2333_v57  ;;  %v2300_v8 = vpop.f32.mrf.mxu3 }
 0x1b7   :  { %v2301_v9 = vadd.f32 %v2300_v8, %v2287_v7  ;;  %v4247_v7 = vld [vmem:[%s4314_s5] sm:$0x3f] }
 0x1b8   :  { %v2452_v16 = vperm.slane %v4247_v7, 0  ;;  %v2453_v18 = vperm.slane %v4247_v7, 1  ;;  %v2454_v19 = vperm.slane %v4247_v7, 2 }
 0x1b9   :  { %v2326_v46 = vadd.f32 %v2314_v3, %v2301_v9  ;;  %v2428_v9 = vperm.slane %v4242_v5, 1 }
 0x1bb   :  { %v2340_v49 = vadd.f32 %v2339_v10, %v2326_v46  ;;  %v2430_v10 = vperm.slane %v4242_v5, 3 }
 0x1bd   :  { %2341 = vadd.xlane.f32.xlu0 %v2340_v49  ;;  %v2431_v49 = vperm.slane %v4242_v5, 4 }
 0x228   :  { %v2335_v20 = vpop.xlane.xlu0 %2334 }
 0x229   :  { %v2350_v29 = vmul.f32 %v2349_v48, %v2335_v20  ;;  %v2456_v20 = vperm.slane %v4247_v7, 4 }
 0x22b   :  { %v4189_v30 = vsub.f32 %v4149_v28, %v2350_v29  ;;  %v4192_v31 = vsub.f32 %v4146_v25, %v2350_v29  ;;  %v4195_v22 = vsub.f32 %v4151_v13, %v2350_v29  ;;  %v4197_v35 = vsub.f32 %v2318_v26, %v2350_v29 }
 0x22c   :  { %v4203_v44 = vsub.f32 %v2319_v42, %v2350_v29  ;;  %v4207_v25 = vsub.f32 %v2320_v62, %v2350_v29 }
 0x22d   :  { %v2364_v39 = vmul.f32 %v4189_v30, %v4189_v30  ;;  %v2365_v36 = vmul.f32 %v4192_v31, %v4192_v31  ;;  %v2366_v28 = vmul.f32 %v4195_v22, %v4195_v22  ;;  %v2367_v13 = vmul.f32 %v4197_v35, %v4197_v35 }
 0x22e   :  { %v2368_v37 = vmul.f32 %v4203_v44, %v4203_v44  ;;  %v2369_v42 = vmul.f32 %v4207_v25, %v4207_v25 }
 0x22f   :  { %v2376_v12 = vadd.f32 %v2365_v36, %v2364_v39 }
 0x230   :  { %v2342_v17 = vpop.xlane.xlu0 %2341 }
 0x231   :  { %v2351_v32 = vmul.f32 %v2349_v48, %v2342_v17  ;;  %v2377_v26 = vadd.f32 %v2376_v12, %v2366_v28 }
 0x233   :  { %v2378_v38 = vadd.f32 %v2377_v26, %v2367_v13  ;;  %v4213_v33 = vsub.f32 %v2321_v59, %v2351_v32  ;;  %v4215_v40 = vsub.f32 %v2322_v53, %v2351_v32  ;;  %v4217_v41 = vsub.f32 %v2323_v21, %v2351_v32 }
 0x234   :  { %v4221_v45 = vsub.f32 %v2324_v34, %v2351_v32  ;;  %v4227_v23 = vsub.f32 %v2325_v51, %v2351_v32  ;;  %v4231_v55 = vsub.f32 %v2326_v46, %v2351_v32  ;;  %v2429_v46 = vperm.slane %v4242_v5, 2 }
 0x235   :  { %v2379_v43 = vadd.f32 %v2378_v38, %v2368_v37  ;;  %v2370_v47 = vmul.f32 %v4213_v33, %v4213_v33  ;;  %v2371_v50 = vmul.f32 %v4215_v40, %v4215_v40  ;;  %v2372_v53 = vmul.f32 %v4217_v41, %v4217_v41 }
 0x236   :  { %v2373_v54 = vmul.f32 %v4221_v45, %v4221_v45  ;;  %v2374_v58 = vmul.f32 %v4227_v23, %v4227_v23  ;;  %v2375_v24 = vmul.f32 %v4231_v55, %v4231_v55  ;;  %v2457_v32 = vperm.slane %v4247_v7, 5 }
 0x237   :  { %v2380_v52 = vadd.f32 %v2379_v43, %v2369_v42  ;;  %v2383_v27 = vadd.f32 %v2371_v50, %v2370_v47 }
 0x239   :  { %2381 = vadd.xlane.f32.xlu1 %v2380_v52  ;;  %v2384_v56 = vadd.f32 %v2383_v27, %v2372_v53 }
 0x23b   :  { %v2385_v59 = vadd.f32 %v2384_v56, %v2373_v54 }
 0x23d   :  { %v2386_v21 = vadd.f32 %v2385_v59, %v2374_v58 }
 0x23f   :  { %v2387_v61 = vadd.f32 %v2386_v21, %v2375_v24 }
 0x241   :  { %2388 = vadd.xlane.f32.xlu1 %v2387_v61 }
 0x2ac   :  { %v2382_v62 = vpop.xlane.xlu1 %2381 }
 0x2ad   :  { %v2390_v63 = vmul.f32 %v2382_v62, %v2349_v48 }
 0x2af   :  { %v2392_v60 = vadd.f32 1e-05, %v2390_v63 }
 0x2b1   :  { %3939 = vrsqrt.f32 %v2392_v60  ;;  %vm2400_vm2 = vweird.f32 %v2392_v60 }
 0x2b4   :  { %v2389_v0 = vpop.xlane.xlu1 %2388 }
 0x2b5   :  { %v2391_v1 = vmul.f32 %v2389_v0, %v2349_v48  ;;  %v2455_v48 = vperm.slane %v4247_v7, 3 }
 0x2b7   :  { %v3940_v34 = vpop.eup %3939  ;;  %v2393_v2 = vadd.f32 1e-05, %v2391_v1 }
 0x2b8   :  { %v2395_v57 = vmul.f32 %v3940_v34, %v2392_v60  ;;  %vm2401_vm1 = vweird.f32 %v3940_v34 }
 0x2b9   :  { %3941 = vrsqrt.f32 %v2393_v2  ;;  %vm2402_vm3 = vmor %vm2400_vm2, %vm2401_vm1  ;;  %vm2410_vm5 = vweird.f32 %v2393_v2 }
 0x2ba   :  { %v2396_v4 = vmul.f32 %v3940_v34, %v2395_v57 }
 0x2bc   :  { %v2397_v51 = vmul.f32 0.5, %v2396_v4 }
 0x2be   :  { %v2398_v8 = vsub.f32 1.5, %v2397_v51 }
 0x2bf   :  { %v3942_v3 = vpop.eup %3941 }
 0x2c0   :  { %v2399_v11 = vmul.f32 %v3940_v34, %v2398_v8  ;;  %v2405_v14 = vmul.f32 %v3942_v3, %v2393_v2  ;;  %vm2411_vm4 = vweird.f32 %v3942_v3 }
 0x2c1   :  { %vm2412_vm6 = vmor %vm2410_vm5, %vm2411_vm4 }
 0x2c2   :  { %v2403_v29 = vsel %vm2402_vm3, %v3940_v34, %v2399_v11  ;;  %v2406_v39 = vmul.f32 %v3942_v3, %v2405_v14 }
 0x2c3   :  { %v2414_v36 = vmul.f32 %v2403_v29, %v4189_v30  ;;  %v2415_v28 = vmul.f32 %v2403_v29, %v4192_v31  ;;  %v2416_v12 = vmul.f32 %v2403_v29, %v4195_v22  ;;  %v2417_v17 = vmul.f32 %v2403_v29, %v4197_v35 }
 0x2c4   :  { %v2418_v13 = vmul.f32 %v2403_v29, %v4203_v44  ;;  %v2419_v26 = vmul.f32 %v2403_v29, %v4207_v25  ;;  %v2407_v37 = vmul.f32 0.5, %v2406_v39 }
 0x2c5   :  { %v2439_v38 = vmul.f32 %v2427_v6, %v2414_v36  ;;  %v2440_v42 = vmul.f32 %v2428_v9, %v2415_v28  ;;  %v2441_v43 = vmul.f32 %v2429_v46, %v2416_v12  ;;  %v2442_v47 = vmul.f32 %v2430_v10, %v2417_v17 }
 0x2c6   :  { %v2443_v50 = vmul.f32 %v2431_v49, %v2418_v13  ;;  %v2444_v52 = vmul.f32 %v2432_v15, %v2419_v26  ;;  %v2408_v30 = vsub.f32 1.5, %v2407_v37 }
 0x2c7   :  { %v2464_v31 = vadd.f32 %v2452_v16, %v2439_v38  ;;  %v2465_v53 = vadd.f32 %v2453_v18, %v2440_v42  ;;  %v2466_v22 = vadd.f32 %v2454_v19, %v2441_v43  ;;  %v2467_v27 = vadd.f32 %v2455_v48, %v2442_v47 }
 0x2c8   :  { %v2409_v35 = vmul.f32 %v3942_v3, %v2408_v30  ;;  %v2468_v54 = vadd.f32 %v2456_v20, %v2443_v50  ;;  %v2469_v44 = vadd.f32 %v2457_v32, %v2444_v52 }
 0x2c9   :  { %2476 = vst [vmem:[%s4315_s6] sm:$0xff] %v2464_v31 }
 0x2ca   :  { %2477 = vst [vmem:[%s4315_s6 + $0x8] sm:$0xff] %v2465_v53  ;;  %v2413_v25 = vsel %vm2412_vm6, %v3942_v3, %v2409_v35 }
 0x2cb   :  { %2478 = vst [vmem:[%s4315_s6 + $0x10] sm:$0xff] %v2466_v22  ;;  %v2420_v56 = vmul.f32 %v2413_v25, %v4213_v33  ;;  %v2421_v58 = vmul.f32 %v2413_v25, %v4215_v40  ;;  %v2422_v59 = vmul.f32 %v2413_v25, %v4217_v41  ;;  %v2423_v24 = vmul.f32 %v2413_v25, %v4221_v45 }
 0x2cc   :  { %2479 = vst [vmem:[%s4315_s6 + $0x18] sm:$0xff] %v2467_v27  ;;  %v2424_v21 = vmul.f32 %v2413_v25, %v4227_v23  ;;  %v2425_v61 = vmul.f32 %v2413_v25, %v4231_v55 }
 0x2cd   :  { %2480 = vst [vmem:[%s4315_s6 + $0x20] sm:$0xff] %v2468_v54  ;;  %v2445_v62 = vmul.f32 %v2427_v6, %v2420_v56  ;;  %v2446_v33 = vmul.f32 %v2428_v9, %v2421_v58  ;;  %v2447_v63 = vmul.f32 %v2429_v46, %v2422_v59  ;;  %v2448_v40 = vmul.f32 %v2430_v10, %v2423_v24 }
 0x2ce   :  { %2481 = vst [vmem:[%s4315_s6 + $0x28] sm:$0xff] %v2469_v44  ;;  %v2449_v41 = vmul.f32 %v2431_v49, %v2424_v21  ;;  %v2450_v45 = vmul.f32 %v2432_v15, %v2425_v61 }
 0x2cf   :  { %v2470_v60 = vadd.f32 %v2452_v16, %v2445_v62  ;;  %v2471_v0 = vadd.f32 %v2453_v18, %v2446_v33  ;;  %v2472_v1 = vadd.f32 %v2454_v19, %v2447_v63  ;;  %v2473_v23 = vadd.f32 %v2455_v48, %v2448_v40 }
 0x2d0   :  { %v2474_v34 = vadd.f32 %v2456_v20, %v2449_v41  ;;  %v2475_v55 = vadd.f32 %v2457_v32, %v2450_v45 }
 0x2d1   :  { %2482 = vst [vmem:[%s4315_s6 + $0x30] sm:$0xff] %v2470_v60 }
 0x2d2   :  { %2483 = vst [vmem:[%s4315_s6 + $0x38] sm:$0xff] %v2471_v0 }
 0x2d3   :  { %2484 = vst [vmem:[%s4315_s6 + $0x40] sm:$0xff] %v2472_v1 }
 0x2d4   :  { %2485 = vst [vmem:[%s4315_s6 + $0x48] sm:$0xff] %v2473_v23 }
 0x2d5   :  { %2486 = vst [vmem:[%s4315_s6 + $0x50] sm:$0xff] %v2474_v34 }
 0x2d6   :  { %2487 = vst [vmem:[%s4315_s6 + $0x58] sm:$0xff] %v2475_v55 }
 0x2d7   :  { %2492 = vsyncpa [#allocation3], 1 }

// kernel: category_transformer_forward.29
= control target key start
LH: loop header
LB: loop body
LE: loop exit
PB: predicated region body
PF: predicated region fallthrough
CT: control target
= control target key end

     0   :  { %8 = vsyncpa [#allocation3], 0  ;;  %s794_s15 = smov [#allocation2]   ;;  %s1004_s0 = inlined_call_operand.vmem [shape: f32[16,768], index: 0, kind: input, shape index: {}]   ;;  %s1005_s1 = inlined_call_operand.vmem [shape: bf16[768,64], index: 1, kind: input, shape index: {}]   ;;  %s1006_s2 = inlined_call_operand.hbm [shape: f32[1,64], index: 2, kind: input, shape index: {}]   ;;  %s1007_s3 = inlined_call_operand.vmem [shape: f32[16,64], index: 3, kind: output, shape index: {}]  }
   0x1   :  { %s18_s14 = sshll.u32 %s1006_s2, 4  ;;  %s20_s16 = sshll.u32 %s794_s15, 4  ;;  %s19_s14 = int_to_ptr.hbm [resolvable:$true] %s18_s14  ;;  %s21_s16 = int_to_ptr.vmem [resolvable:$true] %s20_s16 }
   0x2   :  { %23 = dma.hbm_to_vmem [thread:$0]  %s19_s14, 16, %s21_s16, [#allocation3]  }
   0x3   :  { %792 = dma.done.wait [#allocation3], 16  }
   0x4   :  { %793 = vsyncadd [#allocation3], 4294967280  ;;  %v725_v0 = vld [vmem:[%s1005_s1 + $0x38] sm:$0xff]  ;;  %v724_v4 = vld [vmem:[%s1005_s1 + $0x30] sm:$0xff]  ;;  %vm518_vm0 = vcmask 523264  }
   0x5   :  { %v733_v1 = vld [vmem:[%s1005_s1 + $0x78] sm:$0xff]  ;;  %434 = vmatpush.bf16.msra.mxu0 %v725_v0  ;;  %v732_v5 = vld [vmem:[%s1005_s1 + $0x70] sm:$0xff]  ;;  %v723_v8 = vld [vmem:[%s1005_s1 + $0x28] sm:$0xff] }
   0x6   :  { %v741_v2 = vld [vmem:[%s1005_s1 + $0xb8] sm:$0xff]  ;;  %448 = vmatpush.bf16.msra.mxu1 %v733_v1  ;;  %v740_v6 = vld [vmem:[%s1005_s1 + $0xb0] sm:$0xff]  ;;  %v731_v9 = vld [vmem:[%s1005_s1 + $0x68] sm:$0xff] }
   0x7   :  { %v749_v3 = vld [vmem:[%s1005_s1 + $0xf8] sm:$0xff]  ;;  %462 = vmatpush.bf16.msra.mxu2 %v741_v2  ;;  %v748_v7 = vld [vmem:[%s1005_s1 + $0xf0] sm:$0xff]  ;;  %v739_v10 = vld [vmem:[%s1005_s1 + $0xa8] sm:$0xff] }
   0x8   :  { %476 = vmatpush.bf16.msra.mxu3 %v749_v3  ;;  %v747_v11 = vld [vmem:[%s1005_s1 + $0xe8] sm:$0xff]  ;;  %v722_v12 = vld [vmem:[%s1005_s1 + $0x20] sm:$0xff]  ;;  %v721_v16 = vld [vmem:[%s1005_s1 + $0x18] sm:$0xff] }
   0x9   :  { %435 = vmatpush.bf16.msra.mxu0 %v724_v4  ;;  %v730_v13 = vld [vmem:[%s1005_s1 + $0x60] sm:$0xff]  ;;  %v729_v17 = vld [vmem:[%s1005_s1 + $0x58] sm:$0xff]  ;;  %v720_v20 = vld [vmem:[%s1005_s1 + $0x10] sm:$0xff] }
   0xa   :  { %449 = vmatpush.bf16.msra.mxu1 %v732_v5  ;;  %v738_v14 = vld [vmem:[%s1005_s1 + $0xa0] sm:$0xff]  ;;  %v737_v18 = vld [vmem:[%s1005_s1 + $0x98] sm:$0xff]  ;;  %v728_v21 = vld [vmem:[%s1005_s1 + $0x50] sm:$0xff] }
   0xb   :  { %463 = vmatpush.bf16.msra.mxu2 %v740_v6  ;;  %v746_v15 = vld [vmem:[%s1005_s1 + $0xe0] sm:$0xff]  ;;  %v745_v19 = vld [vmem:[%s1005_s1 + $0xd8] sm:$0xff]  ;;  %v736_v22 = vld [vmem:[%s1005_s1 + $0x90] sm:$0xff] }
   0xc   :  { %477 = vmatpush.bf16.msra.mxu3 %v748_v7  ;;  %v744_v23 = vld [vmem:[%s1005_s1 + $0xd0] sm:$0xff]  ;;  %v719_v24 = vld [vmem:[%s1005_s1 + $0x8] sm:$0xff]  ;;  %v718_v28 = vld [vmem:[%s1005_s1] sm:$0xff] }
   0xd   :  { %436 = vmatpush.bf16.msra.mxu0 %v723_v8  ;;  %v727_v25 = vld [vmem:[%s1005_s1 + $0x48] sm:$0xff]  ;;  %v726_v29 = vld [vmem:[%s1005_s1 + $0x40] sm:$0xff]  ;;  %v34_v31 = vld [vmem:[%s1004_s0 + $0x30] sm:$0xff] }
   0xe   :  { %450 = vmatpush.bf16.msra.mxu1 %v731_v9  ;;  %v735_v26 = vld [vmem:[%s1005_s1 + $0x88] sm:$0xff]  ;;  %v28_v30 = vld [vmem:[%s1004_s0] sm:$0xff]  ;;  %v35_v33 = vld [vmem:[%s1004_s0 + $0x38] sm:$0xff] }
   0xf   :  { %464 = vmatpush.bf16.msra.mxu2 %v739_v10  ;;  %v743_v27 = vld [vmem:[%s1005_s1 + $0xc8] sm:$0xff]  ;;  %v757_v34 = vld [vmem:[%s1005_s1 + $0x138] sm:$0xff]  ;;  %v734_v36 = vld [vmem:[%s1005_s1 + $0x80] sm:$0xff]  ;;  %v40_v40 = vpack.c.bf16 %v34_v31, %v28_v30 }
  0x10   :  { %478 = vmatpush.bf16.msra.mxu3 %v747_v11  ;;  %v29_v32 = vld [vmem:[%s1004_s0 + $0x8] sm:$0xff]  ;;  %v765_v35 = vld [vmem:[%s1005_s1 + $0x178] sm:$0xff]  ;;  %v742_v37 = vld [vmem:[%s1005_s1 + $0xc0] sm:$0xff] }
  0x11   :  { %437 = vmatpush.bf16.msra.mxu0 %v722_v12  ;;  %v30_v38 = vld [vmem:[%s1004_s0 + $0x10] sm:$0xff]  ;;  %v36_v39 = vld [vmem:[%s1004_s0 + $0x40] sm:$0xff]  ;;  %v31_v41 = vld [vmem:[%s1004_s0 + $0x18] sm:$0xff]  ;;  %v41_v43 = vpack.c.bf16 %v35_v33, %v29_v32 }
  0x12   :  { %451 = vmatpush.bf16.msra.mxu1 %v730_v13  ;;  %v37_v42 = vld [vmem:[%s1004_s0 + $0x48] sm:$0xff]  ;;  %v756_v44 = vld [vmem:[%s1005_s1 + $0x130] sm:$0xff]  ;;  %v42_v46 = vpack.c.bf16 %v36_v39, %v30_v38  ;;  %v754_v50 = vld [vmem:[%s1005_s1 + $0x120] sm:$0xff] }
  0x13   :  { %465 = vmatpush.bf16.msra.mxu2 %v738_v14  ;;  %v764_v45 = vld [vmem:[%s1005_s1 + $0x170] sm:$0xff]  ;;  %v43_v47 = vpack.c.bf16 %v37_v42, %v31_v41  ;;  %v755_v48 = vld [vmem:[%s1005_s1 + $0x128] sm:$0xff]  ;;  %v762_v51 = vld [vmem:[%s1005_s1 + $0x160] sm:$0xff] }
  0x14   :  { %479 = vmatpush.bf16.msra.mxu3 %v746_v15  ;;  %v763_v49 = vld [vmem:[%s1005_s1 + $0x168] sm:$0xff]  ;;  %v753_v52 = vld [vmem:[%s1005_s1 + $0x118] sm:$0xff]  ;;  %v752_v54 = vld [vmem:[%s1005_s1 + $0x110] sm:$0xff] }
  0x15   :  { %438 = vmatpush.bf16.msra.mxu0 %v721_v16  ;;  %v761_v53 = vld [vmem:[%s1005_s1 + $0x158] sm:$0xff]  ;;  %v760_v55 = vld [vmem:[%s1005_s1 + $0x150] sm:$0xff]  ;;  %v751_v56 = vld [vmem:[%s1005_s1 + $0x108] sm:$0xff] }
  0x16   :  { %452 = vmatpush.bf16.msra.mxu1 %v729_v17  ;;  %v759_v57 = vld [vmem:[%s1005_s1 + $0x148] sm:$0xff]  ;;  %v750_v58 = vld [vmem:[%s1005_s1 + $0x100] sm:$0xff]  ;;  %v38_v61 = vld [vmem:[%s1004_s0 + $0x50] sm:$0xff] }
  0x17   :  { %466 = vmatpush.bf16.msra.mxu2 %v737_v18  ;;  %v758_v59 = vld [vmem:[%s1005_s1 + $0x140] sm:$0xff]  ;;  %v33_v62 = vld [vmem:[%s1004_s0 + $0x28] sm:$0xff]  ;;  %v39_v63 = vld [vmem:[%s1004_s0 + $0x58] sm:$0xff] }
  0x18   :  { %480 = vmatpush.bf16.msra.mxu3 %v745_v19  ;;  %v32_v60 = vld [vmem:[%s1004_s0 + $0x20] sm:$0xff]  ;;  %v45_v1 = vpack.c.bf16 %v39_v63, %v33_v62 }
  0x19   :  { %439 = vmatpush.bf16.msra.mxu0 %v720_v20  ;;  %v44_v0 = vpack.c.bf16 %v38_v61, %v32_v60  ;;  %v767_v4 = vld [vmem:[#allocation2] ss:$0 sm:$0xff] }
  0x1a   :  { %453 = vmatpush.bf16.msra.mxu1 %v728_v21 }
  0x1b   :  { %467 = vmatpush.bf16.msra.mxu2 %v736_v22 }
  0x1c   :  { %481 = vmatpush.bf16.msra.mxu3 %v744_v23 }
  0x1d   :  { %440 = vmatpush.bf16.msra.mxu0 %v719_v24 }
  0x1e   :  { %454 = vmatpush.bf16.msra.mxu1 %v727_v25 }
  0x1f   :  { %468 = vmatpush.bf16.msra.mxu2 %v735_v26 }
  0x20   :  { %482 = vmatpush.bf16.msra.mxu3 %v743_v27 }
  0x21   :  { %441 = vmatpush.bf16.msra.mxu0 %v718_v28 }
  0x22   :  { %455 = vmatpush.bf16.msra.mxu1 %v726_v29 }
  0x23   :  { %469 = vmatpush.bf16.msra.mxu2 %v734_v36 }
  0x24   :  { %483 = vmatpush.bf16.msra.mxu3 %v742_v37  ;;  %442 = vmatmul.bf16.vlgmr.msra.gmra.mxu0 %v40_v40 }
  0x25   :  { %490 = vmatpush.bf16.msrb.mxu0 %v757_v34  ;;  %456 = vmatmul.bf16.vlgmr.msra.gmra.mxu1 %v41_v43 }
  0x26   :  { %504 = vmatpush.bf16.msrb.mxu1 %v765_v35  ;;  %470 = vmatmul.bf16.vlgmr.msra.gmra.mxu2 %v42_v46 }
  0x27   :  { %484 = vmatmul.bf16.vlgmr.msra.gmra.mxu3 %v43_v47 }
  0x29   :  { %491 = vmatpush.bf16.msrb.mxu0 %v756_v44 }
  0x2a   :  { %505 = vmatpush.bf16.msrb.mxu1 %v764_v45 }
  0x2d   :  { %492 = vmatpush.bf16.msrb.mxu0 %v755_v48 }
  0x2e   :  { %506 = vmatpush.bf16.msrb.mxu1 %v763_v49 }
  0x31   :  { %493 = vmatpush.bf16.msrb.mxu0 %v754_v50 }
  0x32   :  { %507 = vmatpush.bf16.msrb.mxu1 %v762_v51 }
  0x35   :  { %494 = vmatpush.bf16.msrb.mxu0 %v753_v52 }
  0x36   :  { %508 = vmatpush.bf16.msrb.mxu1 %v761_v53 }
  0x39   :  { %495 = vmatpush.bf16.msrb.mxu0 %v752_v54 }
  0x3a   :  { %509 = vmatpush.bf16.msrb.mxu1 %v760_v55 }
  0x3d   :  { %496 = vmatpush.bf16.msrb.mxu0 %v751_v56 }
  0x3e   :  { %510 = vmatpush.bf16.msrb.mxu1 %v759_v57 }
  0x41   :  { %497 = vmatpush.bf16.msrb.mxu0 %v750_v58 }
  0x42   :  { %511 = vmatpush.bf16.msrb.mxu1 %v758_v59 }
  0x44   :  { %498 = vmatmul.bf16.vlgmr.msrb.gmra.mxu0 %v44_v0 }
  0x45   :  { %512 = vmatmul.bf16.vlgmr.msrb.gmra.mxu1 %v45_v1 }
  0xa1   :  { %v443_v2 = vpop.f32.mrf.mxu0 }
  0xa2   :  { %v457_v3 = vpop.f32.mrf.mxu1  ;;  %v444_v5 = vadd.f32 %v767_v4, %v443_v2 }
  0xa4   :  { %v458_v7 = vadd.f32 %v457_v3, %v444_v5 }
  0xa9   :  { %v471_v6 = vpop.f32.mrf.mxu2  ;;  %v445_v8 = vpop.f32.mrf.mxu0 }
  0xaa   :  { %v459_v9 = vpop.f32.mrf.mxu1  ;;  %v485_v10 = vpop.f32.mrf.mxu3  ;;  %v472_v11 = vadd.f32 %v471_v6, %v458_v7  ;;  %v446_v12 = vadd.f32 %v767_v4, %v445_v8 }
  0xac   :  { %v486_v13 = vadd.f32 %v485_v10, %v472_v11  ;;  %v460_v14 = vadd.f32 %v459_v9, %v446_v12 }
  0xb1   :  { %v473_v15 = vpop.f32.mrf.mxu2 }
  0xb2   :  { %v474_v19 = vadd.f32 %v473_v15, %v460_v14  ;;  %v487_v21 = vpop.f32.mrf.mxu3 }
  0xb4   :  { %v488_v22 = vadd.f32 %v487_v21, %v474_v19 }
  0xc1   :  { %v499_v16 = vpop.f32.mrf.mxu0 }
  0xc2   :  { %v513_v17 = vpop.f32.mrf.mxu1  ;;  %v500_v18 = vadd.f32 %v499_v16, %v486_v13 }
  0xc4   :  { %v514_v20 = vadd.f32 %v513_v17, %v500_v18 }
  0xc6   :  { %519 = vst.msk [vmem:[%s1007_s3] sm:$0xff] %vm518_vm0, %v514_v20 }
  0xc9   :  { %v501_v23 = vpop.f32.mrf.mxu0 }
  0xca   :  { %v502_v24 = vadd.f32 %v501_v23, %v488_v22  ;;  %v515_v25 = vpop.f32.mrf.mxu1 }
  0xcc   :  { %v516_v26 = vadd.f32 %v515_v25, %v502_v24 }
  0xce   :  { %520 = vst.msk [vmem:[%s1007_s3 + $0x8] sm:$0xff] %vm518_vm0, %v516_v26 }
  0xcf   :  { %525 = vsyncpa [#allocation3], 1 }

// kernel: category_transformer_forward.35
= control target key start
LH: loop header
LB: loop body
LE: loop exit
PB: predicated region body
PF: predicated region fallthrough
CT: control target
= control target key end

     0   :  { %8 = vsyncpa [#allocation3], 0  ;;  %s230_s0 = inlined_call_operand.vmem [shape: f32[16,64], index: 0, kind: input, shape index: {}]   ;;  %s231_s1 = inlined_call_operand.hbm [shape: bf16[64,128], index: 1, kind: input, shape index: {}]   ;;  %s232_s2 = inlined_call_operand.hbm [shape: f32[1,128], index: 2, kind: input, shape index: {}]   ;;  %s233_s3 = inlined_call_operand.vmem [shape: f32[16,128], index: 3, kind: output, shape index: {}]  }
   0x1   :  { %s16_s14 = sshll.u32 %s231_s1, 4  ;;  %s17_s14 = int_to_ptr.hbm [resolvable:$true] %s16_s14 }
   0x2   :  { %9 = vsyncpa [#allocation5], 0  ;;  %s188_s15 = smov [#allocation2]   ;;  %s30_s19 = sshll.u32 %s232_s2, 4  ;;  %s31_s19 = int_to_ptr.hbm [resolvable:$true] %s30_s19 }
   0x3   :  { %s18_s16 = sshll.u32 %s188_s15, 4  ;;  %s189_s20 = smov 64   ;;  %s19_s16 = int_to_ptr.vmem [resolvable:$true] %s18_s16 }
   0x4   :  { %s190_s21 = smov 4   ;;  %s191_s22 = smov [#allocation4]  }
   0x5   :  { %24 = dma.hbm_to_vmem [thread:$0]  %s17_s14, 512, %s19_s16, [#allocation3], %s189_s20, %s189_s20, %s190_s21  }
   0x6   :  { %s32_s23 = sshll.u32 %s191_s22, 4  ;;  %s33_s23 = int_to_ptr.vmem [resolvable:$true] %s32_s23 }
   0x7   :  { %35 = dma.hbm_to_vmem [thread:$0]  %s31_s19, 16, %s33_s23, [#allocation5]  }
   0x8   :  { %184 = dma.done.wait [#allocation3], 512  }
   0x9   :  { %185 = vsyncadd [#allocation3], 4294966784 }
   0xa   :  { %186 = dma.done.wait [#allocation5], 16  }
   0xb   :  { %187 = vsyncadd [#allocation5], 4294967280  ;;  %v130_v0 = vld [vmem:[#allocation2 + $0x18] sm:$0xff]  ;;  %v129_v1 = vld [vmem:[#allocation2 + $0x10] sm:$0xff]  ;;  %vm84_vm0 = vcmask 523264  }
   0xc   :  { %92 = vmatpush.bf16.msra.mxu0 %v130_v0  ;;  %v128_v2 = vld [vmem:[#allocation2 + $0x8] sm:$0xff]  ;;  %v127_v3 = vld [vmem:[#allocation2] sm:$0xff] }
   0xd   :  { %v45_v4 = vld [vmem:[%s230_s0] sm:$0xff]  ;;  %v46_v5 = vld [vmem:[%s230_s0 + $0x8] sm:$0xff] }
   0xe   :  { %v47_v6 = vpack.c.bf16 %v46_v5, %v45_v4  ;;  %v135_v7 = vld [vmem:[#allocation4] ss:$0 sm:$0xff] }
  0x10   :  { %93 = vmatpush.bf16.msra.mxu0 %v129_v1 }
  0x14   :  { %94 = vmatpush.bf16.msra.mxu0 %v128_v2 }
  0x18   :  { %95 = vmatpush.bf16.msra.mxu0 %v127_v3 }
  0x1b   :  { %126 = vmatmul.msk.bf16.vlgmr.msra.gmra.mxu0 %vm84_vm0, %v47_v6 }
  0x98   :  { %v97_v8 = vpop.f32.mrf.mxu0 }
  0x99   :  { %v98_v9 = vadd.f32 %v135_v7, %v97_v8 }
  0x9b   :  { %102 = vst [vmem:[%s233_s3] sm:$0xff] %v98_v9 }
  0xa0   :  { %v99_v10 = vpop.f32.mrf.mxu0 }
  0xa1   :  { %v100_v11 = vadd.f32 %v135_v7, %v99_v10 }
  0xa3   :  { %103 = vst [vmem:[%s233_s3 + $0x8] sm:$0xff] %v100_v11 }
  0xa4   :  { %108 = vsyncpa [#allocation3], 1 }
  0xa5   :  { %109 = vsyncpa [#allocation5], 1 }

// kernel: category_transformer_forward.28
= control target key start
LH: loop header
LB: loop body
LE: loop exit
PB: predicated region body
PF: predicated region fallthrough
CT: control target
= control target key end

     0   :  { %12 = vsyncpa [#allocation3], 0  ;;  %s3150_s0 = inlined_call_operand.vmem [shape: f32[16,768], index: 0, kind: input, shape index: {}]   ;;  %s3151_s1 = inlined_call_operand.hbm [shape: bf16[768,256], index: 1, kind: input, shape index: {}]   ;;  %s3152_s2 = inlined_call_operand.hbm [shape: f32[1,256], index: 2, kind: input, shape index: {}]   ;;  %s3153_s3 = inlined_call_operand.hbm [shape: bf16[256,768], index: 3, kind: input, shape index: {}]   ;;  %s3154_s4 = inlined_call_operand.vmem [shape: f32[1,768], index: 4, kind: input, shape index: {}]   ;;  %s3155_s5 = inlined_call_operand.vmem [shape: f32[1,768], index: 5, kind: input, shape index: {}]   ;;  %s3156_s6 = inlined_call_operand.vmem [shape: f32[1,768], index: 6, kind: input, shape index: {}]   ;;  %s3157_s7 = inlined_call_operand.vmem [shape: f32[16,768], index: 7, kind: output, shape index: {}]  }
   0x1   :  { %13 = vsyncpa [#allocation5], 0  ;;  %s34_s26 = sshll.u32 %s3152_s2, 4  ;;  %s2844_s27 = smov [#allocation4]   ;;  %s35_s26 = int_to_ptr.hbm [resolvable:$true] %s34_s26 }
   0x2   :  { %s36_s28 = sshll.u32 %s2844_s27, 4  ;;  %s20_s8 = sshll.u32 %s3151_s1, 4  ;;  %s37_s28 = int_to_ptr.vmem [resolvable:$true] %s36_s28  ;;  %s21_s8 = int_to_ptr.hbm [resolvable:$true] %s20_s8 }
   0x3   :  { %39 = dma.hbm_to_vmem [thread:$0]  %s35_s26, 32, %s37_s28, [#allocation5]  }
   0x4   :  { %s2845_s9 = smov [#allocation2]   ;;  %s2846_s11 = smov 128  }
   0x5   :  { %s22_s10 = sshll.u32 %s2845_s9, 4  ;;  %s2847_s12 = smov 8   ;;  %s23_s10 = int_to_ptr.vmem [resolvable:$true] %s22_s10 }
   0x6   :  { %28 = dma.hbm_to_vmem [thread:$0]  %s21_s8, 12288, %s23_s10, [#allocation3], %s2846_s11, %s2846_s11, %s2847_s12  }
   0x7   :  { %s44_s2 = sshll.u32 %s3153_s3, 4  ;;  %s2848_s15 = smov [#allocation6]   ;;  %s45_s2 = int_to_ptr.hbm [resolvable:$true] %s44_s2 }
   0x8   :  { %s46_s16 = sshll.u32 %s2848_s15, 4  ;;  %s2849_s17 = smov 384   ;;  %s47_s16 = int_to_ptr.vmem [resolvable:$true] %s46_s16 }
   0x9   :  { %s2850_s18 = smov 24  }
   0xa   :  { %52 = dma.hbm_to_vmem [thread:$0]  %s45_s2, 12288, %s47_s16, [#allocation5], %s2849_s17, %s2849_s17, %s2850_s18  }
   0xb   :  { %2840 = dma.done.wait [#allocation3], 12288  }
   0xc   :  { %2841 = vsyncadd [#allocation3], 4294955008 }
   0xd   :  { %2842 = dma.done.wait [#allocation5], 12320  }
   0xe   :  { %2843 = vsyncadd [#allocation5], 4294954976  ;;  %v1840_v0 = vld [vmem:[#allocation2 + $0x70] sm:$0xf]  ;;  %v2565_v1 = vld [vmem:[#allocation2 + $0x74] sm:$0xf0] }
   0xf   :  { %v1904_v2 = vld [vmem:[#allocation2 + $0xf0] sm:$0xf]  ;;  %v1841_v3 = vor.u32 %v2565_v1, %v1840_v0  ;;  %v2581_v4 = vld [vmem:[#allocation2 + $0xf4] sm:$0xf0]  ;;  %v1832_v11 = vld [vmem:[#allocation2 + $0x60] sm:$0xf] }
  0x10   :  { %v1968_v5 = vld [vmem:[#allocation2 + $0x170] sm:$0xf]  ;;  %v2597_v6 = vld [vmem:[#allocation2 + $0x174] sm:$0xf0]  ;;  %v1905_v7 = vor.u32 %v2581_v4, %v1904_v2  ;;  %v2563_v13 = vld [vmem:[#allocation2 + $0x64] sm:$0xf0] }
  0x11   :  { %v1969_v8 = vor.u32 %v2597_v6, %v1968_v5  ;;  %v2032_v9 = vld [vmem:[#allocation2 + $0x1f0] sm:$0xf]  ;;  %v2613_v10 = vld [vmem:[#allocation2 + $0x1f4] sm:$0xf0]  ;;  %671 = vmatpush.bf16.msra.mxu0 %v1841_v3  ;;  %v1896_v14 = vld [vmem:[#allocation2 + $0xe0] sm:$0xf]  ;;  %v1833_v16 = vor.u32 %v2563_v13, %v1832_v11 }
  0x12   :  { %v2033_v12 = vor.u32 %v2613_v10, %v2032_v9  ;;  %v2579_v15 = vld [vmem:[#allocation2 + $0xe4] sm:$0xf0]  ;;  %685 = vmatpush.bf16.msra.mxu1 %v1905_v7  ;;  %v1960_v18 = vld [vmem:[#allocation2 + $0x160] sm:$0xf]  ;;  %v1824_v23 = vld [vmem:[#allocation2 + $0x50] sm:$0xf] }
  0x13   :  { %699 = vmatpush.bf16.msra.mxu2 %v1969_v8  ;;  %v1897_v17 = vor.u32 %v2579_v15, %v1896_v14  ;;  %v2595_v19 = vld [vmem:[#allocation2 + $0x164] sm:$0xf0]  ;;  %v2024_v20 = vld [vmem:[#allocation2 + $0x1e0] sm:$0xf]  ;;  %v2561_v24 = vld [vmem:[#allocation2 + $0x54] sm:$0xf0] }
  0x14   :  { %713 = vmatpush.bf16.msra.mxu3 %v2033_v12  ;;  %v1961_v21 = vor.u32 %v2595_v19, %v1960_v18  ;;  %v2611_v22 = vld [vmem:[#allocation2 + $0x1e4] sm:$0xf0]  ;;  %v1888_v26 = vld [vmem:[#allocation2 + $0xd0] sm:$0xf]  ;;  %v2577_v27 = vld [vmem:[#allocation2 + $0xd4] sm:$0xf0]  ;;  %v1825_v29 = vor.u32 %v2561_v24, %v1824_v23 }
  0x15   :  { %v2025_v25 = vor.u32 %v2611_v22, %v2024_v20  ;;  %v1952_v28 = vld [vmem:[#allocation2 + $0x150] sm:$0xf]  ;;  %672 = vmatpush.bf16.msra.mxu0 %v1833_v16  ;;  %v2593_v30 = vld [vmem:[#allocation2 + $0x154] sm:$0xf0]  ;;  %v1889_v33 = vor.u32 %v2577_v27, %v1888_v26  ;;  %v1816_v35 = vld [vmem:[#allocation2 + $0x40] sm:$0xf] }
  0x16   :  { %v2016_v31 = vld [vmem:[#allocation2 + $0x1d0] sm:$0xf]  ;;  %v2609_v32 = vld [vmem:[#allocation2 + $0x1d4] sm:$0xf0]  ;;  %686 = vmatpush.bf16.msra.mxu1 %v1897_v17  ;;  %v1953_v34 = vor.u32 %v2593_v30, %v1952_v28  ;;  %v2559_v36 = vld [vmem:[#allocation2 + $0x44] sm:$0xf0] }
  0x17   :  { %700 = vmatpush.bf16.msra.mxu2 %v1961_v21  ;;  %v1880_v37 = vld [vmem:[#allocation2 + $0xc0] sm:$0xf]  ;;  %v2017_v38 = vor.u32 %v2609_v32, %v2016_v31  ;;  %v2575_v39 = vld [vmem:[#allocation2 + $0xc4] sm:$0xf0]  ;;  %v1817_v44 = vor.u32 %v2559_v36, %v1816_v35  ;;  %v1808_v47 = vld [vmem:[#allocation2 + $0x30] sm:$0xf] }
  0x18   :  { %714 = vmatpush.bf16.msra.mxu3 %v2025_v25  ;;  %v1944_v40 = vld [vmem:[#allocation2 + $0x140] sm:$0xf]  ;;  %v2591_v41 = vld [vmem:[#allocation2 + $0x144] sm:$0xf0]  ;;  %v1881_v45 = vor.u32 %v2575_v39, %v1880_v37  ;;  %v2557_v48 = vld [vmem:[#allocation2 + $0x34] sm:$0xf0] }
  0x19   :  { %v2008_v42 = vld [vmem:[#allocation2 + $0x1c0] sm:$0xf]  ;;  %v2607_v43 = vld [vmem:[#allocation2 + $0x1c4] sm:$0xf0]  ;;  %673 = vmatpush.bf16.msra.mxu0 %v1825_v29  ;;  %v1945_v46 = vor.u32 %v2591_v41, %v1944_v40  ;;  %v1872_v49 = vld [vmem:[#allocation2 + $0xb0] sm:$0xf]  ;;  %v1809_v56 = vor.u32 %v2557_v48, %v1808_v47 }
  0x1a   :  { %687 = vmatpush.bf16.msra.mxu1 %v1889_v33  ;;  %v2009_v50 = vor.u32 %v2607_v43, %v2008_v42  ;;  %v2573_v51 = vld [vmem:[#allocation2 + $0xb4] sm:$0xf0]  ;;  %v1936_v52 = vld [vmem:[#allocation2 + $0x130] sm:$0xf]  ;;  %v1800_v59 = vld [vmem:[#allocation2 + $0x20] sm:$0xf] }
  0x1b   :  { %701 = vmatpush.bf16.msra.mxu2 %v1953_v34  ;;  %v2589_v53 = vld [vmem:[#allocation2 + $0x134] sm:$0xf0]  ;;  %v2000_v54 = vld [vmem:[#allocation2 + $0x1b0] sm:$0xf]  ;;  %v1873_v57 = vor.u32 %v2573_v51, %v1872_v49  ;;  %v2555_v60 = vld [vmem:[#allocation2 + $0x24] sm:$0xf0] }
  0x1c   :  { %715 = vmatpush.bf16.msra.mxu3 %v2017_v38  ;;  %v2605_v55 = vld [vmem:[#allocation2 + $0x1b4] sm:$0xf0]  ;;  %v1937_v58 = vor.u32 %v2589_v53, %v1936_v52  ;;  %v1864_v61 = vld [vmem:[#allocation2 + $0xa0] sm:$0xf]  ;;  %v2571_v63 = vld [vmem:[#allocation2 + $0xa4] sm:$0xf0]  ;;  %v1801_v4 = vor.u32 %v2555_v60, %v1800_v59 }
  0x1d   :  { %674 = vmatpush.bf16.msra.mxu0 %v1817_v44  ;;  %v2001_v62 = vor.u32 %v2605_v55, %v2000_v54  ;;  %v1928_v0 = vld [vmem:[#allocation2 + $0x120] sm:$0xf]  ;;  %v2587_v1 = vld [vmem:[#allocation2 + $0x124] sm:$0xf0]  ;;  %v1865_v5 = vor.u32 %v2571_v63, %v1864_v61  ;;  %v1792_v7 = vld [vmem:[#allocation2 + $0x10] sm:$0xf] }
  0x1e   :  { %688 = vmatpush.bf16.msra.mxu1 %v1881_v45  ;;  %v1992_v2 = vld [vmem:[#allocation2 + $0x1a0] sm:$0xf]  ;;  %v2603_v3 = vld [vmem:[#allocation2 + $0x1a4] sm:$0xf0]  ;;  %v1929_v6 = vor.u32 %v2587_v1, %v1928_v0  ;;  %v2553_v8 = vld [vmem:[#allocation2 + $0x14] sm:$0xf0] }
  0x1f   :  { %702 = vmatpush.bf16.msra.mxu2 %v1945_v46  ;;  %v1856_v9 = vld [vmem:[#allocation2 + $0x90] sm:$0xf]  ;;  %v1993_v10 = vor.u32 %v2603_v3, %v1992_v2  ;;  %v2569_v11 = vld [vmem:[#allocation2 + $0x94] sm:$0xf0]  ;;  %v1793_v16 = vor.u32 %v2553_v8, %v1792_v7  ;;  %v1784_v17 = vld [vmem:[#allocation2] sm:$0xf] }
  0x20   :  { %716 = vmatpush.bf16.msra.mxu3 %v2009_v50  ;;  %v1920_v12 = vld [vmem:[#allocation2 + $0x110] sm:$0xf]  ;;  %v2585_v13 = vld [vmem:[#allocation2 + $0x114] sm:$0xf0]  ;;  %v2551_v18 = vld [vmem:[#allocation2 + $0x4] sm:$0xf0]  ;;  %v1857_v19 = vor.u32 %v2569_v11, %v1856_v9 }
  0x21   :  { %675 = vmatpush.bf16.msra.mxu0 %v1809_v56  ;;  %v1984_v14 = vld [vmem:[#allocation2 + $0x190] sm:$0xf]  ;;  %v2601_v15 = vld [vmem:[#allocation2 + $0x194] sm:$0xf0]  ;;  %v1921_v20 = vor.u32 %v2585_v13, %v1920_v12  ;;  %v1848_v21 = vld [vmem:[#allocation2 + $0x80] sm:$0xf]  ;;  %v1785_v31 = vor.u32 %v2551_v18, %v1784_v17 }
  0x22   :  { %689 = vmatpush.bf16.msra.mxu1 %v1873_v57  ;;  %v2567_v22 = vld [vmem:[#allocation2 + $0x84] sm:$0xf0]  ;;  %v1912_v23 = vld [vmem:[#allocation2 + $0x100] sm:$0xf]  ;;  %v1985_v24 = vor.u32 %v2601_v15, %v1984_v14  ;;  %v2096_v28 = vld [vmem:[#allocation2 + $0x270] sm:$0xf] }
  0x23   :  { %703 = vmatpush.bf16.msra.mxu2 %v1937_v58  ;;  %v2583_v25 = vld [vmem:[#allocation2 + $0x104] sm:$0xf0]  ;;  %v1976_v26 = vld [vmem:[#allocation2 + $0x180] sm:$0xf]  ;;  %v2629_v29 = vld [vmem:[#allocation2 + $0x274] sm:$0xf0]  ;;  %v1849_v35 = vor.u32 %v2567_v22, %v1848_v21 }
  0x24   :  { %717 = vmatpush.bf16.msra.mxu3 %v2001_v62  ;;  %v2599_v27 = vld [vmem:[#allocation2 + $0x184] sm:$0xf0]  ;;  %v2160_v30 = vld [vmem:[#allocation2 + $0x2f0] sm:$0xf]  ;;  %v2645_v32 = vld [vmem:[#allocation2 + $0x2f4] sm:$0xf0]  ;;  %v1913_v36 = vor.u32 %v2583_v25, %v1912_v23  ;;  %v2097_v40 = vor.u32 %v2629_v29, %v2096_v28 }
  0x25   :  { %676 = vmatpush.bf16.msra.mxu0 %v1801_v4  ;;  %v2564_v33 = vld [vmem:[#allocation2 + $0x74] sm:$0xf]  ;;  %v1842_v34 = vld [vmem:[#allocation2 + $0x78] sm:$0xf0]  ;;  %v1977_v39 = vor.u32 %v2599_v27, %v1976_v26  ;;  %v2088_v41 = vld [vmem:[#allocation2 + $0x260] sm:$0xf]  ;;  %v2161_v42 = vor.u32 %v2645_v32, %v2160_v30 }
  0x26   :  { %690 = vmatpush.bf16.msra.mxu1 %v1865_v5  ;;  %v2580_v37 = vld [vmem:[#allocation2 + $0xf4] sm:$0xf]  ;;  %v1906_v38 = vld [vmem:[#allocation2 + $0xf8] sm:$0xf0]  ;;  %v1845_v43 = vor.u32 %v2564_v33, %v1842_v34  ;;  %v2627_v44 = vld [vmem:[#allocation2 + $0x264] sm:$0xf0] }
  0x27   :  { %704 = vmatpush.bf16.msra.mxu2 %v1929_v6  ;;  %v2152_v45 = vld [vmem:[#allocation2 + $0x2e0] sm:$0xf]  ;;  %v2643_v46 = vld [vmem:[#allocation2 + $0x2e4] sm:$0xf0]  ;;  %v1909_v47 = vor.u32 %v2580_v37, %v1906_v38  ;;  %v2562_v48 = vld [vmem:[#allocation2 + $0x64] sm:$0xf]  ;;  %v2089_v54 = vor.u32 %v2627_v44, %v2088_v41 }
  0x28   :  { %718 = vmatpush.bf16.msra.mxu3 %v1993_v10  ;;  %v1834_v49 = vld [vmem:[#allocation2 + $0x68] sm:$0xf0]  ;;  %v2578_v50 = vld [vmem:[#allocation2 + $0xe4] sm:$0xf]  ;;  %v77_v53 = vld [vmem:[%s3150_s0 + $0x30] sm:$0xff]  ;;  %v2153_v59 = vor.u32 %v2643_v46, %v2152_v45 }
  0x29   :  { %677 = vmatpush.bf16.msra.mxu0 %v1793_v16  ;;  %v1898_v51 = vld [vmem:[#allocation2 + $0xe8] sm:$0xf0]  ;;  %v71_v52 = vld [vmem:[%s3150_s0] sm:$0xff]  ;;  %v2080_v55 = vld [vmem:[#allocation2 + $0x250] sm:$0xf]  ;;  %v1837_v60 = vor.u32 %v2562_v48, %v1834_v49 }
  0x2a   :  { %691 = vmatpush.bf16.msra.mxu1 %v1857_v19  ;;  %v2625_v56 = vld [vmem:[#allocation2 + $0x254] sm:$0xf0]  ;;  %v2144_v57 = vld [vmem:[#allocation2 + $0x2d0] sm:$0xf]  ;;  %v2907_v58 = vpack.c.bf16 %v77_v53, %v71_v52  ;;  %v2560_v62 = vld [vmem:[#allocation2 + $0x54] sm:$0xf]  ;;  %v1901_v0 = vor.u32 %v2578_v50, %v1898_v51 }
  0x2b   :  { %705 = vmatpush.bf16.msra.mxu2 %v1921_v20  ;;  %v2641_v61 = vld [vmem:[#allocation2 + $0x2d4] sm:$0xf0]  ;;  %v1826_v63 = vld [vmem:[#allocation2 + $0x58] sm:$0xf0]  ;;  %v2576_v1 = vld [vmem:[#allocation2 + $0xd4] sm:$0xf]  ;;  %v2081_v8 = vor.u32 %v2625_v56, %v2080_v55 }
  0x2c   :  { %719 = vmatpush.bf16.msra.mxu3 %v1985_v24  ;;  %v72_v2 = vld [vmem:[%s3150_s0 + $0x8] sm:$0xff]  ;;  %v78_v3 = vld [vmem:[%s3150_s0 + $0x38] sm:$0xff]  ;;  %v73_v6 = vld [vmem:[%s3150_s0 + $0x10] sm:$0xff]  ;;  %v2145_v12 = vor.u32 %v2641_v61, %v2144_v57  ;;  %v1829_v13 = vor.u32 %v2560_v62, %v1826_v63 }
  0x2d   :  { %678 = vmatpush.bf16.msra.mxu0 %v1785_v31  ;;  %v1890_v4 = vld [vmem:[#allocation2 + $0xd8] sm:$0xf0]  ;;  %v2916_v5 = vpack.c.bf16 %v78_v3, %v72_v2  ;;  %v79_v7 = vld [vmem:[%s3150_s0 + $0x40] sm:$0xff]  ;;  %v2623_v10 = vld [vmem:[#allocation2 + $0x244] sm:$0xf0] }
  0x2e   :  { %692 = vmatpush.bf16.msra.mxu1 %v1849_v35  ;;  %v2072_v9 = vld [vmem:[#allocation2 + $0x240] sm:$0xf]  ;;  %v2924_v11 = vpack.c.bf16 %v79_v7, %v73_v6  ;;  %v2639_v15 = vld [vmem:[#allocation2 + $0x2c4] sm:$0xf0]  ;;  %v2558_v16 = vld [vmem:[#allocation2 + $0x44] sm:$0xf]  ;;  %v1893_v17 = vor.u32 %v2576_v1, %v1890_v4 }
  0x2f   :  { %706 = vmatpush.bf16.msra.mxu2 %v1913_v36  ;;  %v2136_v14 = vld [vmem:[#allocation2 + $0x2c0] sm:$0xf]  ;;  %v1818_v18 = vld [vmem:[#allocation2 + $0x48] sm:$0xf0]  ;;  %v74_v19 = vld [vmem:[%s3150_s0 + $0x18] sm:$0xff]  ;;  %v2073_v24 = vor.u32 %v2623_v10, %v2072_v9 }
  0x30   :  { %720 = vmatpush.bf16.msra.mxu3 %v1977_v39  ;;  %679 = vmatmul.bf16.vlgmr.msra.gmra.mxu0 %v2907_v58  ;;  %v80_v20 = vld [vmem:[%s3150_s0 + $0x48] sm:$0xff]  ;;  %v2574_v21 = vld [vmem:[#allocation2 + $0xc4] sm:$0xf]  ;;  %v2137_v25 = vor.u32 %v2639_v15, %v2136_v14  ;;  %v1821_v26 = vor.u32 %v2558_v16, %v1818_v18  ;;  %v2064_v27 = vld [vmem:[#allocation2 + $0x230] sm:$0xf] }
  0x31   :  { %727 = vmatpush.bf16.msrb.mxu0 %v2097_v40  ;;  %693 = vmatmul.bf16.vlgmr.msra.gmra.mxu1 %v2916_v5  ;;  %v1882_v22 = vld [vmem:[#allocation2 + $0xc8] sm:$0xf0]  ;;  %v2934_v23 = vpack.c.bf16 %v80_v20, %v74_v19  ;;  %v2621_v28 = vld [vmem:[#allocation2 + $0x234] sm:$0xf0]  ;;  %v2128_v29 = vld [vmem:[#allocation2 + $0x2b0] sm:$0xf] }
  0x32   :  { %741 = vmatpush.bf16.msrb.mxu1 %v2161_v42  ;;  %707 = vmatmul.bf16.vlgmr.msra.gmra.mxu2 %v2924_v11  ;;  %v1885_v30 = vor.u32 %v2574_v21, %v1882_v22  ;;  %v2637_v31 = vld [vmem:[#allocation2 + $0x2b4] sm:$0xf0]  ;;  %v2556_v32 = vld [vmem:[#allocation2 + $0x34] sm:$0xf]  ;;  %v1810_v33 = vld [vmem:[#allocation2 + $0x38] sm:$0xf0]  ;;  %v2065_v36 = vor.u32 %v2621_v28, %v2064_v27 }
  0x33   :  { %755 = vmatpush.bf16.msrb.mxu2 %v1845_v43  ;;  %v2572_v34 = vld [vmem:[#allocation2 + $0xb4] sm:$0xf]  ;;  %v1874_v35 = vld [vmem:[#allocation2 + $0xb8] sm:$0xf0]  ;;  %721 = vmatmul.bf16.vlgmr.msra.gmra.mxu3 %v2934_v23  ;;  %v2129_v37 = vor.u32 %v2637_v31, %v2128_v29  ;;  %v1813_v38 = vor.u32 %v2556_v32, %v1810_v33  ;;  %v2056_v39 = vld [vmem:[#allocation2 + $0x220] sm:$0xf] }
  0x34   :  { %769 = vmatpush.bf16.msrb.mxu3 %v1909_v47  ;;  %v2619_v40 = vld [vmem:[#allocation2 + $0x224] sm:$0xf0]  ;;  %v2120_v41 = vld [vmem:[#allocation2 + $0x2a0] sm:$0xf]  ;;  %v1877_v42 = vor.u32 %v2572_v34, %v1874_v35  ;;  %v2554_v44 = vld [vmem:[#allocation2 + $0x24] sm:$0xf] }
  0x35   :  { %728 = vmatpush.bf16.msrb.mxu0 %v2089_v54  ;;  %v2635_v43 = vld [vmem:[#allocation2 + $0x2a4] sm:$0xf0]  ;;  %v1802_v45 = vld [vmem:[#allocation2 + $0x28] sm:$0xf0]  ;;  %v2570_v46 = vld [vmem:[#allocation2 + $0xa4] sm:$0xf]  ;;  %v2057_v48 = vor.u32 %v2619_v40, %v2056_v39 }
  0x36   :  { %742 = vmatpush.bf16.msrb.mxu1 %v2153_v59  ;;  %v1866_v47 = vld [vmem:[#allocation2 + $0xa8] sm:$0xf0]  ;;  %v2121_v49 = vor.u32 %v2635_v43, %v2120_v41  ;;  %v1805_v50 = vor.u32 %v2554_v44, %v1802_v45  ;;  %v2048_v51 = vld [vmem:[#allocation2 + $0x210] sm:$0xf]  ;;  %v2617_v52 = vld [vmem:[#allocation2 + $0x214] sm:$0xf0] }
  0x37   :  { %756 = vmatpush.bf16.msrb.mxu2 %v1837_v60  ;;  %v2112_v53 = vld [vmem:[#allocation2 + $0x290] sm:$0xf]  ;;  %v1869_v54 = vor.u32 %v2570_v46, %v1866_v47  ;;  %v2633_v55 = vld [vmem:[#allocation2 + $0x294] sm:$0xf0]  ;;  %v2552_v56 = vld [vmem:[#allocation2 + $0x14] sm:$0xf]  ;;  %v2049_v61 = vor.u32 %v2617_v52, %v2048_v51 }
  0x38   :  { %770 = vmatpush.bf16.msrb.mxu3 %v1901_v0  ;;  %v1794_v57 = vld [vmem:[#allocation2 + $0x18] sm:$0xf0]  ;;  %v2568_v59 = vld [vmem:[#allocation2 + $0x94] sm:$0xf]  ;;  %v2040_v62 = vld [vmem:[#allocation2 + $0x200] sm:$0xf]  ;;  %v2113_v1 = vor.u32 %v2633_v55, %v2112_v53 }
  0x39   :  { %729 = vmatpush.bf16.msrb.mxu0 %v2081_v8  ;;  %v1858_v60 = vld [vmem:[#allocation2 + $0x98] sm:$0xf0]  ;;  %v2615_v63 = vld [vmem:[#allocation2 + $0x204] sm:$0xf0]  ;;  %v2104_v0 = vld [vmem:[#allocation2 + $0x280] sm:$0xf]  ;;  %v1797_v2 = vor.u32 %v2552_v56, %v1794_v57 }
  0x3a   :  { %743 = vmatpush.bf16.msrb.mxu1 %v2145_v12  ;;  %v2631_v3 = vld [vmem:[#allocation2 + $0x284] sm:$0xf0]  ;;  %v2550_v4 = vld [vmem:[#allocation2 + $0x4] sm:$0xf]  ;;  %v1786_v6 = vld [vmem:[#allocation2 + $0x8] sm:$0xf0]  ;;  %v1861_v7 = vor.u32 %v2568_v59, %v1858_v60  ;;  %v2041_v15 = vor.u32 %v2615_v63, %v2040_v62 }
  0x3b   :  { %757 = vmatpush.bf16.msrb.mxu2 %v1829_v13  ;;  %v2566_v8 = vld [vmem:[#allocation2 + $0x84] sm:$0xf]  ;;  %v1850_v9 = vld [vmem:[#allocation2 + $0x88] sm:$0xf0]  ;;  %v2596_v10 = vld [vmem:[#allocation2 + $0x174] sm:$0xf]  ;;  %v2105_v19 = vor.u32 %v2631_v3, %v2104_v0  ;;  %v1789_v20 = vor.u32 %v2550_v4, %v1786_v6 }
  0x3c   :  { %771 = vmatpush.bf16.msrb.mxu3 %v1893_v17  ;;  %v1970_v12 = vld [vmem:[#allocation2 + $0x178] sm:$0xf0]  ;;  %v2612_v13 = vld [vmem:[#allocation2 + $0x1f4] sm:$0xf]  ;;  %v75_v22 = vld [vmem:[%s3150_s0 + $0x20] sm:$0xff] }
  0x3d   :  { %730 = vmatpush.bf16.msrb.mxu0 %v2073_v24  ;;  %v2034_v14 = vld [vmem:[#allocation2 + $0x1f8] sm:$0xf0]  ;;  %v2628_v16 = vld [vmem:[#allocation2 + $0x274] sm:$0xf]  ;;  %v76_v27 = vld [vmem:[%s3150_s0 + $0x28] sm:$0xff] }
  0x3e   :  { %744 = vmatpush.bf16.msrb.mxu1 %v2137_v25  ;;  %v2098_v17 = vld [vmem:[#allocation2 + $0x278] sm:$0xf0]  ;;  %v2644_v18 = vld [vmem:[#allocation2 + $0x2f4] sm:$0xf]  ;;  %v1853_v25 = vor.u32 %v2566_v8, %v1850_v9  ;;  %v2037_v29 = vor.u32 %v2612_v13, %v2034_v14  ;;  %v2594_v31 = vld [vmem:[#allocation2 + $0x164] sm:$0xf] }
  0x3f   :  { %758 = vmatpush.bf16.msrb.mxu2 %v1821_v26  ;;  %v2162_v21 = vld [vmem:[#allocation2 + $0x2f8] sm:$0xf0]  ;;  %v81_v24 = vld [vmem:[%s3150_s0 + $0x50] sm:$0xff]  ;;  %v1973_v26 = vor.u32 %v2596_v10, %v1970_v12  ;;  %v1962_v32 = vld [vmem:[#allocation2 + $0x168] sm:$0xf0] }
  0x40   :  { %772 = vmatpush.bf16.msrb.mxu3 %v1885_v30  ;;  %v82_v28 = vld [vmem:[%s3150_s0 + $0x58] sm:$0xff]  ;;  %v2101_v30 = vor.u32 %v2628_v16, %v2098_v17  ;;  %v2610_v33 = vld [vmem:[#allocation2 + $0x1e4] sm:$0xf]  ;;  %v2165_v34 = vor.u32 %v2644_v18, %v2162_v21  ;;  %v2949_v35 = vpack.c.bf16 %v81_v24, %v75_v22  ;;  %v2154_v41 = vld [vmem:[#allocation2 + $0x2e8] sm:$0xf0] }
  0x41   :  { %731 = vmatpush.bf16.msrb.mxu0 %v2065_v36  ;;  %v2026_v36 = vld [vmem:[#allocation2 + $0x1e8] sm:$0xf0]  ;;  %v2951_v39 = vpack.c.bf16 %v82_v28, %v76_v27  ;;  %v2642_v40 = vld [vmem:[#allocation2 + $0x2e4] sm:$0xf]  ;;  %v2592_v45 = vld [vmem:[#allocation2 + $0x154] sm:$0xf] }
  0x42   :  { %745 = vmatpush.bf16.msrb.mxu1 %v2129_v37  ;;  %v2626_v37 = vld [vmem:[#allocation2 + $0x264] sm:$0xf]  ;;  %v2029_v43 = vor.u32 %v2610_v33, %v2026_v36  ;;  %v1954_v46 = vld [vmem:[#allocation2 + $0x158] sm:$0xf0]  ;;  %v2608_v47 = vld [vmem:[#allocation2 + $0x1d4] sm:$0xf] }
  0x43   :  { %759 = vmatpush.bf16.msrb.mxu2 %v1813_v38  ;;  %v2090_v38 = vld [vmem:[#allocation2 + $0x268] sm:$0xf0]  ;;  %v2082_v51 = vld [vmem:[#allocation2 + $0x258] sm:$0xf0]  ;;  %v2640_v52 = vld [vmem:[#allocation2 + $0x2d4] sm:$0xf] }
  0x44   :  { %773 = vmatpush.bf16.msrb.mxu3 %v1877_v42  ;;  %v1965_v42 = vor.u32 %v2594_v31, %v1962_v32  ;;  %v2093_v44 = vor.u32 %v2626_v37, %v2090_v38  ;;  %v2146_v53 = vld [vmem:[#allocation2 + $0x2d8] sm:$0xf0]  ;;  %v2590_v57 = vld [vmem:[#allocation2 + $0x144] sm:$0xf]  ;;  %v1946_v59 = vld [vmem:[#allocation2 + $0x148] sm:$0xf0] }
  0x45   :  { %732 = vmatpush.bf16.msrb.mxu0 %v2057_v48  ;;  %v2157_v48 = vor.u32 %v2642_v40, %v2154_v41  ;;  %v2606_v60 = vld [vmem:[#allocation2 + $0x1c4] sm:$0xf]  ;;  %v2010_v62 = vld [vmem:[#allocation2 + $0x1c8] sm:$0xf0]  ;;  %v2588_v4 = vld [vmem:[#allocation2 + $0x134] sm:$0xf] }
  0x46   :  { %746 = vmatpush.bf16.msrb.mxu1 %v2121_v49  ;;  %v2018_v49 = vld [vmem:[#allocation2 + $0x1d8] sm:$0xf0]  ;;  %v2622_v63 = vld [vmem:[#allocation2 + $0x244] sm:$0xf]  ;;  %v2074_v0 = vld [vmem:[#allocation2 + $0x248] sm:$0xf0]  ;;  %v2013_v3 = vor.u32 %v2606_v60, %v2010_v62 }
  0x47   :  { %760 = vmatpush.bf16.msrb.mxu2 %v1805_v50  ;;  %v2624_v50 = vld [vmem:[#allocation2 + $0x254] sm:$0xf]  ;;  %v2021_v55 = vor.u32 %v2608_v47, %v2018_v49  ;;  %v1938_v6 = vld [vmem:[#allocation2 + $0x138] sm:$0xf0]  ;;  %v2586_v18 = vld [vmem:[#allocation2 + $0x124] sm:$0xf] }
  0x48   :  { %774 = vmatpush.bf16.msrb.mxu3 %v1869_v54  ;;  %v1957_v54 = vor.u32 %v2592_v45, %v1954_v46  ;;  %v2085_v56 = vor.u32 %v2624_v50, %v2082_v51  ;;  %v2002_v9 = vld [vmem:[#allocation2 + $0x1b8] sm:$0xf0]  ;;  %v2620_v10 = vld [vmem:[#allocation2 + $0x234] sm:$0xf]  ;;  %v1994_v22 = vld [vmem:[#allocation2 + $0x1a8] sm:$0xf0] }
  0x49   :  { %733 = vmatpush.bf16.msrb.mxu0 %v2049_v61  ;;  %v2149_v61 = vor.u32 %v2640_v52, %v2146_v53  ;;  %v2066_v12 = vld [vmem:[#allocation2 + $0x238] sm:$0xf0]  ;;  %v2636_v13 = vld [vmem:[#allocation2 + $0x2b4] sm:$0xf]  ;;  %v2618_v24 = vld [vmem:[#allocation2 + $0x224] sm:$0xf] }
  0x4a   :  { %747 = vmatpush.bf16.msrb.mxu1 %v2113_v1  ;;  %v2638_v1 = vld [vmem:[#allocation2 + $0x2c4] sm:$0xf]  ;;  %v2130_v14 = vld [vmem:[#allocation2 + $0x2b8] sm:$0xf0]  ;;  %v2069_v17 = vor.u32 %v2620_v10, %v2066_v12  ;;  %v2122_v27 = vld [vmem:[#allocation2 + $0x2a8] sm:$0xf0] }
  0x4b   :  { %761 = vmatpush.bf16.msrb.mxu2 %v1797_v2  ;;  %v1949_v2 = vor.u32 %v2590_v57, %v1946_v59  ;;  %v2133_v21 = vor.u32 %v2636_v13, %v2130_v14  ;;  %v2584_v31 = vld [vmem:[#allocation2 + $0x114] sm:$0xf]  ;;  %v1922_v32 = vld [vmem:[#allocation2 + $0x118] sm:$0xf0]  ;;  %v1914_v46 = vld [vmem:[#allocation2 + $0x108] sm:$0xf0] }
  0x4c   :  { %775 = vmatpush.bf16.msrb.mxu3 %v1861_v7  ;;  %v2604_v7 = vld [vmem:[#allocation2 + $0x1b4] sm:$0xf]  ;;  %v1986_v36 = vld [vmem:[#allocation2 + $0x198] sm:$0xf0]  ;;  %v2598_v47 = vld [vmem:[#allocation2 + $0x184] sm:$0xf] }
  0x4d   :  { %734 = vmatpush.bf16.msrb.mxu0 %v2041_v15  ;;  %v1941_v15 = vor.u32 %v2588_v4, %v1938_v6  ;;  %v2005_v16 = vor.u32 %v2604_v7, %v2002_v9  ;;  %v2600_v33 = vld [vmem:[#allocation2 + $0x194] sm:$0xf]  ;;  %v2050_v38 = vld [vmem:[#allocation2 + $0x218] sm:$0xf0]  ;;  %v2614_v50 = vld [vmem:[#allocation2 + $0x204] sm:$0xf] }
  0x4e   :  { %748 = vmatpush.bf16.msrb.mxu1 %v2105_v19  ;;  %v1930_v19 = vld [vmem:[#allocation2 + $0x128] sm:$0xf0]  ;;  %v2616_v37 = vld [vmem:[#allocation2 + $0x214] sm:$0xf]  ;;  %v2114_v41 = vld [vmem:[#allocation2 + $0x298] sm:$0xf0] }
  0x4f   :  { %762 = vmatpush.bf16.msrb.mxu2 %v1789_v20  ;;  %v2602_v20 = vld [vmem:[#allocation2 + $0x1a4] sm:$0xf]  ;;  %v1933_v28 = vor.u32 %v2586_v18, %v1930_v19  ;;  %v2632_v40 = vld [vmem:[#allocation2 + $0x294] sm:$0xf]  ;;  %v2053_v45 = vor.u32 %v2616_v37, %v2050_v38  ;;  %v2042_v51 = vld [vmem:[#allocation2 + $0x208] sm:$0xf0] }
  0x50   :  { %776 = vmatpush.bf16.msrb.mxu3 %v1853_v25  ;;  %735 = vmatmul.bf16.vlgmr.msrb.gmra.mxu0 %v2949_v35  ;;  %v2058_v25 = vld [vmem:[#allocation2 + $0x228] sm:$0xf0]  ;;  %v2117_v49 = vor.u32 %v2632_v40, %v2114_v41  ;;  %v2630_v52 = vld [vmem:[#allocation2 + $0x284] sm:$0xf]  ;;  %v2688_v57 = vld [vmem:[#allocation6 + $0x154] sm:$0xf] }
  0x51   :  { %783 = vmatpush.bf16.msra.mxu0 %v1973_v26  ;;  %749 = vmatmul.bf16.vlgmr.msrb.gmra.mxu1 %v2951_v39  ;;  %v2634_v26 = vld [vmem:[#allocation2 + $0x2a4] sm:$0xf]  ;;  %v2106_v53 = vld [vmem:[#allocation2 + $0x288] sm:$0xf0]  ;;  %v2288_v6 = vld [vmem:[#allocation6 + $0xf0] sm:$0xf] }
  0x52   :  { %797 = vmatpush.bf16.msra.mxu1 %v2037_v29  ;;  %763 = vmatmul.bf16.vlgmr.msrb.gmra.mxu2 %v2907_v58  ;;  %v2138_v58 = vld [vmem:[#allocation2 + $0x2c8] sm:$0xf0]  ;;  %v1997_v29 = vor.u32 %v2602_v20, %v1994_v22  ;;  %v2109_v62 = vor.u32 %v2630_v52, %v2106_v53  ;;  %v2264_v13 = vld [vmem:[#allocation6 + $0xc0] sm:$0xf]  ;;  %v2673_v14 = vld [vmem:[#allocation6 + $0xd4] sm:$0xf0] }
  0x53   :  { %811 = vmatpush.bf16.msra.mxu2 %v2101_v30  ;;  %777 = vmatmul.bf16.vlgmr.msrb.gmra.mxu3 %v2916_v5  ;;  %v2077_v5 = vor.u32 %v2622_v63, %v2074_v0  ;;  %v2141_v8 = vor.u32 %v2638_v1, %v2138_v58  ;;  %v2061_v30 = vor.u32 %v2618_v24, %v2058_v25  ;;  %v2338_v59 = vld [vmem:[#allocation6 + $0x168] sm:$0xf0]  ;;  %v2312_v1 = vld [vmem:[#allocation6 + $0x120] sm:$0xf]  ;;  %v2685_v58 = vld [vmem:[#allocation6 + $0x134] sm:$0xf0] }
  0x54   :  { %825 = vmatpush.bf16.msra.mxu3 %v2165_v34  ;;  %v2125_v34 = vor.u32 %v2634_v26, %v2122_v27  ;;  %v2341_v0 = vor.u32 %v2688_v57, %v2338_v59  ;;  %v2679_v7 = vld [vmem:[#allocation6 + $0x104] sm:$0xf0]  ;;  %v2290_v9 = vld [vmem:[#allocation6 + $0x108] sm:$0xf0]  ;;  %v2240_v18 = vld [vmem:[#allocation6 + $0x90] sm:$0xf] }
  0x55   :  { %784 = vmatpush.bf16.msra.mxu0 %v1965_v42  ;;  %v1925_v42 = vor.u32 %v2584_v31, %v1922_v32  ;;  %v2289_v10 = vor.u32 %v2679_v7, %v2288_v6  ;;  %v2664_v19 = vld [vmem:[#allocation6 + $0x94] sm:$0xf]  ;;  %v2661_v22 = vld [vmem:[#allocation6 + $0x74] sm:$0xf0]  ;;  %v2658_v24 = vld [vmem:[#allocation6 + $0x64] sm:$0xf] }
  0x56   :  { %798 = vmatpush.bf16.msra.mxu1 %v2029_v43  ;;  %v2582_v43 = vld [vmem:[#allocation2 + $0x104] sm:$0xf]  ;;  %v2218_v25 = vld [vmem:[#allocation6 + $0x78] sm:$0xf0]  ;;  %v2194_v32 = vld [vmem:[#allocation6 + $0x48] sm:$0xf0] }
  0x57   :  { %812 = vmatpush.bf16.msra.mxu2 %v2093_v44  ;;  %v1989_v44 = vor.u32 %v2600_v33, %v1986_v36  ;;  %v2221_v27 = vor.u32 %v2658_v24, %v2218_v25  ;;  %v2649_v36 = vld [vmem:[#allocation6 + $0x14] sm:$0xf0]  ;;  %v2646_v37 = vld [vmem:[#allocation6 + $0x4] sm:$0xf]  ;;  %v2170_v40 = vld [vmem:[#allocation6 + $0x18] sm:$0xf0] }
  0x58   :  { %826 = vmatpush.bf16.msra.mxu3 %v2157_v48  ;;  %v1978_v48 = vld [vmem:[#allocation2 + $0x188] sm:$0xf0]  ;;  %v2344_v41 = vld [vmem:[#allocation6 + $0x158] sm:$0xf]  ;;  %v2322_v52 = vld [vmem:[#allocation6 + $0x140] sm:$0xf0] }
  0x59   :  { %785 = vmatpush.bf16.msra.mxu0 %v1957_v54  ;;  %v2336_v54 = vld [vmem:[#allocation6 + $0x150] sm:$0xf]  ;;  %v1981_v60 = vor.u32 %v2598_v47, %v1978_v48  ;;  %v2320_v48 = vld [vmem:[#allocation6 + $0x128] sm:$0xf]  ;;  %v2530_v59 = vld [vmem:[#allocation6 + $0x2e8] sm:$0xf0] }
  0x5a   :  { %799 = vmatpush.bf16.msra.mxu1 %v2021_v55  ;;  %v2691_v55 = vld [vmem:[#allocation6 + $0x164] sm:$0xf0]  ;;  %v2506_v6 = vld [vmem:[#allocation6 + $0x2b8] sm:$0xf0]  ;;  %v2721_v24 = vld [vmem:[#allocation6 + $0x254] sm:$0xf0] }
  0x5b   :  { %813 = vmatpush.bf16.msra.mxu2 %v2085_v56  ;;  %v1917_v56 = vor.u32 %v2582_v43, %v1914_v46  ;;  %v2337_v63 = vor.u32 %v2691_v55, %v2336_v54  ;;  %v2173_v43 = vor.u32 %v2646_v37, %v2170_v40  ;;  %v2346_v46 = vld [vmem:[#allocation6 + $0x170] sm:$0xf0]  ;;  %v2528_v54 = vld [vmem:[#allocation6 + $0x2d0] sm:$0xf]  ;;  %v2739_v55 = vld [vmem:[#allocation6 + $0x2e4] sm:$0xf0] }
  0x5c   :  { %827 = vmatpush.bf16.msra.mxu3 %v2149_v61  ;;  %v2045_v61 = vor.u32 %v2614_v50, %v2042_v51  ;;  %v2683_v50 = vld [vmem:[#allocation6 + $0x12c] sm:$0xf]  ;;  %v2529_v57 = vor.u32 %v2739_v55, %v2528_v54  ;;  %v2715_v40 = vld [vmem:[#allocation6 + $0x224] sm:$0xf0]  ;;  %v2408_v54 = vld [vmem:[#allocation6 + $0x1e0] sm:$0xf] }
  0x5d   :  { %786 = vmatpush.bf16.msra.mxu0 %v1949_v2  ;;  %v2682_v2 = vld [vmem:[#allocation6 + $0x124] sm:$0xf]  ;;  %v2325_v53 = vor.u32 %v2683_v50, %v2322_v52  ;;  %v2202_v52 = vld [vmem:[#allocation6 + $0x50] sm:$0xf0]  ;;  %v2709_v55 = vld [vmem:[#allocation6 + $0x1f4] sm:$0xf0] }
  0x5e   :  { %800 = vmatpush.bf16.msra.mxu1 %v2013_v3  ;;  %v2314_v3 = vld [vmem:[#allocation6 + $0x138] sm:$0xf0] }
  0x5f   :  { %814 = vmatpush.bf16.msra.mxu2 %v2077_v5  ;;  %v2313_v5 = vor.u32 %v2685_v58, %v2312_v1  ;;  %v2317_v4 = vor.u32 %v2682_v2, %v2314_v3  ;;  %v2298_v1 = vld [vmem:[#allocation6 + $0x110] sm:$0xf0]  ;;  %v2504_v58 = vld [vmem:[#allocation6 + $0x2a0] sm:$0xf]  ;;  %v2733_v2 = vld [vmem:[#allocation6 + $0x2b4] sm:$0xf0] }
  0x60   :  { %828 = vmatpush.bf16.msra.mxu3 %v2141_v8  ;;  %v2676_v8 = vld [vmem:[#allocation6 + $0xf4] sm:$0xf] }
  0x61   :  { %787 = vmatpush.bf16.msra.mxu0 %v1941_v15  ;;  %v2293_v12 = vor.u32 %v2676_v8, %v2290_v9  ;;  %v2670_v15 = vld [vmem:[#allocation6 + $0xc4] sm:$0xf]  ;;  %v2272_v8 = vld [vmem:[#allocation6 + $0xc8] sm:$0xf]  ;;  %v2674_v9 = vld [vmem:[#allocation6 + $0xdc] sm:$0xf0] }
  0x62   :  { %801 = vmatpush.bf16.msra.mxu1 %v2005_v16  ;;  %v2265_v16 = vor.u32 %v2673_v14, %v2264_v13  ;;  %v2274_v13 = vld [vmem:[#allocation6 + $0xe0] sm:$0xf0] }
  0x63   :  { %815 = vmatpush.bf16.msra.mxu2 %v2069_v17 }
  0x64   :  { %829 = vmatpush.bf16.msra.mxu3 %v2133_v21  ;;  %v2216_v21 = vld [vmem:[#allocation6 + $0x60] sm:$0xf] }
  0x65   :  { %788 = vmatpush.bf16.msra.mxu0 %v1933_v28  ;;  %v2217_v26 = vor.u32 %v2661_v22, %v2216_v21  ;;  %v2192_v28 = vld [vmem:[#allocation6 + $0x30] sm:$0xf]  ;;  %v2250_v21 = vld [vmem:[#allocation6 + $0xb0] sm:$0xf0]  ;;  %v2456_v22 = vld [vmem:[#allocation6 + $0x240] sm:$0xf] }
  0x66   :  { %802 = vmatpush.bf16.msra.mxu1 %v1997_v29  ;;  %v2655_v29 = vld [vmem:[#allocation6 + $0x44] sm:$0xf0] }
  0x67   :  { %816 = vmatpush.bf16.msra.mxu2 %v2061_v30  ;;  %v2652_v30 = vld [vmem:[#allocation6 + $0x34] sm:$0xf]  ;;  %v2193_v31 = vor.u32 %v2655_v29, %v2192_v28  ;;  %v2458_v28 = vld [vmem:[#allocation6 + $0x258] sm:$0xf0] }
  0x68   :  { %830 = vmatpush.bf16.msra.mxu3 %v2125_v34  ;;  %v2197_v33 = vor.u32 %v2652_v30, %v2194_v32  ;;  %v2168_v34 = vld [vmem:[#allocation6] sm:$0xf]  ;;  %v2224_v30 = vld [vmem:[#allocation6 + $0x68] sm:$0xf]  ;;  %v2659_v32 = vld [vmem:[#allocation6 + $0x6c] sm:$0xf] }
  0x69   :  { %789 = vmatpush.bf16.msra.mxu0 %v1925_v42  ;;  %v2169_v38 = vor.u32 %v2649_v36, %v2168_v34  ;;  %v2692_v42 = vld [vmem:[#allocation6 + $0x16c] sm:$0xf0]  ;;  %v2226_v36 = vld [vmem:[#allocation6 + $0x80] sm:$0xf0] }
  0x6a   :  { %803 = vmatpush.bf16.msra.mxu1 %v1989_v44  ;;  %v2345_v44 = vor.u32 %v2692_v42, %v2344_v41  ;;  %v2229_v37 = vor.u32 %v2659_v32, %v2226_v36  ;;  %v2712_v41 = vld [vmem:[#allocation6 + $0x214] sm:$0xf] }
  0x6b   :  { %817 = vmatpush.bf16.msra.mxu2 %v2053_v45  ;;  %v2689_v45 = vld [vmem:[#allocation6 + $0x15c] sm:$0xf] }
  0x6c   :  { %831 = vmatpush.bf16.msra.mxu3 %v2117_v49  ;;  %v2349_v47 = vor.u32 %v2689_v45, %v2346_v46  ;;  %v2686_v49 = vld [vmem:[#allocation6 + $0x13c] sm:$0xf0]  ;;  %v2200_v46 = vld [vmem:[#allocation6 + $0x38] sm:$0xf] }
  0x6d   :  { %790 = vmatpush.bf16.msra.mxu0 %v1917_v56  ;;  %v2321_v51 = vor.u32 %v2686_v49, %v2320_v48  ;;  %v2736_v56 = vld [vmem:[#allocation6 + $0x2d4] sm:$0xf]  ;;  %v2653_v48 = vld [vmem:[#allocation6 + $0x3c] sm:$0xf] }
  0x6e   :  { %804 = vmatpush.bf16.msra.mxu1 %v1981_v60  ;;  %v2533_v60 = vor.u32 %v2736_v56, %v2530_v59  ;;  %v2706_v56 = vld [vmem:[#allocation6 + $0x1e4] sm:$0xf]  ;;  %v2410_v59 = vld [vmem:[#allocation6 + $0x1f8] sm:$0xf0] }
  0x6f   :  { %818 = vmatpush.bf16.msra.mxu2 %v2045_v61  ;;  %v2296_v61 = vld [vmem:[#allocation6 + $0xf8] sm:$0xf] }
  0x70   :  { %832 = vmatpush.bf16.msra.mxu3 %v2109_v62  ;;  %791 = vmatmul.bf16.vlgmr.msra.gmra.mxu0 %v2924_v11  ;;  %v2266_v11 = vld [vmem:[#allocation6 + $0xd8] sm:$0xf0]  ;;  %v2680_v62 = vld [vmem:[#allocation6 + $0x10c] sm:$0xf0] }
  0x71   :  { %1435 = vmatpush.bf16.msrb.mxu0 %v2337_v63  ;;  %805 = vmatmul.bf16.vlgmr.msra.gmra.mxu1 %v2934_v23  ;;  %v2269_v17 = vor.u32 %v2670_v15, %v2266_v11  ;;  %v2667_v23 = vld [vmem:[#allocation6 + $0xa4] sm:$0xf0]  ;;  %v2677_v63 = vld [vmem:[#allocation6 + $0xfc] sm:$0xf]  ;;  %v2480_v15 = vld [vmem:[#allocation6 + $0x270] sm:$0xf] }
  0x72   :  { %819 = vmatmul.bf16.vlgmr.msra.gmra.mxu2 %v2949_v35  ;;  %v2242_v35 = vld [vmem:[#allocation6 + $0xa8] sm:$0xf0]  ;;  %v2241_v20 = vor.u32 %v2667_v23, %v2240_v18  ;;  %1449 = vmatpush.bf16.msrb.mxu1 %v2529_v57  ;;  %v2301_v3 = vor.u32 %v2677_v63, %v2298_v1  ;;  %v2727_v11 = vld [vmem:[#allocation6 + $0x284] sm:$0xf0]  ;;  %v2409_v57 = vor.u32 %v2709_v55, %v2408_v54  ;;  %v2178_v1 = vld [vmem:[#allocation6 + $0x20] sm:$0xf0] }
  0x73   :  { %1463 = vmatpush.bf16.msrb.mxu2 %v2341_v0  ;;  %833 = vmatmul.bf16.vlgmr.msra.gmra.mxu3 %v2951_v39  ;;  %v2245_v39 = vor.u32 %v2664_v19, %v2242_v35  ;;  %v2297_v0 = vor.u32 %v2680_v62, %v2296_v61  ;;  %v2482_v18 = vld [vmem:[#allocation6 + $0x288] sm:$0xf0]  ;;  %v2248_v19 = vld [vmem:[#allocation6 + $0x98] sm:$0xf]  ;;  %v2668_v35 = vld [vmem:[#allocation6 + $0xac] sm:$0xf0] }
  0x74   :  { %1477 = vmatpush.bf16.msrb.mxu3 %v2533_v60  ;;  %v2413_v60 = vor.u32 %v2706_v56, %v2410_v59  ;;  %v2176_v61 = vld [vmem:[#allocation6 + $0x8] sm:$0xf]  ;;  %v2650_v62 = vld [vmem:[#allocation6 + $0x1c] sm:$0xf0]  ;;  %v2647_v63 = vld [vmem:[#allocation6 + $0xc] sm:$0xf] }
  0x75   :  { %1436 = vmatpush.bf16.msrb.mxu0 %v2313_v5  ;;  %v2505_v5 = vor.u32 %v2733_v2, %v2504_v58  ;;  %v2181_v2 = vor.u32 %v2647_v63, %v2178_v1  ;;  %v2716_v59 = vld [vmem:[#allocation6 + $0x22c] sm:$0xf0]  ;;  %v2442_v63 = vld [vmem:[#allocation6 + $0x230] sm:$0xf0] }
  0x77   :  { %1464 = vmatpush.bf16.msrb.mxu2 %v2317_v4  ;;  %v2730_v4 = vld [vmem:[#allocation6 + $0x2a4] sm:$0xf]  ;;  %1450 = vmatpush.bf16.msrb.mxu1 %v2505_v5  ;;  %v2703_v5 = vld [vmem:[#allocation6 + $0x1c4] sm:$0xf0] }
  0x78   :  { %v2509_v7 = vor.u32 %v2730_v4, %v2506_v6  ;;  %v2700_v4 = vld [vmem:[#allocation6 + $0x1b4] sm:$0xf]  ;;  %v2386_v6 = vld [vmem:[#allocation6 + $0x1c8] sm:$0xf0] }
  0x79   :  { %1437 = vmatpush.bf16.msrb.mxu0 %v2289_v10  ;;  %v2671_v10 = vld [vmem:[#allocation6 + $0xcc] sm:$0xf] }
  0x7a   :  { %1478 = vmatpush.bf16.msrb.mxu3 %v2509_v7  ;;  %v2277_v14 = vor.u32 %v2671_v10, %v2274_v13  ;;  %v2360_v13 = vld [vmem:[#allocation6 + $0x180] sm:$0xf] }
  0x7b   :  { %1465 = vmatpush.bf16.msrb.mxu2 %v2293_v12  ;;  %v2273_v12 = vor.u32 %v2674_v9, %v2272_v8  ;;  %v2389_v9 = vor.u32 %v2700_v4, %v2386_v6  ;;  %v2690_v4 = vld [vmem:[#allocation6 + $0x164] sm:$0xf]  ;;  %v2354_v6 = vld [vmem:[#allocation6 + $0x178] sm:$0xf0] }
  0x7d   :  { %1438 = vmatpush.bf16.msrb.mxu0 %v2265_v16  ;;  %v2724_v16 = vld [vmem:[#allocation6 + $0x274] sm:$0xf] }
  0x7e   :  { %v2485_v23 = vor.u32 %v2724_v16, %v2482_v18  ;;  %v2536_v18 = vld [vmem:[#allocation6 + $0x2d8] sm:$0xf] }
  0x7f   :  { %1466 = vmatpush.bf16.msrb.mxu2 %v2269_v17  ;;  %v2481_v17 = vor.u32 %v2727_v11, %v2480_v15  ;;  %v2694_v15 = vld [vmem:[#allocation6 + $0x184] sm:$0xf] }
  0x80   :  { %1479 = vmatpush.bf16.msrb.mxu3 %v2485_v23  ;;  %v2740_v23 = vld [vmem:[#allocation6 + $0x2ec] sm:$0xf0] }
  0x81   :  { %1439 = vmatpush.bf16.msrb.mxu0 %v2241_v20  ;;  %v2665_v20 = vld [vmem:[#allocation6 + $0x9c] sm:$0xf]  ;;  %1451 = vmatpush.bf16.msrb.mxu1 %v2481_v17 }
  0x82   :  { %v2253_v25 = vor.u32 %v2665_v20, %v2250_v21  ;;  %v2362_v17 = vld [vmem:[#allocation6 + $0x198] sm:$0xf0]  ;;  %v2537_v20 = vor.u32 %v2740_v23, %v2536_v18  ;;  %v2538_v21 = vld [vmem:[#allocation6 + $0x2f0] sm:$0xf0]  ;;  %v2687_v18 = vld [vmem:[#allocation6 + $0x144] sm:$0xf0] }
  0x83   :  { %1467 = vmatpush.bf16.msrb.mxu2 %v2245_v39  ;;  %v2249_v39 = vor.u32 %v2668_v35, %v2248_v19  ;;  %v2365_v35 = vor.u32 %v2694_v15, %v2362_v17  ;;  %v2328_v15 = vld [vmem:[#allocation6 + $0x130] sm:$0xf]  ;;  %v2357_v17 = vor.u32 %v2690_v4, %v2354_v6  ;;  %v2684_v23 = vld [vmem:[#allocation6 + $0x134] sm:$0xf]  ;;  %v2208_v6 = vld [vmem:[#allocation6 + $0x40] sm:$0xf] }
  0x85   :  { %1440 = vmatpush.bf16.msrb.mxu0 %v2217_v26  ;;  %v2457_v26 = vor.u32 %v2721_v24, %v2456_v22 }
  0x87   :  { %1468 = vmatpush.bf16.msrb.mxu2 %v2221_v27  ;;  %v2718_v27 = vld [vmem:[#allocation6 + $0x244] sm:$0xf]  ;;  %1452 = vmatpush.bf16.msrb.mxu1 %v2457_v26  ;;  %v2512_v26 = vld [vmem:[#allocation6 + $0x2a8] sm:$0xf] }
  0x88   :  { %v2461_v29 = vor.u32 %v2718_v27, %v2458_v28  ;;  %v2734_v27 = vld [vmem:[#allocation6 + $0x2bc] sm:$0xf0]  ;;  %v2731_v28 = vld [vmem:[#allocation6 + $0x2ac] sm:$0xf] }
  0x89   :  { %1441 = vmatpush.bf16.msrb.mxu0 %v2193_v31  ;;  %v2662_v31 = vld [vmem:[#allocation6 + $0x7c] sm:$0xf0] }
  0x8a   :  { %v2225_v34 = vor.u32 %v2662_v31, %v2224_v30  ;;  %1480 = vmatpush.bf16.msrb.mxu3 %v2461_v29  ;;  %v2513_v29 = vor.u32 %v2734_v27, %v2512_v26  ;;  %v2514_v30 = vld [vmem:[#allocation6 + $0x2c0] sm:$0xf0] }
  0x8b   :  { %1469 = vmatpush.bf16.msrb.mxu2 %v2197_v33  ;;  %v2961_v33 = vld [vmem:[#allocation4] sm:$0x3]  ;;  %v2517_v31 = vor.u32 %v2731_v28, %v2514_v30  ;;  %v2329_v28 = vor.u32 %v2687_v18, %v2328_v15  ;;  %v2681_v30 = vld [vmem:[#allocation6 + $0x114] sm:$0xf0] }
  0x8c   :  { %v187_v49 = vperm.slane %v2961_v33, 0 }
  0x8d   :  { %1442 = vmatpush.bf16.msrb.mxu0 %v2169_v38  ;;  %v2432_v38 = vld [vmem:[#allocation6 + $0x210] sm:$0xf] }
  0x8e   :  { %v2433_v42 = vor.u32 %v2715_v40, %v2432_v38  ;;  %v2728_v38 = vld [vmem:[#allocation6 + $0x28c] sm:$0xf0]  ;;  %v2725_v40 = vld [vmem:[#allocation6 + $0x27c] sm:$0xf] }
  0x8f   :  { %1470 = vmatpush.bf16.msrb.mxu2 %v2173_v43  ;;  %v2434_v43 = vld [vmem:[#allocation6 + $0x228] sm:$0xf0] }
  0x90   :  { %v2437_v45 = vor.u32 %v2712_v41, %v2434_v43  ;;  %1453 = vmatpush.bf16.msrb.mxu1 %v2433_v42  ;;  %v2490_v43 = vld [vmem:[#allocation6 + $0x290] sm:$0xf0] }
  0x91   :  { %1491 = vmatpush.bf16.msra.mxu0 %v2345_v44 }
  0x92   :  { %1481 = vmatpush.bf16.msrb.mxu3 %v2437_v45 }
  0x93   :  { %1519 = vmatpush.bf16.msra.mxu2 %v2349_v47  ;;  %v2656_v47 = vld [vmem:[#allocation6 + $0x4c] sm:$0xf0] }
  0x94   :  { %1454 = vmatpush.bf16.msrb.mxu1 %v2409_v57  ;;  %v2440_v57 = vld [vmem:[#allocation6 + $0x218] sm:$0xf] }
  0x95   :  { %1492 = vmatpush.bf16.msra.mxu0 %v2321_v51  ;;  %v2201_v51 = vor.u32 %v2656_v47, %v2200_v46  ;;  %v2493_v46 = vor.u32 %v2725_v40, %v2490_v43 }
  0x96   :  { %1482 = vmatpush.bf16.msrb.mxu3 %v2413_v60  ;;  %v2713_v60 = vld [vmem:[#allocation6 + $0x21c] sm:$0xf] }
  0x97   :  { %1520 = vmatpush.bf16.msra.mxu2 %v2325_v53  ;;  %v2205_v53 = vor.u32 %v2653_v48, %v2202_v52 }
  0x99   :  { %1493 = vmatpush.bf16.msra.mxu0 %v2297_v0  ;;  %v2177_v0 = vor.u32 %v2650_v62, %v2176_v61  ;;  %v2441_v62 = vor.u32 %v2716_v59, %v2440_v57 }
  0x9a   :  { %1483 = vmatpush.bf16.msrb.mxu3 %v2389_v9  ;;  %v2710_v9 = vld [vmem:[#allocation6 + $0x1fc] sm:$0xf0] }
  0x9b   :  { %1521 = vmatpush.bf16.msra.mxu2 %v2301_v3  ;;  %v2384_v3 = vld [vmem:[#allocation6 + $0x1b0] sm:$0xf] }
  0x9c   :  { %v2385_v8 = vor.u32 %v2703_v5, %v2384_v3  ;;  %v2445_v3 = vor.u32 %v2713_v60, %v2442_v63  ;;  %v2232_v63 = vld [vmem:[#allocation6 + $0x70] sm:$0xf] }
  0x9d   :  { %1494 = vmatpush.bf16.msra.mxu0 %v2273_v12 }
  0x9e   :  { %1455 = vmatpush.bf16.msrb.mxu1 %v2385_v8  ;;  %1484 = vmatpush.bf16.msrb.mxu3 %v2365_v35  ;;  %v2416_v8 = vld [vmem:[#allocation6 + $0x1e8] sm:$0xf] }
  0x9f   :  { %1522 = vmatpush.bf16.msra.mxu2 %v2277_v14  ;;  %v2697_v14 = vld [vmem:[#allocation6 + $0x194] sm:$0xf0] }
  0xa0   :  { %v2361_v16 = vor.u32 %v2697_v14, %v2360_v13  ;;  %v2418_v13 = vld [vmem:[#allocation6 + $0x200] sm:$0xf0] }
  0xa1   :  { %1495 = vmatpush.bf16.msra.mxu0 %v2249_v39  ;;  %v2737_v39 = vld [vmem:[#allocation6 + $0x2dc] sm:$0xf] }
  0xa2   :  { %v2541_v24 = vor.u32 %v2737_v39, %v2538_v21  ;;  %1456 = vmatpush.bf16.msrb.mxu1 %v2361_v16  ;;  %v2704_v39 = vld [vmem:[#allocation6 + $0x1cc] sm:$0xf0]  ;;  %v2701_v21 = vld [vmem:[#allocation6 + $0x1bc] sm:$0xf] }
  0xa3   :  { %1523 = vmatpush.bf16.msra.mxu2 %v2253_v25 }
  0xa4   :  { %1533 = vmatpush.bf16.msra.mxu3 %v2541_v24  ;;  %v2394_v24 = vld [vmem:[#allocation6 + $0x1d0] sm:$0xf0] }
  0xa5   :  { %1496 = vmatpush.bf16.msra.mxu0 %v2225_v34  ;;  %v2397_v26 = vor.u32 %v2701_v21, %v2394_v24 }
  0xa6   :  { %1505 = vmatpush.bf16.msra.mxu1 %v2537_v20  ;;  %v2392_v20 = vld [vmem:[#allocation6 + $0x1b8] sm:$0xf] }
  0xa7   :  { %1524 = vmatpush.bf16.msra.mxu2 %v2229_v37  ;;  %v2488_v37 = vld [vmem:[#allocation6 + $0x278] sm:$0xf] }
  0xa8   :  { %1534 = vmatpush.bf16.msra.mxu3 %v2517_v31  ;;  %v2489_v42 = vor.u32 %v2728_v38, %v2488_v37  ;;  %v2678_v31 = vld [vmem:[#allocation6 + $0x104] sm:$0xf]  ;;  %v2698_v37 = vld [vmem:[#allocation6 + $0x19c] sm:$0xf0]  ;;  %v2695_v38 = vld [vmem:[#allocation6 + $0x18c] sm:$0xf] }
  0xa9   :  { %1497 = vmatpush.bf16.msra.mxu0 %v2201_v51  ;;  %v2719_v51 = vld [vmem:[#allocation6 + $0x24c] sm:$0xf] }
  0xaa   :  { %1506 = vmatpush.bf16.msra.mxu1 %v2513_v29 }
  0xab   :  { %1525 = vmatpush.bf16.msra.mxu2 %v2205_v53  ;;  %v2466_v53 = vld [vmem:[#allocation6 + $0x260] sm:$0xf0] }
  0xac   :  { %1535 = vmatpush.bf16.msra.mxu3 %v2493_v46  ;;  %v2469_v55 = vor.u32 %v2719_v51, %v2466_v53  ;;  %v2675_v46 = vld [vmem:[#allocation6 + $0xe4] sm:$0xf0]  ;;  %v2669_v53 = vld [vmem:[#allocation6 + $0xb4] sm:$0xf0] }
  0xad   :  { %v680_v44 = vpop.f32.mrf.mxu0  ;;  %1498 = vmatpush.bf16.msra.mxu0 %v2177_v0 }
  0xae   :  { %v694_v50 = vpop.f32.mrf.mxu1  ;;  %v681_v58 = vadd.f32 %v680_v44, %v187_v49  ;;  %1507 = vmatpush.bf16.msra.mxu1 %v2489_v42 }
  0xaf   :  { %1526 = vmatpush.bf16.msra.mxu2 %v2181_v2  ;;  %v2693_v2 = vld [vmem:[#allocation6 + $0x174] sm:$0xf0] }
  0xb0   :  { %v695_v10 = vadd.f32 %v694_v50, %v681_v58  ;;  %v2722_v50 = vld [vmem:[#allocation6 + $0x25c] sm:$0xf0]  ;;  %1536 = vmatpush.bf16.msra.mxu3 %v2469_v55  ;;  %v2258_v55 = vld [vmem:[#allocation6 + $0xb8] sm:$0xf0] }
  0xb1   :  { %v2352_v58 = vld [vmem:[#allocation6 + $0x160] sm:$0xf] }
  0xb2   :  { %v2353_v16 = vor.u32 %v2693_v2, %v2352_v58 }
  0xb4   :  { %1537 = vmatpush.bf16.msra.mxu3 %v2445_v3 }
  0xb5   :  { %v708_v7 = vpop.f32.mrf.mxu2  ;;  %v682_v12 = vpop.f32.mrf.mxu0 }
  0xb6   :  { %v696_v11 = vpop.f32.mrf.mxu1  ;;  %v722_v19 = vpop.f32.mrf.mxu3  ;;  %v683_v22 = vadd.f32 %v682_v12, %v187_v49  ;;  %v709_v25 = vadd.f32 %v708_v7, %v695_v10  ;;  %v2464_v49 = vld [vmem:[#allocation6 + $0x248] sm:$0xf]  ;;  %v2707_v10 = vld [vmem:[#allocation6 + $0x1ec] sm:$0xf]  ;;  %v2417_v12 = vor.u32 %v2710_v9, %v2416_v8  ;;  %v2657_v8 = vld [vmem:[#allocation6 + $0x54] sm:$0xf0] }
  0xb7   :  { %v2465_v52 = vor.u32 %v2722_v50, %v2464_v49  ;;  %v188_v49 = vperm.slane %v2961_v33, 1  ;;  %v2234_v33 = vld [vmem:[#allocation6 + $0x88] sm:$0xf0]  ;;  %v2654_v9 = vld [vmem:[#allocation6 + $0x44] sm:$0xf] }
  0xb8   :  { %v697_v32 = vadd.f32 %v696_v11, %v683_v22  ;;  %v723_v34 = vadd.f32 %v722_v19, %v709_v25  ;;  %v2421_v11 = vor.u32 %v2707_v10, %v2418_v13  ;;  %v2330_v19 = vld [vmem:[#allocation6 + $0x148] sm:$0xf0]  ;;  %v2393_v22 = vor.u32 %v2704_v39, %v2392_v20  ;;  %v2304_v25 = vld [vmem:[#allocation6 + $0x100] sm:$0xf]  ;;  %v2210_v10 = vld [vmem:[#allocation6 + $0x58] sm:$0xf0] }
  0xb9   :  { %1508 = vmatpush.bf16.msra.mxu1 %v2465_v52  ;;  %v2333_v29 = vor.u32 %v2684_v23, %v2330_v19  ;;  %v2305_v43 = vor.u32 %v2681_v30, %v2304_v25  ;;  %v2256_v52 = vld [vmem:[#allocation6 + $0xa0] sm:$0xf]  ;;  %v2651_v19 = vld [vmem:[#allocation6 + $0x24] sm:$0xf0]  ;;  %v2648_v20 = vld [vmem:[#allocation6 + $0x14] sm:$0xf] }
  0xba   :  { %1538 = vmatpush.bf16.msra.mxu3 %v2421_v11  ;;  %v2209_v11 = vor.u32 %v2657_v8, %v2208_v6  ;;  %v2186_v39 = vld [vmem:[#allocation6 + $0x28] sm:$0xf0]  ;;  %v2400_v8 = vld [vmem:[#allocation6 + $0x1c0] sm:$0xf] }
  0xbb   :  { %v2189_v25 = vor.u32 %v2648_v20, %v2186_v39 }
  0xbd   :  { %v710_v36 = vpop.f32.mrf.mxu2  ;;  %1509 = vmatpush.bf16.msra.mxu1 %v2441_v62 }
  0xbe   :  { %v711_v45 = vadd.f32 %v710_v36, %v697_v32  ;;  %v724_v48 = vpop.f32.mrf.mxu3  ;;  %v2306_v32 = vld [vmem:[#allocation6 + $0x118] sm:$0xf0]  ;;  %1539 = vmatpush.bf16.msra.mxu3 %v2397_v26  ;;  %v2368_v36 = vld [vmem:[#allocation6 + $0x188] sm:$0xf] }
  0xbf   :  { %v2369_v40 = vor.u32 %v2698_v37, %v2368_v36  ;;  %v2738_v36 = vld [vmem:[#allocation6 + $0x2e4] sm:$0xf]  ;;  %v2546_v37 = vld [vmem:[#allocation6 + $0x2f8] sm:$0xf0] }
  0xc0   :  { %v725_v54 = vadd.f32 %v724_v48, %v711_v45  ;;  %v2280_v45 = vld [vmem:[#allocation6 + $0xd0] sm:$0xf]  ;;  %v2282_v48 = vld [vmem:[#allocation6 + $0xe8] sm:$0xf0] }
  0xc1   :  { %1510 = vmatpush.bf16.msra.mxu1 %v2417_v12  ;;  %v2281_v50 = vor.u32 %v2675_v46, %v2280_v45  ;;  %v2735_v45 = vld [vmem:[#allocation6 + $0x2c4] sm:$0xf0]  ;;  %v2732_v46 = vld [vmem:[#allocation6 + $0x2b4] sm:$0xf] }
  0xc5   :  { %1511 = vmatpush.bf16.msra.mxu1 %v2393_v22 }
  0xc9   :  { %1512 = vmatpush.bf16.msra.mxu1 %v2369_v40 }
  0xcd   :  { %v736_v41 = vpop.f32.mrf.mxu0 }
  0xce   :  { %v750_v44 = vpop.f32.mrf.mxu1  ;;  %v737_v47 = vadd.f32 %v736_v41, %v723_v34  ;;  %v2370_v41 = vld [vmem:[#allocation6 + $0x1a0] sm:$0xf0] }
  0xcf   :  { %v2373_v42 = vor.u32 %v2695_v38, %v2370_v41 }
  0xd0   :  { %v751_v56 = vadd.f32 %v750_v44, %v737_v47  ;;  %v2309_v44 = vor.u32 %v2678_v31, %v2306_v32  ;;  %v2672_v47 = vld [vmem:[#allocation6 + $0xd4] sm:$0xf]  ;;  %v2544_v31 = vld [vmem:[#allocation6 + $0x2e0] sm:$0xf] }
  0xd1   :  { %1540 = vmatpush.bf16.msra.mxu3 %v2373_v42  ;;  %v2285_v51 = vor.u32 %v2672_v47, %v2282_v48  ;;  %v2549_v42 = vor.u32 %v2738_v36, %v2546_v37  ;;  %v2522_v47 = vld [vmem:[#allocation6 + $0x2c8] sm:$0xf0] }
  0xd2   :  { %v839_v5 = vmax.f32 %v751_v56, 0.0 }
  0xd5   :  { %v738_v61 = vpop.f32.mrf.mxu0  ;;  %v764_v27 = vpop.f32.mrf.mxu2 }
  0xd6   :  { %v739_v0 = vadd.f32 %v738_v61, %v725_v54  ;;  %v752_v1 = vpop.f32.mrf.mxu1  ;;  %v778_v34 = vpop.f32.mrf.mxu3  ;;  %v2666_v54 = vld [vmem:[#allocation6 + $0xa4] sm:$0xf]  ;;  %v765_v57 = vadd.f32 %v764_v27, %v188_v49  ;;  %v2257_v61 = vor.u32 %v2669_v53, %v2256_v52  ;;  %v2498_v53 = vld [vmem:[#allocation6 + $0x298] sm:$0xf0] }
  0xd7   :  { %v2261_v62 = vor.u32 %v2666_v54, %v2258_v55  ;;  %v2726_v52 = vld [vmem:[#allocation6 + $0x284] sm:$0xf]  ;;  %v2472_v55 = vld [vmem:[#allocation6 + $0x250] sm:$0xf] }
  0xd8   :  { %v753_v7 = vadd.f32 %v752_v1, %v739_v0  ;;  %v2663_v0 = vld [vmem:[#allocation6 + $0x84] sm:$0xf0]  ;;  %v2660_v1 = vld [vmem:[#allocation6 + $0x74] sm:$0xf]  ;;  %v779_v2 = vadd.f32 %v778_v34, %v765_v57  ;;  %v2741_v34 = vld [vmem:[#allocation6 + $0x2f4] sm:$0xf0]  ;;  %v2501_v54 = vor.u32 %v2726_v52, %v2498_v53 }
  0xd9   :  { %v2237_v4 = vor.u32 %v2660_v1, %v2234_v33  ;;  %v2545_v41 = vor.u32 %v2741_v34, %v2544_v31  ;;  %v2720_v57 = vld [vmem:[#allocation6 + $0x254] sm:$0xf]  ;;  %v2450_v1 = vld [vmem:[#allocation6 + $0x238] sm:$0xf0]  ;;  %v2756_v53 = vld [vmem:[%s3150_s0 + $0x8] sm:$0xff] }
  0xda   :  { %v841_v14 = vmax.f32 %v753_v7, 0.0  ;;  %v2976_v31 = vld [vmem:[%s3154_s4] sm:$0x3f] }
  0xdb   :  { %v943_v37 = vperm.slane %v2976_v31, 0 }
  0xdc   :  { %v2964_v35 = vpack.c.bf16 %v841_v14, %v839_v5  ;;  %v2233_v5 = vor.u32 %v2663_v0, %v2232_v63  ;;  %v2717_v63 = vld [vmem:[#allocation6 + $0x234] sm:$0xf0]  ;;  %v2714_v0 = vld [vmem:[#allocation6 + $0x224] sm:$0xf] }
  0xdd   :  { %v766_v56 = vpop.f32.mrf.mxu2 }
  0xde   :  { %1443 = vmatmul.bf16.vlgmr.msrb.gmra.mxu0 %v2964_v35  ;;  %1471 = vmatmul.bf16.vlgmr.msrb.gmra.mxu2 %v2964_v35  ;;  %v780_v59 = vpop.f32.mrf.mxu3  ;;  %v767_v3 = vadd.f32 %v766_v56, %v188_v49  ;;  %v2525_v49 = vor.u32 %v2732_v46, %v2522_v47  ;;  %v2723_v56 = vld [vmem:[#allocation6 + $0x264] sm:$0xf0]  ;;  %v947_v46 = vperm.slane %v2976_v31, 4 }
  0xdf   :  { %1547 = vmatpush.bf16.msrb.mxu0 %v2353_v16  ;;  %1575 = vmatpush.bf16.msrb.mxu2 %v2357_v17  ;;  %v2213_v16 = vor.u32 %v2654_v9, %v2210_v10  ;;  %v2184_v17 = vld [vmem:[#allocation6 + $0x10] sm:$0xf]  ;;  %v2705_v9 = vld [vmem:[#allocation6 + $0x1d4] sm:$0xf0]  ;;  %v2702_v10 = vld [vmem:[#allocation6 + $0x1c4] sm:$0xf] }
  0xe0   :  { %v781_v13 = vadd.f32 %v780_v59, %v767_v3  ;;  %v2185_v24 = vor.u32 %v2651_v19, %v2184_v17  ;;  %v2474_v59 = vld [vmem:[#allocation6 + $0x268] sm:$0xf0]  ;;  %v2711_v3 = vld [vmem:[#allocation6 + $0x204] sm:$0xf0] }
  0xe1   :  { %v2378_v17 = vld [vmem:[#allocation6 + $0x1a8] sm:$0xf0] }
  0xe3   :  { %1548 = vmatpush.bf16.msrb.mxu0 %v2329_v28  ;;  %1576 = vmatpush.bf16.msrb.mxu2 %v2333_v29 }
  0xe7   :  { %1549 = vmatpush.bf16.msrb.mxu0 %v2305_v43  ;;  %1577 = vmatpush.bf16.msrb.mxu2 %v2309_v44  ;;  %v2520_v43 = vld [vmem:[#allocation6 + $0x2b0] sm:$0xf] }
  0xe8   :  { %v2521_v48 = vor.u32 %v2735_v45, %v2520_v43 }
  0xeb   :  { %1550 = vmatpush.bf16.msrb.mxu0 %v2281_v50  ;;  %1578 = vmatpush.bf16.msrb.mxu2 %v2285_v51  ;;  %v2496_v50 = vld [vmem:[#allocation6 + $0x280] sm:$0xf]  ;;  %v2729_v51 = vld [vmem:[#allocation6 + $0x294] sm:$0xf0] }
  0xed   :  { %v792_v60 = vpop.f32.mrf.mxu0 }
  0xee   :  { %v806_v58 = vpop.f32.mrf.mxu1  ;;  %1499 = vmatmul.bf16.vlgmr.msra.gmra.mxu0 %v2964_v35  ;;  %1527 = vmatmul.bf16.vlgmr.msra.gmra.mxu2 %v2964_v35  ;;  %v793_v7 = vadd.f32 %v792_v60, %v779_v2  ;;  %v2473_v60 = vor.u32 %v2723_v56, %v2472_v55  ;;  %v2424_v2 = vld [vmem:[#allocation6 + $0x1f0] sm:$0xf]  ;;  %v948_v55 = vperm.slane %v2976_v31, 5 }
  0xef   :  { %1551 = vmatpush.bf16.msrb.mxu0 %v2257_v61  ;;  %1579 = vmatpush.bf16.msrb.mxu2 %v2261_v62  ;;  %v2477_v61 = vor.u32 %v2720_v57, %v2474_v59  ;;  %v2448_v62 = vld [vmem:[#allocation6 + $0x220] sm:$0xf]  ;;  %v2425_v6 = vor.u32 %v2711_v3, %v2424_v2 }
  0xf0   :  { %v807_v18 = vadd.f32 %v806_v58, %v793_v7  ;;  %v2449_v33 = vor.u32 %v2717_v63, %v2448_v62  ;;  %v2453_v58 = vor.u32 %v2714_v0, %v2450_v1  ;;  %v2758_v62 = vld [vmem:[%s3150_s0 + $0x10] sm:$0xff] }
  0xf3   :  { %1552 = vmatpush.bf16.msrb.mxu0 %v2233_v5  ;;  %1580 = vmatpush.bf16.msrb.mxu2 %v2237_v4  ;;  %v2708_v5 = vld [vmem:[#allocation6 + $0x1f4] sm:$0xf]  ;;  %v2426_v4 = vld [vmem:[#allocation6 + $0x208] sm:$0xf0] }
  0xf4   :  { %v2429_v7 = vor.u32 %v2708_v5, %v2426_v4  ;;  %v2759_v5 = vld [vmem:[%s3150_s0 + $0x18] sm:$0xff] }
  0xf5   :  { %v820_v12 = vpop.f32.mrf.mxu2  ;;  %v794_v15 = vpop.f32.mrf.mxu0 }
  0xf6   :  { %v834_v14 = vpop.f32.mrf.mxu3  ;;  %v795_v23 = vadd.f32 %v794_v15, %v781_v13  ;;  %v821_v21 = vadd.f32 %v820_v12, %v807_v18  ;;  %v808_v22 = vpop.f32.mrf.mxu1  ;;  %v2402_v12 = vld [vmem:[#allocation6 + $0x1d8] sm:$0xf0]  ;;  %v2401_v13 = vor.u32 %v2705_v9, %v2400_v8  ;;  %v2376_v15 = vld [vmem:[#allocation6 + $0x190] sm:$0xf] }
  0xf7   :  { %1553 = vmatpush.bf16.msrb.mxu0 %v2209_v11  ;;  %1581 = vmatpush.bf16.msrb.mxu2 %v2213_v16  ;;  %v2699_v11 = vld [vmem:[#allocation6 + $0x1a4] sm:$0xf0]  ;;  %v2696_v16 = vld [vmem:[#allocation6 + $0x194] sm:$0xf] }
  0xf8   :  { %v809_v26 = vadd.f32 %v808_v22, %v795_v23  ;;  %v835_v28 = vadd.f32 %v834_v14, %v821_v21  ;;  %v2405_v14 = vor.u32 %v2702_v10, %v2402_v12  ;;  %v2377_v18 = vor.u32 %v2699_v11, %v2376_v15  ;;  %v2760_v12 = vld [vmem:[%s3150_s0 + $0x20] sm:$0xff]  ;;  %v2761_v11 = vld [vmem:[%s3150_s0 + $0x38] sm:$0xff] }
  0xf9   :  { %v2381_v23 = vor.u32 %v2696_v16, %v2378_v17 }
  0xfa   :  { %v840_v38 = vmax.f32 %v835_v28, 0.0 }
  0xfb   :  { %1554 = vmatpush.bf16.msrb.mxu0 %v2185_v24  ;;  %1582 = vmatpush.bf16.msrb.mxu2 %v2189_v25 }
  0xfd   :  { %v822_v27 = vpop.f32.mrf.mxu2 }
  0xfe   :  { %v823_v29 = vadd.f32 %v822_v27, %v809_v26  ;;  %v836_v30 = vpop.f32.mrf.mxu3  ;;  %1555 = vmatmul.bf16.vlgmr.msrb.gmra.mxu0 %v2964_v35  ;;  %1583 = vmatmul.bf16.vlgmr.msrb.gmra.mxu2 %v2964_v35  ;;  %v2497_v35 = vor.u32 %v2729_v51, %v2496_v50 }
 0x100   :  { %v837_v32 = vadd.f32 %v836_v30, %v823_v29 }
 0x102   :  { %v842_v40 = vmax.f32 %v837_v32, 0.0  ;;  %v944_v32 = vperm.slane %v2976_v31, 1 }
 0x104   :  { %v844_v44 = vpack.c.bf16 %v842_v40, %v840_v38  ;;  %v945_v38 = vperm.slane %v2976_v31, 2 }
 0x106   :  { %1457 = vmatmul.bf16.vlgmr.msrb.gmra.mxu1 %v844_v44  ;;  %1485 = vmatmul.bf16.vlgmr.msrb.gmra.mxu3 %v844_v44 }
 0x107   :  { %1561 = vmatpush.bf16.msrb.mxu1 %v2545_v41  ;;  %1589 = vmatpush.bf16.msrb.mxu3 %v2549_v42  ;;  %v946_v42 = vperm.slane %v2976_v31, 3 }
 0x10b   :  { %1562 = vmatpush.bf16.msrb.mxu1 %v2521_v48  ;;  %1590 = vmatpush.bf16.msrb.mxu3 %v2525_v49 }
 0x10f   :  { %1563 = vmatpush.bf16.msrb.mxu1 %v2497_v35  ;;  %1591 = vmatpush.bf16.msrb.mxu3 %v2501_v54 }
 0x113   :  { %1564 = vmatpush.bf16.msrb.mxu1 %v2473_v60  ;;  %1592 = vmatpush.bf16.msrb.mxu3 %v2477_v61  ;;  %v2757_v60 = vld [vmem:[%s3150_s0] sm:$0xff] }
 0x116   :  { %1513 = vmatmul.bf16.vlgmr.msra.gmra.mxu1 %v844_v44  ;;  %1541 = vmatmul.bf16.vlgmr.msra.gmra.mxu3 %v844_v44 }
 0x117   :  { %1565 = vmatpush.bf16.msrb.mxu1 %v2449_v33  ;;  %1593 = vmatpush.bf16.msrb.mxu3 %v2453_v58 }
 0x11b   :  { %1566 = vmatpush.bf16.msrb.mxu1 %v2425_v6  ;;  %1594 = vmatpush.bf16.msrb.mxu3 %v2429_v7 }
 0x11f   :  { %1567 = vmatpush.bf16.msrb.mxu1 %v2401_v13  ;;  %1595 = vmatpush.bf16.msrb.mxu3 %v2405_v14 }
 0x123   :  { %1568 = vmatpush.bf16.msrb.mxu1 %v2377_v18  ;;  %1596 = vmatpush.bf16.msrb.mxu3 %v2381_v23 }
 0x126   :  { %1569 = vmatmul.bf16.vlgmr.msrb.gmra.mxu1 %v844_v44  ;;  %1597 = vmatmul.bf16.vlgmr.msrb.gmra.mxu3 %v844_v44 }
 0x15b   :  { %v1444_v19 = vpop.f32.mrf.mxu0 }
 0x15c   :  { %v1445_v44 = vadd.f32 %v1444_v19, %v943_v37  ;;  %v2762_v19 = vld [vmem:[%s3150_s0 + $0x30] sm:$0xff] }
 0x161   :  { %v1472_v20 = vpop.f32.mrf.mxu2 }
 0x162   :  { %v1473_v41 = vadd.f32 %v1472_v20, %v944_v32 }
 0x163   :  { %v1446_v39 = vpop.f32.mrf.mxu0 }
 0x164   :  { %v1447_v1 = vadd.f32 %v1446_v39, %v943_v37  ;;  %v2766_v37 = vld [vmem:[%s3150_s0 + $0x50] sm:$0xff] }
 0x169   :  { %v1474_v22 = vpop.f32.mrf.mxu2 }
 0x16a   :  { %v1475_v59 = vadd.f32 %v1474_v22, %v944_v32 }
 0x16b   :  { %v1500_v24 = vpop.f32.mrf.mxu0 }
 0x16c   :  { %v1501_v45 = vadd.f32 %v1500_v24, %v945_v38 }
 0x171   :  { %v1528_v27 = vpop.f32.mrf.mxu2 }
 0x172   :  { %v1529_v48 = vadd.f32 %v1528_v27, %v946_v42 }
 0x173   :  { %v1502_v29 = vpop.f32.mrf.mxu0 }
 0x174   :  { %v1503_v33 = vadd.f32 %v1502_v29, %v945_v38 }
 0x179   :  { %v1530_v34 = vpop.f32.mrf.mxu2 }
 0x17a   :  { %v1531_v6 = vadd.f32 %v1530_v34, %v946_v42 }
 0x17b   :  { %v1556_v43 = vpop.f32.mrf.mxu0 }
 0x17c   :  { %v1557_v52 = vadd.f32 %v1556_v43, %v947_v46  ;;  %v2767_v43 = vld [vmem:[%s3150_s0 + $0x58] sm:$0xff] }
 0x181   :  { %v1584_v56 = vpop.f32.mrf.mxu2 }
 0x182   :  { %v1585_v8 = vadd.f32 %v1584_v56, %v948_v55 }
 0x183   :  { %v1458_v21 = vpop.f32.mrf.mxu1  ;;  %v1558_v58 = vpop.f32.mrf.mxu0 }
 0x184   :  { %v1459_v49 = vadd.f32 %v1458_v21, %v1445_v44  ;;  %v1559_v14 = vadd.f32 %v1558_v58, %v947_v46  ;;  %v2763_v21 = vld [vmem:[%s3150_s0 + $0x40] sm:$0xff] }
 0x186   :  { %v2992_v61 = vadd.f32 %v2757_v60, %v1459_v49 }
 0x189   :  { %v1486_v25 = vpop.f32.mrf.mxu3 }
 0x18a   :  { %v1487_v47 = vadd.f32 %v1486_v25, %v1473_v41  ;;  %v2764_v25 = vld [vmem:[%s3150_s0 + $0x28] sm:$0xff] }
 0x18b   :  { %v1460_v26 = vpop.f32.mrf.mxu1 }
 0x18c   :  { %v2986_v35 = vadd.f32 %v2756_v53, %v1487_v47  ;;  %v1461_v7 = vadd.f32 %v1460_v26, %v1447_v1  ;;  %v2851_v47 = vmov 768.0  }
 0x18d   :  { %2750 = vrcp.f32 %v2851_v47 }
 0x18e   :  { %v1617_v2 = vadd.f32 %v2986_v35, %v2992_v61  ;;  %v1609_v20 = vadd.f32 %v2762_v19, %v1461_v7 }
 0x191   :  { %v1488_v28 = vpop.f32.mrf.mxu3 }
 0x192   :  { %v1489_v3 = vadd.f32 %v1488_v28, %v1475_v59  ;;  %v1586_v28 = vpop.f32.mrf.mxu2 }
 0x193   :  { %v1514_v30 = vpop.f32.mrf.mxu1  ;;  %v1587_v34 = vadd.f32 %v1586_v28, %v948_v55 }
 0x194   :  { %v1515_v50 = vadd.f32 %v1514_v30, %v1501_v45  ;;  %v1610_v16 = vadd.f32 %v2761_v11, %v1489_v3  ;;  %v2765_v30 = vld [vmem:[%s3150_s0 + $0x48] sm:$0xff] }
 0x196   :  { %v2997_v63 = vadd.f32 %v2758_v62, %v1515_v50  ;;  %v1624_v29 = vadd.f32 %v1610_v16, %v1609_v20 }
 0x198   :  { %v1618_v9 = vadd.f32 %v1617_v2, %v2997_v63 }
 0x199   :  { %v1542_v36 = vpop.f32.mrf.mxu3 }
 0x19a   :  { %v1543_v54 = vadd.f32 %v1542_v36, %v1529_v48  ;;  %v2751_v48 = vpop.eup %2750 }
 0x19b   :  { %v1516_v40 = vpop.f32.mrf.mxu1  ;;  %v1632_v49 = vmul.f32 768.0, %v2751_v48  ;;  %vm1636_vm0 = vweird.f32 %v2751_v48 }
 0x19c   :  { %v1606_v4 = vadd.f32 %v2759_v5, %v1543_v54  ;;  %v1517_v10 = vadd.f32 %v1516_v40, %v1503_v33 }
 0x19d   :  { %v1633_v50 = vsub.f32 1.0, %v1632_v49 }
 0x19e   :  { %v1619_v23 = vadd.f32 %v1618_v9, %v1606_v4  ;;  %v1611_v22 = vadd.f32 %v2763_v21, %v1517_v10 }
 0x1a0   :  { %v1625_v36 = vadd.f32 %v1624_v29, %v1611_v22 }
 0x1a1   :  { %v1544_v51 = vpop.f32.mrf.mxu3 }
 0x1a2   :  { %v1545_v17 = vadd.f32 %v1544_v51, %v1531_v6  ;;  %v1634_v51 = vmul.f32 %v2751_v48, %v1633_v50 }
 0x1a3   :  { %v1570_v57 = vpop.f32.mrf.mxu1 }
 0x1a4   :  { %v1571_v0 = vadd.f32 %v1570_v57, %v1557_v52  ;;  %v1612_v31 = vadd.f32 %v2765_v30, %v1545_v17  ;;  %v1635_v52 = vadd.f32 %v2751_v48, %v1634_v51 }
 0x1a6   :  { %v1607_v13 = vadd.f32 %v2760_v12, %v1571_v0  ;;  %v1626_v41 = vadd.f32 %v1625_v36, %v1612_v31  ;;  %v1637_v53 = vsel %vm1636_vm0, %v2751_v48, %v1635_v52  ;;  %v3083_v36 = vld [vmem:[%s3155_s5] sm:$0x3f] }
 0x1a7   :  { %v1720_v49 = vperm.slane %v3083_v36, 5 }
 0x1a8   :  { %v1620_v27 = vadd.f32 %v1619_v23, %v1607_v13 }
 0x1a9   :  { %v1598_v15 = vpop.f32.mrf.mxu3 }
 0x1aa   :  { %v1599_v18 = vadd.f32 %v1598_v15, %v1585_v8 }
 0x1ab   :  { %v1572_v39 = vpop.f32.mrf.mxu1 }
 0x1ac   :  { %v1573_v24 = vadd.f32 %v1572_v39, %v1559_v14  ;;  %v1608_v26 = vadd.f32 %v2764_v25, %v1599_v18 }
 0x1ae   :  { %v1621_v32 = vadd.f32 %v1620_v27, %v1608_v26  ;;  %v1613_v38 = vadd.f32 %v2766_v37, %v1573_v24 }
 0x1b0   :  { %1622 = vadd.xlane.f32.xlu0 %v1621_v32  ;;  %v1627_v45 = vadd.f32 %v1626_v41, %v1613_v38 }
 0x1b1   :  { %v1600_v40 = vpop.f32.mrf.mxu3 }
 0x1b2   :  { %v1601_v42 = vadd.f32 %v1600_v40, %v1587_v34 }
 0x1b4   :  { %v1614_v44 = vadd.f32 %v2767_v43, %v1601_v42  ;;  %v1715_v42 = vperm.slane %v3083_v36, 0  ;;  %v1716_v43 = vperm.slane %v3083_v36, 1 }
 0x1b6   :  { %v1628_v46 = vadd.f32 %v1627_v45, %v1614_v44  ;;  %v1718_v45 = vperm.slane %v3083_v36, 3 }
 0x1b8   :  { %1629 = vadd.xlane.f32.xlu0 %v1628_v46  ;;  %v1719_v46 = vperm.slane %v3083_v36, 4 }
 0x223   :  { %v1623_v54 = vpop.xlane.xlu0 %1622 }
 0x224   :  { %v1638_v55 = vmul.f32 %v1637_v53, %v1623_v54 }
 0x226   :  { %v3030_v56 = vsub.f32 %v2992_v61, %v1638_v55  ;;  %v3033_v57 = vsub.f32 %v2986_v35, %v1638_v55  ;;  %v3036_v59 = vsub.f32 %v2997_v63, %v1638_v55  ;;  %v3038_v60 = vsub.f32 %v1606_v4, %v1638_v55 }
 0x227   :  { %v3044_v1 = vsub.f32 %v1607_v13, %v1638_v55  ;;  %v3048_v35 = vsub.f32 %v1608_v26, %v1638_v55 }
 0x228   :  { %v1652_v62 = vmul.f32 %v3030_v56, %v3030_v56  ;;  %v1653_v0 = vmul.f32 %v3033_v57, %v3033_v57  ;;  %v1654_v61 = vmul.f32 %v3036_v59, %v3036_v59  ;;  %v1655_v63 = vmul.f32 %v3038_v60, %v3038_v60 }
 0x229   :  { %v1656_v5 = vmul.f32 %v3044_v1, %v3044_v1  ;;  %v1657_v9 = vmul.f32 %v3048_v35, %v3048_v35 }
 0x22a   :  { %v1664_v33 = vadd.f32 %v1653_v0, %v1652_v62 }
 0x22b   :  { %v1630_v58 = vpop.xlane.xlu0 %1629 }
 0x22c   :  { %v1639_v2 = vmul.f32 %v1637_v53, %v1630_v58  ;;  %v1665_v3 = vadd.f32 %v1664_v33, %v1654_v61 }
 0x22e   :  { %v1666_v4 = vadd.f32 %v1665_v3, %v1655_v63  ;;  %v3054_v6 = vsub.f32 %v1609_v20, %v1639_v2  ;;  %v3056_v7 = vsub.f32 %v1610_v16, %v1639_v2  ;;  %v3058_v8 = vsub.f32 %v1611_v22, %v1639_v2 }
 0x22f   :  { %v3062_v12 = vsub.f32 %v1612_v31, %v1639_v2  ;;  %v3068_v11 = vsub.f32 %v1613_v38, %v1639_v2  ;;  %v3072_v18 = vsub.f32 %v1614_v44, %v1639_v2  ;;  %v3088_v38 = vld [vmem:[%s3156_s6] sm:$0x3f]  ;;  %v1717_v44 = vperm.slane %v3083_v36, 2 }
 0x230   :  { %v1667_v10 = vadd.f32 %v1666_v4, %v1656_v5  ;;  %v1658_v13 = vmul.f32 %v3054_v6, %v3054_v6  ;;  %v1659_v14 = vmul.f32 %v3056_v7, %v3056_v7  ;;  %v1660_v16 = vmul.f32 %v3058_v8, %v3058_v8 }
 0x231   :  { %v1661_v23 = vmul.f32 %v3062_v12, %v3062_v12  ;;  %v1662_v20 = vmul.f32 %v3068_v11, %v3068_v11  ;;  %v1663_v21 = vmul.f32 %v3072_v18, %v3072_v18  ;;  %v1740_v50 = vperm.slane %v3088_v38, 0 }
 0x232   :  { %v1668_v15 = vadd.f32 %v1667_v10, %v1657_v9  ;;  %v1671_v17 = vadd.f32 %v1659_v14, %v1658_v13  ;;  %v1741_v51 = vperm.slane %v3088_v38, 1  ;;  %v1742_v52 = vperm.slane %v3088_v38, 2 }
 0x233   :  { %v1744_v54 = vperm.slane %v3088_v38, 4  ;;  %v1745_v2 = vperm.slane %v3088_v38, 5 }
 0x234   :  { %1669 = vadd.xlane.f32.xlu1 %v1668_v15  ;;  %v1672_v19 = vadd.f32 %v1671_v17, %v1660_v16 }
 0x236   :  { %v1673_v39 = vadd.f32 %v1672_v19, %v1661_v23 }
 0x238   :  { %v1674_v22 = vadd.f32 %v1673_v39, %v1662_v20 }
 0x23a   :  { %v1675_v24 = vadd.f32 %v1674_v22, %v1663_v21 }
 0x23c   :  { %1676 = vadd.xlane.f32.xlu1 %v1675_v24 }
 0x2a7   :  { %v1670_v25 = vpop.xlane.xlu1 %1669 }
 0x2a8   :  { %v1678_v26 = vmul.f32 %v1670_v25, %v1637_v53 }
 0x2aa   :  { %v1680_v27 = vadd.f32 1e-05, %v1678_v26 }
 0x2ac   :  { %2752 = vrsqrt.f32 %v1680_v27  ;;  %vm1688_vm2 = vweird.f32 %v1680_v27 }
 0x2af   :  { %v1677_v28 = vpop.xlane.xlu1 %1676 }
 0x2b0   :  { %v1679_v29 = vmul.f32 %v1677_v28, %v1637_v53  ;;  %v1743_v53 = vperm.slane %v3088_v38, 3 }
 0x2b2   :  { %v2753_v30 = vpop.eup %2752  ;;  %v1681_v31 = vadd.f32 1e-05, %v1679_v29 }
 0x2b3   :  { %v1683_v32 = vmul.f32 %v2753_v30, %v1680_v27  ;;  %vm1689_vm1 = vweird.f32 %v2753_v30 }
 0x2b4   :  { %2754 = vrsqrt.f32 %v1681_v31  ;;  %vm1690_vm3 = vmor %vm1688_vm2, %vm1689_vm1  ;;  %vm1698_vm5 = vweird.f32 %v1681_v31 }
 0x2b5   :  { %v1684_v34 = vmul.f32 %v2753_v30, %v1683_v32 }
 0x2b7   :  { %v1685_v37 = vmul.f32 0.5, %v1684_v34 }
 0x2b9   :  { %v1686_v40 = vsub.f32 1.5, %v1685_v37 }
 0x2ba   :  { %v2755_v41 = vpop.eup %2754 }
 0x2bb   :  { %v1687_v47 = vmul.f32 %v2753_v30, %v1686_v40  ;;  %v1693_v48 = vmul.f32 %v2755_v41, %v1681_v31  ;;  %vm1699_vm4 = vweird.f32 %v2755_v41 }
 0x2bc   :  { %vm1700_vm6 = vmor %vm1698_vm5, %vm1699_vm4 }
 0x2bd   :  { %v1691_v55 = vsel %vm1690_vm3, %v2753_v30, %v1687_v47  ;;  %v1694_v62 = vmul.f32 %v2755_v41, %v1693_v48 }
 0x2be   :  { %v1702_v0 = vmul.f32 %v1691_v55, %v3030_v56  ;;  %v1703_v61 = vmul.f32 %v1691_v55, %v3033_v57  ;;  %v1704_v33 = vmul.f32 %v1691_v55, %v3036_v59  ;;  %v1705_v58 = vmul.f32 %v1691_v55, %v3038_v60 }
 0x2bf   :  { %v1706_v63 = vmul.f32 %v1691_v55, %v3044_v1  ;;  %v1707_v3 = vmul.f32 %v1691_v55, %v3048_v35  ;;  %v1695_v5 = vmul.f32 0.5, %v1694_v62 }
 0x2c0   :  { %v1727_v4 = vmul.f32 %v1715_v42, %v1702_v0  ;;  %v1728_v9 = vmul.f32 %v1716_v43, %v1703_v61  ;;  %v1729_v10 = vmul.f32 %v1717_v44, %v1704_v33  ;;  %v1730_v13 = vmul.f32 %v1718_v45, %v1705_v58 }
 0x2c1   :  { %v1731_v14 = vmul.f32 %v1719_v46, %v1706_v63  ;;  %v1732_v15 = vmul.f32 %v1720_v49, %v1707_v3  ;;  %v1696_v56 = vsub.f32 1.5, %v1695_v5 }
 0x2c2   :  { %v1752_v57 = vadd.f32 %v1740_v50, %v1727_v4  ;;  %v1753_v16 = vadd.f32 %v1741_v51, %v1728_v9  ;;  %v1754_v59 = vadd.f32 %v1742_v52, %v1729_v10  ;;  %v1755_v17 = vadd.f32 %v1743_v53, %v1730_v13 }
 0x2c3   :  { %v1697_v60 = vmul.f32 %v2755_v41, %v1696_v56  ;;  %v1756_v23 = vadd.f32 %v1744_v54, %v1731_v14  ;;  %v1757_v1 = vadd.f32 %v1745_v2, %v1732_v15 }
 0x2c4   :  { %1764 = vst [vmem:[%s3157_s7] sm:$0xff] %v1752_v57 }
 0x2c5   :  { %1765 = vst [vmem:[%s3157_s7 + $0x8] sm:$0xff] %v1753_v16  ;;  %v1701_v35 = vsel %vm1700_vm6, %v2755_v41, %v1697_v60 }
 0x2c6   :  { %1766 = vst [vmem:[%s3157_s7 + $0x10] sm:$0xff] %v1754_v59  ;;  %v1708_v19 = vmul.f32 %v1701_v35, %v3054_v6  ;;  %v1709_v20 = vmul.f32 %v1701_v35, %v3056_v7  ;;  %v1710_v39 = vmul.f32 %v1701_v35, %v3058_v8  ;;  %v1711_v21 = vmul.f32 %v1701_v35, %v3062_v12 }
 0x2c7   :  { %1767 = vst [vmem:[%s3157_s7 + $0x18] sm:$0xff] %v1755_v17  ;;  %v1712_v22 = vmul.f32 %v1701_v35, %v3068_v11  ;;  %v1713_v24 = vmul.f32 %v1701_v35, %v3072_v18 }
 0x2c8   :  { %1768 = vst [vmem:[%s3157_s7 + $0x20] sm:$0xff] %v1756_v23  ;;  %v1733_v25 = vmul.f32 %v1715_v42, %v1708_v19  ;;  %v1734_v6 = vmul.f32 %v1716_v43, %v1709_v20  ;;  %v1735_v26 = vmul.f32 %v1717_v44, %v1710_v39  ;;  %v1736_v7 = vmul.f32 %v1718_v45, %v1711_v21 }
 0x2c9   :  { %1769 = vst [vmem:[%s3157_s7 + $0x28] sm:$0xff] %v1757_v1  ;;  %v1737_v8 = vmul.f32 %v1719_v46, %v1712_v22  ;;  %v1738_v12 = vmul.f32 %v1720_v49, %v1713_v24 }
 0x2ca   :  { %v1758_v27 = vadd.f32 %v1740_v50, %v1733_v25  ;;  %v1759_v28 = vadd.f32 %v1741_v51, %v1734_v6  ;;  %v1760_v29 = vadd.f32 %v1742_v52, %v1735_v26  ;;  %v1761_v11 = vadd.f32 %v1743_v53, %v1736_v7 }
 0x2cb   :  { %v1762_v30 = vadd.f32 %v1744_v54, %v1737_v8  ;;  %v1763_v18 = vadd.f32 %v1745_v2, %v1738_v12 }
 0x2cc   :  { %1770 = vst [vmem:[%s3157_s7 + $0x30] sm:$0xff] %v1758_v27 }
 0x2cd   :  { %1771 = vst [vmem:[%s3157_s7 + $0x38] sm:$0xff] %v1759_v28 }
 0x2ce   :  { %1772 = vst [vmem:[%s3157_s7 + $0x40] sm:$0xff] %v1760_v29 }
 0x2cf   :  { %1773 = vst [vmem:[%s3157_s7 + $0x48] sm:$0xff] %v1761_v11 }
 0x2d0   :  { %1774 = vst [vmem:[%s3157_s7 + $0x50] sm:$0xff] %v1762_v30 }
 0x2d1   :  { %1775 = vst [vmem:[%s3157_s7 + $0x58] sm:$0xff] %v1763_v18 }
 0x2d2   :  { %1780 = vsyncpa [#allocation3], 1 }
 0x2d3   :  { %1781 = vsyncpa [#allocation5], 1 }

// kernel: category_transformer_forward.31
= control target key start
LH: loop header
LB: loop body
LE: loop exit
PB: predicated region body
PF: predicated region fallthrough
CT: control target
= control target key end

     0   :  { %8 = vsyncpa [#allocation3], 0  ;;  %s294_s0 = inlined_call_operand.vmem [shape: f32[16,64], index: 0, kind: input, shape index: {}]   ;;  %s295_s1 = inlined_call_operand.hbm [shape: bf16[64,192], index: 1, kind: input, shape index: {}]   ;;  %s296_s2 = inlined_call_operand.hbm [shape: f32[1,192], index: 2, kind: input, shape index: {}]   ;;  %s297_s3 = inlined_call_operand.vmem [shape: f32[16,192], index: 3, kind: output, shape index: {}]  }
   0x1   :  { %s16_s14 = sshll.u32 %s295_s1, 4  ;;  %s17_s14 = int_to_ptr.hbm [resolvable:$true] %s16_s14 }
   0x2   :  { %9 = vsyncpa [#allocation5], 0  ;;  %s242_s15 = smov [#allocation2]   ;;  %s30_s19 = sshll.u32 %s296_s2, 4  ;;  %s31_s19 = int_to_ptr.hbm [resolvable:$true] %s30_s19 }
   0x3   :  { %s18_s16 = sshll.u32 %s242_s15, 4  ;;  %s243_s20 = smov 128   ;;  %s19_s16 = int_to_ptr.vmem [resolvable:$true] %s18_s16 }
   0x4   :  { %s244_s21 = smov 8   ;;  %s245_s22 = smov [#allocation4]  }
   0x5   :  { %24 = dma.hbm_to_vmem [thread:$0]  %s17_s14, 1024, %s19_s16, [#allocation3], %s243_s20, %s243_s20, %s244_s21  }
   0x6   :  { %s32_s23 = sshll.u32 %s245_s22, 4  ;;  %s33_s23 = int_to_ptr.vmem [resolvable:$true] %s32_s23 }
   0x7   :  { %35 = dma.hbm_to_vmem [thread:$0]  %s31_s19, 32, %s33_s23, [#allocation5]  }
   0x8   :  { %238 = dma.done.wait [#allocation3], 1024  }
   0x9   :  { %239 = vsyncadd [#allocation3], 4294966272 }
   0xa   :  { %240 = dma.done.wait [#allocation5], 32  }
   0xb   :  { %241 = vsyncadd [#allocation5], 4294967264  ;;  %v170_v0 = vld [vmem:[#allocation2 + $0x30] sm:$0xf]  ;;  %v185_v1 = vld [vmem:[#allocation2 + $0x34] sm:$0xf0] }
   0xc   :  { %v184_v2 = vld [vmem:[#allocation2 + $0x34] sm:$0xf]  ;;  %v171_v3 = vor.u32 %v185_v1, %v170_v0  ;;  %v172_v4 = vld [vmem:[#allocation2 + $0x38] sm:$0xf0]  ;;  %v162_v5 = vld [vmem:[#allocation2 + $0x20] sm:$0xf] }
   0xd   :  { %v183_v6 = vld [vmem:[#allocation2 + $0x24] sm:$0xf0]  ;;  %v175_v7 = vor.u32 %v184_v2, %v172_v4  ;;  %v182_v8 = vld [vmem:[#allocation2 + $0x24] sm:$0xf]  ;;  %v164_v9 = vld [vmem:[#allocation2 + $0x28] sm:$0xf0] }
   0xe   :  { %110 = vmatpush.bf16.msra.mxu0 %v171_v3  ;;  %v163_v10 = vor.u32 %v183_v6, %v162_v5  ;;  %v167_v11 = vor.u32 %v182_v8, %v164_v9  ;;  %v154_v12 = vld [vmem:[#allocation2 + $0x10] sm:$0xf]  ;;  %v181_v13 = vld [vmem:[#allocation2 + $0x14] sm:$0xf0]  ;;  %v180_v14 = vld [vmem:[#allocation2 + $0x14] sm:$0xf] }
   0xf   :  { %124 = vmatpush.bf16.msra.mxu1 %v175_v7  ;;  %v156_v15 = vld [vmem:[#allocation2 + $0x18] sm:$0xf0]  ;;  %v155_v16 = vor.u32 %v181_v13, %v154_v12  ;;  %v146_v18 = vld [vmem:[#allocation2] sm:$0xf]  ;;  %v179_v19 = vld [vmem:[#allocation2 + $0x4] sm:$0xf0] }
  0x10   :  { %v159_v17 = vor.u32 %v180_v14, %v156_v15  ;;  %v178_v20 = vld [vmem:[#allocation2 + $0x4] sm:$0xf]  ;;  %v148_v21 = vld [vmem:[#allocation2 + $0x8] sm:$0xf0]  ;;  %v147_v22 = vor.u32 %v179_v19, %v146_v18  ;;  %vm102_vm0 = vcmask 523264  }
  0x11   :  { %v45_v23 = vld [vmem:[%s294_s0] sm:$0xff]  ;;  %v46_v24 = vld [vmem:[%s294_s0 + $0x8] sm:$0xff]  ;;  %v151_v25 = vor.u32 %v178_v20, %v148_v21 }
  0x12   :  { %111 = vmatpush.bf16.msra.mxu0 %v163_v10  ;;  %v47_v26 = vpack.c.bf16 %v46_v24, %v45_v23  ;;  %v56_v27 = vld [vmem:[#allocation4] sm:$0x3] }
  0x13   :  { %125 = vmatpush.bf16.msra.mxu1 %v167_v11  ;;  %v58_v28 = vperm.slane %v56_v27, 0  ;;  %v59_v29 = vperm.slane %v56_v27, 1 }
  0x16   :  { %112 = vmatpush.bf16.msra.mxu0 %v155_v16 }
  0x17   :  { %126 = vmatpush.bf16.msra.mxu1 %v159_v17 }
  0x1a   :  { %113 = vmatpush.bf16.msra.mxu0 %v147_v22 }
  0x1b   :  { %127 = vmatpush.bf16.msra.mxu1 %v151_v25 }
  0x1d   :  { %176 = vmatmul.msk.bf16.vlgmr.msra.gmra.mxu0 %vm102_vm0, %v47_v26 }
  0x1e   :  { %177 = vmatmul.msk.bf16.vlgmr.msra.gmra.mxu1 %vm102_vm0, %v47_v26 }
  0x9a   :  { %v115_v30 = vpop.f32.mrf.mxu0 }
  0x9b   :  { %v116_v31 = vadd.f32 %v115_v30, %v58_v28  ;;  %v129_v32 = vpop.f32.mrf.mxu1 }
  0x9c   :  { %v130_v33 = vadd.f32 %v129_v32, %v59_v29 }
  0x9d   :  { %134 = vst [vmem:[%s297_s3] sm:$0xff] %v116_v31 }
  0x9e   :  { %135 = vst.msk [vmem:[%s297_s3 + $0x8] sm:$0xff] %vm102_vm0, %v130_v33 }
  0xa2   :  { %v117_v34 = vpop.f32.mrf.mxu0 }
  0xa3   :  { %v118_v35 = vadd.f32 %v117_v34, %v58_v28  ;;  %v131_v36 = vpop.f32.mrf.mxu1 }
  0xa4   :  { %v132_v37 = vadd.f32 %v131_v36, %v59_v29 }
  0xa5   :  { %136 = vst [vmem:[%s297_s3 + $0x10] sm:$0xff] %v118_v35 }
  0xa6   :  { %137 = vst.msk [vmem:[%s297_s3 + $0x18] sm:$0xff] %vm102_vm0, %v132_v37 }
  0xa7   :  { %142 = vsyncpa [#allocation3], 1 }
  0xa8   :  { %143 = vsyncpa [#allocation5], 1 }

// kernel: category_transformer_forward.30
= control target key start
LH: loop header
LB: loop body
LE: loop exit
PB: predicated region body
PF: predicated region fallthrough
CT: control target
= control target key end

     0   :  { %8 = vsyncpa [#allocation3], 0  ;;  %s183_s0 = inlined_call_operand.vmem [shape: f32[16,3], index: 0, kind: input, shape index: {}]   ;;  %s184_s1 = inlined_call_operand.hbm [shape: bf16[3,32], index: 1, kind: input, shape index: {}]   ;;  %s185_s2 = inlined_call_operand.hbm [shape: f32[1,32], index: 2, kind: input, shape index: {}]   ;;  %s186_s3 = inlined_call_operand.vmem [shape: f32[16,32], index: 3, kind: output, shape index: {}]  }
   0x1   :  { %s17_s14 = sshll.u32 %s184_s1, 4  ;;  %s18_s14 = int_to_ptr.hbm [resolvable:$true] %s17_s14 }
   0x2   :  { %9 = vsyncpa [#allocation5], 0  ;;  %s142_s15 = smov [#allocation2]   ;;  %s28_s19 = sshll.u32 %s185_s2, 4  ;;  %s29_s19 = int_to_ptr.hbm [resolvable:$true] %s28_s19 }
   0x3   :  { %s19_s16 = sshll.u32 %s142_s15, 4  ;;  %s143_s20 = smov [#allocation4]   ;;  %s20_s16 = int_to_ptr.vmem [resolvable:$true] %s19_s16 }
   0x4   :  { %22 = dma.hbm_to_vmem [thread:$0]  %s18_s14, 32, %s20_s16, [#allocation3]  }
   0x5   :  { %s30_s21 = sshll.u32 %s143_s20, 4  ;;  %s31_s21 = int_to_ptr.vmem [resolvable:$true] %s30_s21 }
   0x6   :  { %33 = dma.hbm_to_vmem [thread:$0]  %s29_s19, 16, %s31_s21, [#allocation5]  }
   0x7   :  { %138 = dma.done.wait [#allocation3], 32  }
   0x8   :  { %139 = vsyncadd [#allocation3], 4294967264 }
   0x9   :  { %140 = dma.done.wait [#allocation5], 16  }
   0xa   :  { %141 = vsyncadd [#allocation5], 4294967280  ;;  %vm55_vm0 = vcmask 1040384   ;;  %vm56_vm1 = vcmask 1041408   ;;  %v144_v0 = vmov 65535   ;;  %v43_v4 = vld [vmem:[%s183_s0] sm:$0xff] }
   0xb   :  { %v57_v1 = vsel %vm55_vm0, 4294967295, %v144_v0  ;;  %v46_v3 = vld [vmem:[#allocation2] sm:$0x3]  ;;  %v44_v5 = vld [vmem:[%s183_s0 + $0x8] sm:$0xff]  ;;  %vm51_vm2 = vcmask 23552   ;;  %vm76_vm3 = vcmask 261120  }
   0xc   :  { %v58_v2 = vsel %vm56_vm1, %v57_v1, 0  ;;  %v45_v7 = vpack.c.bf16 %v44_v5, %v43_v4  ;;  %v89_v8 = vld [vmem:[#allocation4] ss:$0 sm:$0xff] }
   0xd   :  { %v60_v6 = vand.u32 %v58_v2, %v46_v3 }
   0xf   :  { %69 = vmatpush.bf16.msra.mxu0 %v60_v6 }
  0x12   :  { %85 = vmatmul.msk.bf16.vlgmr.msra.gmra.mxu0 %vm51_vm2, %v45_v7 }
  0x8f   :  { %v71_v9 = vpop.f32.mrf.mxu0 }
  0x90   :  { %v72_v10 = vadd.f32 %v89_v8, %v71_v9 }
  0x92   :  { %77 = vst.msk [vmem:[%s186_s3] sm:$0xff] %vm76_vm3, %v72_v10 }
  0x97   :  { %v73_v11 = vpop.f32.mrf.mxu0 }
  0x98   :  { %v74_v12 = vadd.f32 %v89_v8, %v73_v11 }
  0x9a   :  { %78 = vst.msk [vmem:[%s186_s3 + $0x8] sm:$0xff] %vm76_vm3, %v74_v12 }
  0x9b   :  { %83 = vsyncpa [#allocation3], 1 }
  0x9c   :  { %84 = vsyncpa [#allocation5], 1 }

// kernel: category_transformer_forward.32
= control target key start
LH: loop header
LB: loop body
LE: loop exit
PB: predicated region body
PF: predicated region fallthrough
CT: control target
= control target key end

     0   :  { %7 = vsyncpa [#allocation3], 0  ;;  %s860_s0 = inlined_call_operand.vmem [shape: f32[2,8,192], index: 0, kind: input, shape index: {}]   ;;  %s861_s1 = inlined_call_operand.hbm [shape: s32[2,1,8], index: 1, kind: input, shape index: {}]   ;;  %s862_s2 = inlined_call_operand.vmem [shape: f32[2,8,64], index: 2, kind: output, shape index: {}]  }
   0x1   :  { %9 = vsyncpa [#allocation3 + $0x1], 0  ;;  %s725_s9 = smov 0   ;;  %s727_s10 = smov 0  }
   0x2   :  { %s729_s11 = smov 0   ;;  %s731_s12 = smov 0  }
   0x3 LB: > { %s744_s13 = sadd.s32 4294967295, %s700_s12   ;;  %s747_s14 = sadd.s32 1, %s700_s12   ;;  %s700_s12 = sphi %s731_s12, %s868_s12   ;;  %s696_s11 = sphi %s729_s11, %s867_s11   ;;  %s692_s10 = sphi %s727_s10, %s866_s10   ;;  %s688_s9 = sphi %s725_s9, %s865_s9  }
   0x4   : > { %s45_s15 = ssub.s32 %s700_s12, %s747_s14  ;;  %s48_s16 = sadd.s32 1, %s696_s11 }
   0x5   : > { %p46_p0 = scmp.eq.s32.totalorder %s45_s15, 0  ;;  %p55_p1 = scmp.ne.s32.totalorder %s696_s11, %s692_s10 }
   0x6   : > { %p56_p2 = scmp.eq.s32.totalorder %s700_s12, 0  ;;  %p61_p3 = scmp.ne.s32.totalorder %s692_s10, %s688_s9 }
   0x7   : > { %s757_s17 = scalar_select %p46_p0, %s696_s11, %s48_s16  }
   0x8   : > { %p57_p4 = por %p56_p2, %p55_p1  ;;  %p62_p5 = scmp.eq.s32.totalorder %s744_s13, 0 }
   0x9   : > { %p579_p6 = scmp.lt.s32.totalorder %s700_s12, 2  ;;  %s119_s19 = sand.u32 1, %s696_s11  }
   0xa   : > { %p761_p7 = por %p62_p5, %p61_p3  ;;  %s125_s22 = scalar_lea.hbm %s861_s1, %s700_s12 }
   0xb   : > { %s122_s23 = scalar_lea.vmem [#allocation2], %s119_s19  ;;  %s127_s25 = sshll.u32 %s125_s22, 4  ;;  %s128_s25 = int_to_ptr.hbm [resolvable:$true] %s127_s25 }
   0xc   : > { %s129_s24 = sshll.u32 %s122_s23, 4  ;;  %p770_p8 = pnand %p579_p6, %p57_p4  ;;  %s130_s24 = int_to_ptr.vmem [resolvable:$true] %s129_s24 }
   0xd   : > { %p554_p9 = scmp.ge.s32.totalorder %s700_s12, 1  ;;  %p134_p10 = scmp.lt.s32.totalorder %s700_s12, 3 }
   0xe   : > { %s120_s27 = scalar_lea.sflag [#allocation3], %s119_s19  ;;  %s636_s28 = sshra.s32 %s128_s25, 4  ;;  %s637_s28 = int_to_ptr.hbm [resolvable:$true] %s636_s28 }
   0xf   : > { %s638_s29 = scalar_lea.hbm %s637_s28, 1  ;;  %p640_p12 = pneg %p770_p8 }
  0x10   : > { %p639_p11 = scmp.ne.s32.totalorder %s637_s28, %s638_s29  ;;  %s643_s4 = scalar_lea.hbm %s861_s1, 2 }
  0x11   : > { %p644_p1 = scmp.lt.s32.totalorder %s637_s28, %s861_s1  ;;  %p645_p2 = scmp.lt.s32.totalorder %s643_s4, %s638_s29 }
  0x12   : > { %p641_p13 = pnand %p640_p12, %p639_p11 }
  0x13   : > { %p646_p3 = por %p645_p2, %p644_p1 }
  0x14   : > { %p642_p0 = pneg %p641_p13 }
  0x16   : > { %p647_p4 = pnand %p646_p3, %p642_p0 }
  0x18   : > { %650 = shalt.err (!%p647_p4)
}
  0x19   : > { %578 = dma.hbm_to_vmem [thread:$0]  (!%p770_p8), %s128_s25, 16, %s130_s24, %s120_s27  }
  0x1a   : > { %p135_p5 = pnand %p554_p9, %p134_p10 }
  0x1b   : > { %s140_s7 = sand.u32 (!%p135_p5), 1, %s692_s10  }
  0x1c   : > { %138 = sbr.rel (%p135_p5) target bundleno = 1227 (0x4cb), region = 28  ;;  %s141_s8 = scalar_lea.sflag (!%p135_p5), [#allocation3], %s140_s7 }
  0x1d   : > { %s143_s9 = scalar_lea.vmem (!%p135_p5), [#allocation2], %s140_s7 }
  0x21   : > { %683 = dma.done.wait (%p761_p7), %s141_s8, 16  }
  0x22   : > { %685 = vsyncadd (%p761_p7), %s141_s8, 4294967280  ;;  %p168_p6 = scmp.lt.s32.totalorder %s744_s13, 1  ;;  %s702_s20 = smov 64   ;;  %vm195_vm0 = vcmask 130048   ;;  %v182_v2 = vlaneseq  ;;  %v179_v3 = vld [vmem:[%s143_s9] sm:$0x1] }
  0x23   : > { %s703_s18 = smov 112   ;;  %s704_s21 = smov 32   ;;  %vm180_vm1 = vcmp.gt.s32.totalorder %v179_v3, 0  ;;  %v708_v6 = vmov -1e+09   ;;  %vm222_vm3 = vcmask 64512  }
  0x24   : > { %s870_s13 = smov (!%p168_p6, %s744_s13), 1  ;;  %s705_s22 = smov 16   ;;  %v183_v4 = vshrl.u32 %v182_v2, 7  ;;  %v185_v5 = vand.u32 127, %v182_v2  ;;  %v181_v7 = vsel %vm180_vm1, 0.0, %v708_v6  ;;  %vm472_vm4 = vcmask 261120  }
  0x25   : > { %s572_s15 = sshll.u32 %s870_s13, 4  ;;  %s706_s23 = smov 96   ;;  %v189_v8 = vperm.slane %v181_v7, 0  ;;  %vm474_vm5 = vcmask 392192   ;;  %vm476_vm6 = vcmask 523264  }
  0x26   : > { %s803_s19 = scalar_lea.vmem %s860_s0, %s572_s15  ;;  %s707_s24 = smov 80   ;;  %vm186_vm2 = vcmp.le.s32.totalorder %v185_v5, %v183_v4 }
  0x27   : > { %v177_v0 = vld [vmem:[%s803_s19] sm:$0xff]  ;;  %v187_v9 = vsel %vm186_vm2, 0.0, %v708_v6  ;;  %s709_s25 = smov 48   ;;  %v178_v25 = vld [vmem:[%s803_s19 + $0x8] sm:$0xff]  ;;  %s557_s26 = sshll.u32 %s870_s13, 3 }
  0x28   : > { %193 = vrot.lane.b32.xlu0 %v177_v0, %s702_s20  ;;  %257 = vrot.lane.b32.xlu2 %v177_v0, %s703_s18  ;;  %v191_v10 = vadd.f32 %v189_v8, %v187_v9  ;;  %s176_s29 = scalar_lea.vmem %s862_s2, %s557_s26 }
  0x29   : > { %252 = vmatpush.msra.mxu1 %v178_v25 }
  0x30   : > { %327 = vrot.lane.b32.xlu2 %v177_v0, %s704_s21 }
  0x38   : > { %394 = vrot.lane.b32.xlu2 %v177_v0, %s705_s22 }
  0x40   : > { %325 = vrot.lane.b32.xlu2 %v177_v0, %s706_s23 }
  0x48   : > { %392 = vrot.lane.b32.xlu2 %v177_v0, %s707_s24 }
  0x82   : > { %v258_v15 = vpop.permute.xlu2 %257 }
  0x8a   : > { %v328_v16 = vpop.permute.xlu2 %327 }
  0x8b   : > { %564 = vmatpush.xpose.msk.msrb.mxu1 %vm195_vm0, %v328_v16 }
  0x92   : > { %v395_v17 = vpop.permute.xlu2 %394 }
  0x9a   : > { %v194_v1 = vpop.permute.xlu0 %193  ;;  %v326_v18 = vpop.permute.xlu2 %325 }
  0x9b   : > { %558 = vmatpush.xpose.msk.msra.mxu0 %vm195_vm0, %v194_v1 }
  0x9e   : > { %559 = vmatmul.msk.f32.vlgmr.msra.gmra.mxu0 %vm195_vm0, %v177_v0 }
  0x9f   : > { %567 = vmatpush.xpose.msk.msrb.mxu0 %vm195_vm0, %v395_v17 }
  0xa2   : > { %v393_v22 = vpop.permute.xlu2 %392 }
  0xa6   : > { %568 = vmatmul.msk.f32.vlgmr.msrb.gmra.mxu0 %vm195_vm0, %v393_v22 }
 0x11b   : > { %v217_v11 = vpop.f32.mrf.mxu0 }
 0x11c   : > { %v220_v12 = vmul.f32 0.25, %v217_v11 }
 0x11e   : > { %v221_v13 = vadd.f32 %v220_v12, %v191_v10 }
 0x120   : > { %v223_v14 = vsel %vm222_vm3, %v221_v13, -inf }
 0x121   : > { %224 = vmax.xlane.f32.xlu0 %v223_v14 }
 0x123   : > { %v417_v27 = vpop.f32.mrf.mxu0 }
 0x124   : > { %v420_v28 = vmul.f32 0.25, %v417_v27 }
 0x126   : > { %v421_v30 = vadd.f32 %v420_v28, %v191_v10 }
 0x128   : > { %v422_v32 = vsel %vm222_vm3, %v421_v30, -inf }
 0x129   : > { %423 = vmax.xlane.f32.xlu0 %v422_v32 }
 0x194   : > { %v225_v19 = vpop.xlane.xlu0 %224 }
 0x195   : > { %v226_v20 = vsub.f32 %v221_v13, %v225_v19 }
 0x197   : > { %v227_v21 = vmul.f32 1.442695, %v226_v20 }
 0x199   : > { %620 = vpow2.f32 %v227_v21 }
 0x19c   : > { %v424_v39 = vpop.xlane.xlu0 %423 }
 0x19d   : > { %v425_v40 = vsub.f32 %v421_v30, %v424_v39 }
 0x19f   : > { %v621_v23 = vpop.eup %620  ;;  %v426_v41 = vmul.f32 1.442695, %v425_v40 }
 0x1a0   : > { %v229_v24 = vsel %vm222_vm3, %v621_v23, 0.0 }
 0x1a1   : > { %230 = vadd.xlane.f32.xlu1 %v229_v24 }
 0x1ba   : > { %259 = vrot.lane.b32.xlu1 %v177_v0, %s709_s25 }
 0x214   : > { %v231_v26 = vpop.xlane.xlu1 %230 }
 0x215   : > { %622 = vrcp.f32 %v231_v26 }
 0x216   : > { %624 = vpow2.f32 %v426_v41 }
 0x21b   : > { %v623_v29 = vpop.eup %622 }
 0x21c   : > { %v233_v31 = vmul.f32 %v623_v29, %v621_v23  ;;  %v625_v46 = vpop.eup %624 }
 0x21d   : > { %v428_v47 = vsel %vm222_vm3, %v625_v46, 0.0 }
 0x21e   : > { %560 = vmatmul.msk.f32.vlgmr.msra.gmra.mxu1 %vm222_vm3, %v233_v31 }
 0x226   : > { %565 = vmatmul.msk.f32.vlgmr.msrb.gmra.mxu1 %vm195_vm0, %v326_v18 }
 0x22c   : > { %v260_v33 = vpop.permute.xlu1 %259 }
 0x22d   : > { %561 = vmatpush.xpose.msk.msra.mxu2 %vm195_vm0, %v260_v33 }
 0x230   : > { %562 = vmatmul.msk.f32.vlgmr.msra.gmra.mxu2 %vm195_vm0, %v258_v15 }
 0x29b   : > { %v825_v34 = vpop.f32.mrf.mxu1 }
 0x2a3   : > { %v350_v35 = vpop.f32.mrf.mxu1 }
 0x2a4   : > { %v353_v36 = vmul.f32 0.25, %v350_v35 }
 0x2a6   : > { %v354_v37 = vadd.f32 %v353_v36, %v191_v10 }
 0x2a8   : > { %v355_v38 = vsel %vm222_vm3, %v354_v37, -inf }
 0x2a9   : > { %356 = vmax.xlane.f32.xlu2 %v355_v38 }
 0x2b3   : > { %v282_v42 = vpop.f32.mrf.mxu2 }
 0x2b4   : > { %v285_v43 = vmul.f32 0.25, %v282_v42 }
 0x2b6   : > { %v286_v44 = vadd.f32 %v285_v43, %v191_v10 }
 0x2b8   : > { %v287_v45 = vsel %vm222_vm3, %v286_v44, -inf }
 0x2b9   : > { %288 = vmax.xlane.f32.xlu1 %v287_v45 }
 0x2c1   : > { %429 = vadd.xlane.f32.xlu1 %v428_v47  ;;  %366 = vrot.lane.b32.xlu2 %v178_v25, %s706_s23 }
 0x2da   : > { %433 = vrot.lane.b32.xlu1 %v178_v25, %s707_s24 }
 0x31c   : > { %v357_v48 = vpop.xlane.xlu2 %356 }
 0x31d   : > { %v358_v51 = vsub.f32 %v354_v37, %v357_v48 }
 0x31f   : > { %v359_v53 = vmul.f32 1.442695, %v358_v51 }
 0x324   : > { %v367_v2 = vpop.permute.xlu2 %366 }
 0x32c   : > { %v289_v49 = vpop.xlane.xlu1 %288 }
 0x32d   : > { %v290_v50 = vsub.f32 %v286_v44, %v289_v49 }
 0x32f   : > { %v291_v52 = vmul.f32 1.442695, %v290_v50 }
 0x331   : > { %626 = vpow2.f32 %v291_v52 }
 0x332   : > { %628 = vpow2.f32 %v359_v53 }
 0x334   : > { %v430_v57 = vpop.xlane.xlu1 %429 }
 0x335   : > { %630 = vrcp.f32 %v430_v57 }
 0x337   : > { %v627_v54 = vpop.eup %626 }
 0x338   : > { %v293_v55 = vsel %vm222_vm3, %v627_v54, 0.0  ;;  %v629_v56 = vpop.eup %628 }
 0x339   : > { %294 = vadd.xlane.f32.xlu0 %v293_v55  ;;  %v361_v58 = vsel %vm222_vm3, %v629_v56, 0.0 }
 0x33b   : > { %v631_v59 = vpop.eup %630 }
 0x33c   : > { %v432_v61 = vmul.f32 %v631_v59, %v625_v46 }
 0x341   : > { %362 = vadd.xlane.f32.xlu0 %v361_v58 }
 0x34c   : > { %v434_v60 = vpop.permute.xlu1 %433 }
 0x34d   : > { %454 = vmatpush.msrb.mxu2 %v434_v60 }
 0x34e   : > { %569 = vmatmul.msk.f32.vlgmr.msrb.gmra.mxu2 %vm222_vm3, %v432_v61 }
 0x355   : > { %299 = vrot.lane.b32.xlu0 %v178_v25, %s703_s18 }
 0x3ac   : > { %v295_v62 = vpop.xlane.xlu0 %294 }
 0x3ad   : > { %632 = vrcp.f32 %v295_v62 }
 0x3b3   : > { %v633_v0 = vpop.eup %632 }
 0x3b4   : > { %v363_v63 = vpop.xlane.xlu0 %362  ;;  %v297_v3 = vmul.f32 %v633_v0, %v627_v54 }
 0x3b5   : > { %634 = vrcp.f32 %v363_v63 }
 0x3bb   : > { %v635_v4 = vpop.eup %634 }
 0x3bc   : > { %v365_v5 = vmul.f32 %v635_v4, %v629_v56 }
 0x3c7   : > { %v300_v1 = vpop.permute.xlu0 %299 }
 0x3c8   : > { %320 = vmatpush.msra.mxu3 %v300_v1 }
 0x3c9   : > { %563 = vmatmul.msk.f32.vlgmr.msra.gmra.mxu3 %vm222_vm3, %v297_v3 }
 0x3ca   : > { %387 = vmatpush.msrb.mxu3 %v367_v2 }
 0x3d1   : > { %566 = vmatmul.msk.f32.vlgmr.msrb.gmra.mxu3 %vm222_vm3, %v365_v5  ;;  %v456_v6 = vpop.f32.mrf.mxu2 }
 0x3d2   : > { %468 = vrot.lane.b32.xlu2 %v456_v6, %s709_s25 }
 0x42c   : > { %v469_v12 = vpop.permute.xlu2 %468 }
 0x44c   : > { %v322_v7 = vpop.f32.mrf.mxu3 }
 0x44d   : > { %460 = vrot.lane.b32.xlu0 %v322_v7, %s705_s22 }
 0x454   : > { %v389_v8 = vpop.f32.mrf.mxu3 }
 0x455   : > { %464 = vrot.lane.b32.xlu0 %v389_v8, %s704_s21 }
 0x4bf   : > { %v461_v9 = vpop.permute.xlu0 %460 }
 0x4c0   : > { %v471_v10 = vsel %vm195_vm0, %v825_v34, %v461_v9 }
 0x4c7   : > { %v465_v11 = vpop.permute.xlu0 %464 }
 0x4c8   : > { %v473_v13 = vsel %vm472_vm4, %v471_v10, %v465_v11 }
 0x4c9   : > { %v475_v14 = vsel %vm474_vm5, %v473_v13, %v469_v12 }
 0x4ca   : > { %477 = vst.msk [vmem:[%s176_s29] sm:$0xff] %vm476_vm6, %v475_v14 }
 0x4cb PF: > { %p12_p7 = scmp.ge.s32.totalorder %s747_s14, 4   ;;  %s865_s9 = smov %s692_s10 }
 0x4cc   : > { %s866_s10 = smov %s696_s11  ;;  %s867_s11 = smov %s757_s17 }
 0x4cd   : > { %s868_s12 = smov %s747_s14  ;;  %14 = sbr.rel (!%p12_p7) target bundleno = 3 (0x3), region = 71 }
 0x4d2   :  { %497 = vsyncpa [#allocation3], 1 }
 0x4d3   :  { %499 = vsyncpa [#allocation3 + $0x1], 1 }

// kernel: category_transformer_forward.33
= control target key start
LH: loop header
LB: loop body
LE: loop exit
PB: predicated region body
PF: predicated region fallthrough
CT: control target
= control target key end

     0   :  { %11 = vsyncpa [#allocation3], 0  ;;  %s432_s0 = inlined_call_operand.vmem [shape: f32[16,64], index: 0, kind: input, shape index: {}]   ;;  %s433_s1 = inlined_call_operand.hbm [shape: bf16[64,64], index: 1, kind: input, shape index: {}]   ;;  %s434_s2 = inlined_call_operand.hbm [shape: f32[1,64], index: 2, kind: input, shape index: {}]   ;;  %s435_s3 = inlined_call_operand.vmem [shape: f32[16,64], index: 3, kind: input, shape index: {}]   ;;  %s436_s4 = inlined_call_operand.hbm [shape: f32[1,64], index: 4, kind: input, shape index: {}]   ;;  %s437_s5 = inlined_call_operand.hbm [shape: f32[1,64], index: 5, kind: input, shape index: {}]   ;;  %s438_s6 = inlined_call_operand.vmem [shape: f32[16,64], index: 6, kind: output, shape index: {}]  }
   0x1   :  { %12 = vsyncpa [#allocation5], 0  ;;  %s34_s23 = sshll.u32 %s434_s2, 4  ;;  %s35_s23 = int_to_ptr.hbm [resolvable:$true] %s34_s23 }
   0x2   :  { %13 = vsyncpa [#allocation8], 0  ;;  %s353_s24 = smov [#allocation4]   ;;  %s20_s28 = sshll.u32 %s433_s1, 4  ;;  %s21_s28 = int_to_ptr.hbm [resolvable:$true] %s20_s28 }
   0x3   :  { %s36_s25 = sshll.u32 %s353_s24, 4  ;;  %s354_s29 = smov [#allocation2]   ;;  %s37_s25 = int_to_ptr.vmem [resolvable:$true] %s36_s25 }
   0x4   :  { %39 = dma.hbm_to_vmem [thread:$0]  %s35_s23, 16, %s37_s25, [#allocation5]  }
   0x5   :  { %s22_s30 = sshll.u32 %s354_s29, 4  ;;  %s355_s7 = smov 64   ;;  %s23_s30 = int_to_ptr.vmem [resolvable:$true] %s22_s30 }
   0x6   :  { %s356_s8 = smov 4   ;;  %s47_s2 = sshll.u32 %s436_s4, 4  ;;  %s48_s2 = int_to_ptr.hbm [resolvable:$true] %s47_s2 }
   0x7   :  { %28 = dma.hbm_to_vmem [thread:$0]  %s21_s28, 512, %s23_s30, [#allocation3], %s355_s7, %s355_s7, %s356_s8  }
   0x8   :  { %s357_s11 = smov [#allocation6]   ;;  %s58_s1 = sshll.u32 %s437_s5, 4  ;;  %s59_s1 = int_to_ptr.hbm [resolvable:$true] %s58_s1 }
   0x9   :  { %s49_s12 = sshll.u32 %s357_s11, 4  ;;  %s358_s15 = smov [#allocation7]   ;;  %s50_s12 = int_to_ptr.vmem [resolvable:$true] %s49_s12 }
   0xa   :  { %52 = dma.hbm_to_vmem [thread:$0]  %s48_s2, 16, %s50_s12, [#allocation5]  }
   0xb   :  { %s60_s16 = sshll.u32 %s358_s15, 4  ;;  %s61_s16 = int_to_ptr.vmem [resolvable:$true] %s60_s16 }
   0xc   :  { %63 = dma.hbm_to_vmem [thread:$0]  %s59_s1, 16, %s61_s16, [#allocation8]  }
   0xd   :  { %347 = dma.done.wait [#allocation3], 512  }
   0xe   :  { %348 = vsyncadd [#allocation3], 4294966784 }
   0xf   :  { %349 = dma.done.wait [#allocation5], 32  }
  0x10   :  { %350 = vsyncadd [#allocation5], 4294967264 }
  0x11   :  { %351 = dma.done.wait [#allocation8], 16  }
  0x12   :  { %352 = vsyncadd [#allocation8], 4294967280  ;;  %v234_v0 = vld [vmem:[#allocation2 + $0x18] sm:$0xff]  ;;  %v233_v1 = vld [vmem:[#allocation2 + $0x10] sm:$0xff]  ;;  %vm120_vm0 = vcmask 523264   ;;  %v359_v18 = vmov 64.0  }
  0x13   :  { %128 = vmatpush.bf16.msra.mxu0 %v234_v0  ;;  %v232_v2 = vld [vmem:[#allocation2 + $0x8] sm:$0xff]  ;;  %v231_v3 = vld [vmem:[#allocation2] sm:$0xff]  ;;  %245 = vrcp.f32 %v359_v18 }
  0x14   :  { %v81_v4 = vld [vmem:[%s432_s0] sm:$0xff]  ;;  %v82_v5 = vld [vmem:[%s432_s0 + $0x8] sm:$0xff] }
  0x15   :  { %v83_v6 = vpack.c.bf16 %v82_v5, %v81_v4  ;;  %v242_v7 = vld [vmem:[#allocation4] ss:$0 sm:$0xff]  ;;  %v139_v14 = vld [vmem:[%s435_s3 + $0x8] sm:$0xff]  ;;  %v243_v49 = vld [vmem:[#allocation6] ss:$0 sm:$0xff] }
  0x16   :  { %v138_v9 = vld [vmem:[%s435_s3] sm:$0xff] }
  0x17   :  { %129 = vmatpush.bf16.msra.mxu0 %v233_v1  ;;  %v244_v52 = vld [vmem:[#allocation7] ss:$0 sm:$0xff] }
  0x19   :  { %v246_v19 = vpop.eup %245 }
  0x1a   :  { %v151_v20 = vmul.f32 64.0, %v246_v19  ;;  %vm155_vm1 = vweird.f32 %v246_v19 }
  0x1b   :  { %130 = vmatpush.bf16.msra.mxu0 %v232_v2 }
  0x1c   :  { %v152_v21 = vsub.f32 1.0, %v151_v20 }
  0x1e   :  { %v153_v22 = vmul.f32 %v246_v19, %v152_v21 }
  0x1f   :  { %131 = vmatpush.bf16.msra.mxu0 %v231_v3 }
  0x20   :  { %v154_v23 = vadd.f32 %v246_v19, %v153_v22 }
  0x22   :  { %230 = vmatmul.msk.bf16.vlgmr.msra.gmra.mxu0 %vm120_vm0, %v83_v6  ;;  %v156_v24 = vsel %vm155_vm1, %v246_v19, %v154_v23 }
  0x9f   :  { %v133_v8 = vpop.f32.mrf.mxu0 }
  0xa0   :  { %v134_v10 = vadd.f32 %v242_v7, %v133_v8 }
  0xa2   :  { %v140_v11 = vadd.f32 %v138_v9, %v134_v10 }
  0xa4   :  { %v144_v12 = vsel %vm120_vm0, %v140_v11, 0.0 }
  0xa5   :  { %145 = vadd.xlane.f32.xlu0 %v144_v12 }
  0xa7   :  { %v135_v13 = vpop.f32.mrf.mxu0 }
  0xa8   :  { %v136_v15 = vadd.f32 %v242_v7, %v135_v13 }
  0xaa   :  { %v141_v16 = vadd.f32 %v139_v14, %v136_v15 }
  0xac   :  { %v147_v17 = vsel %vm120_vm0, %v141_v16, 0.0 }
  0xad   :  { %148 = vadd.xlane.f32.xlu0 %v147_v17 }
 0x118   :  { %v146_v25 = vpop.xlane.xlu0 %145 }
 0x119   :  { %v157_v26 = vmul.f32 %v156_v24, %v146_v25 }
 0x11b   :  { %v159_v27 = vsub.f32 %v140_v11, %v157_v26 }
 0x11d   :  { %v161_v28 = vmul.f32 %v159_v27, %v159_v27 }
 0x11f   :  { %v163_v29 = vsel %vm120_vm0, %v161_v28, 0.0 }
 0x120   :  { %164 = vadd.xlane.f32.xlu1 %v163_v29  ;;  %v149_v30 = vpop.xlane.xlu0 %148 }
 0x121   :  { %v158_v31 = vmul.f32 %v156_v24, %v149_v30 }
 0x123   :  { %v160_v32 = vsub.f32 %v141_v16, %v158_v31 }
 0x125   :  { %v162_v33 = vmul.f32 %v160_v32, %v160_v32 }
 0x127   :  { %v166_v34 = vsel %vm120_vm0, %v162_v33, 0.0 }
 0x128   :  { %167 = vadd.xlane.f32.xlu1 %v166_v34 }
 0x193   :  { %v165_v35 = vpop.xlane.xlu1 %164 }
 0x194   :  { %v169_v36 = vmul.f32 %v165_v35, %v156_v24 }
 0x196   :  { %v171_v37 = vadd.f32 1e-05, %v169_v36 }
 0x198   :  { %247 = vrsqrt.f32 %v171_v37  ;;  %vm179_vm3 = vweird.f32 %v171_v37 }
 0x19b   :  { %v168_v38 = vpop.xlane.xlu1 %167 }
 0x19c   :  { %v170_v39 = vmul.f32 %v168_v38, %v156_v24 }
 0x19e   :  { %v248_v40 = vpop.eup %247  ;;  %v172_v41 = vadd.f32 1e-05, %v170_v39 }
 0x19f   :  { %v174_v42 = vmul.f32 %v248_v40, %v171_v37  ;;  %vm180_vm2 = vweird.f32 %v248_v40 }
 0x1a0   :  { %249 = vrsqrt.f32 %v172_v41  ;;  %vm181_vm4 = vmor %vm179_vm3, %vm180_vm2  ;;  %vm189_vm6 = vweird.f32 %v172_v41 }
 0x1a1   :  { %v175_v43 = vmul.f32 %v248_v40, %v174_v42 }
 0x1a3   :  { %v176_v44 = vmul.f32 0.5, %v175_v43 }
 0x1a5   :  { %v177_v45 = vsub.f32 1.5, %v176_v44 }
 0x1a6   :  { %v250_v46 = vpop.eup %249 }
 0x1a7   :  { %v178_v47 = vmul.f32 %v248_v40, %v177_v45  ;;  %v184_v48 = vmul.f32 %v250_v46, %v172_v41  ;;  %vm190_vm5 = vweird.f32 %v250_v46 }
 0x1a8   :  { %vm191_vm7 = vmor %vm189_vm6, %vm190_vm5 }
 0x1a9   :  { %v182_v50 = vsel %vm181_vm4, %v248_v40, %v178_v47  ;;  %v185_v51 = vmul.f32 %v250_v46, %v184_v48 }
 0x1aa   :  { %v193_v53 = vmul.f32 %v182_v50, %v159_v27 }
 0x1ab   :  { %v186_v54 = vmul.f32 0.5, %v185_v51 }
 0x1ac   :  { %v198_v55 = vmul.f32 %v243_v49, %v193_v53 }
 0x1ad   :  { %v187_v56 = vsub.f32 1.5, %v186_v54 }
 0x1ae   :  { %v203_v57 = vadd.f32 %v244_v52, %v198_v55 }
 0x1af   :  { %v188_v58 = vmul.f32 %v250_v46, %v187_v56 }
 0x1b0   :  { %205 = vst.msk [vmem:[%s438_s6] sm:$0xff] %vm120_vm0, %v203_v57 }
 0x1b1   :  { %v192_v59 = vsel %vm191_vm7, %v250_v46, %v188_v58 }
 0x1b2   :  { %v194_v60 = vmul.f32 %v192_v59, %v160_v32 }
 0x1b4   :  { %v199_v61 = vmul.f32 %v243_v49, %v194_v60 }
 0x1b6   :  { %v204_v62 = vadd.f32 %v244_v52, %v199_v61 }
 0x1b8   :  { %206 = vst.msk [vmem:[%s438_s6 + $0x8] sm:$0xff] %vm120_vm0, %v204_v62 }
 0x1b9   :  { %211 = vsyncpa [#allocation3], 1 }
 0x1ba   :  { %212 = vsyncpa [#allocation5], 1 }
 0x1bb   :  { %213 = vsyncpa [#allocation8], 1 }

// kernel: category_transformer_forward.34
= control target key start
LH: loop header
LB: loop body
LE: loop exit
PB: predicated region body
PF: predicated region fallthrough
CT: control target
= control target key end

     0   :  { %8 = vsyncpa [#allocation3], 0  ;;  %s230_s0 = inlined_call_operand.vmem [shape: f32[16,64], index: 0, kind: input, shape index: {}]   ;;  %s231_s1 = inlined_call_operand.hbm [shape: bf16[64,64], index: 1, kind: input, shape index: {}]   ;;  %s232_s2 = inlined_call_operand.hbm [shape: f32[1,64], index: 2, kind: input, shape index: {}]   ;;  %s233_s3 = inlined_call_operand.vmem [shape: f32[16,64], index: 3, kind: output, shape index: {}]  }
   0x1   :  { %s16_s14 = sshll.u32 %s231_s1, 4  ;;  %s17_s14 = int_to_ptr.hbm [resolvable:$true] %s16_s14 }
   0x2   :  { %9 = vsyncpa [#allocation5], 0  ;;  %s188_s15 = smov [#allocation2]   ;;  %s30_s19 = sshll.u32 %s232_s2, 4  ;;  %s31_s19 = int_to_ptr.hbm [resolvable:$true] %s30_s19 }
   0x3   :  { %s18_s16 = sshll.u32 %s188_s15, 4  ;;  %s189_s20 = smov 64   ;;  %s19_s16 = int_to_ptr.vmem [resolvable:$true] %s18_s16 }
   0x4   :  { %s190_s21 = smov 4   ;;  %s191_s22 = smov [#allocation4]  }
   0x5   :  { %24 = dma.hbm_to_vmem [thread:$0]  %s17_s14, 512, %s19_s16, [#allocation3], %s189_s20, %s189_s20, %s190_s21  }
   0x6   :  { %s32_s23 = sshll.u32 %s191_s22, 4  ;;  %s33_s23 = int_to_ptr.vmem [resolvable:$true] %s32_s23 }
   0x7   :  { %35 = dma.hbm_to_vmem [thread:$0]  %s31_s19, 16, %s33_s23, [#allocation5]  }
   0x8   :  { %184 = dma.done.wait [#allocation3], 512  }
   0x9   :  { %185 = vsyncadd [#allocation3], 4294966784 }
   0xa   :  { %186 = dma.done.wait [#allocation5], 16  }
   0xb   :  { %187 = vsyncadd [#allocation5], 4294967280  ;;  %v130_v0 = vld [vmem:[#allocation2 + $0x18] sm:$0xff]  ;;  %v129_v1 = vld [vmem:[#allocation2 + $0x10] sm:$0xff]  ;;  %vm84_vm0 = vcmask 523264  }
   0xc   :  { %92 = vmatpush.bf16.msra.mxu0 %v130_v0  ;;  %v128_v2 = vld [vmem:[#allocation2 + $0x8] sm:$0xff]  ;;  %v127_v3 = vld [vmem:[#allocation2] sm:$0xff] }
   0xd   :  { %v45_v4 = vld [vmem:[%s230_s0] sm:$0xff]  ;;  %v46_v5 = vld [vmem:[%s230_s0 + $0x8] sm:$0xff] }
   0xe   :  { %v47_v6 = vpack.c.bf16 %v46_v5, %v45_v4  ;;  %v135_v7 = vld [vmem:[#allocation4] ss:$0 sm:$0xff] }
  0x10   :  { %93 = vmatpush.bf16.msra.mxu0 %v129_v1 }
  0x14   :  { %94 = vmatpush.bf16.msra.mxu0 %v128_v2 }
  0x18   :  { %95 = vmatpush.bf16.msra.mxu0 %v127_v3 }
  0x1b   :  { %126 = vmatmul.msk.bf16.vlgmr.msra.gmra.mxu0 %vm84_vm0, %v47_v6 }
  0x98   :  { %v97_v8 = vpop.f32.mrf.mxu0 }
  0x99   :  { %v98_v9 = vadd.f32 %v135_v7, %v97_v8 }
  0x9b   :  { %102 = vst.msk [vmem:[%s233_s3] sm:$0xff] %vm84_vm0, %v98_v9 }
  0xa0   :  { %v99_v10 = vpop.f32.mrf.mxu0 }
  0xa1   :  { %v100_v11 = vadd.f32 %v135_v7, %v99_v10 }
  0xa3   :  { %103 = vst.msk [vmem:[%s233_s3 + $0x8] sm:$0xff] %vm84_vm0, %v100_v11 }
  0xa4   :  { %108 = vsyncpa [#allocation3], 1 }
  0xa5   :  { %109 = vsyncpa [#allocation5], 1 }

// kernel: category_transformer_forward.36
= control target key start
LH: loop header
LB: loop body
LE: loop exit
PB: predicated region body
PF: predicated region fallthrough
CT: control target
= control target key end

     0   :  { %8 = vsyncpa [#allocation3], 0  ;;  %s913_s0 = inlined_call_operand.vmem [shape: f32[2,8,64], index: 0, kind: input, shape index: {}]   ;;  %s914_s1 = inlined_call_operand.vmem [shape: f32[2,8,128], index: 1, kind: input, shape index: {}]   ;;  %s915_s2 = inlined_call_operand.hbm [shape: s32[2,1,8], index: 2, kind: input, shape index: {}]   ;;  %s916_s3 = inlined_call_operand.vmem [shape: f32[2,8,64], index: 3, kind: output, shape index: {}]  }
   0x1   :  { %10 = vsyncpa [#allocation3 + $0x1], 0  ;;  %s776_s12 = smov 0   ;;  %s778_s13 = smov 0  }
   0x2   :  { %s780_s14 = smov 0   ;;  %s782_s15 = smov 0  }
   0x3 LB: > { %s795_s16 = sadd.s32 4294967295, %s746_s15   ;;  %s798_s17 = sadd.s32 1, %s746_s15   ;;  %s746_s15 = sphi %s782_s15, %s922_s15   ;;  %s742_s14 = sphi %s780_s14, %s921_s14   ;;  %s738_s13 = sphi %s778_s13, %s920_s13   ;;  %s734_s12 = sphi %s776_s12, %s919_s12  }
   0x4   : > { %s72_s18 = ssub.s32 %s746_s15, %s798_s17  ;;  %s75_s19 = sadd.s32 1, %s742_s14 }
   0x5   : > { %p73_p0 = scmp.eq.s32.totalorder %s72_s18, 0  ;;  %p82_p1 = scmp.ne.s32.totalorder %s742_s14, %s738_s13 }
   0x6   : > { %p83_p2 = scmp.eq.s32.totalorder %s746_s15, 0  ;;  %p88_p3 = scmp.ne.s32.totalorder %s738_s13, %s734_s12 }
   0x7   : > { %s808_s20 = scalar_select %p73_p0, %s742_s14, %s75_s19  }
   0x8   : > { %p84_p4 = por %p83_p2, %p82_p1  ;;  %p89_p5 = scmp.eq.s32.totalorder %s795_s16, 0 }
   0x9   : > { %p625_p6 = scmp.lt.s32.totalorder %s746_s15, 2  ;;  %s152_s22 = sand.u32 1, %s742_s14  }
   0xa   : > { %p812_p7 = por %p89_p5, %p88_p3  ;;  %s158_s25 = scalar_lea.hbm %s915_s2, %s746_s15 }
   0xb   : > { %s155_s26 = scalar_lea.vmem [#allocation2], %s152_s22  ;;  %s160_s28 = sshll.u32 %s158_s25, 4  ;;  %s161_s28 = int_to_ptr.hbm [resolvable:$true] %s160_s28 }
   0xc   : > { %s162_s27 = sshll.u32 %s155_s26, 4  ;;  %p821_p8 = pnand %p625_p6, %p84_p4  ;;  %s163_s27 = int_to_ptr.vmem [resolvable:$true] %s162_s27 }
   0xd   : > { %p601_p9 = scmp.ge.s32.totalorder %s746_s15, 1  ;;  %p167_p10 = scmp.lt.s32.totalorder %s746_s15, 3 }
   0xe   : > { %s153_s30 = scalar_lea.sflag [#allocation3], %s152_s22  ;;  %s682_s4 = sshra.s32 %s161_s28, 4  ;;  %s683_s4 = int_to_ptr.hbm [resolvable:$true] %s682_s4 }
   0xf   : > { %s684_s5 = scalar_lea.hbm %s683_s4, 1  ;;  %p686_p12 = pneg %p821_p8 }
  0x10   : > { %p685_p11 = scmp.ne.s32.totalorder %s683_s4, %s684_s5  ;;  %s689_s8 = scalar_lea.hbm %s915_s2, 2 }
  0x11   : > { %p690_p1 = scmp.lt.s32.totalorder %s683_s4, %s915_s2  ;;  %p691_p2 = scmp.lt.s32.totalorder %s689_s8, %s684_s5 }
  0x12   : > { %p687_p13 = pnand %p686_p12, %p685_p11 }
  0x13   : > { %p692_p3 = por %p691_p2, %p690_p1 }
  0x14   : > { %p688_p0 = pneg %p687_p13 }
  0x16   : > { %p693_p4 = pnand %p692_p3, %p688_p0 }
  0x18   : > { %696 = shalt.err (!%p693_p4)
}
  0x19   : > { %624 = dma.hbm_to_vmem [thread:$0]  (!%p821_p8), %s161_s28, 16, %s163_s27, %s153_s30  }
  0x1a   : > { %p168_p5 = pnand %p601_p9, %p167_p10 }
  0x1b   : > { %s173_s11 = sand.u32 (!%p168_p5), 1, %s738_s13  }
  0x1c   : > { %171 = sbr.rel (%p168_p5) target bundleno = 1082 (0x43a), region = 32  ;;  %s174_s12 = scalar_lea.sflag (!%p168_p5), [#allocation3], %s173_s11 }
  0x1d   : > { %s176_s18 = scalar_lea.vmem (!%p168_p5), [#allocation2], %s173_s11 }
  0x21   : > { %729 = dma.done.wait (%p812_p7), %s174_s12, 16  }
  0x22   : > { %731 = vsyncadd (%p812_p7), %s174_s12, 4294967280  ;;  %p206_p6 = scmp.lt.s32.totalorder %s795_s16, 1  ;;  %vm223_vm0 = vcmask 130048   ;;  %v220_v2 = vld [vmem:[%s176_s18] sm:$0x1]  ;;  %vm255_vm2 = vcmask 64512  }
  0x23   : > { %vm221_vm1 = vcmp.gt.s32.totalorder %v220_v2, 0  ;;  %v749_v3 = vmov -1e+09   ;;  %s750_s21 = smov 96   ;;  %s751_s27 = smov 64   ;;  %vm507_vm3 = vcmask 261120  }
  0x24   : > { %s924_s16 = smov (!%p206_p6, %s795_s16), 1  ;;  %v222_v4 = vsel %vm221_vm1, 0.0, %v749_v3  ;;  %s752_s28 = smov 80   ;;  %vm509_vm4 = vcmask 392192   ;;  %vm511_vm5 = vcmask 523264  }
  0x25   : > { %s848_s19 = sshll.u32 %s924_s16, 3  ;;  %s748_s16 = smov 112   ;;  %v252_v5 = vperm.slane %v222_v4, 0 }
  0x26   : > { %s213_s23 = scalar_lea.vmem %s914_s1, %s848_s19  ;;  %s209_s26 = scalar_lea.vmem %s913_s0, %s848_s19 }
  0x27   : > { %v858_v0 = vld [vmem:[%s213_s23] sm:$0xff]  ;;  %s753_s29 = smov 32   ;;  %s754_s30 = smov 48  }
  0x28   : > { %605 = vmatpush.xpose.msk.msra.mxu0 %vm223_vm0, %v858_v0  ;;  %v218_v1 = vld [vmem:[%s209_s26] sm:$0xff]  ;;  %295 = vrot.lane.b32.xlu1 %v858_v0, %s748_s16  ;;  %s755_s4 = smov 16   ;;  %s217_s7 = scalar_lea.vmem %s916_s3, %s848_s19 }
  0x29   : > { %267 = vrot.lane.b32.xlu2 %v858_v0, %s751_s27 }
  0x2b   : > { %606 = vmatmul.msk.f32.vlgmr.msra.gmra.mxu0 %vm223_vm0, %v218_v1 }
  0x30   : > { %293 = vrot.lane.b32.xlu1 %v218_v1, %s748_s16 }
  0x31   : > { %362 = vrot.lane.b32.xlu2 %v858_v0, %s750_s21 }
  0x38   : > { %360 = vrot.lane.b32.xlu1 %v218_v1, %s750_s21 }
  0x39   : > { %427 = vrot.lane.b32.xlu2 %v218_v1, %s752_s28 }
  0x83   : > { %v268_v17 = vpop.permute.xlu2 %267 }
  0x84   : > { %288 = vmatpush.msra.mxu1 %v268_v17 }
  0x8b   : > { %v363_v18 = vpop.permute.xlu2 %362 }
  0x8c   : > { %611 = vmatpush.xpose.msk.msrb.mxu1 %vm223_vm0, %v363_v18 }
  0x93   : > { %v428_v28 = vpop.permute.xlu2 %427 }
  0x9a   : > { %v296_v10 = vpop.permute.xlu1 %295 }
  0x9b   : > { %608 = vmatpush.xpose.msk.msra.mxu2 %vm223_vm0, %v296_v10 }
  0xa2   : > { %v294_v11 = vpop.permute.xlu1 %293 }
  0xa3   : > { %609 = vmatmul.msk.f32.vlgmr.msra.gmra.mxu2 %vm223_vm0, %v294_v11 }
  0xa8   : > { %v247_v6 = vpop.f32.mrf.mxu0 }
  0xa9   : > { %v250_v7 = vmul.f32 0.25, %v247_v6 }
  0xaa   : > { %v361_v26 = vpop.permute.xlu1 %360 }
  0xab   : > { %v254_v8 = vadd.f32 %v252_v5, %v250_v7 }
  0xad   : > { %v256_v9 = vsel %vm255_vm2, %v254_v8, -inf }
  0xae   : > { %257 = vmax.xlane.f32.xlu0 %v256_v9 }
 0x121   : > { %v258_v12 = vpop.xlane.xlu0 %257 }
 0x122   : > { %v259_v13 = vsub.f32 %v254_v8, %v258_v12 }
 0x124   : > { %v260_v14 = vmul.f32 1.442695, %v259_v13 }
 0x126   : > { %666 = vpow2.f32 %v260_v14  ;;  %v318_v19 = vpop.f32.mrf.mxu2 }
 0x127   : > { %v321_v20 = vmul.f32 0.25, %v318_v19 }
 0x129   : > { %v322_v21 = vadd.f32 %v321_v20, %v252_v5 }
 0x12b   : > { %v323_v22 = vsel %vm255_vm2, %v322_v21, -inf }
 0x12c   : > { %v667_v15 = vpop.eup %666  ;;  %324 = vmax.xlane.f32.xlu1 %v323_v22 }
 0x12d   : > { %v262_v16 = vsel %vm255_vm2, %v667_v15, 0.0 }
 0x12e   : > { %263 = vadd.xlane.f32.xlu0 %v262_v16 }
 0x142   : > { %429 = vrot.lane.b32.xlu0 %v858_v0, %s752_s28 }
 0x19f   : > { %v325_v29 = vpop.xlane.xlu1 %324 }
 0x1a0   : > { %v326_v31 = vsub.f32 %v322_v21, %v325_v29 }
 0x1a1   : > { %v264_v23 = vpop.xlane.xlu0 %263 }
 0x1a2   : > { %668 = vrcp.f32 %v264_v23  ;;  %v327_v32 = vmul.f32 1.442695, %v326_v31 }
 0x1a4   : > { %670 = vpow2.f32 %v327_v32 }
 0x1a8   : > { %v669_v24 = vpop.eup %668 }
 0x1a9   : > { %v266_v25 = vmul.f32 %v669_v24, %v667_v15 }
 0x1aa   : > { %v671_v39 = vpop.eup %670 }
 0x1ab   : > { %607 = vmatmul.msk.f32.vlgmr.msra.gmra.mxu1 %vm255_vm2, %v266_v25  ;;  %v329_v42 = vsel %vm255_vm2, %v671_v39, 0.0 }
 0x1b3   : > { %612 = vmatmul.msk.f32.vlgmr.msrb.gmra.mxu1 %vm223_vm0, %v361_v26 }
 0x1b4   : > { %v430_v27 = vpop.permute.xlu0 %429 }
 0x1b5   : > { %614 = vmatpush.xpose.msk.msrb.mxu0 %vm223_vm0, %v430_v27 }
 0x1b8   : > { %615 = vmatmul.msk.f32.vlgmr.msrb.gmra.mxu0 %vm223_vm0, %v428_v28 }
 0x228   : > { %v877_v30 = vpop.f32.mrf.mxu1 }
 0x230   : > { %v385_v33 = vpop.f32.mrf.mxu1 }
 0x231   : > { %v388_v34 = vmul.f32 0.25, %v385_v33 }
 0x233   : > { %v389_v35 = vadd.f32 %v388_v34, %v252_v5 }
 0x235   : > { %v452_v36 = vpop.f32.mrf.mxu0  ;;  %v390_v37 = vsel %vm255_vm2, %v389_v35, -inf }
 0x236   : > { %v455_v38 = vmul.f32 0.25, %v452_v36  ;;  %391 = vmax.xlane.f32.xlu2 %v390_v37 }
 0x238   : > { %v456_v40 = vadd.f32 %v455_v38, %v252_v5 }
 0x23a   : > { %v457_v41 = vsel %vm255_vm2, %v456_v40, -inf }
 0x23b   : > { %458 = vmax.xlane.f32.xlu0 %v457_v41 }
 0x23e   : > { %330 = vadd.xlane.f32.xlu2 %v329_v42 }
 0x24f   : > { %401 = vrot.lane.b32.xlu0 %v858_v0, %s753_s29 }
 0x256   : > { %334 = vrot.lane.b32.xlu2 %v858_v0, %s754_s30 }
 0x2a9   : > { %v392_v43 = vpop.xlane.xlu2 %391 }
 0x2aa   : > { %v393_v46 = vsub.f32 %v389_v35, %v392_v43 }
 0x2ac   : > { %v394_v49 = vmul.f32 1.442695, %v393_v46 }
 0x2ae   : > { %v459_v44 = vpop.xlane.xlu0 %458 }
 0x2af   : > { %v460_v45 = vsub.f32 %v456_v40, %v459_v44 }
 0x2b1   : > { %v461_v47 = vmul.f32 1.442695, %v460_v45  ;;  %v331_v48 = vpop.xlane.xlu2 %330 }
 0x2b2   : > { %672 = vrcp.f32 %v331_v48 }
 0x2b3   : > { %674 = vpow2.f32 %v461_v47 }
 0x2b4   : > { %676 = vpow2.f32 %v394_v49 }
 0x2b8   : > { %v673_v50 = vpop.eup %672 }
 0x2b9   : > { %v675_v51 = vpop.eup %674  ;;  %v335_v52 = vpop.permute.xlu2 %334  ;;  %v333_v53 = vmul.f32 %v673_v50, %v671_v39 }
 0x2ba   : > { %355 = vmatpush.msra.mxu3 %v335_v52  ;;  %v463_v54 = vsel %vm255_vm2, %v675_v51, 0.0  ;;  %v677_v55 = vpop.eup %676 }
 0x2bb   : > { %610 = vmatmul.msk.f32.vlgmr.msra.gmra.mxu3 %vm255_vm2, %v333_v53  ;;  %464 = vadd.xlane.f32.xlu1 %v463_v54  ;;  %v396_v56 = vsel %vm255_vm2, %v677_v55, 0.0 }
 0x2c1   : > { %v402_v57 = vpop.permute.xlu0 %401 }
 0x2c2   : > { %422 = vmatpush.msrb.mxu3 %v402_v57 }
 0x2c3   : > { %397 = vadd.xlane.f32.xlu1 %v396_v56 }
 0x2dc   : > { %468 = vrot.lane.b32.xlu1 %v858_v0, %s755_s4 }
 0x32e   : > { %v465_v58 = vpop.xlane.xlu1 %464 }
 0x336   : > { %v398_v59 = vpop.xlane.xlu1 %397 }
 0x337   : > { %678 = vrcp.f32 %v398_v59 }
 0x338   : > { %680 = vrcp.f32 %v465_v58 }
 0x33d   : > { %v679_v60 = vpop.eup %678 }
 0x33e   : > { %v357_v61 = vpop.f32.mrf.mxu3  ;;  %v400_v62 = vmul.f32 %v679_v60, %v677_v55  ;;  %v681_v63 = vpop.eup %680 }
 0x33f   : > { %495 = vrot.lane.b32.xlu2 %v357_v61, %s755_s4  ;;  %v467_v2 = vmul.f32 %v681_v63, %v675_v51 }
 0x340   : > { %613 = vmatmul.msk.f32.vlgmr.msrb.gmra.mxu3 %vm255_vm2, %v400_v62 }
 0x34e   : > { %v469_v1 = vpop.permute.xlu1 %468 }
 0x34f   : > { %489 = vmatpush.msrb.mxu2 %v469_v1 }
 0x350   : > { %616 = vmatmul.msk.f32.vlgmr.msrb.gmra.mxu2 %vm255_vm2, %v467_v2 }
 0x399   : > { %v496_v4 = vpop.permute.xlu2 %495 }
 0x39a   : > { %v506_v5 = vsel %vm223_vm0, %v877_v30, %v496_v4 }
 0x3c3   : > { %v424_v0 = vpop.f32.mrf.mxu3 }
 0x3c4   : > { %499 = vrot.lane.b32.xlu0 %v424_v0, %s753_s29 }
 0x3d3   : > { %v491_v3 = vpop.f32.mrf.mxu2 }
 0x3d4   : > { %503 = vrot.lane.b32.xlu2 %v491_v3, %s754_s30 }
 0x42e   : > { %v504_v7 = vpop.permute.xlu2 %503 }
 0x436   : > { %v500_v6 = vpop.permute.xlu0 %499 }
 0x437   : > { %v508_v8 = vsel %vm507_vm3, %v506_v5, %v500_v6 }
 0x438   : > { %v510_v9 = vsel %vm509_vm4, %v508_v8, %v504_v7 }
 0x439   : > { %512 = vst.msk [vmem:[%s217_s7] sm:$0xff] %vm511_vm5, %v510_v9 }
 0x43a PF: > { %p13_p7 = scmp.ge.s32.totalorder %s798_s17, 4   ;;  %s919_s12 = smov %s738_s13 }
 0x43b   : > { %s920_s13 = smov %s742_s14  ;;  %s921_s14 = smov %s808_s20 }
 0x43c   : > { %s922_s15 = smov %s798_s17  ;;  %15 = sbr.rel (!%p13_p7) target bundleno = 3 (0x3), region = 78 }
 0x441   :  { %532 = vsyncpa [#allocation3], 1 }
 0x442   :  { %534 = vsyncpa [#allocation3 + $0x1], 1 }

// kernel: category_transformer_forward.38
= control target key start
LH: loop header
LB: loop body
LE: loop exit
PB: predicated region body
PF: predicated region fallthrough
CT: control target
= control target key end

     0   :  { %12 = vsyncpa [#allocation3], 0  ;;  %s624_s0 = inlined_call_operand.vmem [shape: f32[16,64], index: 0, kind: input, shape index: {}]   ;;  %s625_s1 = inlined_call_operand.hbm [shape: bf16[64,128], index: 1, kind: input, shape index: {}]   ;;  %s626_s2 = inlined_call_operand.hbm [shape: f32[1,128], index: 2, kind: input, shape index: {}]   ;;  %s627_s3 = inlined_call_operand.vmem [shape: bf16[128,64], index: 3, kind: input, shape index: {}]   ;;  %s628_s4 = inlined_call_operand.hbm [shape: f32[1,64], index: 4, kind: input, shape index: {}]   ;;  %s629_s5 = inlined_call_operand.hbm [shape: f32[1,64], index: 5, kind: input, shape index: {}]   ;;  %s630_s6 = inlined_call_operand.hbm [shape: f32[1,64], index: 6, kind: input, shape index: {}]   ;;  %s631_s7 = inlined_call_operand.vmem [shape: f32[16,64], index: 7, kind: output, shape index: {}]  }
   0x1   :  { %13 = vsyncpa [#allocation5], 0  ;;  %s35_s26 = sshll.u32 %s626_s2, 4  ;;  %s36_s26 = int_to_ptr.hbm [resolvable:$true] %s35_s26 }
   0x2   :  { %14 = vsyncpa [#allocation8], 0  ;;  %s518_s27 = smov [#allocation4]   ;;  %s59_s8 = sshll.u32 %s629_s5, 4  ;;  %s60_s8 = int_to_ptr.hbm [resolvable:$true] %s59_s8 }
   0x3   :  { %s37_s28 = sshll.u32 %s518_s27, 4  ;;  %s519_s9 = smov [#allocation7]   ;;  %s38_s28 = int_to_ptr.vmem [resolvable:$true] %s37_s28 }
   0x4   :  { %40 = dma.hbm_to_vmem [thread:$0]  %s36_s26, 16, %s38_s28, [#allocation5]  }
   0x5   :  { %s61_s10 = sshll.u32 %s519_s9, 4  ;;  %s21_s13 = sshll.u32 %s625_s1, 4  ;;  %s62_s10 = int_to_ptr.vmem [resolvable:$true] %s61_s10  ;;  %s22_s13 = int_to_ptr.hbm [resolvable:$true] %s21_s13 }
   0x6   :  { %64 = dma.hbm_to_vmem [thread:$0]  %s60_s8, 16, %s62_s10, [#allocation8]  }
   0x7   :  { %s520_s2 = smov [#allocation2]   ;;  %s48_s17 = sshll.u32 %s628_s4, 4  ;;  %s49_s17 = int_to_ptr.hbm [resolvable:$true] %s48_s17 }
   0x8   :  { %s23_s14 = sshll.u32 %s520_s2, 4  ;;  %s521_s18 = smov 64   ;;  %s24_s14 = int_to_ptr.vmem [resolvable:$true] %s23_s14 }
   0x9   :  { %s522_s5 = smov 4   ;;  %s523_s19 = smov [#allocation6]  }
   0xa   :  { %29 = dma.hbm_to_vmem [thread:$0]  %s22_s13, 512, %s24_s14, [#allocation3], %s521_s18, %s521_s18, %s522_s5  }
   0xb   :  { %s50_s20 = sshll.u32 %s523_s19, 4  ;;  %s70_s1 = sshll.u32 %s630_s6, 4  ;;  %s51_s20 = int_to_ptr.vmem [resolvable:$true] %s50_s20  ;;  %s71_s1 = int_to_ptr.hbm [resolvable:$true] %s70_s1 }
   0xc   :  { %53 = dma.hbm_to_vmem [thread:$0]  %s49_s17, 16, %s51_s20, [#allocation5]  }
   0xd   :  { %s524_s23 = smov [#allocation9]  }
   0xe   :  { %s72_s24 = sshll.u32 %s524_s23, 4  ;;  %s73_s24 = int_to_ptr.vmem [resolvable:$true] %s72_s24 }
   0xf   :  { %75 = dma.hbm_to_vmem [thread:$0]  %s71_s1, 16, %s73_s24, [#allocation8]  }
  0x10   :  { %512 = dma.done.wait [#allocation3], 512  }
  0x11   :  { %513 = vsyncadd [#allocation3], 4294966784 }
  0x12   :  { %514 = dma.done.wait [#allocation5], 32  }
  0x13   :  { %515 = vsyncadd [#allocation5], 4294967264 }
  0x14   :  { %516 = dma.done.wait [#allocation8], 32  }
  0x15   :  { %517 = vsyncadd [#allocation8], 4294967264  ;;  %v365_v0 = vld [vmem:[#allocation2 + $0x18] sm:$0xff]  ;;  %v364_v1 = vld [vmem:[#allocation2 + $0x10] sm:$0xff]  ;;  %vm136_vm0 = vcmask 523264   ;;  %v525_v32 = vmov 64.0  }
  0x16   :  { %144 = vmatpush.bf16.msra.mxu0 %v365_v0  ;;  %v373_v2 = vld [vmem:[%s627_s3 + $0x38] sm:$0xff]  ;;  %v372_v3 = vld [vmem:[%s627_s3 + $0x30] sm:$0xff]  ;;  %v363_v4 = vld [vmem:[#allocation2 + $0x8] sm:$0xff]  ;;  %386 = vrcp.f32 %v525_v32 }
  0x17   :  { %225 = vmatpush.bf16.msra.mxu1 %v373_v2  ;;  %v371_v5 = vld [vmem:[%s627_s3 + $0x28] sm:$0xff]  ;;  %v362_v6 = vld [vmem:[#allocation2] sm:$0xff]  ;;  %v369_v11 = vld [vmem:[%s627_s3 + $0x18] sm:$0xff] }
  0x18   :  { %v97_v7 = vld [vmem:[%s624_s0] sm:$0xff]  ;;  %v98_v8 = vld [vmem:[%s624_s0 + $0x8] sm:$0xff]  ;;  %v368_v12 = vld [vmem:[%s627_s3 + $0x10] sm:$0xff] }
  0x19   :  { %v370_v9 = vld [vmem:[%s627_s3 + $0x20] sm:$0xff]  ;;  %v99_v10 = vpack.c.bf16 %v98_v8, %v97_v7  ;;  %v367_v13 = vld [vmem:[%s627_s3 + $0x8] sm:$0xff] }
  0x1a   :  { %145 = vmatpush.bf16.msra.mxu0 %v364_v1  ;;  %v366_v14 = vld [vmem:[%s627_s3] sm:$0xff] }
  0x1b   :  { %226 = vmatpush.bf16.msra.mxu1 %v372_v3  ;;  %v382_v16 = vld [vmem:[#allocation4] ss:$0 sm:$0xff]  ;;  %v383_v23 = vld [vmem:[#allocation6] ss:$0 sm:$0xff]  ;;  %v384_v63 = vld [vmem:[#allocation7] ss:$0 sm:$0xff] }
  0x1c   :  { %v387_v33 = vpop.eup %386  ;;  %v385_v2 = vld [vmem:[#allocation9] ss:$0 sm:$0xff] }
  0x1d   :  { %v250_v34 = vmul.f32 64.0, %v387_v33  ;;  %vm254_vm1 = vweird.f32 %v387_v33 }
  0x1e   :  { %146 = vmatpush.bf16.msra.mxu0 %v363_v4 }
  0x1f   :  { %227 = vmatpush.bf16.msra.mxu1 %v371_v5  ;;  %v251_v35 = vsub.f32 1.0, %v250_v34 }
  0x21   :  { %v252_v36 = vmul.f32 %v387_v33, %v251_v35 }
  0x22   :  { %147 = vmatpush.bf16.msra.mxu0 %v362_v6 }
  0x23   :  { %228 = vmatpush.bf16.msra.mxu1 %v370_v9  ;;  %v253_v37 = vadd.f32 %v387_v33, %v252_v36 }
  0x25   :  { %329 = vmatmul.msk.bf16.vlgmr.msra.gmra.mxu0 %vm136_vm0, %v99_v10  ;;  %v255_v38 = vsel %vm254_vm1, %v387_v33, %v253_v37 }
  0x27   :  { %229 = vmatpush.bf16.msra.mxu1 %v369_v11 }
  0x2b   :  { %230 = vmatpush.bf16.msra.mxu1 %v368_v12 }
  0x2f   :  { %231 = vmatpush.bf16.msra.mxu1 %v367_v13 }
  0x33   :  { %232 = vmatpush.bf16.msra.mxu1 %v366_v14 }
  0xa2   :  { %v149_v15 = vpop.f32.mrf.mxu0 }
  0xa3   :  { %v150_v17 = vadd.f32 %v382_v16, %v149_v15 }
  0xa5   :  { %v154_v20 = vmax.f32 %v150_v17, 0.0 }
  0xaa   :  { %v151_v18 = vpop.f32.mrf.mxu0 }
  0xab   :  { %v152_v19 = vadd.f32 %v382_v16, %v151_v18 }
  0xad   :  { %v155_v21 = vmax.f32 %v152_v19, 0.0 }
  0xaf   :  { %v156_v22 = vpack.c.bf16 %v155_v21, %v154_v20 }
  0xb1   :  { %233 = vmatmul.bf16.vlgmr.msra.gmra.mxu1 %v156_v22 }
 0x12e   :  { %v234_v24 = vpop.f32.mrf.mxu1 }
 0x12f   :  { %v235_v25 = vadd.f32 %v383_v23, %v234_v24 }
 0x131   :  { %v239_v26 = vadd.f32 %v235_v25, %v97_v7 }
 0x133   :  { %v243_v27 = vsel %vm136_vm0, %v239_v26, 0.0 }
 0x134   :  { %244 = vadd.xlane.f32.xlu0 %v243_v27 }
 0x136   :  { %v236_v28 = vpop.f32.mrf.mxu1 }
 0x137   :  { %v237_v29 = vadd.f32 %v383_v23, %v236_v28 }
 0x139   :  { %v240_v30 = vadd.f32 %v237_v29, %v98_v8 }
 0x13b   :  { %v246_v31 = vsel %vm136_vm0, %v240_v30, 0.0 }
 0x13c   :  { %247 = vadd.xlane.f32.xlu0 %v246_v31 }
 0x1a7   :  { %v245_v39 = vpop.xlane.xlu0 %244 }
 0x1a8   :  { %v256_v40 = vmul.f32 %v255_v38, %v245_v39 }
 0x1aa   :  { %v258_v41 = vsub.f32 %v239_v26, %v256_v40 }
 0x1ac   :  { %v260_v42 = vmul.f32 %v258_v41, %v258_v41 }
 0x1ae   :  { %v262_v43 = vsel %vm136_vm0, %v260_v42, 0.0 }
 0x1af   :  { %263 = vadd.xlane.f32.xlu1 %v262_v43  ;;  %v248_v44 = vpop.xlane.xlu0 %247 }
 0x1b0   :  { %v257_v45 = vmul.f32 %v255_v38, %v248_v44 }
 0x1b2   :  { %v259_v46 = vsub.f32 %v240_v30, %v257_v45 }
 0x1b4   :  { %v261_v47 = vmul.f32 %v259_v46, %v259_v46 }
 0x1b6   :  { %v265_v48 = vsel %vm136_vm0, %v261_v47, 0.0 }
 0x1b7   :  { %266 = vadd.xlane.f32.xlu1 %v265_v48 }
 0x222   :  { %v264_v49 = vpop.xlane.xlu1 %263 }
 0x223   :  { %v268_v50 = vmul.f32 %v264_v49, %v255_v38 }
 0x225   :  { %v270_v51 = vadd.f32 1e-05, %v268_v50 }
 0x227   :  { %388 = vrsqrt.f32 %v270_v51  ;;  %vm278_vm3 = vweird.f32 %v270_v51 }
 0x22a   :  { %v267_v52 = vpop.xlane.xlu1 %266 }
 0x22b   :  { %v269_v53 = vmul.f32 %v267_v52, %v255_v38 }
 0x22d   :  { %v389_v54 = vpop.eup %388  ;;  %v271_v55 = vadd.f32 1e-05, %v269_v53 }
 0x22e   :  { %v273_v56 = vmul.f32 %v389_v54, %v270_v51  ;;  %vm279_vm2 = vweird.f32 %v389_v54 }
 0x22f   :  { %390 = vrsqrt.f32 %v271_v55  ;;  %vm280_vm4 = vmor %vm278_vm3, %vm279_vm2  ;;  %vm288_vm6 = vweird.f32 %v271_v55 }
 0x230   :  { %v274_v57 = vmul.f32 %v389_v54, %v273_v56 }
 0x232   :  { %v275_v58 = vmul.f32 0.5, %v274_v57 }
 0x234   :  { %v276_v59 = vsub.f32 1.5, %v275_v58 }
 0x235   :  { %v391_v60 = vpop.eup %390 }
 0x236   :  { %v277_v61 = vmul.f32 %v389_v54, %v276_v59  ;;  %v283_v62 = vmul.f32 %v391_v60, %v271_v55  ;;  %vm289_vm5 = vweird.f32 %v391_v60 }
 0x237   :  { %vm290_vm7 = vmor %vm288_vm6, %vm289_vm5 }
 0x238   :  { %v281_v0 = vsel %vm280_vm4, %v389_v54, %v277_v61  ;;  %v284_v1 = vmul.f32 %v391_v60, %v283_v62 }
 0x239   :  { %v292_v3 = vmul.f32 %v281_v0, %v258_v41 }
 0x23a   :  { %v285_v4 = vmul.f32 0.5, %v284_v1 }
 0x23b   :  { %v297_v5 = vmul.f32 %v384_v63, %v292_v3 }
 0x23c   :  { %v286_v6 = vsub.f32 1.5, %v285_v4 }
 0x23d   :  { %v302_v7 = vadd.f32 %v385_v2, %v297_v5 }
 0x23e   :  { %v287_v8 = vmul.f32 %v391_v60, %v286_v6 }
 0x23f   :  { %304 = vst.msk [vmem:[%s631_s7] sm:$0xff] %vm136_vm0, %v302_v7 }
 0x240   :  { %v291_v9 = vsel %vm290_vm7, %v391_v60, %v287_v8 }
 0x241   :  { %v293_v10 = vmul.f32 %v291_v9, %v259_v46 }
 0x243   :  { %v298_v11 = vmul.f32 %v384_v63, %v293_v10 }
 0x245   :  { %v303_v12 = vadd.f32 %v385_v2, %v298_v11 }
 0x247   :  { %305 = vst.msk [vmem:[%s631_s7 + $0x8] sm:$0xff] %vm136_vm0, %v303_v12 }
 0x248   :  { %310 = vsyncpa [#allocation3], 1 }
 0x249   :  { %311 = vsyncpa [#allocation5], 1 }
 0x24a   :  { %312 = vsyncpa [#allocation8], 1 }

// kernel: category_transformer_forward.47
= control target key start
LH: loop header
LB: loop body
LE: loop exit
PB: predicated region body
PF: predicated region fallthrough
CT: control target
= control target key end

     0   :  { %vm54_vm0 = vcmask 523264   ;;  %s199_s1 = inlined_call_operand.vmem [shape: bf16[64,128], index: 1, kind: input, shape index: {}]   ;;  %s200_s2 = inlined_call_operand.vmem [shape: f32[1,128], index: 2, kind: input, shape index: {}]   ;;  %s201_s0 = inlined_call_operand.vmem [shape: f32[16,64], index: 0, kind: input, shape index: {}]   ;;  %s202_s3 = inlined_call_operand.vmem [shape: f32[16,128], index: 3, kind: output, shape index: {}]  }
   0x1   :  { %v142_v0 = vld [vmem:[%s199_s1 + $0x18] sm:$0xff]  ;;  %v141_v1 = vld [vmem:[%s199_s1 + $0x10] sm:$0xff]  ;;  %v140_v2 = vld [vmem:[%s199_s1 + $0x8] sm:$0xff] }
   0x2   :  { %62 = vmatpush.bf16.msra.mxu0 %v142_v0  ;;  %v139_v3 = vld [vmem:[%s199_s1] sm:$0xff]  ;;  %v16_v5 = vld [vmem:[%s201_s0 + $0x8] sm:$0xff] }
   0x3   :  { %v15_v4 = vld [vmem:[%s201_s0] sm:$0xff] }
   0x4   :  { %v17_v6 = vpack.c.bf16 %v16_v5, %v15_v4  ;;  %v143_v7 = vld [vmem:[%s200_s2] ss:$0 sm:$0xff] }
   0x6   :  { %63 = vmatpush.bf16.msra.mxu0 %v141_v1 }
   0xa   :  { %64 = vmatpush.bf16.msra.mxu0 %v140_v2 }
   0xe   :  { %65 = vmatpush.bf16.msra.mxu0 %v139_v3 }
  0x11   :  { %138 = vmatmul.msk.bf16.vlgmr.msra.gmra.mxu0 %vm54_vm0, %v17_v6 }
  0x8e   :  { %v67_v8 = vpop.f32.mrf.mxu0 }
  0x8f   :  { %v68_v9 = vadd.f32 %v143_v7, %v67_v8 }
  0x91   :  { %72 = vmax.xlane.f32.xlu0 %v68_v9 }
  0x96   :  { %v69_v10 = vpop.f32.mrf.mxu0 }
  0x97   :  { %v70_v11 = vadd.f32 %v143_v7, %v69_v10 }
  0x99   :  { %74 = vmax.xlane.f32.xlu0 %v70_v11 }
 0x104   :  { %v73_v12 = vpop.xlane.xlu0 %72 }
 0x105   :  { %v76_v13 = vsub.f32 %v68_v9, %v73_v12 }
 0x107   :  { %v78_v14 = vmul.f32 1.442695, %v76_v13 }
 0x109   :  { %144 = vpow2.f32 %v78_v14 }
 0x10c   :  { %v75_v15 = vpop.xlane.xlu0 %74 }
 0x10d   :  { %v77_v16 = vsub.f32 %v70_v11, %v75_v15 }
 0x10f   :  { %v145_v17 = vpop.eup %144  ;;  %v80_v18 = vmul.f32 1.442695, %v77_v16 }
 0x110   :  { %82 = vadd.xlane.f32.xlu1 %v145_v17 }
 0x111   :  { %146 = vpow2.f32 %v80_v18 }
 0x117   :  { %v147_v19 = vpop.eup %146 }
 0x118   :  { %84 = vadd.xlane.f32.xlu1 %v147_v19 }
 0x183   :  { %v83_v20 = vpop.xlane.xlu1 %82 }
 0x184   :  { %148 = vrcp.f32 %v83_v20  ;;  %v97_v25 = vand.u32 2147483648, %v83_v20  ;;  %v95_v27 = vand.u32 2147483647, %v83_v20  ;;  %vm91_vm2 = vweird.f32 %v83_v20 }
 0x186   :  { %v98_v30 = vor.u32 1.1754944e-38, %v97_v25  ;;  %vm96_vm4 = vcmp.eq.f32.partialorder %v95_v27, 8.507059e+37 }
 0x18a   :  { %v149_v21 = vpop.eup %148 }
 0x18b   :  { %v87_v22 = vmul.f32 %v149_v21, %v83_v20  ;;  %v85_v23 = vpop.xlane.xlu1 %84  ;;  %vm92_vm1 = vweird.f32 %v149_v21 }
 0x18c   :  { %150 = vrcp.f32 %v85_v23  ;;  %vm93_vm3 = vmor %vm91_vm2, %vm92_vm1  ;;  %v112_v36 = vand.u32 2147483648, %v85_v23  ;;  %v110_v38 = vand.u32 2147483647, %v85_v23  ;;  %vm106_vm6 = vweird.f32 %v85_v23 }
 0x18d   :  { %v88_v24 = vsub.f32 1.0, %v87_v22 }
 0x18e   :  { %v113_v40 = vor.u32 1.1754944e-38, %v112_v36  ;;  %vm111_vm8 = vcmp.eq.f32.partialorder %v110_v38, 8.507059e+37 }
 0x18f   :  { %v89_v26 = vmul.f32 %v149_v21, %v88_v24 }
 0x191   :  { %v90_v28 = vadd.f32 %v149_v21, %v89_v26 }
 0x192   :  { %v151_v29 = vpop.eup %150 }
 0x193   :  { %v94_v31 = vsel %vm93_vm3, %v149_v21, %v90_v28  ;;  %v102_v32 = vmul.f32 %v151_v29, %v85_v23  ;;  %vm107_vm5 = vweird.f32 %v151_v29 }
 0x194   :  { %v99_v33 = vsel %vm96_vm4, %v98_v30, %v94_v31  ;;  %vm108_vm7 = vmor %vm106_vm6, %vm107_vm5 }
 0x195   :  { %v100_v34 = vmul.f32 %v145_v17, %v99_v33  ;;  %v103_v35 = vsub.f32 1.0, %v102_v32 }
 0x197   :  { %116 = vst [vmem:[%s202_s3] sm:$0xff] %v100_v34  ;;  %v104_v37 = vmul.f32 %v151_v29, %v103_v35 }
 0x199   :  { %v105_v39 = vadd.f32 %v151_v29, %v104_v37 }
 0x19b   :  { %v109_v41 = vsel %vm108_vm7, %v151_v29, %v105_v39 }
 0x19c   :  { %v114_v42 = vsel %vm111_vm8, %v113_v40, %v109_v41 }
 0x19d   :  { %v115_v43 = vmul.f32 %v147_v19, %v114_v42 }
 0x19f   :  { %117 = vst [vmem:[%s202_s3 + $0x8] sm:$0xff] %v115_v43 }

</bundles_post_ra>
